<compile_context>
chip_gen: v6e
topology: v6e:2x2x1
jax: 0.10.0
libtpu: 0.0.40
codegen_flags: <defaults>
</compile_context>

<pallas_src>
import jax
import jax.numpy as jnp
from jax.experimental import pallas as pl
from jax.experimental.pallas import tpu as pltpu


def bottleneck_kernel(x_ref, w1_ref, s1_ref, b1_ref,
                      w2_ref, s2_ref, b2_ref,
                      w3_ref, s3_ref, b3_ref,
                      o_ref, h1p_ref):
    # x_ref block: (1, H, W, Cin) f32
    _, H, W, Cin = x_ref.shape
    Cmid = w1_ref.shape[1]
    Cout = w3_ref.shape[1]
    HW = H * W
    LEAD = (h1p_ref.shape[0] - HW) // 2          # tile-aligned pad rows per side

    x = x_ref[0].reshape(HW, Cin)                # free reshape (collapse leading dims)
    x_bf = x.astype(jnp.bfloat16)

    # ---- conv1 (1x1, no bias) + folded BN + ReLU (bf16 MXU, f32 acc) -------
    h1 = jnp.dot(x_bf, w1_ref[...], preferred_element_type=jnp.float32)
    h1 = jnp.maximum(h1 * s1_ref[...] + b1_ref[...], 0.0)         # (HW, Cmid) f32
    h1_bf = h1.astype(jnp.bfloat16)

    # ---- flat zero-padded buffer for the 3x3 conv ---------------------------
    # Layout: [LEAD zero rows | h1 (row-major HxW) | LEAD zero rows], LEAD >= W+1
    # and a multiple of 16 so the h1 store is bf16-tile aligned.  Tap (dy, dx)
    # is the contiguous slice starting at LEAD - (W+1) + dy*W + dx.
    zeros_pad = jnp.zeros((LEAD, Cmid), jnp.bfloat16)
    h1p_ref[0:LEAD, :] = zeros_pad
    h1p_ref[LEAD:LEAD + HW, :] = h1_bf
    h1p_ref[LEAD + HW:LEAD + HW + LEAD, :] = zeros_pad

    # Column masks removing horizontal wrap-around of the flat-shift trick.
    col = jax.lax.broadcasted_iota(jnp.int32, (HW, 1), 0) % W
    left_ok = col != 0          # output column 0 gets no dx==0 contribution
    right_ok = col != W - 1     # output column W-1 gets no dx==2 contribution

    # ---- conv2 (3x3, stride=1, pad=1, no bias): 9 contiguous-slice matmuls --
    # Centre tap (dy=1, dx=1) window is exactly h1 -> seed the accumulator
    # from the live value (no buffer re-read, no zero-init pass).
    acc = jnp.dot(h1_bf, w2_ref[4], preferred_element_type=jnp.float32)
    base = LEAD - (W + 1)
    for dy in range(3):
        for dx in range(3):
            if dy == 1 and dx == 1:
                continue
            start = base + dy * W + dx
            win = h1p_ref[start:start + HW, :]    # (HW, Cmid) bf16, contiguous
            if dx == 0:
                win = jnp.where(left_ok, win, jnp.zeros_like(win))
            elif dx == 2:
                win = jnp.where(right_ok, win, jnp.zeros_like(win))
            acc = acc + jnp.dot(win, w2_ref[dy * 3 + dx],
                                preferred_element_type=jnp.float32)
    h2 = jnp.maximum(acc * s2_ref[...] + b2_ref[...], 0.0)        # (HW, Cmid) f32

    # ---- conv3 (1x1, no bias) + folded BN -----------------------------------
    h3 = jnp.dot(h2.astype(jnp.bfloat16), w3_ref[...],
                 preferred_element_type=jnp.float32)
    h3 = h3 * s3_ref[...] + b3_ref[...]                           # (HW, Cout) f32

    # ---- identity residual + ReLU (f32) -------------------------------------
    o_ref[0] = jnp.maximum(h3 + x, 0.0).reshape(H, W, Cout)


def bottleneck_forward(x_nhwc, params):
    w1, s1, b1, w2, s2, b2, w3, s3, b3 = params
    N, H, W, Cin = x_nhwc.shape
    Cmid = w1.shape[1]
    Cout = w3.shape[1]
    HW = H * W

    # Leading/trailing pad of the flat h1 buffer: >= W+1 rows, rounded up to a
    # multiple of 16 (bf16 sublane tile) so the h1 store is aligned.
    LEAD = -((W + 1) // -16) * 16

    # bf16 weights feed the MXU (halves weight HBM/VMEM traffic);
    # BN scale/shift stay f32 for the VPU path.
    w1b = w1.astype(jnp.bfloat16)                              # (Cin, Cmid)
    w2b = w2.reshape(9, Cmid, Cmid).astype(jnp.bfloat16)       # tap order dy*3+dx
    w3b = w3.astype(jnp.bfloat16)                              # (Cmid, Cout)

    def full_spec(shape):
        return pl.BlockSpec(shape, lambda n, _nd=len(shape): (0,) * _nd)

    return pl.pallas_call(
        bottleneck_kernel,
        out_shape=jax.ShapeDtypeStruct((N, H, W, Cout), jnp.float32),
        grid_spec=pltpu.PrefetchScalarGridSpec(
            num_scalar_prefetch=0,
            grid=(N,),
            in_specs=[
                pl.BlockSpec((1, H, W, Cin), lambda n: (n, 0, 0, 0)),
                full_spec(w1b.shape), full_spec(s1.shape), full_spec(b1.shape),
                full_spec(w2b.shape), full_spec(s2.shape), full_spec(b2.shape),
                full_spec(w3b.shape), full_spec(s3.shape), full_spec(b3.shape),
            ],
            out_specs=pl.BlockSpec((1, H, W, Cout), lambda n: (n, 0, 0, 0)),
            scratch_shapes=[
                pltpu.VMEM((LEAD + HW + LEAD, Cmid), jnp.bfloat16),  # padded h1
            ],
        ),
        compiler_params=pltpu.CompilerParams(
            dimension_semantics=("parallel",)),   # batch blocks are disjoint
    )(x_nhwc, w1b, s1, b1, w2b, s2, b2, w3b, s3, b3)


def init_params(key, in_planes, planes, expansion=4):
    Cin, Cmid, Cout = in_planes, planes, expansion * planes
    ks = jax.random.split(key, 15)

    def conv_w(k, cout, cin, kh, kw):
        fan_in = cin * kh * kw
        return jax.random.normal(k, (cout, cin, kh, kw),
                                 jnp.float32) * (2.0 / fan_in) ** 0.5

    def bn_fold(kg, kb, km, kv, c):
        gamma = 1.0 + 0.1 * jax.random.normal(kg, (c,), jnp.float32)
        beta = 0.1 * jax.random.normal(kb, (c,), jnp.float32)
        mean = 0.1 * jax.random.normal(km, (c,), jnp.float32)
        var = jax.random.uniform(kv, (c,), jnp.float32, minval=0.5, maxval=1.5)
        eps = 1e-5
        scale = gamma / jnp.sqrt(var + eps)
        shift = beta - mean * scale
        return scale.reshape(1, c), shift.reshape(1, c)

    # PyTorch Conv2d weight layout: (out, in, kh, kw)
    wc1 = conv_w(ks[0], Cmid, Cin, 1, 1)
    wc2 = conv_w(ks[1], Cmid, Cmid, 3, 3)
    wc3 = conv_w(ks[2], Cout, Cmid, 1, 1)

    w1 = wc1[:, :, 0, 0].T                    # (Cin, Cmid)
    w2 = jnp.transpose(wc2, (2, 3, 1, 0))     # (3, 3, Cmid_in, Cmid_out)
    w3 = wc3[:, :, 0, 0].T                    # (Cmid, Cout)

    s1, b1 = bn_fold(ks[3], ks[4], ks[5], ks[6], Cmid)
    s2, b2 = bn_fold(ks[7], ks[8], ks[9], ks[10], Cmid)
    s3, b3 = bn_fold(ks[11], ks[12], ks[13], ks[14], Cout)
    return (w1, s1, b1, w2, s2, b2, w3, s3, b3)


def ref_forward(x_nhwc, params):
    # Pure-JAX reference mirroring the kernel's numerics:
    # bf16 matmul operands, f32 accumulation, f32 BN/ReLU/residual.
    w1, s1, b1, w2, s2, b2, w3, s3, b3 = params
    N, H, W, _ = x_nhwc.shape
    bf, f32 = jnp.bfloat16, jnp.float32

    def mm(a, b):
        return jnp.einsum('nhwc,cd->nhwd', a.astype(bf), b.astype(bf),
                          preferred_element_type=f32)

    h1 = jnp.maximum(mm(x_nhwc, w1) * s1 + b1, 0.0)
    h1p = jnp.pad(h1.astype(bf), ((0, 0), (1, 1), (1, 1), (0, 0)))
    acc = jnp.zeros((N, H, W, w2.shape[-1]), f32)
    for dy in range(3):
        for dx in range(3):
            acc = acc + jnp.einsum('nhwc,cd->nhwd',
                                   h1p[:, dy:dy + H, dx:dx + W, :],
                                   w2[dy, dx].astype(bf),
                                   preferred_element_type=f32)
    h2 = jnp.maximum(acc * s2 + b2, 0.0)
    h3 = mm(h2, w3) * s3 + b3
    return jnp.maximum(h3 + x_nhwc, 0.0)


if __name__ == "__main__":
    key = jax.random.PRNGKey(0)
    # Realistic Bottleneck widths: expansion*planes == in_planes (identity
    # residual), lane-dense Cin/Cout = 256.
    in_planes, planes = 256, 64
    N, H, W = 2, 16, 16

    kx, kp = jax.random.split(key)
    # PyTorch-style NCHW input
    x_nchw = jax.random.normal(kx, (N, in_planes, H, W), jnp.float32)
    x_nhwc = jnp.transpose(x_nchw, (0, 2, 3, 1))

    params = init_params(kp, in_planes, planes)

    out_nhwc = jax.block_until_ready(bottleneck_forward(x_nhwc, params))
    out_nchw = jnp.transpose(out_nhwc, (0, 3, 1, 2))

    ref = ref_forward(x_nhwc, params)
    max_err = float(jnp.max(jnp.abs(out_nhwc - ref)))
    assert out_nchw.shape == (N, 4 * planes, H, W), out_nchw.shape
    assert max_err < 5e-2, f"max abs err {max_err}"
    print("KERNEL_OK")
</pallas_src>

<mosaic_0001>
module attributes {stable_mosaic.version = 11 : i64} {
  func.func @bottleneck_kernel(%arg0: i32, %arg1: memref<1x16x16x256xf32, #tpu.memory_space<vmem>>, %arg2: memref<256x64xbf16, #tpu.memory_space<vmem>>, %arg3: memref<1x64xf32, #tpu.memory_space<vmem>>, %arg4: memref<1x64xf32, #tpu.memory_space<vmem>>, %arg5: memref<9x64x64xbf16, #tpu.memory_space<vmem>>, %arg6: memref<1x64xf32, #tpu.memory_space<vmem>>, %arg7: memref<1x64xf32, #tpu.memory_space<vmem>>, %arg8: memref<64x256xbf16, #tpu.memory_space<vmem>>, %arg9: memref<1x256xf32, #tpu.memory_space<vmem>>, %arg10: memref<1x256xf32, #tpu.memory_space<vmem>>, %arg11: memref<1x16x16x256xf32, #tpu.memory_space<vmem>>, %arg12: memref<320x64xbf16, #tpu.memory_space<vmem>>) attributes {dimension_semantics = [#tpu.dimension_semantics<parallel>], iteration_bounds = array<i64: 2>, scalar_prefetch = 0 : i64, scratch_operands = 1 : i64, tpu.core_type = #tpu.core_type<tc>, window_params = [{transform_indices = @transform_0, window_bounds = array<i64: 1, 16, 16, 256>}, {pipeline_mode = #tpu.pipeline_mode<synchronous>, transform_indices = @transform_1, window_bounds = array<i64: 256, 64>}, {pipeline_mode = #tpu.pipeline_mode<synchronous>, transform_indices = @transform_2, window_bounds = array<i64: 1, 64>}, {pipeline_mode = #tpu.pipeline_mode<synchronous>, transform_indices = @transform_3, window_bounds = array<i64: 1, 64>}, {pipeline_mode = #tpu.pipeline_mode<synchronous>, transform_indices = @transform_4, window_bounds = array<i64: 9, 64, 64>}, {pipeline_mode = #tpu.pipeline_mode<synchronous>, transform_indices = @transform_5, window_bounds = array<i64: 1, 64>}, {pipeline_mode = #tpu.pipeline_mode<synchronous>, transform_indices = @transform_6, window_bounds = array<i64: 1, 64>}, {pipeline_mode = #tpu.pipeline_mode<synchronous>, transform_indices = @transform_7, window_bounds = array<i64: 64, 256>}, {pipeline_mode = #tpu.pipeline_mode<synchronous>, transform_indices = @transform_8, window_bounds = array<i64: 1, 256>}, {pipeline_mode = #tpu.pipeline_mode<synchronous>, transform_indices = @transform_9, window_bounds = array<i64: 1, 256>}, {transform_indices = @transform_10, window_bounds = array<i64: 1, 16, 16, 256>}]} {
    %c0 = arith.constant 0 : index
    %c0_0 = arith.constant 0 : index
    %c0_1 = arith.constant 0 : index
    %c0_2 = arith.constant 0 : index
    %0 = vector.load %arg1[%c0, %c0_0, %c0_1, %c0_2] : memref<1x16x16x256xf32, #tpu.memory_space<vmem>>, vector<1x16x16x256xf32>
    %1 = vector.shape_cast %0 : vector<1x16x16x256xf32> to vector<16x16x256xf32>
    %2 = vector.shape_cast %1 : vector<16x16x256xf32> to vector<256x256xf32>
    %3 = arith.truncf %2 : vector<256x256xf32> to vector<256x256xbf16>
    %c0_3 = arith.constant 0 : index
    %c0_4 = arith.constant 0 : index
    %4 = vector.load %arg2[%c0_3, %c0_4] : memref<256x64xbf16, #tpu.memory_space<vmem>>, vector<256x64xbf16>
    %cst = arith.constant dense<0.000000e+00> : vector<256x64xf32>
    %5 = tpu.matmul %3, %4, %cst {dimension_numbers = #tpu.dot_dimension_numbers<[1], [0], [0], [1], [0, 0, 1, 1], [], []>} : vector<256x256xbf16>, vector<256x64xbf16>, vector<256x64xf32> -> vector<256x64xf32>
    %c0_5 = arith.constant 0 : index
    %c0_6 = arith.constant 0 : index
    %6 = vector.load %arg3[%c0_5, %c0_6] : memref<1x64xf32, #tpu.memory_space<vmem>>, vector<1x64xf32>
    %7 = vector.broadcast %6 : vector<1x64xf32> to vector<256x64xf32>
    %8 = arith.mulf %5, %7 : vector<256x64xf32>
    %c0_7 = arith.constant 0 : index
    %c0_8 = arith.constant 0 : index
    %9 = vector.load %arg4[%c0_7, %c0_8] : memref<1x64xf32, #tpu.memory_space<vmem>>, vector<1x64xf32>
    %10 = vector.broadcast %9 : vector<1x64xf32> to vector<256x64xf32>
    %11 = arith.addf %8, %10 : vector<256x64xf32>
    %cst_9 = arith.constant 0.000000e+00 : f32
    %12 = vector.broadcast %cst_9 : f32 to vector<256x64xf32>
    %13 = arith.maximumf %11, %12 : vector<256x64xf32>
    %14 = arith.truncf %13 : vector<256x64xf32> to vector<256x64xbf16>
    %cst_10 = arith.constant 0.000000e+00 : bf16
    %15 = vector.broadcast %cst_10 : bf16 to vector<32x64xbf16>
    %c0_11 = arith.constant 0 : index
    %c0_12 = arith.constant 0 : index
    %16 = vector.load %arg12[%c0_11, %c0_12] : memref<320x64xbf16, #tpu.memory_space<vmem>>, vector<32x64xbf16>
    tpu.vector_store %arg12[%c0_11, %c0_12], %15 {strides = array<i32>} : memref<320x64xbf16, #tpu.memory_space<vmem>>, vector<32x64xbf16>,
    %c32 = arith.constant 32 : index
    %c0_13 = arith.constant 0 : index
    %17 = vector.load %arg12[%c32, %c0_13] : memref<320x64xbf16, #tpu.memory_space<vmem>>, vector<256x64xbf16>
    tpu.vector_store %arg12[%c32, %c0_13], %14 {strides = array<i32>} : memref<320x64xbf16, #tpu.memory_space<vmem>>, vector<256x64xbf16>,
    %c288 = arith.constant 288 : index
    %c0_14 = arith.constant 0 : index
    %18 = vector.load %arg12[%c288, %c0_14] : memref<320x64xbf16, #tpu.memory_space<vmem>>, vector<32x64xbf16>
    tpu.vector_store %arg12[%c288, %c0_14], %15 {strides = array<i32>} : memref<320x64xbf16, #tpu.memory_space<vmem>>, vector<32x64xbf16>,
    %19 = tpu.iota {dimensions = array<i32: 0>} : vector<256x1xi32>
    %c16_i32 = arith.constant 16 : i32
    %c0_i32 = arith.constant 0 : i32
    %20 = arith.cmpi eq, %c16_i32, %c0_i32 : i32
    %c1_i32 = arith.constant 1 : i32
    %21 = arith.select %20, %c1_i32, %c16_i32 : i32
    %22 = vector.broadcast %21 : i32 to vector<256x1xi32>
    %23 = arith.remsi %19, %22 : vector<256x1xi32>
    %c0_i32_15 = arith.constant 0 : i32
    %24 = vector.broadcast %c0_i32_15 : i32 to vector<256x1xi32>
    %25 = arith.cmpi ne, %23, %24 : vector<256x1xi32>
    %c0_i32_16 = arith.constant 0 : i32
    %26 = vector.broadcast %c0_i32_16 : i32 to vector<256x1xi32>
    %27 = arith.cmpi slt, %23, %26 : vector<256x1xi32>
    %c0_i32_17 = arith.constant 0 : i32
    %28 = arith.cmpi slt, %21, %c0_i32_17 : i32
    %29 = vector.broadcast %28 : i1 to vector<256x1xi1>
    %30 = vector.broadcast %29 : vector<256x1xi1> to vector<256x1xi1>
    %31 = arith.xori %27, %30 : vector<256x1xi1>
    %32 = arith.andi %31, %25 : vector<256x1xi1>
    %33 = vector.broadcast %21 : i32 to vector<256x1xi32>
    %34 = arith.addi %23, %33 : vector<256x1xi32>
    %35 = arith.select %32, %34, %23 : vector<256x1xi1>, vector<256x1xi32>
    %c0_i32_18 = arith.constant 0 : i32
    %36 = vector.broadcast %c0_i32_18 : i32 to vector<256x1xi32>
    %37 = arith.cmpi ne, %35, %36 : vector<256x1xi32>
    %c15_i32 = arith.constant 15 : i32
    %38 = vector.broadcast %c15_i32 : i32 to vector<256x1xi32>
    %39 = arith.cmpi ne, %35, %38 : vector<256x1xi32>
    %c4 = arith.constant 4 : index
    %c0_19 = arith.constant 0 : index
    %c0_20 = arith.constant 0 : index
    %40 = vector.load %arg5[%c4, %c0_19, %c0_20] : memref<9x64x64xbf16, #tpu.memory_space<vmem>>, vector<1x64x64xbf16>
    %41 = vector.shape_cast %40 : vector<1x64x64xbf16> to vector<64x64xbf16>
    %cst_21 = arith.constant dense<0.000000e+00> : vector<256x64xf32>
    %42 = tpu.matmul %14, %41, %cst_21 {dimension_numbers = #tpu.dot_dimension_numbers<[1], [0], [0], [1], [0, 0, 1, 1], [], []>} : vector<256x64xbf16>, vector<64x64xbf16>, vector<256x64xf32> -> vector<256x64xf32>
    %c15 = arith.constant 15 : index
    %c0_22 = arith.constant 0 : index
    %43 = vector.load %arg12[%c15, %c0_22] : memref<320x64xbf16, #tpu.memory_space<vmem>>, vector<256x64xbf16>
    %cst_23 = arith.constant 0.000000e+00 : bf16
    %44 = vector.broadcast %cst_23 : bf16 to vector<256x64xbf16>
    %45 = vector.shape_cast %37 : vector<256x1xi1> to vector<256x1xi1>
    %46 = vector.broadcast %45 : vector<256x1xi1> to vector<256x64xi1>
    %47 = arith.select %46, %43, %44 : vector<256x64xi1>, vector<256x64xbf16>
    %c0_24 = arith.constant 0 : index
    %c0_25 = arith.constant 0 : index
    %c0_26 = arith.constant 0 : index
    %48 = vector.load %arg5[%c0_24, %c0_25, %c0_26] : memref<9x64x64xbf16, #tpu.memory_space<vmem>>, vector<1x64x64xbf16>
    %49 = vector.shape_cast %48 : vector<1x64x64xbf16> to vector<64x64xbf16>
    %cst_27 = arith.constant dense<0.000000e+00> : vector<256x64xf32>
    %50 = tpu.matmul %47, %49, %cst_27 {dimension_numbers = #tpu.dot_dimension_numbers<[1], [0], [0], [1], [0, 0, 1, 1], [], []>} : vector<256x64xbf16>, vector<64x64xbf16>, vector<256x64xf32> -> vector<256x64xf32>
    %51 = arith.addf %42, %50 : vector<256x64xf32>
    %c16 = arith.constant 16 : index
    %c0_28 = arith.constant 0 : index
    %52 = vector.load %arg12[%c16, %c0_28] : memref<320x64xbf16, #tpu.memory_space<vmem>>, vector<256x64xbf16>
    %c1 = arith.constant 1 : index
    %c0_29 = arith.constant 0 : index
    %c0_30 = arith.constant 0 : index
    %53 = vector.load %arg5[%c1, %c0_29, %c0_30] : memref<9x64x64xbf16, #tpu.memory_space<vmem>>, vector<1x64x64xbf16>
    %54 = vector.shape_cast %53 : vector<1x64x64xbf16> to vector<64x64xbf16>
    %cst_31 = arith.constant dense<0.000000e+00> : vector<256x64xf32>
    %55 = tpu.matmul %52, %54, %cst_31 {dimension_numbers = #tpu.dot_dimension_numbers<[1], [0], [0], [1], [0, 0, 1, 1], [], []>} : vector<256x64xbf16>, vector<64x64xbf16>, vector<256x64xf32> -> vector<256x64xf32>
    %56 = arith.addf %51, %55 : vector<256x64xf32>
    %c17 = arith.constant 17 : index
    %c0_32 = arith.constant 0 : index
    %57 = vector.load %arg12[%c17, %c0_32] : memref<320x64xbf16, #tpu.memory_space<vmem>>, vector<256x64xbf16>
    %cst_33 = arith.constant 0.000000e+00 : bf16
    %58 = vector.broadcast %cst_33 : bf16 to vector<256x64xbf16>
    %59 = vector.shape_cast %39 : vector<256x1xi1> to vector<256x1xi1>
    %60 = vector.broadcast %59 : vector<256x1xi1> to vector<256x64xi1>
    %61 = arith.select %60, %57, %58 : vector<256x64xi1>, vector<256x64xbf16>
    %c2 = arith.constant 2 : index
    %c0_34 = arith.constant 0 : index
    %c0_35 = arith.constant 0 : index
    %62 = vector.load %arg5[%c2, %c0_34, %c0_35] : memref<9x64x64xbf16, #tpu.memory_space<vmem>>, vector<1x64x64xbf16>
    %63 = vector.shape_cast %62 : vector<1x64x64xbf16> to vector<64x64xbf16>
    %cst_36 = arith.constant dense<0.000000e+00> : vector<256x64xf32>
    %64 = tpu.matmul %61, %63, %cst_36 {dimension_numbers = #tpu.dot_dimension_numbers<[1], [0], [0], [1], [0, 0, 1, 1], [], []>} : vector<256x64xbf16>, vector<64x64xbf16>, vector<256x64xf32> -> vector<256x64xf32>
    %65 = arith.addf %56, %64 : vector<256x64xf32>
    %c31 = arith.constant 31 : index
    %c0_37 = arith.constant 0 : index
    %66 = vector.load %arg12[%c31, %c0_37] : memref<320x64xbf16, #tpu.memory_space<vmem>>, vector<256x64xbf16>
    %cst_38 = arith.constant 0.000000e+00 : bf16
    %67 = vector.broadcast %cst_38 : bf16 to vector<256x64xbf16>
    %68 = vector.shape_cast %37 : vector<256x1xi1> to vector<256x1xi1>
    %69 = vector.broadcast %68 : vector<256x1xi1> to vector<256x64xi1>
    %70 = arith.select %69, %66, %67 : vector<256x64xi1>, vector<256x64xbf16>
    %c3 = arith.constant 3 : index
    %c0_39 = arith.constant 0 : index
    %c0_40 = arith.constant 0 : index
    %71 = vector.load %arg5[%c3, %c0_39, %c0_40] : memref<9x64x64xbf16, #tpu.memory_space<vmem>>, vector<1x64x64xbf16>
    %72 = vector.shape_cast %71 : vector<1x64x64xbf16> to vector<64x64xbf16>
    %cst_41 = arith.constant dense<0.000000e+00> : vector<256x64xf32>
    %73 = tpu.matmul %70, %72, %cst_41 {dimension_numbers = #tpu.dot_dimension_numbers<[1], [0], [0], [1], [0, 0, 1, 1], [], []>} : vector<256x64xbf16>, vector<64x64xbf16>, vector<256x64xf32> -> vector<256x64xf32>
    %74 = arith.addf %65, %73 : vector<256x64xf32>
    %c33 = arith.constant 33 : index
    %c0_42 = arith.constant 0 : index
    %75 = vector.load %arg12[%c33, %c0_42] : memref<320x64xbf16, #tpu.memory_space<vmem>>, vector<256x64xbf16>
    %cst_43 = arith.constant 0.000000e+00 : bf16
    %76 = vector.broadcast %cst_43 : bf16 to vector<256x64xbf16>
    %77 = vector.shape_cast %39 : vector<256x1xi1> to vector<256x1xi1>
    %78 = vector.broadcast %77 : vector<256x1xi1> to vector<256x64xi1>
    %79 = arith.select %78, %75, %76 : vector<256x64xi1>, vector<256x64xbf16>
    %c5 = arith.constant 5 : index
    %c0_44 = arith.constant 0 : index
    %c0_45 = arith.constant 0 : index
    %80 = vector.load %arg5[%c5, %c0_44, %c0_45] : memref<9x64x64xbf16, #tpu.memory_space<vmem>>, vector<1x64x64xbf16>
    %81 = vector.shape_cast %80 : vector<1x64x64xbf16> to vector<64x64xbf16>
    %cst_46 = arith.constant dense<0.000000e+00> : vector<256x64xf32>
    %82 = tpu.matmul %79, %81, %cst_46 {dimension_numbers = #tpu.dot_dimension_numbers<[1], [0], [0], [1], [0, 0, 1, 1], [], []>} : vector<256x64xbf16>, vector<64x64xbf16>, vector<256x64xf32> -> vector<256x64xf32>
    %83 = arith.addf %74, %82 : vector<256x64xf32>
    %c47 = arith.constant 47 : index
    %c0_47 = arith.constant 0 : index
    %84 = vector.load %arg12[%c47, %c0_47] : memref<320x64xbf16, #tpu.memory_space<vmem>>, vector<256x64xbf16>
    %cst_48 = arith.constant 0.000000e+00 : bf16
    %85 = vector.broadcast %cst_48 : bf16 to vector<256x64xbf16>
    %86 = vector.shape_cast %37 : vector<256x1xi1> to vector<256x1xi1>
    %87 = vector.broadcast %86 : vector<256x1xi1> to vector<256x64xi1>
    %88 = arith.select %87, %84, %85 : vector<256x64xi1>, vector<256x64xbf16>
    %c6 = arith.constant 6 : index
    %c0_49 = arith.constant 0 : index
    %c0_50 = arith.constant 0 : index
    %89 = vector.load %arg5[%c6, %c0_49, %c0_50] : memref<9x64x64xbf16, #tpu.memory_space<vmem>>, vector<1x64x64xbf16>
    %90 = vector.shape_cast %89 : vector<1x64x64xbf16> to vector<64x64xbf16>
    %cst_51 = arith.constant dense<0.000000e+00> : vector<256x64xf32>
    %91 = tpu.matmul %88, %90, %cst_51 {dimension_numbers = #tpu.dot_dimension_numbers<[1], [0], [0], [1], [0, 0, 1, 1], [], []>} : vector<256x64xbf16>, vector<64x64xbf16>, vector<256x64xf32> -> vector<256x64xf32>
    %92 = arith.addf %83, %91 : vector<256x64xf32>
    %c48 = arith.constant 48 : index
    %c0_52 = arith.constant 0 : index
    %93 = vector.load %arg12[%c48, %c0_52] : memref<320x64xbf16, #tpu.memory_space<vmem>>, vector<256x64xbf16>
    %c7 = arith.constant 7 : index
    %c0_53 = arith.constant 0 : index
    %c0_54 = arith.constant 0 : index
    %94 = vector.load %arg5[%c7, %c0_53, %c0_54] : memref<9x64x64xbf16, #tpu.memory_space<vmem>>, vector<1x64x64xbf16>
    %95 = vector.shape_cast %94 : vector<1x64x64xbf16> to vector<64x64xbf16>
    %cst_55 = arith.constant dense<0.000000e+00> : vector<256x64xf32>
    %96 = tpu.matmul %93, %95, %cst_55 {dimension_numbers = #tpu.dot_dimension_numbers<[1], [0], [0], [1], [0, 0, 1, 1], [], []>} : vector<256x64xbf16>, vector<64x64xbf16>, vector<256x64xf32> -> vector<256x64xf32>
    %97 = arith.addf %92, %96 : vector<256x64xf32>
    %c49 = arith.constant 49 : index
    %c0_56 = arith.constant 0 : index
    %98 = vector.load %arg12[%c49, %c0_56] : memref<320x64xbf16, #tpu.memory_space<vmem>>, vector<256x64xbf16>
    %cst_57 = arith.constant 0.000000e+00 : bf16
    %99 = vector.broadcast %cst_57 : bf16 to vector<256x64xbf16>
    %100 = vector.shape_cast %39 : vector<256x1xi1> to vector<256x1xi1>
    %101 = vector.broadcast %100 : vector<256x1xi1> to vector<256x64xi1>
    %102 = arith.select %101, %98, %99 : vector<256x64xi1>, vector<256x64xbf16>
    %c8 = arith.constant 8 : index
    %c0_58 = arith.constant 0 : index
    %c0_59 = arith.constant 0 : index
    %103 = vector.load %arg5[%c8, %c0_58, %c0_59] : memref<9x64x64xbf16, #tpu.memory_space<vmem>>, vector<1x64x64xbf16>
    %104 = vector.shape_cast %103 : vector<1x64x64xbf16> to vector<64x64xbf16>
    %cst_60 = arith.constant dense<0.000000e+00> : vector<256x64xf32>
    %105 = tpu.matmul %102, %104, %cst_60 {dimension_numbers = #tpu.dot_dimension_numbers<[1], [0], [0], [1], [0, 0, 1, 1], [], []>} : vector<256x64xbf16>, vector<64x64xbf16>, vector<256x64xf32> -> vector<256x64xf32>
    %106 = arith.addf %97, %105 : vector<256x64xf32>
    %c0_61 = arith.constant 0 : index
    %c0_62 = arith.constant 0 : index
    %107 = vector.load %arg6[%c0_61, %c0_62] : memref<1x64xf32, #tpu.memory_space<vmem>>, vector<1x64xf32>
    %108 = vector.broadcast %107 : vector<1x64xf32> to vector<256x64xf32>
    %109 = arith.mulf %106, %108 : vector<256x64xf32>
    %c0_63 = arith.constant 0 : index
    %c0_64 = arith.constant 0 : index
    %110 = vector.load %arg7[%c0_63, %c0_64] : memref<1x64xf32, #tpu.memory_space<vmem>>, vector<1x64xf32>
    %111 = vector.broadcast %110 : vector<1x64xf32> to vector<256x64xf32>
    %112 = arith.addf %109, %111 : vector<256x64xf32>
    %cst_65 = arith.constant 0.000000e+00 : f32
    %113 = vector.broadcast %cst_65 : f32 to vector<256x64xf32>
    %114 = arith.maximumf %112, %113 : vector<256x64xf32>
    %115 = arith.truncf %114 : vector<256x64xf32> to vector<256x64xbf16>
    %c0_66 = arith.constant 0 : index
    %c0_67 = arith.constant 0 : index
    %116 = vector.load %arg8[%c0_66, %c0_67] : memref<64x256xbf16, #tpu.memory_space<vmem>>, vector<64x256xbf16>
    %cst_68 = arith.constant dense<0.000000e+00> : vector<256x256xf32>
    %117 = tpu.matmul %115, %116, %cst_68 {dimension_numbers = #tpu.dot_dimension_numbers<[1], [0], [0], [1], [0, 0, 1, 1], [], []>} : vector<256x64xbf16>, vector<64x256xbf16>, vector<256x256xf32> -> vector<256x256xf32>
    %c0_69 = arith.constant 0 : index
    %c0_70 = arith.constant 0 : index
    %118 = vector.load %arg9[%c0_69, %c0_70] : memref<1x256xf32, #tpu.memory_space<vmem>>, vector<1x256xf32>
    %119 = vector.broadcast %118 : vector<1x256xf32> to vector<256x256xf32>
    %120 = arith.mulf %117, %119 : vector<256x256xf32>
    %c0_71 = arith.constant 0 : index
    %c0_72 = arith.constant 0 : index
    %121 = vector.load %arg10[%c0_71, %c0_72] : memref<1x256xf32, #tpu.memory_space<vmem>>, vector<1x256xf32>
    %122 = vector.broadcast %121 : vector<1x256xf32> to vector<256x256xf32>
    %123 = arith.addf %120, %122 : vector<256x256xf32>
    %124 = arith.addf %123, %2 : vector<256x256xf32>
    %cst_73 = arith.constant 0.000000e+00 : f32
    %125 = vector.broadcast %cst_73 : f32 to vector<256x256xf32>
    %126 = arith.maximumf %124, %125 : vector<256x256xf32>
    %127 = vector.shape_cast %126 : vector<256x256xf32> to vector<16x16x256xf32>
    %c0_74 = arith.constant 0 : index
    %c0_75 = arith.constant 0 : index
    %c0_76 = arith.constant 0 : index
    %c0_77 = arith.constant 0 : index
    %128 = vector.load %arg11[%c0_74, %c0_75, %c0_76, %c0_77] : memref<1x16x16x256xf32, #tpu.memory_space<vmem>>, vector<1x16x16x256xf32>
    %129 = vector.shape_cast %128 : vector<1x16x16x256xf32> to vector<16x16x256xf32>
    %130 = vector.shape_cast %127 : vector<16x16x256xf32> to vector<1x16x16x256xf32>
    tpu.vector_store %arg11[%c0_74, %c0_75, %c0_76, %c0_77], %130 {strides = array<i32>} : memref<1x16x16x256xf32, #tpu.memory_space<vmem>>, vector<1x16x16x256xf32>,
    return
  }
  func.func @transform_0(%arg0: i32) -> (i32, i32, i32, i32) {
    %c0_i32 = arith.constant 0 : i32
    %c0_i32_0 = arith.constant 0 : i32
    %c0_i32_1 = arith.constant 0 : i32
    %c0_i32_2 = arith.constant 0 : i32
    return %arg0, %c0_i32, %c0_i32_0, %c0_i32_1 : i32, i32, i32, i32
  }
  func.func @transform_1(%arg0: i32) -> (i32, i32) {
    %c0_i32 = arith.constant 0 : i32
    %c0_i32_0 = arith.constant 0 : i32
    %c0_i32_1 = arith.constant 0 : i32
    return %c0_i32, %c0_i32_0 : i32, i32
  }
  func.func @transform_2(%arg0: i32) -> (i32, i32) {
    %c0_i32 = arith.constant 0 : i32
    %c0_i32_0 = arith.constant 0 : i32
    %c0_i32_1 = arith.constant 0 : i32
    return %c0_i32, %c0_i32_0 : i32, i32
  }
  func.func @transform_3(%arg0: i32) -> (i32, i32) {
    %c0_i32 = arith.constant 0 : i32
    %c0_i32_0 = arith.constant 0 : i32
    %c0_i32_1 = arith.constant 0 : i32
    return %c0_i32, %c0_i32_0 : i32, i32
  }
  func.func @transform_4(%arg0: i32) -> (i32, i32, i32) {
    %c0_i32 = arith.constant 0 : i32
    %c0_i32_0 = arith.constant 0 : i32
    %c0_i32_1 = arith.constant 0 : i32
    %c0_i32_2 = arith.constant 0 : i32
    return %c0_i32, %c0_i32_0, %c0_i32_1 : i32, i32, i32
  }
  func.func @transform_5(%arg0: i32) -> (i32, i32) {
    %c0_i32 = arith.constant 0 : i32
    %c0_i32_0 = arith.constant 0 : i32
    %c0_i32_1 = arith.constant 0 : i32
    return %c0_i32, %c0_i32_0 : i32, i32
  }
  func.func @transform_6(%arg0: i32) -> (i32, i32) {
    %c0_i32 = arith.constant 0 : i32
    %c0_i32_0 = arith.constant 0 : i32
    %c0_i32_1 = arith.constant 0 : i32
    return %c0_i32, %c0_i32_0 : i32, i32
  }
  func.func @transform_7(%arg0: i32) -> (i32, i32) {
    %c0_i32 = arith.constant 0 : i32
    %c0_i32_0 = arith.constant 0 : i32
    %c0_i32_1 = arith.constant 0 : i32
    return %c0_i32, %c0_i32_0 : i32, i32
  }
  func.func @transform_8(%arg0: i32) -> (i32, i32) {
    %c0_i32 = arith.constant 0 : i32
    %c0_i32_0 = arith.constant 0 : i32
    %c0_i32_1 = arith.constant 0 : i32
    return %c0_i32, %c0_i32_0 : i32, i32
  }
  func.func @transform_9(%arg0: i32) -> (i32, i32) {
    %c0_i32 = arith.constant 0 : i32
    %c0_i32_0 = arith.constant 0 : i32
    %c0_i32_1 = arith.constant 0 : i32
    return %c0_i32, %c0_i32_0 : i32, i32
  }
  func.func @transform_10(%arg0: i32) -> (i32, i32, i32, i32) {
    %c0_i32 = arith.constant 0 : i32
    %c0_i32_0 = arith.constant 0 : i32
    %c0_i32_1 = arith.constant 0 : i32
    %c0_i32_2 = arith.constant 0 : i32
    return %arg0, %c0_i32, %c0_i32_0, %c0_i32_1 : i32, i32, i32, i32
  }
}

</mosaic_0001>

<bundles_post_ra>
// kernel: tpu_custom_call.1
= control target key start
LH: loop header
LB: loop body
LE: loop exit
PB: predicated region body
PF: predicated region fallthrough
CT: control target
= control target key end

     0   :  { %s13130_s0 = inlined_call_operand.hbm [shape: f32[2,16,16,256], index: 0, kind: input, shape index: {}]   ;;  %s13131_s1 = inlined_call_operand.vmem [shape: bf16[256,64], index: 1, kind: input, shape index: {}]   ;;  %s13132_s2 = inlined_call_operand.vmem [shape: f32[1,64], index: 2, kind: input, shape index: {}]   ;;  %s13133_s3 = inlined_call_operand.vmem [shape: f32[1,64], index: 3, kind: input, shape index: {}]   ;;  %s13134_s4 = inlined_call_operand.hbm [shape: bf16[9,64,64], index: 4, kind: input, shape index: {}]   ;;  %s13135_s5 = inlined_call_operand.vmem [shape: f32[1,64], index: 5, kind: input, shape index: {}]   ;;  %s13136_s6 = inlined_call_operand.vmem [shape: f32[1,64], index: 6, kind: input, shape index: {}]   ;;  %s13137_s7 = inlined_call_operand.vmem [shape: bf16[64,256], index: 7, kind: input, shape index: {}]   ;;  %s13138_s8 = inlined_call_operand.vmem [shape: f32[1,256], index: 8, kind: input, shape index: {}]   ;;  %s13139_s9 = inlined_call_operand.vmem [shape: f32[1,256], index: 9, kind: input, shape index: {}]   ;;  %s13140_s10 = inlined_call_operand.hbm [shape: f32[2,16,16,256], index: 10, kind: output, shape index: {}]  }
   0x1   :  { %13386 = sst [smem:[#allocation110_spill]] %s13134_s4 }
   0x2   :  { %15 = vsyncpa [#allocation4], 0 }
   0x3   :  { %17 = vsyncpa [#allocation4 + $0x1], 0 }
   0x4   :  { %18 = vsyncpa [#allocation7], 0 }
   0x5   :  { %19 = vsyncpa [#allocation5], 0 }
   0x6   :  { %21 = vsyncpa [#allocation5 + $0x1], 0  ;;  %s9174_s13 = smov 0   ;;  %s9176_s14 = smov 0  }
   0x7   :  { %s9178_s15 = smov 0   ;;  %s9180_s16 = smov 0  }
   0x8 LB: > { %13387 = sst [smem:[#allocation12_spill]] %s9094_s13  ;;  %s9195_s17 = sadd.s32 4294967295, %s9106_s16   ;;  %s9106_s16 = sphi %s9180_s16, %s14329_s16   ;;  %s9102_s15 = sphi %s9178_s15, %s14332_s15   ;;  %s9098_s14 = sphi %s9176_s14, %s14331_s14   ;;  %s9094_s13 = sphi %s9174_s13, %s14330_s13  }
   0x9   : > { %s7641_s18 = sadd.s32 4294967294, %s9106_s16   ;;  %p47_p0 = scmp.ne.s32.totalorder %s9098_s14, %s9094_s13 }
   0xa   : > { %p13145_p1 = scmp.eq.s32.totalorder %s9195_s17, 0  ;;  %p266_p3 = scmp.eq.s32.totalorder %s7641_s18, 1 }
   0xb   : > { %p7642_p5 = scmp.ge.s32.totalorder %s9106_s16, 1  ;;  %p273_p7 = scmp.lt.s32.totalorder %s9106_s16, 3 }
   0xc   : > { %p9204_p4 = por %p13145_p1, %p47_p0  ;;  %p9209_p6 = por %p266_p3, %p47_p0 }
   0xd   : > { %p9214_p8 = pnand %p7642_p5, %p273_p7  ;;  %s9108_s22 = smov [#allocation6]  }
   0xe   : > { %s13388_s19 = scalar_select %p9204_p4, 1, 0 }
   0xf   : > { %s13389_s20 = scalar_select %p9209_p6, 1, 0 }
  0x10   : > { %s13391_s21 = scalar_select %p9214_p8, 1, 0 }
  0x11   : > { %13390 = sst [smem:[#allocation13_spill]] %s13389_s20  ;;  %s294_s23 = sshll.u32 %s9108_s22, 4  ;;  %s295_s23 = int_to_ptr.vmem [resolvable:$true] %s294_s23 }
  0x12   : > { %p8749_p9 = pneg %p9214_p8  ;;  %s9228_s25 = sadd.s32 1, %s9106_s16  }
  0x13   : > { %13393 = sst [smem:[#allocation14_spill]] %s9228_s25  ;;  %s34_s26 = sadd.s32 1, %s9102_s15 }
  0x14   : > { %p9223_p11 = pnand %p8749_p9, %p13145_p1  ;;  %s31_s27 = ssub.s32 %s9106_s16, %s9228_s25 }
  0x15   : > { %s8995_s28 = scalar_lea.vmem %s295_s23, 4608  ;;  %p9003_p5 = scmp.lt.s32.totalorder %s295_s23, %s295_s23 }
  0x16   : > { %p8986_p12 = pneg %p9223_p11  ;;  %p8996_p13 = scmp.ne.s32.totalorder %s295_s23, %s8995_s28 }
  0x17   : > { %p9004_p7 = scmp.lt.s32.totalorder %s8995_s28, %s8995_s28 }
  0x18   : > { %p8998_p0 = pnand %p8996_p13, %p8986_p12 }
  0x19   : > { %p9005_p10 = por %p9004_p7, %p9003_p5 }
  0x1a   : > { %p8999_p3 = pneg %p8998_p0 }
  0x1c   : > { %p9006_p2 = pnand %p9005_p10, %p8999_p3 }
  0x1e   : > { %9009 = shalt.err (!%p9006_p2)
}
  0x1f   : > { %s9109_s29 = smov 64   ;;  %s9110_s30 = smov 4  }
  0x20   : > { %s13394_s4 = sld [smem:[#allocation110_spill]]  ;;  %p32_p9 = scmp.eq.s32.totalorder %s31_s27, 0 }
  0x21   : > { %p41_p12 = scmp.ne.s32.totalorder %s9102_s15, %s9098_s14  ;;  %p42_p10 = scmp.eq.s32.totalorder %s9106_s16, 0 }
  0x22   : > { %p8762_p2 = scmp.lt.s32.totalorder %s9106_s16, 2  ;;  %p13395_p0 = scmp.eq.s32.totalorder %s9195_s17, 1 }
  0x23   : > { %s9245_s18 = scalar_select %p32_p9, %s9102_s15, %s34_s26  }
  0x24   : > { %p43_p13 = por %p42_p10, %p41_p12  ;;  %p9249_p3 = por %p13395_p0, %p41_p12 }
  0x25   : > { %s323_s28 = sand.u32 1, %s9102_s15   ;;  %s8047_s25 = sshll.u32 %s9106_s16, 13 }
  0x26   : > { %8752 = dma.hbm_to_vmem [thread:$0]  (!%p9223_p11), %s13394_s4, 4608, %s295_s23, [#allocation7], %s9109_s29, %s9109_s29, %s9110_s30  }
  0x27   : > { %s13396_s22 = scalar_select %p9249_p3, 1, 0 }
  0x28   : > { %s7645_s20 = sshll.u32 %s323_s28, 9  ;;  %s9258_s11 = scalar_lea.hbm %s13130_s0, %s8047_s25 }
  0x29   : > { %s327_s23 = scalar_lea.vmem [#allocation3], %s7645_s20  ;;  %p9260_p11 = pnand %p8762_p2, %p43_p13 }
  0x2a   : > { %s334_s26 = sshll.u32 %s327_s23, 4  ;;  %s9266_s29 = scalar_lea.sflag [#allocation4], %s323_s28  ;;  %s9264_s26 = int_to_ptr.vmem [resolvable:$true] %s334_s26 }
  0x2b   : > { %s9010_s30 = scalar_lea.hbm %s9258_s11, 8192  ;;  %p9012_p7 = pneg %p9260_p11 }
  0x2c   : > { %p9011_p5 = scmp.ne.s32.totalorder %s9258_s11, %s9010_s30  ;;  %s9015_s20 = scalar_lea.hbm %s13130_s0, 16384 }
  0x2d   : > { %p9016_p10 = scmp.lt.s32.totalorder %s9258_s11, %s13130_s0  ;;  %p9017_p2 = scmp.lt.s32.totalorder %s9015_s20, %s9010_s30 }
  0x2e   : > { %p9013_p9 = pnand %p9012_p7, %p9011_p5 }
  0x2f   : > { %p9018_p13 = por %p9017_p2, %p9016_p10 }
  0x30   : > { %p9014_p12 = pneg %p9013_p9 }
  0x32   : > { %p9019_p0 = pnand %p9018_p13, %p9014_p12 }
  0x34   : > { %9022 = shalt.err (!%p9019_p0)
}
  0x35   : > { %s9023_s28 = scalar_lea.vmem %s9264_s26, 8192  ;;  %s9111_s23 = smov [#allocation3]  }
  0x36   : > { %p9024_p1 = scmp.ne.s32.totalorder %s9264_s26, %s9023_s28  ;;  %s9028_s4 = sshll.u32 %s9111_s23, 4  ;;  %s9029_s4 = int_to_ptr.vmem [resolvable:$false] %s9028_s4 }
  0x37   : > { %s9030_s13 = scalar_lea.vmem %s9029_s4, 16384  ;;  %p9031_p9 = scmp.lt.s32.totalorder %s9264_s26, %s9029_s4 }
  0x38   : > { %p9026_p6 = pnand %p9024_p1, %p9012_p7  ;;  %p9032_p3 = scmp.lt.s32.totalorder %s9030_s13, %s9023_s28 }
  0x3a   : > { %p9027_p5 = pneg %p9026_p6  ;;  %p9033_p4 = por %p9032_p3, %p9031_p9 }
  0x3c   : > { %p9034_p8 = pnand %p9033_p4, %p9027_p5 }
  0x3e   : > { %9037 = shalt.err (!%p9034_p8)
}
  0x3f   : > { %s9112_s30 = smov 256   ;;  %s9113_s25 = smov 16  }
  0x40   : > { %8756 = dma.hbm_to_vmem [thread:$0]  (!%p9260_p11), %s9258_s11, 8192, %s9264_s26, %s9266_s29, %s9112_s30, %s9112_s30, %s9113_s25  }
  0x41   : > { %p13398_p1 = scmp.ne.s32.totalorder %s13391_s21, 0 }
  0x43   : > { %346 = sbr.rel (%p13398_p1) target bundleno = 1365 (0x555), region = 60 }
  0x48   : > { %s9290_s20 = sand.u32 1, %s9098_s14   ;;  %p13399_p4 = scmp.ne.s32.totalorder %s13388_s19, 0 }
  0x49   : > { %s7649_s4 = sshll.u32 %s9290_s20, 9  ;;  %s349_s12 = scalar_lea.sflag [#allocation4], %s9290_s20 }
  0x4a   : > { %s9296_s24 = scalar_lea.vmem [#allocation3], %s7649_s4 }
  0x4b   : > { %9081 = dma.done.wait (%p13399_p4), %s349_s12, 8192  }
  0x4c   : > { %9083 = vsyncadd (%p13399_p4), %s349_s12, 4294959104  ;;  %p13400_p6 = scmp.eq.s32.totalorder %s9195_s17, 0 }
  0x4e   : > { %9085 = dma.done.wait (%p13400_p6), [#allocation7], 4608   ;;  %p13401_p8 = pmov %p13400_p6 }
  0x4f   : > { %vm13195_vm0 = vcmask 519168   ;;  %v13149_v0 = vmov 0   ;;  %v8806_v1 = vld [vmem:[%s13131_s1 + $0x78] sm:$0xff]   ;;  %v8808_v3 = vld [vmem:[%s13131_s1 + $0x70] sm:$0xff]   ;;  %v8810_v5 = vld [vmem:[%s13131_s1 + $0x68] sm:$0xff]   ;;  %vm9115_vm4 = vmmov 1  }
  0x50   : > { %9087 = vsyncadd (%p13401_p8), [#allocation7], 4294962688  ;;  %909 = vst.msk [vmem:[#allocation2 + $0x4] sm:$0xf] %vm13195_vm0, %v13149_v0  ;;  %v8807_v2 = vld [vmem:[%s13131_s1 + $0x38] sm:$0xff]   ;;  %8081 = vmatprep.subr.bf16.mxu0 %v8806_v1  ;;  %v8809_v4 = vld [vmem:[%s13131_s1 + $0x30] sm:$0xff]  }
  0x51   : > { %910 = vst.msk [vmem:[#allocation2 + $0x8] sm:$0xf] %vm13195_vm0, %v13149_v0  ;;  %911 = vst.msk [vmem:[#allocation2 + $0xc] sm:$0xf] %vm13195_vm0, %v13149_v0  ;;  %8082 = vmatpush3.bf16.msra.mxu0 %v8807_v2  ;;  %v8811_v6 = vld [vmem:[%s13131_s1 + $0x28] sm:$0xff]   ;;  %v8812_v7 = vld [vmem:[%s13131_s1 + $0x60] sm:$0xff]  }
  0x52   : > { %1056 = vst.msk [vmem:[#allocation2 + $0x90] sm:$0xf] %vm13195_vm0, %v13149_v0  ;;  %1057 = vst.msk [vmem:[#allocation2 + $0x94] sm:$0xf] %vm13195_vm0, %v13149_v0  ;;  %8083 = vmatprep.subr.bf16.mxu0 %v8808_v3  ;;  %v8813_v8 = vld [vmem:[%s13131_s1 + $0x20] sm:$0xff]   ;;  %v8814_v9 = vld [vmem:[%s13131_s1 + $0x58] sm:$0xff]  }
  0x53   : > { %1058 = vst.msk [vmem:[#allocation2 + $0x98] sm:$0xf] %vm13195_vm0, %v13149_v0  ;;  %v8815_v10 = vld [vmem:[%s13131_s1 + $0x18] sm:$0xff]   ;;  %v8816_v11 = vld [vmem:[%s13131_s1 + $0x50] sm:$0xff]   ;;  %v397_v12 = vld [vmem:[%s9296_s24 + $0x8] sm:$0xff]  ;;  %s12831_s27 = scalar_lea.vmem [#allocation8], %s7649_s4 }
  0x54   : > { %v399_v13 = vld [vmem:[%s9296_s24 + $0x18] sm:$0xff]  ;;  %v8817_v15 = vld [vmem:[%s13131_s1 + $0x10] sm:$0xff]   ;;  %v8818_v16 = vld [vmem:[%s13131_s1 + $0x48] sm:$0xff]   ;;  %vm1711_vm9 = vsmask.f32 3328  ;;  %s8080_s4 = sshll.u32 %s9195_s17, 13 }
  0x55   : > { %8084 = vmatpush3.bf16.msra.mxu0 %v8809_v4  ;;  %v461_v14 = vpack.c.bf16 %v399_v13, %v397_v12  ;;  %v8819_v17 = vld [vmem:[%s13131_s1 + $0x8] sm:$0xff]   ;;  %v8820_v18 = vld [vmem:[%s13131_s1 + $0x40] sm:$0xff]   ;;  %v398_v21 = vld [vmem:[%s9296_s24 + $0x10] sm:$0xff]  ;;  %vm1712_vm10 = vsmask.f32 7440  ;;  %s7558_s29 = sshll.u32 %s12831_s27, 4  ;;  %s13083_s13 = scalar_lea.hbm %s13140_s10, %s8080_s4  ;;  %s13085_s29 = int_to_ptr.vmem [resolvable:$true] %s7558_s29 }
  0x56   : > { %8085 = vmatprep.subr.bf16.mxu0 %v8810_v5  ;;  %v8821_v19 = vld [vmem:[%s13131_s1] sm:$0xff]   ;;  %v401_v22 = vld [vmem:[%s9296_s24 + $0x28] sm:$0xff]  ;;  %v403_v23 = vld [vmem:[%s9296_s24 + $0x38] sm:$0xff]  ;;  %vm3325_vm13 = vsmask.f32 256  ;;  %s7545_s30 = scalar_lea.sflag [#allocation5], %s9290_s20 }
  0x57   : > { %652 = vmatprep.mubr.bf16.mxu0 %v461_v14  ;;  %v396_v20 = vld [vmem:[%s9296_s24] sm:$0xff]  ;;  %v463_v25 = vpack.c.bf16 %v403_v23, %v401_v22  ;;  %v402_v27 = vld [vmem:[%s9296_s24 + $0x30] sm:$0xff]  ;;  %v405_v28 = vld [vmem:[%s9296_s24 + $0x48] sm:$0xff]  ;;  %vm3326_vm14 = vsmask.f32 4368  ;;  %s9038_s17 = scalar_lea.vmem %s13085_s29, 8192 }
  0x58   : > { %v460_v24 = vpack.c.bf16 %v398_v21, %v396_v20  ;;  %v400_v26 = vld [vmem:[%s9296_s24 + $0x20] sm:$0xff]  ;;  %v407_v29 = vld [vmem:[%s9296_s24 + $0x58] sm:$0xff]  ;;  %v406_v33 = vld [vmem:[%s9296_s24 + $0x50] sm:$0xff]  ;;  %p9039_p3 = scmp.ne.s32.totalorder %s13085_s29, %s9038_s17  ;;  %p14324_p11 = scmp.ne.s32.totalorder %s13396_s22, 0 }
  0x59   : > { %8086 = vmatpush3.bf16.msra.mxu0 %v8811_v6  ;;  %v462_v30 = vpack.c.bf16 %v402_v27, %v400_v26  ;;  %v465_v31 = vpack.c.bf16 %v407_v29, %v405_v28  ;;  %v404_v32 = vld [vmem:[%s9296_s24 + $0x40] sm:$0xff]  ;;  %v409_v34 = vld [vmem:[%s9296_s24 + $0x68] sm:$0xff]  ;;  %v411_v35 = vld [vmem:[%s9296_s24 + $0x78] sm:$0xff] }
  0x5a   : > { %8087 = vmatprep.subr.bf16.mxu0 %v8812_v7  ;;  %v464_v36 = vpack.c.bf16 %v406_v33, %v404_v32  ;;  %v467_v37 = vpack.c.bf16 %v411_v35, %v409_v34  ;;  %v408_v38 = vld [vmem:[%s9296_s24 + $0x60] sm:$0xff]  ;;  %v410_v39 = vld [vmem:[%s9296_s24 + $0x70] sm:$0xff]  ;;  %v413_v40 = vld [vmem:[%s9296_s24 + $0x88] sm:$0xff]  ;;  %p9040_p7 = pnand %p9039_p3, %p14324_p11 }
  0x5b   : > { %v415_v41 = vld [vmem:[%s9296_s24 + $0x98] sm:$0xff]  ;;  %v466_v42 = vpack.c.bf16 %v410_v39, %v408_v38  ;;  %v412_v44 = vld [vmem:[%s9296_s24 + $0x80] sm:$0xff]  ;;  %v414_v45 = vld [vmem:[%s9296_s24 + $0x90] sm:$0xff] }
  0x5c   : > { %v469_v43 = vpack.c.bf16 %v415_v41, %v413_v40  ;;  %v417_v46 = vld [vmem:[%s9296_s24 + $0xa8] sm:$0xff]  ;;  %v419_v47 = vld [vmem:[%s9296_s24 + $0xb8] sm:$0xff]  ;;  %v468_v48 = vpack.c.bf16 %v414_v45, %v412_v44  ;;  %v416_v50 = vld [vmem:[%s9296_s24 + $0xa0] sm:$0xff]  ;;  %p9041_p12 = pneg %p9040_p7 }
  0x5d   : > { %8088 = vmatpush3.bf16.msra.mxu0 %v8813_v8  ;;  %v471_v49 = vpack.c.bf16 %v419_v47, %v417_v46  ;;  %v418_v51 = vld [vmem:[%s9296_s24 + $0xb0] sm:$0xff]  ;;  %v421_v52 = vld [vmem:[%s9296_s24 + $0xc8] sm:$0xff]  ;;  %v423_v53 = vld [vmem:[%s9296_s24 + $0xd8] sm:$0xff] }
  0x5e   : > { %8089 = vmatprep.subr.bf16.mxu0 %v8814_v9  ;;  %v470_v54 = vpack.c.bf16 %v418_v51, %v416_v50  ;;  %v473_v55 = vpack.c.bf16 %v423_v53, %v421_v52  ;;  %v420_v56 = vld [vmem:[%s9296_s24 + $0xc0] sm:$0xff]  ;;  %v422_v57 = vld [vmem:[%s9296_s24 + $0xd0] sm:$0xff]  ;;  %v425_v58 = vld [vmem:[%s9296_s24 + $0xe8] sm:$0xff] }
  0x5f   : > { %v427_v59 = vld [vmem:[%s9296_s24 + $0xf8] sm:$0xff]  ;;  %v472_v60 = vpack.c.bf16 %v422_v57, %v420_v56  ;;  %v424_v62 = vld [vmem:[%s9296_s24 + $0xe0] sm:$0xff]  ;;  %v426_v63 = vld [vmem:[%s9296_s24 + $0xf0] sm:$0xff] }
  0x60   : > { %v475_v61 = vpack.c.bf16 %v427_v59, %v425_v58  ;;  %v429_v1 = vld [vmem:[%s9296_s24 + $0x108] sm:$0xff]  ;;  %v431_v2 = vld [vmem:[%s9296_s24 + $0x118] sm:$0xff]  ;;  %v474_v3 = vpack.c.bf16 %v426_v63, %v424_v62  ;;  %v428_v5 = vld [vmem:[%s9296_s24 + $0x100] sm:$0xff] }
  0x61   : > { %8090 = vmatpush3.bf16.msra.mxu0 %v8815_v10  ;;  %v477_v4 = vpack.c.bf16 %v431_v2, %v429_v1  ;;  %v430_v6 = vld [vmem:[%s9296_s24 + $0x110] sm:$0xff]  ;;  %v433_v7 = vld [vmem:[%s9296_s24 + $0x128] sm:$0xff]  ;;  %v435_v8 = vld [vmem:[%s9296_s24 + $0x138] sm:$0xff] }
  0x62   : > { %8091 = vmatprep.subr.bf16.mxu0 %v8816_v11  ;;  %v476_v9 = vpack.c.bf16 %v430_v6, %v428_v5  ;;  %v479_v10 = vpack.c.bf16 %v435_v8, %v433_v7  ;;  %v432_v11 = vld [vmem:[%s9296_s24 + $0x120] sm:$0xff]  ;;  %v434_v12 = vld [vmem:[%s9296_s24 + $0x130] sm:$0xff]  ;;  %v437_v13 = vld [vmem:[%s9296_s24 + $0x148] sm:$0xff] }
  0x63   : > { %v439_v14 = vld [vmem:[%s9296_s24 + $0x158] sm:$0xff]  ;;  %v440_v23 = vld [vmem:[%s9296_s24 + $0x160] sm:$0xff]  ;;  %v446_v32 = vld [vmem:[%s9296_s24 + $0x190] sm:$0xff] }
  0x64   : > { %v443_v20 = vld [vmem:[%s9296_s24 + $0x178] sm:$0xff]  ;;  %v8824_v33 = vld [vmem:[#allocation6 + $0x10] sm:$0xff]   ;;  %v449_v34 = vld [vmem:[%s9296_s24 + $0x1a8] sm:$0xff] }
  0x65   : > { %8092 = vmatpush3.bf16.msra.mxu0 %v8817_v15  ;;  %v478_v15 = vpack.c.bf16 %v434_v12, %v432_v11  ;;  %v447_v26 = vld [vmem:[%s9296_s24 + $0x198] sm:$0xff]  ;;  %v8826_v40 = vld [vmem:[#allocation6 + $0x8] sm:$0xff]   ;;  %v448_v44 = vld [vmem:[%s9296_s24 + $0x1a0] sm:$0xff] }
  0x66   : > { %8093 = vmatprep.subr.bf16.mxu0 %v8818_v16  ;;  %v481_v16 = vpack.c.bf16 %v439_v14, %v437_v13  ;;  %v8822_v29 = vld [vmem:[#allocation6 + $0x18] sm:$0xff]   ;;  %v450_v45 = vld [vmem:[%s9296_s24 + $0x1b0] sm:$0xff]  ;;  %v8829_v46 = vld [vmem:[#allocation6] sm:$0xff]  }
  0x67   : > { %8373 = vmatprep.subr.bf16.mxu1 %v8822_v29  ;;  %v451_v35 = vld [vmem:[%s9296_s24 + $0x1b8] sm:$0xff]  ;;  %v453_v47 = vld [vmem:[%s9296_s24 + $0x1c8] sm:$0xff]  ;;  %v486_v50 = vpack.c.bf16 %v450_v45, %v448_v44  ;;  %v452_v53 = vld [vmem:[%s9296_s24 + $0x1c0] sm:$0xff] }
  0x68   : > { %8374 = vmatpush3.bf16.msra.mxu1 %v8822_v29  ;;  %v487_v39 = vpack.c.bf16 %v451_v35, %v449_v34  ;;  %v459_v56 = vld [vmem:[%s9296_s24 + $0x1f8] sm:$0xff]  ;;  %vm1648_vm5 = vmpackc.low %vm9115_vm4, %vm9115_vm4  ;;  %v1550_v35 = vld [vmem:[#allocation2 + $0x4] sm:$0x8] }
  0x69   : > { %8094 = vmatpush3.bf16.msra.mxu0 %v8819_v17  ;;  %v436_v17 = vld [vmem:[%s9296_s24 + $0x140] sm:$0xff]  ;;  %8375 = vmatprep.subr.bf16.mxu1 %v8824_v33  ;;  %v1680_v7 = vsel %vm1648_vm5, 65537, %v13149_v0  ;;  %vm9451_vm11 = vmor %vm1711_vm9, %vm1712_vm10  ;;  %v8831_v44 = vld [vmem:[#allocation6 + $0xb8] sm:$0xff]  }
  0x6a   : > { %8095 = vmatprep.subr.bf16.mxu0 %v8820_v18  ;;  %v438_v18 = vld [vmem:[%s9296_s24 + $0x150] sm:$0xff]  ;;  %v1724_v12 = vshll.u32 %v1680_v7, 16  ;;  %v1728_v13 = vshrl.u32 %v1680_v7, 16  ;;  %vm9483_vm4 = vmor %vm3325_vm13, %vm3326_vm14  ;;  %v13426_v7 = vmov 0 }
  0x6b   : > { %v480_v21 = vpack.c.bf16 %v438_v18, %v436_v17 }
  0x6c   : > { %8376 = vmatpush3.bf16.msra.mxu1 %v8824_v33 }
  0x6d   : > { %8096 = vmatpush3.bf16.msra.mxu0 %v8821_v19  ;;  %v441_v19 = vld [vmem:[%s9296_s24 + $0x168] sm:$0xff]  ;;  %8377 = vmatprep.subr.bf16.mxu1 %v8826_v40 }
  0x6e   : > { %v483_v22 = vpack.c.bf16 %v443_v20, %v441_v19  ;;  %v9455_v20 = vrot.slane %v1724_v12, 5 }
  0x70   : > { %653 = vmatmul.mubr.bf16.vlgmr.msra.gmra.mxu0 %v460_v24  ;;  %v442_v24 = vld [vmem:[%s9296_s24 + $0x170] sm:$0xff]  ;;  %8378 = vmatpush3.bf16.msra.mxu1 %v8826_v40 }
  0x71   : > { %660 = vmatprep.mubr.bf16.mxu0 %v463_v25  ;;  %v445_v25 = vld [vmem:[%s9296_s24 + $0x188] sm:$0xff]  ;;  %v482_v27 = vpack.c.bf16 %v442_v24, %v440_v23  ;;  %8379 = vmatprep.subr.bf16.mxu1 %v8829_v46 }
  0x72   : > { %v485_v28 = vpack.c.bf16 %v447_v26, %v445_v25  ;;  %v3331_v26 = vrot.slane %v1728_v13, 7 }
  0x74   : > { %8380 = vmatpush3.bf16.msra.mxu1 %v8829_v46 }
  0x78   : > { %661 = vmatmul.mubr.bf16.gmra.mxu0 %v462_v30  ;;  %v8823_v30 = vld [vmem:[#allocation6 + $0x58] sm:$0xff]  }
  0x79   : > { %668 = vmatprep.mubr.bf16.mxu0 %v465_v31  ;;  %v444_v31 = vld [vmem:[%s9296_s24 + $0x180] sm:$0xff]  ;;  %8493 = vmatprep.subr.bf16.mxu0 %v8823_v30 }
  0x7a   : > { %8494 = vmatpush3.bf16.msra.mxu0 %v8823_v30  ;;  %v484_v38 = vpack.c.bf16 %v446_v32, %v444_v31  ;;  %v9468_v32 = vrot.slane %v3331_v26, 4 }
  0x80   : > { %669 = vmatmul.mubr.bf16.gmra.mxu0 %v464_v36  ;;  %v1060_v36 = vlaneseq }
  0x81   : > { %676 = vmatprep.mubr.bf16.mxu0 %v467_v37  ;;  %v8825_v37 = vld [vmem:[#allocation6 + $0x50] sm:$0xff]  }
  0x82   : > { %8495 = vmatprep.subr.bf16.mxu0 %v8825_v37  ;;  %v9420_v41 = vshrl.u32 %v1060_v36, 7  ;;  %v1551_v36 = vld [vmem:[#allocation2 + $0x8] sm:$0xf] }
  0x83   : > { %8496 = vmatpush3.bf16.msra.mxu0 %v8825_v37  ;;  %v13412_v37 = vmov 0 }
  0x84   : > { %13402 = vst [vmem:[#allocation15_spill] sm:$0xff] %v9420_v41  ;;  %v1062_v52 = vadd.s32 8, %v9420_v41  ;;  %v1063_v57 = vadd.s32 16, %v9420_v41  ;;  %v1065_v14 = vadd.s32 32, %v9420_v41  ;;  %v1067_v40 = vadd.s32 48, %v9420_v41 }
  0x86   : > { %v1104_v59 = vand.u32 15, %v1062_v52  ;;  %v1111_v1 = vand.u32 15, %v1063_v57  ;;  %v1125_v23 = vand.u32 15, %v1065_v14  ;;  %v13421_v57 = vmov 0 }
  0x88   : > { %677 = vmatmul.mubr.bf16.gmra.mxu0 %v466_v42  ;;  %v8828_v42 = vld [vmem:[#allocation6 + $0x48] sm:$0xff]   ;;  %vm9434_vm3 = vcmp.ne.s32.totalorder %v1104_v59, 15  ;;  %vm1479_vm6 = vcmp.ne.s32.totalorder %v1111_v1, 0  ;;  %vm9471_vm15 = vcmp.ne.s32.totalorder %v1125_v23, 0 }
  0x89   : > { %684 = vmatprep.mubr.bf16.mxu0 %v469_v43  ;;  %v1097_v43 = vand.u32 15, %v9420_v41  ;;  %8497 = vmatprep.subr.bf16.mxu0 %v8828_v42  ;;  %vm3262_vm7 = vmpackc.low %vm9434_vm3, %vm9434_vm3 }
  0x8a   : > { %8498 = vmatpush3.bf16.msra.mxu0 %v8828_v42  ;;  %vm1649_vm8 = vmpackc.low %vm1479_vm6, %vm1479_vm6  ;;  %v3294_v11 = vsel %vm3262_vm7, 65537, %v13149_v0 }
  0x8b   : > { %vm1477_vm1 = vcmp.ne.s32.totalorder %v1097_v43, 0  ;;  %v3337_v17 = vshrl.u32 %v3294_v11, 16  ;;  %vm1651_vm5 = vmpackc.low %vm9471_vm15, %vm9471_vm15 }
  0x8c   : > { %vm1647_vm2 = vmpackc.low %vm1477_vm1, %vm1477_vm1 }
  0x8d   : > { %v1679_v58 = vsel %vm1647_vm2, 65537, %v13149_v0 }
  0x8e   : > { %v1715_v62 = vshll.u32 %v1679_v58, 16  ;;  %v1718_v63 = vshrl.u32 %v1679_v58, 16  ;;  %v1068_v58 = vadd.s32 56, %v9420_v41 }
  0x90   : > { %685 = vmatmul.mubr.bf16.gmra.mxu0 %v468_v48  ;;  %v455_v48 = vld [vmem:[%s9296_s24 + $0x1d8] sm:$0xff]  ;;  %v9440_v5 = vrot.slane %v1715_v62, 5  ;;  %v1720_v6 = vrot.slane %v1718_v63, 4 }
  0x91   : > { %692 = vmatprep.mubr.bf16.mxu0 %v471_v49  ;;  %v8830_v49 = vld [vmem:[#allocation6 + $0x40] sm:$0xff]   ;;  %v489_v51 = vpack.c.bf16 %v455_v48, %v453_v47 }
  0x92   : > { %8499 = vmatprep.subr.bf16.mxu0 %v8830_v49  ;;  %13405 = vst [vmem:[#allocation16_spill] sm:$0xff] %v9440_v5  ;;  %vm13174_vm2 = vcmp.ne.s16.totalorder %v9440_v5, 0 }
  0x93   : > { %8500 = vmatpush3.bf16.msra.mxu0 %v8830_v49  ;;  %v2066_v47 = vsel %vm13174_vm2, %v1550_v35, 0  ;;  %v9500_v49 = vor.u32 %v3331_v26, %v1724_v12  ;;  %vm13203_vm2 = vcmask 523264  }
  0x94   : > { %8573 = vmatprep.subr.bf16.mxu0 %v8831_v44 }
  0x95   : > { %13418 = vst [vmem:[#allocation19_spill] sm:$0xff] %v9500_v49 }
  0x98   : > { %693 = vmatmul.mubr.bf16.gmra.mxu0 %v470_v54  ;;  %v454_v54 = vld [vmem:[%s9296_s24 + $0x1d0] sm:$0xff] }
  0x99   : > { %700 = vmatprep.mubr.bf16.mxu0 %v473_v55  ;;  %v457_v55 = vld [vmem:[%s9296_s24 + $0x1e8] sm:$0xff] }
  0xa0   : > { %701 = vmatmul.mubr.bf16.gmra.mxu0 %v472_v60  ;;  %v488_v60 = vpack.c.bf16 %v454_v54, %v452_v53  ;;  %v1139_v53 = vand.u32 15, %v1067_v40 }
  0xa1   : > { %708 = vmatprep.mubr.bf16.mxu0 %v475_v61  ;;  %v491_v61 = vpack.c.bf16 %v459_v56, %v457_v55  ;;  %v3164_v55 = vld [vmem:[#allocation2 + $0x8] sm:$0xf]  ;;  %v3165_v56 = vld [vmem:[#allocation2 + $0xc] sm:$0xf] }
  0xa2   : > { %vm9530_vm10 = vcmp.ne.s32.totalorder %v1139_v53, 0 }
  0xa3   : > { %vm1653_vm13 = vmpackc.low %vm9530_vm10, %vm9530_vm10 }
  0xa8   : > { %709 = vmatmul.mubr.bf16.gmra.mxu0 %v474_v3  ;;  %v456_v3 = vld [vmem:[%s9296_s24 + $0x1e0] sm:$0xff] }
  0xa9   : > { %716 = vmatprep.mubr.bf16.mxu0 %v477_v4  ;;  %v458_v4 = vld [vmem:[%s9296_s24 + $0x1f0] sm:$0xff] }
  0xaa   : > { %v490_v8 = vpack.c.bf16 %v458_v4, %v456_v3 }
  0xb0   : > { %717 = vmatmul.mubr.bf16.gmra.mxu0 %v476_v9  ;;  %v1064_v9 = vadd.s32 24, %v9420_v41 }
  0xb1   : > { %724 = vmatprep.mubr.bf16.mxu0 %v479_v10  ;;  %v1721_v10 = vor.u32 %v1720_v6, %v9440_v5 }
  0xb3   : > { %v1722_v18 = vrot.slane %v1721_v10, 4 }
  0xb5   : > { %v1727_v29 = vsel %vm9451_vm11, %v1722_v18, %v9455_v20 }
  0xb6   : > { %vm9479_vm3 = vcmp.ne.s16.totalorder %v1727_v29, 0  ;;  %v1685_v29 = vsel %vm1653_vm13, 65537, %v13149_v0 }
  0xb7   : > { %v13413_v37 = vsel %vm9479_vm3, 4294967295, %v13412_v37  ;;  %v2067_v48 = vsel %vm9479_vm3, %v1551_v36, 0  ;;  %v1774_v44 = vshll.u32 %v1685_v29, 16 }
  0xb8   : > { %725 = vmatmul.mubr.bf16.gmra.mxu0 %v478_v15  ;;  %v1681_v15 = vsel %vm1649_vm8, 65537, %v13149_v0  ;;  %13414 = vst [vmem:[#allocation17_spill] sm:$0xff] %v13413_v37  ;;  %vm13179_vm8 = vcmp.ne.s16.totalorder %v9500_v49, 0 }
  0xb9   : > { %732 = vmatprep.mubr.bf16.mxu0 %v481_v16  ;;  %v1118_v16 = vand.u32 15, %v1064_v9  ;;  %v1734_v24 = vshll.u32 %v1681_v15, 16  ;;  %v1738_v30 = vshrl.u32 %v1681_v15, 16  ;;  %v3648_v2 = vsel %vm13179_vm8, %v3164_v55, 0  ;;  %v9540_v9 = vld [vmem:[#allocation2 + $0xc] sm:$0xf] }
  0xbb   : > { %vm9457_vm12 = vcmp.ne.s32.totalorder %v1118_v16, 15  ;;  %v1736_v42 = vrot.slane %v1734_v24, 5  ;;  %v1740_v43 = vrot.slane %v1738_v30, 4 }
  0xbc   : > { %vm3264_vm1 = vmpackc.low %vm9457_vm12, %vm9457_vm12 }
  0xbd   : > { %v1741_v54 = vor.u32 %v1740_v43, %v1736_v42 }
  0xbf   : > { %v9534_v6 = vrot.slane %v1741_v54, 4 }
  0xc0   : > { %733 = vmatmul.mubr.bf16.gmra.mxu0 %v480_v21  ;;  %v1730_v21 = vrot.slane %v1728_v13, 4  ;;  %v1070_v13 = vadd.s32 72, %v9420_v41 }
  0xc1   : > { %740 = vmatprep.mubr.bf16.mxu0 %v483_v22  ;;  %v3340_v22 = vshll.u32 %v3294_v11, 16 }
  0xc2   : > { %v1731_v31 = vor.u32 %v1730_v21, %v9455_v20 }
  0xc4   : > { %v9491_v45 = vrot.slane %v1731_v31, 4  ;;  %v1160_v31 = vand.u32 15, %v1070_v13 }
  0xc6   : > { %13417 = vst [vmem:[#allocation18_spill] sm:$0xff] %v9491_v45  ;;  %v1737_v59 = vsel %vm9451_vm11, %v9491_v45, %v1736_v42 }
  0xc7   : > { %vm9536_vm12 = vcmp.ne.s16.totalorder %v1737_v59, 0 }
  0xc8   : > { %741 = vmatmul.mubr.bf16.gmra.mxu0 %v482_v27  ;;  %v9461_v27 = vrot.slane %v3337_v17, 7  ;;  %v13427_v7 = vsel %vm9536_vm12, 4294967295, %v13426_v7  ;;  %v1071_v17 = vadd.s32 80, %v9420_v41 }
  0xc9   : > { %748 = vmatprep.mubr.bf16.mxu0 %v485_v28  ;;  %v1066_v28 = vadd.s32 40, %v9420_v41  ;;  %13428 = vst [vmem:[#allocation21_spill] sm:$0xff] %v13427_v7 }
  0xca   : > { %v3342_v33 = vor.u32 %v3340_v22, %v9461_v27  ;;  %v1167_v36 = vand.u32 15, %v1071_v17 }
  0xcc   : > { %v3343_v46 = vsel %vm9483_vm4, %v9468_v32, %v3342_v33 }
  0xcd   : > { %vm9513_vm7 = vcmp.ne.s16.totalorder %v3343_v46, 0  ;;  %v1778_v46 = vshrl.u32 %v1685_v29, 16 }
  0xce   : > { %v13422_v57 = vsel %vm9513_vm7, 4294967295, %v13421_v57  ;;  %v3649_v3 = vsel %vm9513_vm7, %v3165_v56, 0 }
  0xcf   : > { %13423 = vst [vmem:[#allocation20_spill] sm:$0xff] %v13422_v57  ;;  %v7795_v14 = vcombine.low %v3648_v2, %v3649_v3 }
  0xd0   : > { %749 = vmatmul.mubr.bf16.gmra.mxu0 %v484_v38 }
  0xd1   : > { %756 = vmatprep.mubr.bf16.mxu0 %v487_v39  ;;  %v1132_v39 = vand.u32 15, %v1066_v28  ;;  %v3344_v28 = vrot.slane %v9461_v27, 4  ;;  %v3777_v34 = vshll.u32 %v7795_v14, 16  ;;  %v1072_v27 = vadd.s32 88, %v9420_v41 }
  0xd3   : > { %vm9509_vm6 = vcmp.ne.s32.totalorder %v1132_v39, 15  ;;  %v3779_v53 = vrot.slane %v3777_v34, 1  ;;  %v1076_v34 = vadd.s32 120, %v9420_v41 }
  0xd4   : > { %vm3266_vm9 = vmpackc.low %vm9509_vm6, %vm9509_vm6  ;;  %vm9587_vm6 = vcmp.ne.s32.totalorder %v1160_v31, 15 }
  0xd5   : > { %v3298_v11 = vsel %vm3266_vm9, 65537, %v13149_v0  ;;  %vm9594_vm9 = vcmp.ne.s32.totalorder %v1167_v36, 0  ;;  %vm3270_vm10 = vmpackc.low %vm9587_vm6, %vm9587_vm6 }
  0xd6   : > { %v3373_v25 = vshrl.u32 %v3298_v11, 16  ;;  %v3376_v42 = vshll.u32 %v3298_v11, 16  ;;  %vm1657_vm13 = vmpackc.low %vm9594_vm9, %vm9594_vm9  ;;  %v3302_v17 = vsel %vm3270_vm10, 65537, %v13149_v0 }
  0xd7   : > { %v1689_v26 = vsel %vm1657_vm13, 65537, %v13149_v0  ;;  %v3412_v52 = vshll.u32 %v3302_v17, 16 }
  0xd8   : > { %757 = vmatmul.mubr.bf16.gmra.mxu0 %v486_v50  ;;  %v3296_v50 = vsel %vm3264_vm1, 65537, %v13149_v0  ;;  %v3375_v43 = vrot.slane %v3373_v25, 7 }
  0xd9   : > { %764 = vmatprep.mubr.bf16.mxu0 %v489_v51  ;;  %v1683_v51 = vsel %vm1651_vm5, 65537, %v13149_v0  ;;  %v3355_v1 = vshrl.u32 %v3296_v50, 16  ;;  %v3358_v22 = vshll.u32 %v3296_v50, 16 }
  0xda   : > { %v1754_v62 = vshll.u32 %v1683_v51, 16  ;;  %v1758_v63 = vshrl.u32 %v1683_v51, 16  ;;  %v3775_v51 = vshrl.u32 %v7795_v14, 16  ;;  %v3380_v13 = vrot.slane %v3375_v43, 4 }
  0xdb   : > { %v3357_v21 = vrot.slane %v3355_v1, 7  ;;  %v1780_v1 = vrot.slane %v1778_v46, 4  ;;  %v1818_v46 = vshrl.u32 %v1689_v26, 16 }
  0xdc   : > { %v9544_v15 = vrot.slane %v1754_v62, 5  ;;  %v1760_v16 = vrot.slane %v1758_v63, 4  ;;  %v9605_v62 = vor.u32 %v3376_v42, %v3375_v43  ;;  %v9607_v63 = vrot.slane %v1774_v44, 5 }
  0xdd   : > { %v9572_v40 = vor.u32 %v3358_v22, %v3357_v21  ;;  %v3362_v50 = vrot.slane %v3357_v21, 4  ;;  %v9625_v11 = vor.u32 %v3779_v53, %v3775_v51  ;;  %v1074_v21 = vadd.s32 104, %v9420_v41 }
  0xde   : > { %v1761_v35 = vor.u32 %v1760_v16, %v9544_v15  ;;  %v1781_v25 = vor.u32 %v1780_v1, %v9607_v63  ;;  %v3409_v42 = vshrl.u32 %v3302_v17, 16  ;;  %v1814_v44 = vshll.u32 %v1689_v26, 16 }
  0xdf   : > { %v9619_v4 = vsel %vm9483_vm4, %v3362_v50, %v9500_v49  ;;  %v1079_v53 = vadd.s32 144, %v9420_v41 }
  0xe0   : > { %765 = vmatmul.mubr.bf16.gmra.mxu0 %v488_v60  ;;  %v7702_v60 = vcombine.low %v2066_v47, %v2067_v48  ;;  %v1073_v47 = vadd.s32 96, %v9420_v41  ;;  %v9585_v48 = vsel %vm9483_vm4, %v3344_v28, %v9500_v49  ;;  %v9591_v54 = vrot.slane %v1761_v35, 4  ;;  %13438 = vst [vmem:[#allocation23_spill] sm:$0xff] %v9619_v4 }
  0xe1   : > { %772 = vmatprep.mubr.bf16.mxu0 %v491_v61  ;;  %v1069_v61 = vadd.s32 64, %v9420_v41  ;;  %13433 = vst [vmem:[#allocation22_spill] sm:$0xff] %v9585_v48  ;;  %v9653_v35 = vsel %vm9483_vm4, %v3380_v13, %v9500_v49  ;;  %v9668_v51 = vrot.slane %v1781_v25, 4  ;;  %v3411_v1 = vrot.slane %v3409_v42, 7 }
  0xe2   : > { %v2192_v10 = vshrl.u32 %v7702_v60, 16  ;;  %v2195_v18 = vshll.u32 %v7702_v60, 16  ;;  %v1181_v2 = vand.u32 15, %v1073_v47  ;;  %13443 = vst [vmem:[#allocation24_spill] sm:$0xff] %v9653_v35  ;;  %v1188_v47 = vand.u32 15, %v1074_v21 }
  0xe3   : > { %v1153_v12 = vand.u32 15, %v1069_v61  ;;  %v1174_v61 = vand.u32 15, %v1072_v27  ;;  %v1077_v27 = vadd.s32 128, %v9420_v41  ;;  %v1223_v26 = vand.u32 15, %v1079_v53 }
  0xe4   : > { %v9567_v33 = vrot.slane %v2192_v10, 3  ;;  %v9570_v39 = vrot.slane %v2195_v18, 4  ;;  %v1075_v10 = vadd.s32 112, %v9420_v41  ;;  %vm9684_vm9 = vcmp.ne.s32.totalorder %v1188_v47, 15 }
  0xe5   : > { %vm9563_vm15 = vcmp.ne.s32.totalorder %v1153_v12, 0  ;;  %v9708_v42 = vor.u32 %v3412_v52, %v3411_v1  ;;  %v3416_v47 = vrot.slane %v3411_v1, 4  ;;  %v9721_v52 = vld [vmem:[#allocation6 + $0x98] sm:$0xff]  }
  0xe6   : > { %vm1655_vm5 = vmpackc.low %vm9563_vm15, %vm9563_vm15  ;;  %vm9643_vm15 = vcmp.ne.s32.totalorder %v1181_v2, 0  ;;  %v1195_v31 = vand.u32 15, %v1075_v10  ;;  %v1078_v10 = vadd.s32 136, %v9420_v41  ;;  %8413 = vmatprep.subr.bf16.mxu1 %v9721_v52 }
  0xe7   : > { %v1687_v60 = vsel %vm1655_vm5, 65537, %v13149_v0  ;;  %vm1659_vm5 = vmpackc.low %vm9643_vm15, %vm9643_vm15 }
  0xe8   : > { %773 = vmatmul.mubr.bf16.gmra.mxu0 %v490_v8  ;;  %v1146_v8 = vand.u32 15, %v1068_v58  ;;  %v1794_v14 = vshll.u32 %v1687_v60, 16  ;;  %v1798_v16 = vshrl.u32 %v1687_v60, 16  ;;  %vm9675_vm6 = vcmp.ne.s32.totalorder %v1195_v31, 0 }
  0xe9   : > { %v1691_v2 = vsel %vm1659_vm5, 65537, %v13149_v0  ;;  %vm1661_vm10 = vmpackc.low %vm9675_vm6, %vm9675_vm6 }
  0xea   : > { %vm9557_vm14 = vcmp.ne.s32.totalorder %v1146_v8, 15  ;;  %v9655_v36 = vrot.slane %v1794_v14, 5  ;;  %v1800_v43 = vrot.slane %v1798_v16, 4  ;;  %v9682_v14 = vrot.slane %v1814_v44, 5 }
  0xeb   : > { %vm3268_vm1 = vmpackc.low %vm9557_vm14, %vm9557_vm14  ;;  %vm9632_vm14 = vcmp.ne.s32.totalorder %v1174_v61, 15  ;;  %v1202_v61 = vand.u32 15, %v1076_v34  ;;  %v1820_v16 = vrot.slane %v1818_v46, 4  ;;  %v1838_v31 = vshrl.u32 %v1691_v2, 16 }
  0xec   : > { %v3300_v55 = vsel %vm3268_vm1, 65537, %v13149_v0  ;;  %vm3272_vm1 = vmpackc.low %vm9632_vm14, %vm9632_vm14  ;;  %v1801_v13 = vor.u32 %v1800_v43, %v9655_v36  ;;  %v1216_v43 = vand.u32 15, %v1078_v10  ;;  %v1693_v53 = vsel %vm1661_vm10, 65537, %v13149_v0 }
  0xed   : > { %v3391_v8 = vshrl.u32 %v3300_v55, 16  ;;  %v3394_v30 = vshll.u32 %v3300_v55, 16  ;;  %v3304_v56 = vsel %vm3272_vm1, 65537, %v13149_v0  ;;  %vm9700_vm13 = vcmp.ne.s32.totalorder %v1202_v61, 15  ;;  %vm3274_vm14 = vmpackc.low %vm9684_vm9, %vm9684_vm9 }
  0xee   : > { %v3427_v25 = vshrl.u32 %v3304_v56, 16  ;;  %v9717_v44 = vrot.slane %v1801_v13, 4  ;;  %v1821_v46 = vor.u32 %v1820_v16, %v9682_v14  ;;  %v3430_v61 = vshll.u32 %v3304_v56, 16  ;;  %vm3276_vm5 = vmpackc.low %vm9700_vm13, %vm9700_vm13 }
  0xef   : > { %v9647_v29 = vrot.slane %v3391_v8, 7  ;;  %v1209_v8 = vand.u32 15, %v1077_v27  ;;  %vm9723_vm1 = vcmp.ne.s32.totalorder %v1223_v26, 0  ;;  %v1840_v13 = vrot.slane %v1838_v31, 4 }
  0xf0   : > { %v3429_v60 = vrot.slane %v3427_v25, 7  ;;  %v3306_v1 = vsel %vm3274_vm14, 65537, %v13149_v0  ;;  %v1080_v56 = vadd.s32 152, %v9420_v41  ;;  %v1854_v16 = vshll.u32 %v1693_v53, 16  ;;  %vm1665_vm10 = vmpackc.low %vm9723_vm1, %vm9723_vm1 }
  0xf1   : > { %v9672_v55 = vor.u32 %v3394_v30, %v9647_v29  ;;  %v3398_v21 = vrot.slane %v9647_v29, 4  ;;  %v1834_v30 = vshll.u32 %v1691_v2, 16  ;;  %vm9713_vm15 = vcmp.ne.s32.totalorder %v1209_v8, 0 }
  0xf2   : > { %v1081_v8 = vadd.s32 160, %v9420_v41  ;;  %vm1663_vm6 = vmpackc.low %vm9713_vm15, %vm9713_vm15  ;;  %v1858_v17 = vshrl.u32 %v1693_v53, 16  ;;  %vm9739_vm9 = vcmp.ne.s32.totalorder %v1216_v43, 15  ;;  %v9756_v53 = vrot.slane %v1821_v46, 4 }
  0xf3   : > { %v9731_v10 = vrot.slane %v1834_v30, 5  ;;  %v9750_v31 = vsel %vm9483_vm4, %v3398_v21, %v9500_v49  ;;  %v9764_v43 = vsel %vm9483_vm4, %v3416_v47, %v9500_v49  ;;  %v1695_v21 = vsel %vm1663_vm6, 65537, %v13149_v0  ;;  %vm3278_vm14 = vmpackc.low %vm9739_vm9, %vm9739_vm9 }
  0xf4   : > { %v1237_v25 = vand.u32 15, %v1081_v8  ;;  %13456 = vst [vmem:[#allocation25_spill] sm:$0xff] %v9750_v31  ;;  %13457 = vst [vmem:[#allocation26_spill] sm:$0xff] %v9764_v43  ;;  %v9766_v8 = vor.u32 %v3430_v61, %v3429_v60  ;;  %v3308_v46 = vsel %vm3276_vm5, 65537, %v13149_v0  ;;  %v3445_v47 = vshrl.u32 %v3306_v1, 16 }
  0xf5   : > { %v1841_v27 = vor.u32 %v1840_v13, %v9731_v10  ;;  %v1230_v61 = vand.u32 15, %v1080_v56  ;;  %v9783_v30 = vrot.slane %v1854_v16, 5  ;;  %v1860_v29 = vrot.slane %v1858_v17, 4 }
  0xf6   : > { %v1697_v34 = vsel %vm1665_vm10, 65537, %v13149_v0  ;;  %vm9786_vm13 = vcmp.ne.s32.totalorder %v1237_v25, 0  ;;  %v3434_v2 = vrot.slane %v3429_v60, 4  ;;  %v1874_v58 = vshll.u32 %v1695_v21, 16 }
  0xf7   : > { %13458 = vst [vmem:[#allocation27_spill] sm:$0xff] %v9783_v30  ;;  %v3463_v26 = vshrl.u32 %v3308_v46, 16  ;;  %v1878_v16 = vshrl.u32 %v1695_v21, 16  ;;  %v3310_v17 = vsel %vm3278_vm14, 65537, %v13149_v0  ;;  %v1082_v25 = vadd.s32 168, %v9420_v41  ;;  %vm1667_vm15 = vmpackc.low %vm9786_vm13, %vm9786_vm13 }
  0xf8   : > { %v1894_v18 = vshll.u32 %v1697_v34, 16  ;;  %v1898_v50 = vshrl.u32 %v1697_v34, 16  ;;  %vm9803_vm1 = vcmp.ne.s32.totalorder %v1230_v61, 15  ;;  %v1083_v13 = vadd.s32 176, %v9420_v41 }
  0xf9   : > { %v9808_v22 = vrot.slane %v1841_v27, 4  ;;  %v3447_v56 = vrot.slane %v3445_v47, 7  ;;  %v3448_v21 = vshll.u32 %v3306_v1, 16  ;;  %v1861_v24 = vor.u32 %v1860_v29, %v9783_v30  ;;  %vm3280_vm5 = vmpackc.low %vm9803_vm1, %vm9803_vm1 }
  0xfa   : > { %v9818_v28 = vsel %vm9483_vm4, %v3434_v2, %v9500_v49  ;;  %v9820_v61 = vrot.slane %v1874_v58, 5  ;;  %v3465_v12 = vrot.slane %v3463_v26, 7  ;;  %v1880_v3 = vrot.slane %v1878_v16, 4 }
  0xfb   : > { %13463 = vst [vmem:[#allocation28_spill] sm:$0xff] %v9808_v22  ;;  %13464 = vst [vmem:[#allocation29_spill] sm:$0xff] %v9818_v28  ;;  %v1699_v27 = vsel %vm1667_vm15, 65537, %v13149_v0  ;;  %v3481_v47 = vshrl.u32 %v3310_v17, 16  ;;  %v1244_v29 = vand.u32 15, %v1082_v25  ;;  %v9826_v1 = vrot.slane %v1894_v18, 5 }
  0xfc   : > { %13465 = vst [vmem:[#allocation30_spill] sm:$0xff] %v9820_v61  ;;  %v1900_v34 = vrot.slane %v1898_v50, 4  ;;  %v3466_v59 = vshll.u32 %v3308_v46, 16  ;;  %v1251_v23 = vand.u32 15, %v1083_v13  ;;  %v9832_v2 = vor.u32 %v3448_v21, %v3447_v56 }
  0xfd   : > { %13466 = vst [vmem:[#allocation31_spill] sm:$0xff] %v9826_v1  ;;  %v9834_v26 = vrot.slane %v1861_v24, 4  ;;  %v1084_v16 = vadd.s32 184, %v9420_v41  ;;  %v3452_v60 = vrot.slane %v3447_v56, 4  ;;  %v1914_v0 = vshll.u32 %v1699_v27, 16 }
  0xfe   : > { %13467 = vst [vmem:[#allocation32_spill] sm:$0xff] %v9832_v2  ;;  %v1918_v37 = vshrl.u32 %v1699_v27, 16  ;;  %v13469_v25 = vmov 0   ;;  %v1881_v50 = vor.u32 %v1880_v3, %v9820_v61  ;;  %v3483_v46 = vrot.slane %v3481_v47, 7 }
  0xff   : > { %13468 = vst [vmem:[#allocation33_spill] sm:$0xff] %v9834_v26  ;;  %v3312_v18 = vsel %vm3280_vm5, 65537, %v13469_v25  ;;  %v3484_v13 = vshll.u32 %v3310_v17, 16  ;;  %vm9839_vm6 = vcmp.ne.s32.totalorder %v1244_v29, 15  ;;  %v1901_v21 = vor.u32 %v1900_v34, %v9826_v1 }
 0x100   : > { %v9844_v58 = vor.u32 %v3466_v59, %v3465_v12  ;;  %vm9846_vm9 = vcmp.ne.s32.totalorder %v1251_v23, 0  ;;  %v1085_v56 = vadd.s32 192, %v9420_v41  ;;  %v3499_v27 = vshrl.u32 %v3312_v18, 16  ;;  %vm3282_vm10 = vmpackc.low %vm9839_vm6, %vm9839_vm6 }
 0x101   : > { %v1258_v34 = vand.u32 15, %v1084_v16  ;;  %v9863_v59 = vrot.slane %v1914_v0, 5  ;;  %v1920_v47 = vrot.slane %v1918_v37, 4  ;;  %v9868_v3 = vrot.slane %v1881_v50, 4  ;;  %vm1669_vm14 = vmpackc.low %vm9846_vm9, %vm9846_vm9 }
 0x102   : > { %13472 = vst [vmem:[#allocation34_spill] sm:$0xff] %v9844_v58  ;;  %v1265_v29 = vand.u32 15, %v1085_v56  ;;  %v9873_v17 = vsel %vm9483_vm4, %v3452_v60, %v9500_v49  ;;  %v3470_v16 = vrot.slane %v3465_v12, 4  ;;  %v9875_v30 = vor.u32 %v3484_v13, %v3483_v46 }
 0x103   : > { %13475 = vst [vmem:[#allocation35_spill] sm:$0xff] %v9863_v59  ;;  %13476 = vst [vmem:[#allocation36_spill] sm:$0xff] %v9868_v3  ;;  %v9884_v5 = vrot.slane %v1901_v21, 4  ;;  %v3501_v60 = vrot.slane %v3499_v27, 7  ;;  %v3502_v50 = vshll.u32 %v3312_v18, 16  ;;  %v3314_v13 = vsel %vm3282_vm10, 65537, %v13469_v25 }
 0x104   : > { %13477 = vst [vmem:[#allocation37_spill] sm:$0xff] %v9873_v17  ;;  %13478 = vst [vmem:[#allocation38_spill] sm:$0xff] %v9875_v30  ;;  %vm9890_vm13 = vcmp.ne.s32.totalorder %v1265_v29, 0  ;;  %vm9898_vm1 = vcmp.ne.s32.totalorder %v1258_v34, 15  ;;  %v1921_v24 = vor.u32 %v1920_v47, %v9863_v59  ;;  %v3488_v56 = vrot.slane %v3483_v46, 4 }
 0x105   : > { %13479 = vst [vmem:[#allocation39_spill] sm:$0xff] %v9884_v5  ;;  %vm1671_vm15 = vmpackc.low %vm9890_vm13, %vm9890_vm13  ;;  %v1701_v29 = vsel %vm1669_vm14, 65537, %v13469_v25  ;;  %v1086_v37 = vadd.s32 200, %v9420_v41  ;;  %v9916_v34 = vsel %vm9483_vm4, %v3470_v16, %v9500_v49  ;;  %v3517_v12 = vshrl.u32 %v3314_v13, 16 }
 0x106   : > { %13484 = vst [vmem:[#allocation40_spill] sm:$0xff] %v9916_v34  ;;  %v1703_v18 = vsel %vm1671_vm15, 65537, %v13469_v25  ;;  %vm3284_vm5 = vmpackc.low %vm9898_vm1, %vm9898_vm1  ;;  %v1087_v16 = vadd.s32 208, %v9420_v41  ;;  %v9931_v27 = vor.u32 %v3502_v50, %v3501_v60  ;;  %v1934_v0 = vshll.u32 %v1701_v29, 16 }
 0x107   : > { %v1938_v23 = vshrl.u32 %v1701_v29, 16  ;;  %v1272_v34 = vand.u32 15, %v1086_v37  ;;  %v9933_v30 = vrot.slane %v1921_v24, 4  ;;  %v9938_v47 = vsel %vm9483_vm4, %v3488_v56, %v9500_v49  ;;  %v9948_v37 = vld [vmem:[%s13132_s2] ss:$0 sm:$0xff] }
 0x108   : > { %13485 = vst [vmem:[#allocation41_spill] sm:$0xff] %v9931_v27  ;;  %13487 = vst [vmem:[#allocation43_spill] sm:$0xff] %v9938_v47  ;;  %v3506_v58 = vrot.slane %v3501_v60, 4  ;;  %v1279_v17 = vand.u32 15, %v1087_v16  ;;  %v1954_v21 = vshll.u32 %v1703_v18, 16  ;;  %v1958_v5 = vshrl.u32 %v1703_v18, 16 }
 0x109   : > { %13486 = vst [vmem:[#allocation42_spill] sm:$0xff] %v9933_v30  ;;  %v3316_v1 = vsel %vm3284_vm5, 65537, %v13469_v25  ;;  %vm9941_vm6 = vcmp.ne.s32.totalorder %v1272_v34, 15  ;;  %v9954_v24 = vrot.slane %v3517_v12, 7  ;;  %v3520_v56 = vshll.u32 %v3314_v13, 16 }
 0x10a   : > { %vm1503_vm9 = vcmp.ne.s32.totalorder %v1279_v17, 0  ;;  %vm3286_vm10 = vmpackc.low %vm9941_vm6, %vm9941_vm6  ;;  %v9963_v16 = vrot.slane %v1934_v0, 5  ;;  %v1940_v47 = vrot.slane %v1938_v23, 4  ;;  %v9968_v12 = vld [vmem:[%s13133_s3] ss:$0 sm:$0xff]  ;;  %v3535_v0 = vshrl.u32 %v3316_v1, 16 }
 0x10b   : > { %vm1673_vm14 = vmpackc.low %vm1503_vm9, %vm1503_vm9  ;;  %v1960_v34 = vrot.slane %v1958_v5, 4  ;;  %v3318_v60 = vsel %vm3286_vm10, 65537, %v13469_v25  ;;  %v9985_v59 = vor.u32 %v3520_v56, %v9954_v24  ;;  %v1089_v3 = vadd.s32 224, %v9420_v41 }
 0x10c   : > { %13490 = vst [vmem:[#allocation44_spill] sm:$0xff] %v9963_v16  ;;  %v1705_v23 = vsel %vm1673_vm14, 65537, %v13469_v25  ;;  %v1941_v61 = vor.u32 %v1940_v47, %v9963_v16  ;;  %v3538_v26 = vshll.u32 %v3316_v1, 16  ;;  %v3553_v2 = vshrl.u32 %v3318_v60, 16 }
 0x10d   : > { %v1974_v13 = vshll.u32 %v1705_v23, 16  ;;  %v1978_v30 = vshrl.u32 %v1705_v23, 16  ;;  %v1293_v5 = vand.u32 15, %v1089_v3  ;;  %v1088_v28 = vadd.s32 216, %v9420_v41 }
 0x10e   : > { %v13493_v1 = vsel %vm9451_vm11, %v9534_v6, %v9455_v20  ;;  %v13494_v3 = vmov 0  ;;  %vm13188_vm1 = vcmp.ne.s16.totalorder %v9585_v48, 0  ;;  %v10018_v6 = vrot.slane %v1941_v61, 4 }
 0x10f   : > { %vm10004_vm13 = vcmp.ne.s16.totalorder %v13493_v1, 0  ;;  %v10008_v47 = vrot.slane %v1974_v13, 5  ;;  %vm10010_vm15 = vcmp.ne.s32.totalorder %v1293_v5, 0  ;;  %v3524_v13 = vrot.slane %v9954_v24, 4 }
 0x110   : > { %v13495_v3 = vsel %vm10004_vm13, 4294967295, %v13494_v3  ;;  %vm1675_vm5 = vmpackc.low %vm10010_vm15, %vm10010_vm15  ;;  %v3556_v1 = vshll.u32 %v3318_v60, 16 }
 0x111   : > { %13496 = vst [vmem:[#allocation47_spill] sm:$0xff] %v13495_v3  ;;  %13497 = vst [vmem:[#allocation48_spill] sm:$0xff] %v10008_v47  ;;  %v1707_v61 = vsel %vm1675_vm5, 65537, %v13469_v25  ;;  %vm13196_vm5 = vsmask.f32 4352 }
 0x112   : > { %v1998_v60 = vshrl.u32 %v1707_v61, 16 }
 0x130   : > { %v8097_v46 = vpop.f32.mrf.mxu0 }
 0x132   : > { %v8098_v29 = vpop.f32.mrf.mxu0 }
 0x133   : > { %v8099_v18 = vadd.f32 %v8098_v29, %v8097_v46  ;;  %v9977_v46 = vsel %vm9483_vm4, %v3506_v58, %v9500_v49  ;;  %v9981_v29 = vrot.slane %v1954_v21, 5  ;;  %v3537_v21 = vrot.slane %v3535_v0, 7 }
 0x134   : > { %v8100_v17 = vpop.f32.mrf.mxu0  ;;  %13491 = vst [vmem:[#allocation45_spill] sm:$0xff] %v9977_v46 }
 0x135   : > { %v788_v50 = vmul.f32 %v8099_v18, %v9948_v37  ;;  %v10024_v5 = vor.u32 %v3538_v26, %v3537_v21  ;;  %v13505_v26 = vmov 0 }
 0x136   : > { %v8101_v27 = vpop.f32.mrf.mxu0 }
 0x137   : > { %v827_v58 = vadd.f32 %v9968_v12, %v788_v50  ;;  %v8102_v46 = vadd.f32 %v8101_v27, %v8100_v17  ;;  %v1961_v27 = vor.u32 %v1960_v34, %v9981_v29  ;;  %v1286_v50 = vand.u32 15, %v1088_v28  ;;  %13500 = vst [vmem:[#allocation49_spill] sm:$0xff] %v10024_v5 }
 0x138   : > { %v8103_v18 = vpop.f32.mrf.mxu0  ;;  %v10026_v28 = vrot.slane %v3553_v2, 7  ;;  %v13504_v2 = vsel %vm9483_vm4, %v9468_v32, %v9572_v40  ;;  %v10145_v5 = vrot.slane %v1998_v60, 4 }
 0x139   : > { %v9991_v22 = vmax.f32 %v827_v58, 0.0  ;;  %v789_v56 = vmul.f32 %v8102_v46, %v9948_v37  ;;  %v1980_v46 = vrot.slane %v1978_v30, 4  ;;  %vm10033_vm6 = vcmp.ne.s32.totalorder %v1286_v50, 15 }
 0x13a   : > { %v8104_v17 = vpop.f32.mrf.mxu0  ;;  %vm10042_vm9 = vcmp.ne.s16.totalorder %v13504_v2, 0  ;;  %v10050_v24 = vrot.slane %v1961_v27, 4  ;;  %v3542_v50 = vrot.slane %v3537_v21, 4  ;;  %v10067_v21 = vsel %vm9483_vm4, %v3524_v13, %v9500_v49  ;;  %vm3288_vm10 = vmpackc.low %vm10033_vm6, %vm10033_vm6 }
 0x13b   : > { %13492 = vst [vmem:[#allocation46_spill] sm:$0xff] %v9991_v22  ;;  %v8048_v34 = vpack.c.bf16 %v9991_v22, %v9991_v22  ;;  %v828_v58 = vadd.f32 %v9968_v12, %v789_v56  ;;  %v8105_v23 = vadd.f32 %v8104_v17, %v8103_v18  ;;  %v13506_v26 = vsel %vm10042_vm9, 4294967295, %v13505_v26  ;;  %13508 = vst [vmem:[#allocation52_spill] sm:$0xff] %v10067_v21 }
 0x13c   : > { %v8106_v30 = vpop.f32.mrf.mxu0  ;;  %13507 = vst [vmem:[#allocation51_spill] sm:$0xff] %v13506_v26  ;;  %v13511_v13 = vsel %vm9451_vm11, %v9491_v45, %v9544_v15  ;;  %v13512_v27 = vmov 0 }
 0x13d   : > { %1024 = vst.msk [vmem:[#allocation2 + $0x10] sm:$0xf] %vm13195_vm0, %v8048_v34  ;;  %v10029_v56 = vmax.f32 %v828_v58, 0.0  ;;  %v790_v18 = vmul.f32 %v8105_v23, %v9948_v37  ;;  %v1981_v23 = vor.u32 %v1980_v46, %v10008_v47  ;;  %v10070_v46 = vor.u32 %v3556_v1, %v10026_v28 }
 0x13e   : > { %v8107_v0 = vpop.f32.mrf.mxu0  ;;  %vm10084_vm14 = vcmp.ne.s16.totalorder %v13511_v13, 0 }
 0x13f   : > { %13501 = vst [vmem:[#allocation50_spill] sm:$0xff] %v10029_v56  ;;  %v8049_v34 = vpack.c.bf16 %v10029_v56, %v10029_v56  ;;  %v829_v58 = vadd.f32 %v9968_v12, %v790_v18  ;;  %v8108_v40 = vadd.f32 %v8107_v0, %v8106_v30  ;;  %13509 = vst [vmem:[#allocation53_spill] sm:$0xff] %v10070_v46  ;;  %v1994_v30 = vshll.u32 %v1707_v61, 16 }
 0x140   : > { %v8109_v16 = vpop.f32.mrf.mxu0  ;;  %v13513_v27 = vsel %vm10084_vm14, 4294967295, %v13512_v27  ;;  %v10109_v13 = vrot.slane %v1981_v23, 4  ;;  %v10125_v23 = vsel %vm3288_vm10, 65537, %v13469_v25 }
 0x141   : > { %1025 = vst.msk [vmem:[#allocation2 + $0x14] sm:$0xf] %vm13195_vm0, %v8049_v34  ;;  %v10076_v18 = vmax.f32 %v829_v58, 0.0  ;;  %v791_v0 = vmul.f32 %v8108_v40, %v9948_v37  ;;  %13514 = vst [vmem:[#allocation55_spill] sm:$0xff] %v13513_v27  ;;  %v13515_v58 = vsel %vm9451_vm11, %v9591_v54, %v9455_v20  ;;  %v13516_v40 = vmov 0 }
 0x142   : > { %v8110_v34 = vpop.f32.mrf.mxu0  ;;  %vm10097_vm15 = vcmp.ne.s16.totalorder %v13515_v58, 0  ;;  %v10114_v54 = vsel %vm9483_vm4, %v3542_v50, %v9500_v49  ;;  %v3571_v60 = vshrl.u32 %v10125_v23, 16 }
 0x143   : > { %13510 = vst [vmem:[#allocation54_spill] sm:$0xff] %v10076_v18  ;;  %v13517_v40 = vsel %vm10097_vm15, 4294967295, %v13516_v40  ;;  %13519 = vst [vmem:[#allocation57_spill] sm:$0xff] %v10114_v54  ;;  %v8050_v58 = vpack.c.bf16 %v10076_v18, %v10076_v18  ;;  %v830_v1 = vadd.f32 %v9968_v12, %v791_v0  ;;  %v8111_v2 = vadd.f32 %v8110_v34, %v8109_v16 }
 0x144   : > { %13518 = vst [vmem:[#allocation56_spill] sm:$0xff] %v13517_v40  ;;  %v8112_v61 = vpop.f32.mrf.mxu0  ;;  %v10127_v15 = vld [vmem:[#allocation2 + $0x10] sm:$0xf]  ;;  %v10133_v16 = vrot.slane %v1994_v30, 5  ;;  %v3560_v34 = vrot.slane %v10026_v28, 4  ;;  %v13522_v28 = vsel %vm9536_vm12, %v9540_v9, 0 }
 0x145   : > { %13520 = vst [vmem:[#allocation58_spill] sm:$0xff] %v10127_v15  ;;  %v3166_v50 = vld [vmem:[#allocation2 + $0x10] sm:$0xf]  ;;  %1026 = vst.msk [vmem:[#allocation2 + $0x18] sm:$0xf] %vm13195_vm0, %v8050_v58  ;;  %v10139_v25 = vmax.f32 %v830_v1, 0.0  ;;  %v792_v54 = vmul.f32 %v8111_v2, %v9948_v37  ;;  %v13523_v2 = vsel %vm9483_vm4, %v9468_v32, %v9605_v62 }
 0x146   : > { %v2069_v47 = vsel %vm10004_vm13, %v10127_v15, 0  ;;  %v8113_v30 = vpop.f32.mrf.mxu0  ;;  %v3650_v58 = vsel %vm13188_vm1, %v3166_v50, 0  ;;  %vm10159_vm8 = vcmp.ne.s16.totalorder %v13523_v2, 0  ;;  %v13524_v1 = vmov 0 }
 0x147   : > { %13521 = vst [vmem:[#allocation59_spill] sm:$0xff] %v10139_v25  ;;  %v7703_v0 = vcombine.low %v13522_v28, %v2069_v47  ;;  %v13525_v1 = vsel %vm10159_vm8, 4294967295, %v13524_v1  ;;  %v8051_v47 = vpack.c.bf16 %v10139_v25, %v10139_v25  ;;  %v831_v50 = vadd.f32 %v9968_v12, %v792_v54 }
 0x148   : > { %13526 = vst [vmem:[#allocation60_spill] sm:$0xff] %v13525_v1  ;;  %v8114_v28 = vadd.f32 %v8113_v30, %v8112_v61  ;;  %v8115_v7 = vpop.f32.mrf.mxu0  ;;  %v10170_v3 = vld [vmem:[#allocation2 + $0x14] sm:$0xf]  ;;  %v10179_v9 = vsel %vm9483_vm4, %v3560_v34, %v9500_v49  ;;  %v13530_v34 = vsel %vm9451_vm11, %v9491_v45, %v9607_v63  ;;  %vm13567_vm12 = vcmask 519168  }
 0x149   : > { %13527 = vst [vmem:[#allocation61_spill] sm:$0xff] %v10170_v3  ;;  %v2200_v62 = vshrl.u32 %v7703_v0, 16  ;;  %v2203_v2 = vshll.u32 %v7703_v0, 16  ;;  %v3167_v22 = vld [vmem:[#allocation2 + $0x14] sm:$0xf]  ;;  %13528 = vst [vmem:[#allocation62_spill] sm:$0xff] %v10179_v9 }
 0x14a   : > { %1027 = vst.msk [vmem:[#allocation2 + $0x1c] sm:$0xf] %vm13195_vm0, %v8051_v47  ;;  %v10182_v54 = vmax.f32 %v831_v50, 0.0  ;;  %v793_v61 = vmul.f32 %v8114_v28, %v9948_v37  ;;  %v3651_v30 = vsel %vm10042_vm9, %v3167_v22, 0  ;;  %v8116_v18 = vpop.f32.mrf.mxu0  ;;  %vm10196_vm1 = vcmp.ne.s16.totalorder %v13530_v34, 0 }
 0x14b   : > { %v2202_v25 = vrot.slane %v2200_v62, 3  ;;  %v2205_v17 = vrot.slane %v2203_v2, 4  ;;  %v10189_v56 = vcombine.low %v3650_v58, %v3651_v30  ;;  %v13531_v47 = vmov 0  ;;  %v4747_v58 = vld [vmem:[#allocation2 + $0x14] sm:$0xf] }
 0x14c   : > { %13529 = vst [vmem:[#allocation63_spill] sm:$0xff] %v10182_v54  ;;  %v13532_v47 = vsel %vm10196_vm1, 4294967295, %v13531_v47  ;;  %v13534_v50 = vsel %vm9451_vm11, %v9668_v51, %v9455_v20  ;;  %v13535_v22 = vmov 0  ;;  %v10210_v28 = vadd.s32 240, %v9420_v41  ;;  %v8118_v34 = vpop.f32.mrf.mxu0  ;;  %v4746_v9 = vld [vmem:[#allocation2 + $0x10] sm:$0xf] }
 0x14d   : > { %13533 = vst [vmem:[#allocation64_spill] sm:$0xff] %v13532_v47  ;;  %vm10205_vm10 = vcmp.ne.s16.totalorder %v13534_v50, 0  ;;  %v8052_v63 = vpack.c.bf16 %v10182_v54, %v10182_v54  ;;  %v832_v62 = vadd.f32 %v9968_v12, %v793_v61  ;;  %v8117_v2 = vadd.f32 %v8116_v18, %v8115_v7  ;;  %v1555_v50 = vld [vmem:[#allocation2 + $0x18] sm:$0xf] }
 0x14e   : > { %v13536_v22 = vsel %vm10205_vm10, 4294967295, %v13535_v22  ;;  %v10215_v30 = vrot.slane %v3571_v60, 7  ;;  %v10217_v0 = vor.u32 %v2205_v17, %v2202_v25  ;;  %v3782_v51 = vshll.u32 %v10189_v56, 16  ;;  %v8119_v60 = vpop.f32.mrf.mxu0  ;;  %v4748_v57 = vld [vmem:[#allocation2 + $0x18] sm:$0xf] }
 0x14f   : > { %13537 = vst [vmem:[#allocation65_spill] sm:$0xff] %v13536_v22  ;;  %v2070_v15 = vsel %vm10084_vm14, %v10170_v3, 0  ;;  %1028 = vst.msk [vmem:[#allocation2 + $0x20] sm:$0xf] %vm13195_vm0, %v8052_v63  ;;  %v10228_v7 = vmax.f32 %v832_v62, 0.0  ;;  %v794_v25 = vmul.f32 %v8117_v2, %v9948_v37  ;;  %v2071_v18 = vsel %vm10097_vm15, %v1555_v50, 0 }
 0x150   : > { %v4780_v17 = vsel %vm9513_vm7, %v4747_v58, 0  ;;  %v13539_v61 = vor.u32 %v9570_v39, %v9567_v33  ;;  %v3784_v46 = vrot.slane %v3782_v51, 1  ;;  %v7704_v27 = vcombine.low %v2070_v15, %v2071_v18  ;;  %v3168_v63 = vld [vmem:[#allocation2 + $0x18] sm:$0xf]  ;;  %v8121_v50 = vpop.f32.mrf.mxu0 }
 0x151   : > { %13538 = vst [vmem:[#allocation66_spill] sm:$0xff] %v10228_v7  ;;  %v13540_v62 = vsel %vm9483_vm4, %v9468_v32, %v9672_v55  ;;  %v13541_v2 = vmov 0  ;;  %v10251_v58 = vadd.s32 232, %v9420_v41  ;;  %v8053_v33 = vpack.c.bf16 %v10228_v7, %v10228_v7 }
 0x152   : > { %v2207_v3 = vsel %vm13196_vm5, %v13539_v61, %v10217_v0  ;;  %vm10246_vm6 = vcmp.ne.s16.totalorder %v13540_v62, 0  ;;  %v833_v39 = vadd.f32 %v9968_v12, %v794_v25  ;;  %v8120_v15 = vadd.f32 %v8119_v60, %v8118_v34  ;;  %v3169_v62 = vld [vmem:[#allocation2 + $0x1c] sm:$0xf] }
 0x153   : > { %v13542_v2 = vsel %vm10246_vm6, 4294967295, %v13541_v2  ;;  %8381 = vmatprep.mubr.msk.bf16.mxu1 %vm13203_vm2, %v2207_v3  ;;  %vm13544_vm0 = vcmp.ne.s16.totalorder %v9500_v49, 0  ;;  %vm13545_vm5 = vsmask.f32 7424  ;;  %v2209_v18 = vshrl.u32 %v7704_v27, 16 }
 0x154   : > { %13543 = vst [vmem:[#allocation67_spill] sm:$0xff] %v13542_v2  ;;  %v4779_v51 = vsel %vm13544_vm0, %v4746_v9, 0  ;;  %v3785_v55 = vsel %vm13545_vm5, %v9625_v11, %v3784_v46  ;;  %v2212_v61 = vshll.u32 %v7704_v27, 16  ;;  %vm13546_vm7 = vcmask 519168   ;;  %v8122_v9 = vpop.f32.mrf.mxu0 }
 0x155   : > { %v10261_v40 = vcombine.low %v4779_v51, %v4780_v17  ;;  %1029 = vst.msk [vmem:[#allocation2 + $0x24] sm:$0xf] %vm13546_vm7, %v8053_v33  ;;  %v10264_v41 = vmax.f32 %v833_v39, 0.0  ;;  %v795_v34 = vmul.f32 %v8120_v15, %v9948_v37  ;;  %8501 = vmatprep.mubr.msk.bf16.mxu0 %vm13203_vm2, %v3785_v55  ;;  %vm13548_vm0 = vcmp.ne.s16.totalorder %v9619_v4, 0  ;;  %v1556_v33 = vld [vmem:[#allocation2 + $0x1c] sm:$0xf] }
 0x156   : > { %v3652_v3 = vsel %vm13548_vm0, %v3168_v63, 0  ;;  %v3653_v11 = vsel %vm10159_vm8, %v3169_v62, 0  ;;  %v3786_v27 = vshrl.u32 %v10189_v56, 16  ;;  %v2211_v25 = vrot.slane %v2209_v18, 3 }
 0x157   : > { %13547 = vst [vmem:[#allocation68_spill] sm:$0xff] %v10264_v41  ;;  %v2214_v17 = vrot.slane %v2212_v61, 4  ;;  %v10273_v60 = vcombine.low %v3652_v3, %v3653_v11  ;;  %v13549_v39 = vsel %vm9451_vm11, %v9491_v45, %v9655_v36  ;;  %v13550_v15 = vmov 0  ;;  %v8124_v61 = vpop.f32.mrf.mxu0  ;;  %v1557_v11 = vld [vmem:[#allocation2 + $0x20] sm:$0xf] }
 0x158   : > { %vm10280_vm7 = vcmp.ne.s16.totalorder %v13549_v39, 0  ;;  %v13553_v56 = vsel %vm9451_vm11, %v9717_v44, %v9455_v20  ;;  %v13554_v63 = vmov 0  ;;  %v8054_v51 = vpack.c.bf16 %v10264_v41, %v10264_v41  ;;  %v4749_v44 = vld [vmem:[#allocation2 + $0x1c] sm:$0xf] }
 0x159   : > { %v13551_v15 = vsel %vm10280_vm7, 4294967295, %v13550_v15  ;;  %vm10289_vm5 = vcmp.ne.s16.totalorder %v13553_v56, 0  ;;  %v834_v55 = vadd.f32 %v9968_v12, %v795_v34  ;;  %v8123_v18 = vadd.f32 %v8122_v9, %v8121_v50  ;;  %v8836_v9 = vld [vmem:[#allocation6 + $0x90] sm:$0xff]  }
 0x15a   : > { %13552 = vst [vmem:[#allocation69_spill] sm:$0xff] %v13551_v15  ;;  %v13555_v63 = vsel %vm10289_vm5, 4294967295, %v13554_v63  ;;  %vm13557_vm0 = vcmp.ne.s16.totalorder %v9585_v48, 0  ;;  %v10298_v62 = vor.u32 %v2214_v17, %v2211_v25  ;;  %v3790_v3 = vshll.u32 %v10273_v60, 16  ;;  %v8125_v17 = vpop.f32.mrf.mxu0 }
 0x15b   : > { %13556 = vst [vmem:[#allocation70_spill] sm:$0xff] %v13555_v63  ;;  %v4781_v36 = vsel %vm13557_vm0, %v4748_v57, 0  ;;  %vm13558_vm2 = vcmask 519168   ;;  %v10305_v41 = vmax.f32 %v834_v55, 0.0  ;;  %v796_v50 = vmul.f32 %v8123_v18, %v9948_v37  ;;  %v8832_v18 = vld [vmem:[#allocation6 + $0xb0] sm:$0xff]  }
 0x15c   : > { %1030 = vst.msk [vmem:[#allocation2 + $0x28] sm:$0xf] %vm13558_vm2, %v8054_v51  ;;  %v2072_v57 = vsel %vm10196_vm1, %v1556_v33, 0  ;;  %v2073_v34 = vsel %vm10205_vm10, %v1557_v11, 0  ;;  %v3788_v25 = vor.u32 %v3786_v27, %v3784_v46  ;;  %vm13560_vm0 = vsmask.f32 4352  ;;  %v8127_v11 = vpop.f32.mrf.mxu0 }
 0x15d   : > { %13559 = vst [vmem:[#allocation71_spill] sm:$0xff] %v10305_v41  ;;  %v2216_v39 = vsel %vm13560_vm0, %v10217_v0, %v10298_v62  ;;  %v3792_v56 = vrot.slane %v3790_v3, 1  ;;  %v7705_v48 = vcombine.low %v2072_v57, %v2073_v34  ;;  %v3170_v51 = vld [vmem:[#allocation2 + $0x20] sm:$0xf]  ;;  %v13561_v33 = vsel %vm9483_vm4, %v9468_v32, %v9708_v42 }
 0x15e   : > { %vm10321_vm3 = vcmp.ne.s16.totalorder %v13561_v33, 0  ;;  %v13562_v55 = vmov 0  ;;  %v8055_v46 = vpack.c.bf16 %v10305_v41, %v10305_v41  ;;  %v835_v27 = vadd.f32 %v9968_v12, %v796_v50  ;;  %v3171_v33 = vld [vmem:[#allocation2 + $0x24] sm:$0xf] }
 0x15f   : > { %v13563_v55 = vsel %vm10321_vm3, 4294967295, %v13562_v55  ;;  %v8126_v0 = vadd.f32 %v8125_v17, %v8124_v61  ;;  %vm13565_vm0 = vcmask 523264   ;;  %v4782_v3 = vsel %vm10042_vm9, %v4749_v44, 0 }
 0x160   : > { %13564 = vst [vmem:[#allocation72_spill] sm:$0xff] %v13563_v55  ;;  %8382 = vmatmul.mubr.msk.bf16.vlgmr.msra.gmra.mxu1 %vm13565_vm0, %v2216_v39  ;;  %vm13566_vm2 = vsmask.f32 7424  ;;  %v2218_v42 = vshrl.u32 %v7705_v48, 16  ;;  %v2221_v34 = vshll.u32 %v7705_v48, 16  ;;  %v3794_v22 = vshrl.u32 %v10273_v60, 16 }
 0x161   : > { %v3793_v57 = vsel %vm13566_vm2, %v3788_v25, %v3792_v56  ;;  %8414 = vmatpush3.bf16.msra.mxu1 %v9721_v52  ;;  %1031 = vst.msk [vmem:[#allocation2 + $0x2c] sm:$0xf] %vm13567_vm12, %v8055_v46  ;;  %v10335_v50 = vmax.f32 %v835_v27, 0.0  ;;  %v797_v61 = vmul.f32 %v8126_v0, %v9948_v37  ;;  %vm13569_vm9 = vcmp.ne.s16.totalorder %v9653_v35, 0  ;;  %v8837_v60 = vld [vmem:[#allocation6 + $0x88] sm:$0xff]   ;;  %v8128_v25 = vpop.f32.mrf.mxu0 }
 0x162   : > { %8502 = vmatmul.mubr.msk.bf16.vlgmr.msra.gmra.mxu0 %vm13565_vm0, %v3793_v57  ;;  %v3654_v44 = vsel %vm13569_vm9, %v3170_v51, 0  ;;  %v3655_v39 = vsel %vm10246_vm6, %v3171_v33, 0  ;;  %v13570_v48 = vsel %vm9451_vm11, %v9491_v45, %v9682_v14  ;;  %v13571_v52 = vmov 0  ;;  %8415 = vmatprep.subr.bf16.mxu1 %v8836_v9  ;;  %v1558_v51 = vld [vmem:[#allocation2 + $0x24] sm:$0xf]  ;;  %v8890_v14 = vld [vmem:[#allocation6 + $0xb8] sm:$0xff]  }
 0x163   : > { %13568 = vst [vmem:[#allocation73_spill] sm:$0xff] %v10335_v50  ;;  %vm10348_vm2 = vcmp.ne.s16.totalorder %v13570_v48, 0  ;;  %v2220_v17 = vrot.slane %v2218_v42, 3  ;;  %v2223_v46 = vrot.slane %v2221_v34, 4  ;;  %v10352_v27 = vcombine.low %v3654_v44, %v3655_v39  ;;  %8574 = vmatpush3.bf16.msra.mxu0 %v8890_v14  ;;  %v8833_v48 = vld [vmem:[#allocation6 + $0xa8] sm:$0xff]   ;;  %v8130_v26 = vpop.f32.mrf.mxu0 }
 0x164   : > { %v13572_v52 = vsel %vm10348_vm2, 4294967295, %v13571_v52  ;;  %v13574_v0 = vsel %vm9451_vm11, %v9756_v53, %v9455_v20  ;;  %v13575_v57 = vmov 0  ;;  %v10363_v33 = vcombine.low %v4781_v36, %v4782_v3  ;;  %8575 = vmatprep.subr.bf16.mxu0 %v8832_v18  ;;  %v3172_v14 = vld [vmem:[#allocation2 + $0x28] sm:$0xf] }
 0x165   : > { %13573 = vst [vmem:[#allocation74_spill] sm:$0xff] %v13572_v52  ;;  %vm10359_vm12 = vcmp.ne.s16.totalorder %v13574_v0, 0  ;;  %v8056_v42 = vpack.c.bf16 %v10335_v50, %v10335_v50  ;;  %v836_v34 = vadd.f32 %v9968_v12, %v797_v61  ;;  %v8129_v44 = vadd.f32 %v8128_v25, %v8127_v11  ;;  %v1559_v0 = vld [vmem:[#allocation2 + $0x28] sm:$0xf]  ;;  %8416 = vmatpush3.bf16.msra.mxu1 %v8836_v9  ;;  %v8838_v61 = vld [vmem:[#allocation6 + $0x80] sm:$0xff]   ;;  %v8131_v9 = vpop.f32.mrf.mxu0 }
 0x166   : > { %v13576_v57 = vsel %vm10359_vm12, 4294967295, %v13575_v57  ;;  %v3796_v39 = vor.u32 %v3794_v22, %v3792_v56  ;;  %v10368_v41 = vor.u32 %v2223_v46, %v2220_v17  ;;  %v3798_v53 = vshll.u32 %v10352_v27, 16  ;;  %8417 = vmatprep.subr.bf16.mxu1 %v8837_v60 }
 0x167   : > { %13577 = vst [vmem:[#allocation75_spill] sm:$0xff] %v13576_v57  ;;  %v4907_v47 = vshll.u32 %v10261_v40, 16  ;;  %vm13578_vm9 = vcmask 519168   ;;  %v10375_v3 = vmax.f32 %v836_v34, 0.0  ;;  %v798_v22 = vmul.f32 %v8129_v44, %v9948_v37  ;;  %8576 = vmatpush3.bf16.msra.mxu0 %v8832_v18 }
 0x168   : > { %1032 = vst.msk [vmem:[#allocation2 + $0x30] sm:$0xf] %vm13578_vm9, %v8056_v42  ;;  %v2074_v56 = vsel %vm10280_vm7, %v1558_v51, 0  ;;  %v2075_v11 = vsel %vm10289_vm5, %v1559_v0, 0  ;;  %vm13580_vm13 = vsmask.f32 4352  ;;  %v13581_v51 = vsel %vm9483_vm4, %v9468_v32, %v9766_v8  ;;  %8577 = vmatprep.subr.bf16.mxu0 %v8833_v48  ;;  %v8133_v8 = vpop.f32.mrf.mxu0 }
 0x169   : > { %13579 = vst [vmem:[#allocation76_spill] sm:$0xff] %v10375_v3  ;;  %v2225_v25 = vsel %vm13580_vm13, %v10298_v62, %v10368_v41  ;;  %v3800_v17 = vrot.slane %v3798_v53, 1  ;;  %v7706_v46 = vcombine.low %v2074_v56, %v2075_v11  ;;  %vm10391_vm9 = vcmp.ne.s16.totalorder %v13581_v51, 0  ;;  %vm13585_vm13 = vmmov %vm13565_vm0  ;;  %v8834_v56 = vld [vmem:[#allocation6 + $0xa0] sm:$0xff]   ;;  %v3173_v18 = vld [vmem:[#allocation2 + $0x2c] sm:$0xf]  ;;  %8418 = vmatpush3.bf16.msra.mxu1 %v8837_v60 }
 0x16a   : > { %v13582_v42 = vmov 0  ;;  %v4912_v34 = vshll.u32 %v10363_v33, 16  ;;  %v8057_v44 = vpack.c.bf16 %v10375_v3, %v10375_v3  ;;  %v837_v62 = vadd.f32 %v9968_v12, %v798_v22  ;;  %8385 = vmatprep.mubr.msk.bf16.mxu1 %vm13585_vm13, %v2225_v25  ;;  %vm13589_vm7 = vmmov %vm13585_vm13  ;;  %8419 = vmatprep.subr.bf16.mxu1 %v8838_v61  ;;  %v8134_v25 = vpop.f32.mrf.mxu0 }
 0x16b   : > { %v13583_v42 = vsel %vm10391_vm9, 4294967295, %v13582_v42  ;;  %v8132_v53 = vadd.f32 %v8131_v9, %v8130_v26  ;;  %v3802_v0 = vshrl.u32 %v10352_v27, 16  ;;  %vm13586_vm0 = vsmask.f32 7424  ;;  %v8841_v9 = vld [vmem:[#allocation6 + $0x38] sm:$0xff]   ;;  %8578 = vmatpush3.bf16.msra.mxu0 %v8833_v48 }
 0x16c   : > { %13584 = vst [vmem:[#allocation77_spill] sm:$0xff] %v13583_v42  ;;  %v3801_v11 = vsel %vm13586_vm0, %v3796_v39, %v3800_v17  ;;  %v2227_v51 = vshrl.u32 %v7706_v46, 16  ;;  %v2230_v36 = vshll.u32 %v7706_v46, 16  ;;  %v4909_v50 = vrot.slane %v4907_v47, 1  ;;  %v1560_v39 = vld [vmem:[#allocation2 + $0x2c] sm:$0xf]  ;;  %8579 = vmatprep.subr.bf16.mxu0 %v8834_v56 }
 0x16d   : > { %vm13587_vm5 = vcmask 519168   ;;  %v10403_v3 = vmax.f32 %v837_v62, 0.0  ;;  %v799_v26 = vmul.f32 %v8132_v53, %v9948_v37  ;;  %8505 = vmatprep.mubr.msk.bf16.mxu0 %vm13589_vm7, %v3801_v11  ;;  %vm13590_vm13 = vcmp.ne.s16.totalorder %v9750_v31, 0  ;;  %8420 = vmatpush3.bf16.msra.mxu1 %v8838_v61  ;;  %v13605_v61 = vld [vmem:[#allocation32_spill] sm:$0xff] }
 0x16e   : > { %1033 = vst.msk [vmem:[#allocation2 + $0x34] sm:$0xf] %vm13587_vm5, %v8057_v44  ;;  %v3656_v27 = vsel %vm13590_vm13, %v3172_v14, 0  ;;  %v3657_v22 = vsel %vm10321_vm3, %v3173_v18, 0  ;;  %v2229_v47 = vrot.slane %v2227_v51, 3  ;;  %v2232_v60 = vrot.slane %v2230_v36, 4  ;;  %8453 = vmatprep.subr.bf16.mxu1 %v8841_v9 }
 0x16f   : > { %13588 = vst [vmem:[#allocation78_spill] sm:$0xff] %v10403_v3  ;;  %v10411_v46 = vcombine.low %v3656_v27, %v3657_v22  ;;  %v13591_v44 = vsel %vm9451_vm11, %v9491_v45, %v9731_v10  ;;  %v13592_v62 = vmov 0  ;;  %v13595_v14 = vld [vmem:[#allocation28_spill] sm:$0xff]  ;;  %v13597_v11 = vmov 0  ;;  %v10434_v22 = vld [vmem:[#allocation6 + $0xf8] sm:$0xff]   ;;  %8580 = vmatpush3.bf16.msra.mxu0 %v8834_v56 }
 0x170   : > { %vm10418_vm7 = vcmp.ne.s16.totalorder %v13591_v44, 0  ;;  %v13596_v53 = vsel %vm9451_vm11, %v13595_v14, %v9455_v20  ;;  %v4914_v36 = vrot.slane %v4912_v34, 1  ;;  %v8058_v51 = vpack.c.bf16 %v10403_v3, %v10403_v3  ;;  %v8136_v44 = vpop.f32.mrf.mxu0  ;;  %v13600_v34 = vld [vmem:[#allocation29_spill] sm:$0xff]  ;;  %8653 = vmatprep.subr.bf16.mxu0 %v10434_v22 }
 0x171   : > { %v13593_v62 = vsel %vm10418_vm7, 4294967295, %v13592_v62  ;;  %vm10427_vm5 = vcmp.ne.s16.totalorder %v13596_v53, 0  ;;  %v838_v10 = vadd.f32 %v9968_v12, %v799_v26  ;;  %v8135_v18 = vadd.f32 %v8134_v25, %v8133_v8  ;;  %v1561_v53 = vld [vmem:[#allocation2 + $0x30] sm:$0xf] }
 0x172   : > { %13594 = vst [vmem:[#allocation79_spill] sm:$0xff] %v13593_v62  ;;  %v13598_v11 = vsel %vm10427_vm5, 4294967295, %v13597_v11  ;;  %v3804_v27 = vor.u32 %v3802_v0, %v3800_v17  ;;  %v10436_v54 = vor.u32 %v2232_v60, %v2229_v47  ;;  %v3806_v14 = vshll.u32 %v10411_v46, 16  ;;  %v3174_v26 = vld [vmem:[#allocation2 + $0x30] sm:$0xf] }
 0x173   : > { %13599 = vst [vmem:[#allocation28_spill] sm:$0xff] %v13598_v11  ;;  %v2076_v48 = vsel %vm10348_vm2, %v1560_v39, 0  ;;  %v13601_v3 = vshrl.u32 %v10261_v40, 16  ;;  %vm13602_vm13 = vcmask 519168   ;;  %v10445_v17 = vmax.f32 %v838_v10, 0.0  ;;  %v8137_v39 = vpop.f32.mrf.mxu0 }
 0x174   : > { %1034 = vst.msk [vmem:[#allocation2 + $0x38] sm:$0xf] %vm13602_vm13, %v8058_v51  ;;  %v800_v0 = vmul.f32 %v8135_v18, %v9948_v37  ;;  %v2077_v8 = vsel %vm10359_vm12, %v1561_v53, 0  ;;  %v4916_v25 = vshrl.u32 %v10363_v33, 16  ;;  %vm13604_vm0 = vsmask.f32 4352 }
 0x175   : > { %v4910_v7 = vor.u32 %v4909_v50, %v13601_v3  ;;  %13603 = vst [vmem:[#allocation80_spill] sm:$0xff] %v10445_v17  ;;  %v2234_v40 = vsel %vm13604_vm0, %v10368_v41, %v10436_v54  ;;  %v3808_v50 = vrot.slane %v3806_v14, 1  ;;  %v7707_v3 = vcombine.low %v2076_v48, %v2077_v8  ;;  %v4750_v18 = vld [vmem:[#allocation2 + $0x20] sm:$0xf]  ;;  %v4751_v14 = vld [vmem:[#allocation2 + $0x24] sm:$0xf]  ;;  %v8139_v53 = vpop.f32.mrf.mxu0 }
 0x176   : > { %v13606_v47 = vsel %vm9483_vm4, %v9468_v32, %v13605_v61  ;;  %v13607_v60 = vmov 0  ;;  %vm13610_vm2 = vsmask.f32 7424  ;;  %v8059_v33 = vpack.c.bf16 %v10445_v17, %v10445_v17  ;;  %v3175_v56 = vld [vmem:[#allocation2 + $0x34] sm:$0xf] }
 0x177   : > { %vm10459_vm13 = vcmp.ne.s16.totalorder %v13606_v47, 0  ;;  %v10464_v51 = vsel %vm13610_vm2, %v4910_v7, %v4914_v36  ;;  %v839_v41 = vadd.f32 %v9968_v12, %v800_v0  ;;  %v8138_v9 = vadd.f32 %v8137_v39, %v8136_v44  ;;  %vm13612_vm12 = vmmov %vm13610_vm2  ;;  %v1562_v17 = vld [vmem:[#allocation2 + $0x34] sm:$0xf] }
 0x178   : > { %v13608_v60 = vsel %vm10459_vm13, 4294967295, %v13607_v60  ;;  %vm13611_vm0 = vcmask 523264   ;;  %v3810_v10 = vshrl.u32 %v10411_v46, 16  ;;  %v3809_v48 = vsel %vm13612_vm12, %v3804_v27, %v3808_v50  ;;  %v8140_v27 = vpop.f32.mrf.mxu0 }
 0x179   : > { %13609 = vst [vmem:[#allocation32_spill] sm:$0xff] %v13608_v60  ;;  %8386 = vmatmul.mubr.msk.bf16.gmra.mxu1 %vm13611_vm0, %v2234_v40  ;;  %v2236_v7 = vshrl.u32 %v7707_v3, 16  ;;  %v2239_v8 = vshll.u32 %v7707_v3, 16  ;;  %vm13613_vm2 = vcmp.ne.s16.totalorder %v9764_v43, 0  ;;  %vm13614_vm10 = vcmask 519168   ;;  %8506 = vmatmul.mubr.msk.bf16.gmra.mxu0 %vm13611_vm0, %v3809_v48 }
 0x17a   : > { %v3658_v61 = vsel %vm13613_vm2, %v3174_v26, 0  ;;  %1035 = vst.msk [vmem:[#allocation2 + $0x3c] sm:$0xf] %vm13614_vm10, %v8059_v33  ;;  %v10476_v44 = vmax.f32 %v839_v41, 0.0  ;;  %v801_v0 = vmul.f32 %v8138_v9, %v9948_v37  ;;  %v3659_v46 = vsel %vm10391_vm9, %v3175_v56, 0  ;;  %v13616_v26 = vld [vmem:[#allocation27_spill] sm:$0xff] }
 0x17b   : > { %v10482_v39 = vor.u32 %v4916_v25, %v4914_v36  ;;  %v2238_v40 = vrot.slane %v2236_v7, 3  ;;  %v2241_v3 = vrot.slane %v2239_v8, 4  ;;  %v7800_v47 = vcombine.low %v3658_v61, %v3659_v46  ;;  %v13621_v9 = vld [vmem:[#allocation33_spill] sm:$0xff]  ;;  %v8142_v46 = vpop.f32.mrf.mxu0  ;;  %v3176_v52 = vld [vmem:[#allocation2 + $0x38] sm:$0xf] }
 0x17c   : > { %13615 = vst [vmem:[#allocation81_spill] sm:$0xff] %v10476_v44  ;;  %v13617_v33 = vsel %vm9451_vm11, %v9491_v45, %v13616_v26  ;;  %v13618_v41 = vmov 0  ;;  %v13622_v36 = vsel %vm9451_vm11, %v13621_v9, %v9455_v20  ;;  %v13623_v25 = vmov 0  ;;  %v4756_v2 = vld [vmem:[#allocation2 + $0x38] sm:$0xf] }
 0x17d   : > { %vm10489_vm10 = vcmp.ne.s16.totalorder %v13617_v33, 0  ;;  %vm10498_vm12 = vcmp.ne.s16.totalorder %v13622_v36, 0  ;;  %v4784_v48 = vsel %vm10159_vm8, %v4751_v14, 0  ;;  %v8060_v7 = vpack.c.bf16 %v10476_v44, %v10476_v44  ;;  %v1563_v36 = vld [vmem:[#allocation2 + $0x38] sm:$0xf] }
 0x17e   : > { %v13619_v41 = vsel %vm10489_vm10, 4294967295, %v13618_v41  ;;  %v13624_v25 = vsel %vm10498_vm12, 4294967295, %v13623_v25  ;;  %v840_v8 = vadd.f32 %v9968_v12, %v801_v0  ;;  %v8141_v56 = vadd.f32 %v8140_v27, %v8139_v53  ;;  %v8143_v0 = vpop.f32.mrf.mxu0  ;;  %v11177_v38 = vld [vmem:[#allocation2 + $0x38] sm:$0xf] }
 0x17f   : > { %13620 = vst [vmem:[#allocation27_spill] sm:$0xff] %v13619_v41  ;;  %13625 = vst [vmem:[#allocation33_spill] sm:$0xff] %v13624_v25  ;;  %vm13626_vm2 = vcmp.ne.s16.totalorder %v9619_v4, 0  ;;  %v2242_v26 = vor.u32 %v2241_v3, %v2238_v40  ;;  %v3812_v33 = vor.u32 %v3810_v10, %v3808_v50  ;;  %v3814_v9 = vshll.u32 %v7800_v47, 16  ;;  %v4752_v3 = vld [vmem:[#allocation2 + $0x28] sm:$0xf] }
 0x180   : > { %v4783_v61 = vsel %vm13626_vm2, %v4750_v18, 0  ;;  %vm13627_vm0 = vcmask 519168   ;;  %v10512_v14 = vmax.f32 %v840_v8, 0.0  ;;  %v802_v1 = vmul.f32 %v8141_v56, %v9948_v37  ;;  %v4753_v56 = vld [vmem:[#allocation2 + $0x2c] sm:$0xf]  ;;  %v8857_v41 = vld [vmem:[#allocation6 + $0x20] sm:$0xff]  }
 0x181   : > { %v10509_v57 = vcombine.low %v4783_v61, %v4784_v48  ;;  %1036 = vst.msk [vmem:[#allocation2 + $0x40] sm:$0xf] %vm13627_vm0, %v8060_v7  ;;  %v2078_v53 = vsel %vm10418_vm7, %v1562_v17, 0  ;;  %v2079_v18 = vsel %vm10427_vm5, %v1563_v36, 0  ;;  %vm13629_vm2 = vsmask.f32 4352  ;;  %v8145_v61 = vpop.f32.mrf.mxu0 }
 0x182   : > { %13628 = vst [vmem:[#allocation82_spill] sm:$0xff] %v10512_v14  ;;  %v2243_v50 = vsel %vm13629_vm2, %v10436_v54, %v2242_v26  ;;  %v3816_v10 = vrot.slane %v3814_v9, 1  ;;  %v7708_v27 = vcombine.low %v2078_v53, %v2079_v18  ;;  %v3818_v40 = vshrl.u32 %v7800_v47, 16  ;;  %v3177_v53 = vld [vmem:[#allocation2 + $0x3c] sm:$0xf] }
 0x183   : > { %v8061_v48 = vpack.c.bf16 %v10512_v14, %v10512_v14  ;;  %v841_v7 = vadd.f32 %v9968_v12, %v802_v1  ;;  %v8144_v8 = vadd.f32 %v8143_v0, %v8142_v46  ;;  %vm13630_vm0 = vcmask 523264   ;;  %v1564_v4 = vld [vmem:[#allocation2 + $0x3c] sm:$0xf] }
 0x184   : > { %8389 = vmatprep.mubr.msk.bf16.mxu1 %vm13630_vm0, %v2243_v50  ;;  %vm13631_vm8 = vcmp.ne.s16.totalorder %v13600_v34, 0  ;;  %vm13632_vm5 = vsmask.f32 7424  ;;  %v2245_v54 = vshrl.u32 %v7708_v27, 16  ;;  %v2248_v9 = vshll.u32 %v7708_v27, 16  ;;  %vm13635_vm7 = vmmov %vm13630_vm0  ;;  %v8146_v27 = vpop.f32.mrf.mxu0 }
 0x185   : > { %v3660_v17 = vsel %vm13631_vm8, %v3176_v52, 0  ;;  %v3817_v36 = vsel %vm13632_vm5, %v3812_v33, %v3816_v10  ;;  %v4920_v47 = vshll.u32 %v10509_v57, 16  ;;  %vm13633_vm2 = vcmask 519168   ;;  %v13637_v33 = vld [vmem:[#allocation30_spill] sm:$0xff] }
 0x186   : > { %1037 = vst.msk [vmem:[#allocation2 + $0x44] sm:$0xf] %vm13633_vm2, %v8061_v48  ;;  %v10530_v18 = vmax.f32 %v841_v7, 0.0  ;;  %v803_v1 = vmul.f32 %v8144_v8, %v9948_v37  ;;  %8509 = vmatprep.mubr.msk.bf16.mxu0 %vm13635_vm7, %v3817_v36  ;;  %v3661_v52 = vsel %vm10459_vm13, %v3177_v53, 0  ;;  %vm13636_vm8 = vcmp.ne.s16.totalorder %v9653_v35, 0  ;;  %v13643_v53 = vld [vmem:[#allocation36_spill] sm:$0xff]  ;;  %vm13648_vm0 = vmmov %vm13633_vm2 }
 0x187   : > { %v4785_v46 = vsel %vm13636_vm8, %v4752_v3, 0  ;;  %v13638_v0 = vsel %vm9451_vm11, %v9491_v45, %v13637_v33  ;;  %v13639_v50 = vmov 0  ;;  %v2247_v48 = vrot.slane %v2245_v54, 3 }
 0x188   : > { %13634 = vst [vmem:[#allocation83_spill] sm:$0xff] %v10530_v18  ;;  %vm10543_vm5 = vcmp.ne.s16.totalorder %v13638_v0, 0  ;;  %v2250_v7 = vrot.slane %v2248_v9, 4  ;;  %v10547_v8 = vcombine.low %v3660_v17, %v3661_v52  ;;  %v3820_v36 = vor.u32 %v3818_v40, %v3816_v10  ;;  %v8148_v10 = vpop.f32.mrf.mxu0  ;;  %v1565_v52 = vld [vmem:[#allocation2 + $0x40] sm:$0xf] }
 0x189   : > { %v13640_v50 = vsel %vm10543_vm5, 4294967295, %v13639_v50  ;;  %v13644_v3 = vsel %vm9451_vm11, %v13643_v53, %v9455_v20  ;;  %v13645_v35 = vmov 0  ;;  %v8062_v33 = vpack.c.bf16 %v10530_v18, %v10530_v18 }
 0x18a   : > { %13641 = vst [vmem:[#allocation30_spill] sm:$0xff] %v13640_v50  ;;  %13642 = vst [vmem:[#allocation84_spill] sm:$0xff] %v10547_v8  ;;  %vm10554_vm7 = vcmp.ne.s16.totalorder %v13644_v3, 0  ;;  %v842_v0 = vadd.f32 %v9968_v12, %v803_v1  ;;  %v8147_v54 = vadd.f32 %v8146_v27, %v8145_v61  ;;  %v4786_v17 = vsel %vm10246_vm6, %v4753_v56, 0  ;;  %v8149_v1 = vpop.f32.mrf.mxu0 }
 0x18b   : > { %v13646_v35 = vsel %vm10554_vm7, 4294967295, %v13645_v35  ;;  %v2251_v40 = vor.u32 %v2250_v7, %v2247_v48  ;;  %v3822_v9 = vshll.u32 %v10547_v8, 16  ;;  %v4922_v14 = vrot.slane %v4920_v47, 1  ;;  %1038 = vst.msk [vmem:[#allocation2 + $0x48] sm:$0xf] %vm13648_vm0, %v8062_v33 }
 0x18c   : > { %13647 = vst [vmem:[#allocation36_spill] sm:$0xff] %v13646_v35  ;;  %v10564_v53 = vcombine.low %v4785_v46, %v4786_v17  ;;  %v10567_v3 = vmax.f32 %v842_v0, 0.0  ;;  %v804_v18 = vmul.f32 %v8147_v54, %v9948_v37  ;;  %v2080_v61 = vsel %vm10489_vm10, %v1564_v4, 0  ;;  %v4754_v54 = vld [vmem:[#allocation2 + $0x30] sm:$0xf] }
 0x18d   : > { %v2081_v56 = vsel %vm10498_vm12, %v1565_v52, 0  ;;  %vm13650_vm2 = vsmask.f32 4352  ;;  %v10575_v48 = vrot.slane %v3822_v9, 1  ;;  %v8150_v0 = vadd.f32 %v8149_v1, %v8148_v10  ;;  %v4755_v17 = vld [vmem:[#allocation2 + $0x34] sm:$0xf]  ;;  %v8151_v52 = vpop.f32.mrf.mxu0 }
 0x18e   : > { %13649 = vst [vmem:[#allocation85_spill] sm:$0xff] %v10567_v3  ;;  %v2252_v27 = vsel %vm13650_vm2, %v2242_v26, %v2251_v40  ;;  %v7709_v47 = vcombine.low %v2080_v61, %v2081_v56  ;;  %v4928_v46 = vshll.u32 %v10564_v53, 16  ;;  %v8063_v7 = vpack.c.bf16 %v10567_v3, %v10567_v3  ;;  %v4759_v42 = vld [vmem:[#allocation2 + $0x44] sm:$0xf] }
 0x18f   : > { %13651 = vst [vmem:[#allocation86_spill] sm:$0xff] %v10575_v48  ;;  %v843_v33 = vadd.f32 %v9968_v12, %v804_v18  ;;  %vm13652_vm8 = vcmask 523264   ;;  %v4924_v4 = vshrl.u32 %v10509_v57, 16  ;;  %vm13653_vm0 = vsmask.f32 7424  ;;  %v13655_v18 = vld [vmem:[#allocation31_spill] sm:$0xff]  ;;  %v8152_v8 = vpop.f32.mrf.mxu0 }
 0x190   : > { %8390 = vmatmul.mubr.msk.bf16.gmra.mxu1 %vm13652_vm8, %v2252_v27  ;;  %v3825_v26 = vsel %vm13653_vm0, %v3820_v36, %v10575_v48  ;;  %v2254_v9 = vshrl.u32 %v7709_v47, 16  ;;  %v2257_v61 = vshll.u32 %v7709_v47, 16  ;;  %vm13654_vm2 = vmmov %vm13653_vm0  ;;  %v13656_v10 = vsel %vm9451_vm11, %v9491_v45, %v13655_v18  ;;  %v1566_v47 = vld [vmem:[#allocation2 + $0x44] sm:$0xf]  ;;  %v4757_v48 = vld [vmem:[#allocation2 + $0x3c] sm:$0xf] }
 0x191   : > { %v4923_v56 = vsel %vm13654_vm2, %v10482_v39, %v4922_v14  ;;  %vm10592_vm8 = vcmp.ne.s16.totalorder %v13656_v10, 0  ;;  %v13657_v1 = vmov 0  ;;  %vm13660_vm6 = vcmask 519168  }
 0x192   : > { %v13658_v1 = vsel %vm10592_vm8, 4294967295, %v13657_v1  ;;  %1039 = vst.msk [vmem:[#allocation2 + $0x4c] sm:$0xf] %vm13660_vm6, %v8063_v7  ;;  %v10597_v57 = vmax.f32 %v843_v33, 0.0  ;;  %v805_v36 = vmul.f32 %v8150_v0, %v9948_v37  ;;  %vm13662_vm0 = vcmask 523264   ;;  %v13665_v33 = vld [vmem:[#allocation39_spill] sm:$0xff] }
 0x193   : > { %13659 = vst [vmem:[#allocation31_spill] sm:$0xff] %v13658_v1  ;;  %8510 = vmatmul.mubr.msk.bf16.gmra.mxu0 %vm13662_vm0, %v3825_v26  ;;  %v4926_v27 = vor.u32 %v4924_v4, %v4922_v14  ;;  %v4930_v39 = vrot.slane %v4928_v46, 1  ;;  %vm13663_vm2 = vmmov %vm13662_vm0  ;;  %v2256_v18 = vrot.slane %v2254_v9, 3  ;;  %v2259_v10 = vrot.slane %v2257_v61, 4 }
 0x194   : > { %13661 = vst [vmem:[#allocation87_spill] sm:$0xff] %v10597_v57  ;;  %8581 = vmatprep.mubr.msk.bf16.mxu0 %vm13663_vm2, %v10464_v51  ;;  %vm13664_vm12 = vcmp.ne.s16.totalorder %v9750_v31, 0  ;;  %v4788_v7 = vsel %vm10321_vm3, %v4755_v17, 0  ;;  %v13666_v14 = vsel %vm9451_vm11, %v13665_v33, %v9455_v20  ;;  %v13667_v46 = vmov 0  ;;  %v1567_v17 = vld [vmem:[#allocation2 + $0x48] sm:$0xf] }
 0x195   : > { %v4787_v3 = vsel %vm13664_vm12, %v4754_v54, 0  ;;  %vm10612_vm6 = vcmp.ne.s16.totalorder %v13666_v14, 0  ;;  %v8064_v51 = vpack.c.bf16 %v10597_v57, %v10597_v57  ;;  %v844_v0 = vadd.f32 %v9968_v12, %v805_v36  ;;  %v8154_v54 = vpop.f32.mrf.mxu0 }
 0x196   : > { %v13668_v46 = vsel %vm10612_vm6, 4294967295, %v13667_v46  ;;  %v8153_v4 = vadd.f32 %v8152_v8, %v8151_v52  ;;  %v7873_v26 = vcombine.low %v4787_v3, %v4788_v7  ;;  %v10619_v9 = vor.u32 %v2259_v10, %v2256_v18 }
 0x197   : > { %13669 = vst [vmem:[#allocation39_spill] sm:$0xff] %v13668_v46  ;;  %v2082_v61 = vsel %vm10543_vm5, %v1566_v47, 0  ;;  %vm13670_vm12 = vcmp.ne.s16.totalorder %v9764_v43, 0  ;;  %v4790_v14 = vsel %vm10391_vm9, %v4757_v48, 0  ;;  %vm13671_vm0 = vcmask 519168   ;;  %v8155_v36 = vpop.f32.mrf.mxu0 }
 0x198   : > { %v4789_v33 = vsel %vm13670_vm12, %v4756_v2, 0  ;;  %1040 = vst.msk [vmem:[#allocation2 + $0x50] sm:$0xf] %vm13671_vm0, %v8064_v51  ;;  %v10628_v31 = vmax.f32 %v844_v0, 0.0  ;;  %v806_v8 = vmul.f32 %v8153_v4, %v9948_v37  ;;  %v2083_v3 = vsel %vm10554_vm7, %v1567_v17, 0  ;;  %v13675_v4 = vld [vmem:[#allocation37_spill] sm:$0xff] }
 0x199   : > { %v4936_v52 = vshll.u32 %v7873_v26, 16  ;;  %vm13673_vm2 = vsmask.f32 4352  ;;  %v7710_v18 = vcombine.low %v2082_v61, %v2083_v3  ;;  %v4932_v2 = vshrl.u32 %v10564_v53, 16  ;;  %v8840_v61 = vld [vmem:[#allocation6 + $0xf0] sm:$0xff]  }
 0x19a   : > { %13672 = vst [vmem:[#allocation88_spill] sm:$0xff] %v10628_v31  ;;  %v2261_v47 = vsel %vm13673_vm2, %v2251_v40, %v10619_v9  ;;  %v10636_v10 = vcombine.low %v4789_v33, %v4790_v14  ;;  %v8065_v48 = vpack.c.bf16 %v10628_v31, %v10628_v31  ;;  %v845_v7 = vadd.f32 %v9968_v12, %v806_v8  ;;  %v13676_v40 = vld [vmem:[#allocation34_spill] sm:$0xff]  ;;  %v8157_v33 = vpop.f32.mrf.mxu0  ;;  %v4758_v43 = vld [vmem:[#allocation2 + $0x40] sm:$0xf] }
 0x19b   : > { %v8156_v51 = vadd.f32 %v8155_v36, %v8154_v54  ;;  %vm13674_vm12 = vcmask 523264   ;;  %v4938_v0 = vrot.slane %v4936_v52, 1  ;;  %v13677_v17 = vsel %vm9483_vm4, %v9468_v32, %v13676_v40  ;;  %v1568_v36 = vld [vmem:[#allocation2 + $0x4c] sm:$0xf] }
 0x19c   : > { %8393 = vmatprep.mubr.msk.bf16.mxu1 %vm13674_vm12, %v2261_v47  ;;  %vm10648_vm2 = vcmp.ne.s16.totalorder %v13677_v17, 0  ;;  %v13678_v53 = vmov 0  ;;  %v2263_v14 = vshrl.u32 %v7710_v18, 16  ;;  %v2266_v3 = vshll.u32 %v7710_v18, 16  ;;  %vm13681_vm12 = vmmov %vm13671_vm0  ;;  %v13685_v18 = vld [vmem:[#allocation35_spill] sm:$0xff] }
 0x19d   : > { %v13679_v53 = vsel %vm10648_vm2, 4294967295, %v13678_v53  ;;  %v4934_v8 = vor.u32 %v4932_v2, %v4930_v39  ;;  %v4944_v54 = vshll.u32 %v10636_v10, 16  ;;  %1041 = vst.msk [vmem:[#allocation2 + $0x54] sm:$0xf] %vm13681_vm12, %v8065_v48  ;;  %v10654_v52 = vmax.f32 %v845_v7, 0.0  ;;  %v8158_v48 = vpop.f32.mrf.mxu0 }
 0x19e   : > { %13680 = vst [vmem:[#allocation34_spill] sm:$0xff] %v13679_v53  ;;  %v807_v47 = vmul.f32 %v8156_v51, %v9948_v37  ;;  %vm13683_vm0 = vcmask 523264   ;;  %vm13684_vm9 = vsmask.f32 7424  ;;  %v4940_v17 = vshrl.u32 %v7873_v26, 16 }
 0x19f   : > { %13682 = vst [vmem:[#allocation89_spill] sm:$0xff] %v10654_v52  ;;  %8582 = vmatmul.mubr.msk.bf16.vlgmr.msra.gmra.mxu0 %vm13683_vm0, %v4923_v56  ;;  %v4931_v40 = vsel %vm13684_vm9, %v4926_v27, %v4930_v39  ;;  %v13686_v2 = vsel %vm9451_vm11, %v9491_v45, %v13685_v18  ;;  %v13687_v55 = vmov 0  ;;  %vm13690_vm12 = vmmov %vm13683_vm0  ;;  %v2265_v37 = vrot.slane %v2263_v14, 3  ;;  %v13692_v39 = vld [vmem:[#allocation42_spill] sm:$0xff]  ;;  %v8160_v18 = vpop.f32.mrf.mxu0 }
 0x1a0   : > { %vm10664_vm3 = vcmp.ne.s16.totalorder %v13686_v2, 0  ;;  %8585 = vmatprep.mubr.msk.bf16.mxu0 %vm13690_vm12, %v4931_v40  ;;  %v2268_v7 = vrot.slane %v2266_v3, 4  ;;  %vm13691_vm0 = vmmov %vm13684_vm9  ;;  %v10670_v27 = vrot.slane %v4944_v54, 1  ;;  %v13693_v26 = vsel %vm9451_vm11, %v13692_v39, %v9455_v20  ;;  %8654 = vmatpush3.bf16.msra.mxu0 %v10434_v22  ;;  %v8842_v54 = vld [vmem:[#allocation6 + $0xe8] sm:$0xff]  }
 0x1a1   : > { %v13688_v55 = vsel %vm10664_vm3, 4294967295, %v13687_v55  ;;  %v4939_v56 = vsel %vm13691_vm0, %v4934_v8, %v4938_v0  ;;  %vm10677_vm9 = vcmp.ne.s16.totalorder %v13693_v26, 0  ;;  %v13694_v51 = vmov 0  ;;  %8655 = vmatprep.subr.bf16.mxu0 %v8840_v61  ;;  %v1569_v26 = vld [vmem:[#allocation2 + $0x50] sm:$0xf] }
 0x1a2   : > { %13689 = vst [vmem:[#allocation35_spill] sm:$0xff] %v13688_v55  ;;  %v13695_v51 = vsel %vm10677_vm9, 4294967295, %v13694_v51  ;;  %v8066_v40 = vpack.c.bf16 %v10654_v52, %v10654_v52  ;;  %v846_v14 = vadd.f32 %v9968_v12, %v807_v47  ;;  %v8159_v3 = vadd.f32 %v8158_v48, %v8157_v33  ;;  %v13698_v52 = vld [vmem:[#allocation40_spill] sm:$0xff]  ;;  %v10700_v33 = vld [vmem:[%s13132_s2] ss:$0 sm:$0xff] }
 0x1a3   : > { %13696 = vst [vmem:[#allocation42_spill] sm:$0xff] %v13695_v51  ;;  %v2084_v8 = vsel %vm10592_vm8, %v1568_v36, 0  ;;  %v10687_v2 = vor.u32 %v2268_v7, %v2265_v37  ;;  %v4942_v39 = vor.u32 %v4940_v17, %v4938_v0  ;;  %vm13697_vm12 = vcmp.ne.s16.totalorder %v13600_v34, 0  ;;  %v4760_v47 = vld [vmem:[#allocation2 + $0x48] sm:$0xf]  ;;  %v8161_v7 = vpop.f32.mrf.mxu0 }
 0x1a4   : > { %v4791_v31 = vsel %vm13697_vm12, %v4758_v43, 0  ;;  %v4792_v22 = vsel %vm10459_vm13, %v4759_v42, 0  ;;  %vm13699_vm7 = vcmask 519168   ;;  %v10695_v12 = vmax.f32 %v846_v14, 0.0  ;;  %v4761_v17 = vld [vmem:[#allocation2 + $0x4c] sm:$0xf]  ;;  %8656 = vmatpush3.bf16.msra.mxu0 %v8840_v61 }
 0x1a5   : > { %1042 = vst.msk [vmem:[#allocation2 + $0x58] sm:$0xf] %vm13699_vm7, %v8066_v40  ;;  %v808_v0 = vmul.f32 %v10700_v33, %v8159_v3  ;;  %v2085_v36 = vsel %vm10612_vm6, %v1569_v26, 0  ;;  %v7875_v43 = vcombine.low %v4791_v31, %v4792_v22  ;;  %v13701_v42 = vld [vmem:[#allocation38_spill] sm:$0xff]  ;;  %v13703_v37 = vmov 0  ;;  %8657 = vmatprep.subr.bf16.mxu0 %v8842_v54 }
 0x1a6   : > { %13700 = vst [vmem:[#allocation90_spill] sm:$0xff] %v10695_v12  ;;  %v13702_v48 = vsel %vm9483_vm4, %v9468_v32, %v13701_v42  ;;  %vm13706_vm12 = vsmask.f32 4352  ;;  %v4947_v14 = vsel %vm13691_vm0, %v4942_v39, %v10670_v27  ;;  %v7711_v31 = vcombine.low %v2084_v8, %v2085_v36  ;;  %v10725_v22 = vld [vmem:[%s13133_s3] ss:$0 sm:$0xff]  ;;  %v8163_v8 = vpop.f32.mrf.mxu0 }
 0x1a7   : > { %vm10710_vm7 = vcmp.ne.s16.totalorder %v13702_v48, 0  ;;  %v2270_v40 = vsel %vm13706_vm12, %v10619_v9, %v10687_v2  ;;  %v4948_v3 = vshrl.u32 %v10636_v10, 16  ;;  %v8067_v26 = vpack.c.bf16 %v10695_v12, %v10695_v12  ;;  %v8845_v39 = vld [vmem:[#allocation6 + $0xe0] sm:$0xff]  }
 0x1a8   : > { %v13704_v37 = vsel %vm10710_vm7, 4294967295, %v13703_v37  ;;  %v847_v42 = vadd.f32 %v10725_v22, %v808_v0  ;;  %v8162_v48 = vadd.f32 %v8161_v7, %v8160_v18  ;;  %vm13707_vm13 = vcmask 523264   ;;  %v13712_v12 = vld [vmem:[#allocation43_spill] sm:$0xff]  ;;  %8658 = vmatpush3.bf16.msra.mxu0 %v8842_v54 }
 0x1a9   : > { %13705 = vst [vmem:[#allocation38_spill] sm:$0xff] %v13704_v37  ;;  %8394 = vmatmul.mubr.msk.bf16.gmra.mxu1 %vm13707_vm13, %v2270_v40  ;;  %v4952_v9 = vshll.u32 %v7875_v43, 16  ;;  %v2272_v36 = vshrl.u32 %v7711_v31, 16  ;;  %v2275_v10 = vshll.u32 %v7711_v31, 16  ;;  %vm13708_vm0 = vcmp.ne.s16.totalorder %v13675_v4, 0  ;;  %vm13711_vm6 = vmmov %vm13707_vm13  ;;  %8659 = vmatprep.subr.bf16.mxu0 %v8845_v39 }
 0x1aa   : > { %v4793_v61 = vsel %vm13708_vm0, %v4760_v47, 0  ;;  %v4794_v34 = vsel %vm10648_vm2, %v4761_v17, 0  ;;  %vm13709_vm12 = vcmask 519168   ;;  %v10734_v60 = vmax.f32 %v847_v42, 0.0  ;;  %8586 = vmatmul.mubr.msk.bf16.gmra.mxu0 %vm13711_vm6, %v4939_v56  ;;  %v1570_v40 = vld [vmem:[#allocation2 + $0x54] sm:$0xf] }
 0x1ab   : > { %1043 = vst.msk [vmem:[#allocation2 + $0x5c] sm:$0xf] %vm13709_vm12, %v8067_v26  ;;  %v809_v18 = vmul.f32 %v10700_v33, %v8162_v48  ;;  %v4954_v0 = vrot.slane %v4952_v9, 1  ;;  %v10738_v7 = vcombine.low %v4793_v61, %v4794_v34  ;;  %v13713_v47 = vld [vmem:[#allocation41_spill] sm:$0xff]  ;;  %v13715_v17 = vmov 0  ;;  %v8164_v26 = vpop.f32.mrf.mxu0  ;;  %vm13718_vm12 = vmmov %vm13711_vm6  ;;  %v13719_v9 = vld [vmem:[#allocation44_spill] sm:$0xff] }
 0x1ac   : > { %13710 = vst [vmem:[#allocation91_spill] sm:$0xff] %v10734_v60  ;;  %v13714_v31 = vsel %vm9483_vm4, %v9468_v32, %v13713_v47  ;;  %8589 = vmatprep.mubr.msk.bf16.mxu0 %vm13718_vm12, %v4947_v14  ;;  %v2274_v42 = vrot.slane %v2272_v36, 3  ;;  %v2277_v56 = vrot.slane %v2275_v10, 4  ;;  %v4956_v48 = vshrl.u32 %v7875_v43, 16  ;;  %v4762_v34 = vld [vmem:[#allocation2 + $0x50] sm:$0xf]  ;;  %8660 = vmatpush3.bf16.msra.mxu0 %v8845_v39 }
 0x1ad   : > { %vm10746_vm0 = vcmp.ne.s16.totalorder %v13714_v31, 0  ;;  %v13720_v61 = vsel %vm9451_vm11, %v9491_v45, %v13719_v9  ;;  %v13721_v4 = vmov 0  ;;  %v13724_v47 = vsel %vm9451_vm11, %v10018_v6, %v9455_v20  ;;  %v8166_v53 = vpop.f32.mrf.mxu0  ;;  %v1571_v44 = vld [vmem:[#allocation2 + $0x58] sm:$0xf] }
 0x1ae   : > { %v13716_v17 = vsel %vm10746_vm0, 4294967295, %v13715_v17  ;;  %vm10756_vm6 = vcmp.ne.s16.totalorder %v13720_v61, 0  ;;  %vm10765_vm13 = vcmp.ne.s16.totalorder %v13724_v47, 0  ;;  %v13725_v14 = vmov 0  ;;  %v4763_v61 = vld [vmem:[#allocation2 + $0x54] sm:$0xf] }
 0x1af   : > { %13717 = vst [vmem:[#allocation41_spill] sm:$0xff] %v13716_v17  ;;  %v13722_v4 = vsel %vm10756_vm6, 4294967295, %v13721_v4  ;;  %v13726_v14 = vsel %vm10765_vm13, 4294967295, %v13725_v14  ;;  %v8068_v36 = vpack.c.bf16 %v10734_v60, %v10734_v60  ;;  %v848_v10 = vadd.f32 %v10725_v22, %v809_v18 }
 0x1b0   : > { %13723 = vst [vmem:[#allocation44_spill] sm:$0xff] %v13722_v4  ;;  %13727 = vst [vmem:[#allocation92_spill] sm:$0xff] %v13726_v14  ;;  %v8165_v31 = vadd.f32 %v8164_v26, %v8163_v8  ;;  %v4950_v9 = vor.u32 %v4948_v3, %v10670_v27  ;;  %v2278_v57 = vor.u32 %v2277_v56, %v2274_v42  ;;  %v4960_v47 = vshll.u32 %v10738_v7, 16  ;;  %v8167_v8 = vpop.f32.mrf.mxu0 }
 0x1b1   : > { %v4958_v6 = vor.u32 %v4956_v48, %v4954_v0  ;;  %v2086_v43 = vsel %vm10664_vm3, %v1570_v40, 0  ;;  %vm13728_vm12 = vcmask 519168   ;;  %v10778_v54 = vmax.f32 %v848_v10, 0.0 }
 0x1b2   : > { %1044 = vst.msk [vmem:[#allocation2 + $0x60] sm:$0xf] %vm13728_vm12, %v8068_v36  ;;  %v810_v18 = vmul.f32 %v10700_v33, %v8165_v31  ;;  %v2087_v27 = vsel %vm10677_vm9, %v1571_v44, 0  ;;  %vm13730_vm2 = vcmp.ne.s16.totalorder %v13698_v52, 0  ;;  %vm13731_vm8 = vsmask.f32 4352  ;;  %v8169_v31 = vpop.f32.mrf.mxu0 }
 0x1b3   : > { %13729 = vst [vmem:[#allocation93_spill] sm:$0xff] %v10778_v54  ;;  %v4795_v3 = vsel %vm13730_vm2, %v4762_v34, 0  ;;  %v2279_v26 = vsel %vm13731_vm8, %v10687_v2, %v2278_v57  ;;  %v4962_v42 = vrot.slane %v4960_v47, 1  ;;  %v7712_v56 = vcombine.low %v2086_v43, %v2087_v27  ;;  %v4764_v34 = vld [vmem:[#allocation2 + $0x58] sm:$0xf] }
 0x1b4   : > { %v4796_v40 = vsel %vm10710_vm7, %v4763_v61, 0  ;;  %v8069_v48 = vpack.c.bf16 %v10778_v54, %v10778_v54  ;;  %v849_v36 = vadd.f32 %v10725_v22, %v810_v18  ;;  %v8168_v10 = vadd.f32 %v8167_v8, %v8166_v53  ;;  %v4765_v27 = vld [vmem:[#allocation2 + $0x5c] sm:$0xf]  ;;  %v13735_v61 = vld [vmem:[#allocation45_spill] sm:$0xff] }
 0x1b5   : > { %vm13732_vm12 = vcmask 523264   ;;  %v7877_v44 = vcombine.low %v4795_v3, %v4796_v40  ;;  %vm13733_vm2 = vsmask.f32 7424  ;;  %v2281_v43 = vshrl.u32 %v7712_v56, 16  ;;  %v8170_v3 = vpop.f32.mrf.mxu0  ;;  %v1572_v40 = vld [vmem:[#allocation2 + $0x5c] sm:$0xf] }
 0x1b6   : > { %8397 = vmatprep.mubr.msk.bf16.mxu1 %vm13732_vm12, %v2279_v26  ;;  %v4955_v52 = vsel %vm13733_vm2, %v4950_v9, %v4954_v0  ;;  %vm13734_vm8 = vmmov %vm13733_vm2  ;;  %v2284_v47 = vshll.u32 %v7712_v56, 16  ;;  %v13736_v39 = vsel %vm9483_vm4, %v9468_v32, %v9985_v59  ;;  %v13737_v53 = vmov 0 }
 0x1b7   : > { %v4963_v2 = vsel %vm13734_vm8, %v4958_v6, %v4962_v42  ;;  %vm10801_vm3 = vcmp.ne.s16.totalorder %v13736_v39, 0  ;;  %vm13740_vm12 = vcmask 519168   ;;  %v10806_v18 = vmax.f32 %v849_v36, 0.0 }
 0x1b8   : > { %v13738_v53 = vsel %vm10801_vm3, 4294967295, %v13737_v53  ;;  %1045 = vst.msk [vmem:[#allocation2 + $0x64] sm:$0xf] %vm13740_vm12, %v8069_v48  ;;  %v811_v0 = vmul.f32 %v10700_v33, %v8168_v10  ;;  %vm13741_vm2 = vcmask 523264   ;;  %v4964_v9 = vshrl.u32 %v10738_v7, 16 }
 0x1b9   : > { %13739 = vst [vmem:[#allocation94_spill] sm:$0xff] %v13738_v53  ;;  %8590 = vmatmul.mubr.msk.bf16.gmra.mxu0 %vm13741_vm2, %v4955_v52  ;;  %v4968_v6 = vshll.u32 %v7877_v44, 16  ;;  %vm13742_vm8 = vmmov %vm13741_vm2  ;;  %v2283_v8 = vrot.slane %v2281_v43, 3  ;;  %v2286_v59 = vrot.slane %v2284_v47, 4  ;;  %vm13743_vm7 = vcmp.ne.s16.totalorder %v13712_v12, 0  ;;  %v8172_v43 = vpop.f32.mrf.mxu0 }
 0x1ba   : > { %8593 = vmatprep.mubr.msk.bf16.mxu0 %vm13742_vm8, %v4963_v2  ;;  %v4797_v26 = vsel %vm13743_vm7, %v4764_v34, 0  ;;  %v4798_v56 = vsel %vm10746_vm0, %v4765_v27, 0  ;;  %v13744_v52 = vsel %vm9451_vm11, %v9491_v45, %v9981_v29  ;;  %v13745_v7 = vmov 0 }
 0x1bb   : > { %vm10821_vm12 = vcmp.ne.s16.totalorder %v13744_v52, 0  ;;  %v13748_v48 = vsel %vm9451_vm11, %v10050_v24, %v9455_v20  ;;  %v13749_v36 = vmov 0  ;;  %v8070_v10 = vpack.c.bf16 %v10806_v18, %v10806_v18  ;;  %v1573_v52 = vld [vmem:[#allocation2 + $0x60] sm:$0xf] }
 0x1bc   : > { %v13746_v7 = vsel %vm10821_vm12, 4294967295, %v13745_v7  ;;  %vm10830_vm2 = vcmp.ne.s16.totalorder %v13748_v48, 0  ;;  %v850_v34 = vadd.f32 %v10725_v22, %v811_v0  ;;  %v8171_v2 = vadd.f32 %v8170_v3, %v8169_v31 }
 0x1bd   : > { %13747 = vst [vmem:[#allocation95_spill] sm:$0xff] %v13746_v7  ;;  %v13750_v36 = vsel %vm10830_vm2, 4294967295, %v13749_v36  ;;  %v4970_v29 = vrot.slane %v4968_v6, 1  ;;  %v2287_v47 = vor.u32 %v2286_v59, %v2283_v8  ;;  %v4966_v27 = vor.u32 %v4964_v9, %v4962_v42  ;;  %v8173_v42 = vpop.f32.mrf.mxu0 }
 0x1be   : > { %13751 = vst [vmem:[#allocation96_spill] sm:$0xff] %v13750_v36  ;;  %v7878_v39 = vcombine.low %v4797_v26, %v4798_v56  ;;  %v13752_v12 = vshll.u32 %v10125_v23, 16  ;;  %vm13753_vm7 = vcmask 519168   ;;  %v10843_v48 = vmax.f32 %v850_v34, 0.0 }
 0x1bf   : > { %1046 = vst.msk [vmem:[#allocation2 + $0x68] sm:$0xf] %vm13753_vm7, %v8070_v10  ;;  %v812_v17 = vmul.f32 %v10700_v33, %v8171_v2  ;;  %v2088_v31 = vsel %vm10756_vm6, %v1572_v40, 0  ;;  %v2089_v0 = vsel %vm10765_vm13, %v1573_v52, 0  ;;  %vm13754_vm8 = vsmask.f32 4352  ;;  %v8175_v40 = vpop.f32.mrf.mxu0 }
 0x1c0   : > { %v10840_v24 = vor.u32 %v13752_v12, %v10215_v30  ;;  %v2288_v9 = vsel %vm13754_vm8, %v2278_v57, %v2287_v47  ;;  %v4972_v6 = vshrl.u32 %v7877_v44, 16  ;;  %v4976_v3 = vshll.u32 %v7878_v39, 16  ;;  %v4766_v12 = vld [vmem:[#allocation2 + $0x60] sm:$0xf]  ;;  %v4767_v2 = vld [vmem:[#allocation2 + $0x64] sm:$0xf] }
 0x1c1   : > { %v7713_v23 = vcombine.low %v2088_v31, %v2089_v0  ;;  %v8071_v8 = vpack.c.bf16 %v10843_v48, %v10843_v48  ;;  %v851_v59 = vadd.f32 %v10725_v22, %v812_v17  ;;  %v8174_v26 = vadd.f32 %v8173_v42, %v8172_v43  ;;  %v13757_v52 = vld [vmem:[#allocation49_spill] sm:$0xff]  ;;  %v13765_v42 = vld [vmem:[#allocation48_spill] sm:$0xff] }
 0x1c2   : > { %vm13755_vm7 = vcmask 523264   ;;  %vm13756_vm0 = vsmask.f32 7424  ;;  %v4974_v10 = vor.u32 %v4972_v6, %v4970_v29  ;;  %v4978_v34 = vrot.slane %v4976_v3, 1  ;;  %v8176_v3 = vpop.f32.mrf.mxu0 }
 0x1c3   : > { %8398 = vmatmul.mubr.msk.bf16.gmra.mxu1 %vm13755_vm7, %v2288_v9  ;;  %v4971_v56 = vsel %vm13756_vm0, %v4966_v27, %v4970_v29  ;;  %v2290_v57 = vshrl.u32 %v7713_v23, 16  ;;  %v2293_v44 = vshll.u32 %v7713_v23, 16  ;;  %v13758_v31 = vsel %vm9483_vm4, %v9468_v32, %v13757_v52 }
 0x1c4   : > { %vm10862_vm8 = vcmp.ne.s16.totalorder %v13758_v31, 0  ;;  %v13759_v17 = vmov 0  ;;  %vm13762_vm7 = vcmask 519168   ;;  %v10867_v43 = vmax.f32 %v851_v59, 0.0 }
 0x1c5   : > { %v13760_v17 = vsel %vm10862_vm8, 4294967295, %v13759_v17  ;;  %1047 = vst.msk [vmem:[#allocation2 + $0x6c] sm:$0xf] %vm13762_vm7, %v8071_v8  ;;  %v813_v27 = vmul.f32 %v10700_v33, %v8174_v26  ;;  %vm13763_vm0 = vcmask 523264   ;;  %vm13764_vm6 = vcmp.ne.s16.totalorder %v13735_v61, 0 }
 0x1c6   : > { %13761 = vst [vmem:[#allocation49_spill] sm:$0xff] %v13760_v17  ;;  %8594 = vmatmul.mubr.msk.bf16.gmra.mxu0 %vm13763_vm0, %v4971_v56  ;;  %v4799_v29 = vsel %vm13764_vm6, %v4766_v12, 0  ;;  %v4800_v0 = vsel %vm10801_vm3, %v4767_v2, 0  ;;  %v13766_v9 = vsel %vm9451_vm11, %v9491_v45, %v13765_v42  ;;  %v13767_v6 = vmov 0  ;;  %v10885_v56 = vld [vmem:[#allocation2 + $0x64] sm:$0xf] }
 0x1c7   : > { %vm10880_vm13 = vcmp.ne.s16.totalorder %v13766_v9, 0  ;;  %vm13770_vm7 = vsmask.f32 7424  ;;  %v2292_v8 = vrot.slane %v2290_v57, 3  ;;  %v2295_v59 = vrot.slane %v2293_v44, 4  ;;  %13771 = vst [vmem:[#allocation97_spill] sm:$0xff] %v10885_v56 }
 0x1c8   : > { %v13768_v6 = vsel %vm10880_vm13, 4294967295, %v13767_v6  ;;  %v4979_v23 = vsel %vm13770_vm7, %v4974_v10, %v4978_v34  ;;  %v7879_v26 = vcombine.low %v4799_v29, %v4800_v0  ;;  %v13772_v12 = vsel %vm9451_vm11, %v10109_v13, %v9455_v20  ;;  %v8178_v29 = vpop.f32.mrf.mxu0  ;;  %v10903_v9 = vld [vmem:[#allocation2 + $0x68] sm:$0xf] }
 0x1c9   : > { %13769 = vst [vmem:[#allocation48_spill] sm:$0xff] %v13768_v6  ;;  %vm10892_vm6 = vcmp.ne.s16.totalorder %v13772_v12, 0  ;;  %v13773_v2 = vmov 0  ;;  %v8072_v52 = vpack.c.bf16 %v10867_v43, %v10867_v43  ;;  %v852_v31 = vadd.f32 %v10725_v22, %v813_v27  ;;  %8597 = vmatprep.mubr.msk.bf16.mxu0 %vm13763_vm0, %v4979_v23  ;;  %13777 = vst [vmem:[#allocation99_spill] sm:$0xff] %v10903_v9 }
 0x1ca   : > { %v13774_v2 = vsel %vm10892_vm6, 4294967295, %v13773_v2  ;;  %v8177_v10 = vadd.f32 %v8176_v3, %v8175_v40  ;;  %v13776_v57 = vor.u32 %v10145_v5, %v10133_v16  ;;  %v2296_v0 = vor.u32 %v2295_v59, %v2292_v8  ;;  %v4768_v3 = vld [vmem:[#allocation2 + $0x68] sm:$0xf]  ;;  %v8179_v23 = vpop.f32.mrf.mxu0 }
 0x1cb   : > { %13775 = vst [vmem:[#allocation98_spill] sm:$0xff] %v13774_v2  ;;  %v4980_v42 = vshrl.u32 %v7878_v39, 16  ;;  %v4984_v13 = vshll.u32 %v7879_v26, 16  ;;  %vm13778_vm7 = vcmask 519168   ;;  %v10910_v40 = vmax.f32 %v852_v31, 0.0 }
 0x1cc   : > { %v2002_v44 = vrot.slane %v13776_v57, 4  ;;  %1048 = vst.msk [vmem:[#allocation2 + $0x70] sm:$0xf] %vm13778_vm7, %v8072_v52  ;;  %v814_v27 = vmul.f32 %v10700_v33, %v8177_v10  ;;  %v2090_v5 = vsel %vm10821_vm12, %v10885_v56, 0  ;;  %v2091_v39 = vsel %vm10830_vm2, %v10903_v9, 0  ;;  %v8181_v53 = vpop.f32.mrf.mxu0 }
 0x1cd   : > { %vm13779_vm0 = vsmask.f32 4352  ;;  %v4982_v59 = vor.u32 %v4980_v42, %v4978_v34  ;;  %v4986_v57 = vrot.slane %v4984_v13, 1  ;;  %v7714_v12 = vcombine.low %v2090_v5, %v2091_v39  ;;  %v4769_v34 = vld [vmem:[#allocation2 + $0x6c] sm:$0xf]  ;;  %v13783_v13 = vld [vmem:[#allocation57_spill] sm:$0xff] }
 0x1ce   : > { %v2297_v8 = vsel %vm13779_vm0, %v2287_v47, %v2296_v0  ;;  %v8073_v52 = vpack.c.bf16 %v10910_v40, %v10910_v40  ;;  %v853_v31 = vadd.f32 %v10725_v22, %v814_v27  ;;  %v8180_v10 = vadd.f32 %v8179_v23, %v8178_v29  ;;  %v13784_v29 = vld [vmem:[#allocation53_spill] sm:$0xff]  ;;  %v10947_v23 = vld [vmem:[#allocation2 + $0x6c] sm:$0xf] }
 0x1cf   : > { %vm13780_vm7 = vcmask 523264   ;;  %v2007_v61 = vsel %vm9451_vm11, %v2002_v44, %v9455_v20  ;;  %vm13781_vm3 = vsmask.f32 7424  ;;  %v2299_v9 = vshrl.u32 %v7714_v12, 16  ;;  %13791 = vst [vmem:[#allocation100_spill] sm:$0xff] %v10947_v23 }
 0x1d0   : > { %8401 = vmatprep.mubr.msk.bf16.mxu1 %vm13780_vm7, %v2297_v8  ;;  %v4987_v37 = vsel %vm13781_vm3, %v4982_v59, %v4986_v57  ;;  %v2302_v47 = vshll.u32 %v7714_v12, 16  ;;  %vm13782_vm0 = vcmp.ne.s16.totalorder %v10067_v21, 0  ;;  %v13785_v27 = vsel %vm9483_vm4, %v9468_v32, %v13784_v29 }
 0x1d1   : > { %v4801_v42 = vsel %vm13782_vm0, %v4768_v3, 0  ;;  %vm10936_vm7 = vcmp.ne.s16.totalorder %v13785_v27, 0  ;;  %v13786_v5 = vmov 0  ;;  %vm13789_vm2 = vcmask 519168  }
 0x1d2   : > { %v13787_v5 = vsel %vm10936_vm7, 4294967295, %v13786_v5  ;;  %1049 = vst.msk [vmem:[#allocation2 + $0x74] sm:$0xf] %vm13789_vm2, %v8073_v52  ;;  %v10941_v44 = vmax.f32 %v853_v31, 0.0  ;;  %v815_v12 = vmul.f32 %v10700_v33, %v8180_v10  ;;  %vm13790_vm3 = vcmask 523264   ;;  %v8182_v52 = vpop.f32.mrf.mxu0 }
 0x1d3   : > { %13788 = vst [vmem:[#allocation53_spill] sm:$0xff] %v13787_v5  ;;  %8598 = vmatmul.mubr.msk.bf16.gmra.mxu0 %vm13790_vm3, %v4987_v37  ;;  %v4802_v39 = vsel %vm10862_vm8, %v4769_v34, 0  ;;  %v4988_v3 = vshrl.u32 %v7879_v26, 16  ;;  %v13792_v8 = vsel %vm9451_vm11, %v9491_v45, %v10133_v16  ;;  %v13793_v59 = vmov 0  ;;  %v4770_v21 = vld [vmem:[#allocation2 + $0x70] sm:$0xf] }
 0x1d4   : > { %vm10954_vm0 = vcmp.ne.s16.totalorder %v13792_v8, 0  ;;  %v2301_v31 = vrot.slane %v2299_v9, 3  ;;  %v2304_v10 = vrot.slane %v2302_v47, 4  ;;  %v7880_v29 = vcombine.low %v4801_v42, %v4802_v39  ;;  %v8184_v9 = vpop.f32.mrf.mxu0  ;;  %v10974_v39 = vld [vmem:[#allocation2 + $0x70] sm:$0xf] }
 0x1d5   : > { %v13794_v59 = vsel %vm10954_vm0, 4294967295, %v13793_v59  ;;  %v13795_v37 = vand.u32 15, %v10210_v28  ;;  %v8074_v26 = vpack.c.bf16 %v10941_v44, %v10941_v44  ;;  %v854_v27 = vadd.f32 %v10725_v22, %v815_v12  ;;  %13800 = vst [vmem:[#allocation101_spill] sm:$0xff] %v10974_v39 }
 0x1d6   : > { %v8183_v16 = vadd.f32 %v8182_v52, %v8181_v53  ;;  %vm10967_vm3 = vcmp.ne.s16.totalorder %v2007_v61, 0  ;;  %v13798_v8 = vmov 0  ;;  %v2305_v28 = vor.u32 %v2304_v10, %v2301_v31  ;;  %v13806_v52 = vld [vmem:[#allocation62_spill] sm:$0xff] }
 0x1d7   : > { %vm10960_vm2 = vcmp.ne.s32.totalorder %v13795_v37, 0  ;;  %v13799_v8 = vsel %vm10967_vm3, 4294967295, %v13798_v8  ;;  %v4990_v47 = vor.u32 %v4988_v3, %v4986_v57  ;;  %v4992_v42 = vshll.u32 %v7880_v29, 16  ;;  %v8185_v57 = vpop.f32.mrf.mxu0 }
 0x1d8   : > { %v2092_v37 = vsel %vm10880_vm13, %v10947_v23, 0  ;;  %vm13801_vm8 = vcmask 519168   ;;  %v10980_v61 = vmax.f32 %v854_v27, 0.0  ;;  %v816_v53 = vmul.f32 %v10700_v33, %v8183_v16 }
 0x1d9   : > { %1050 = vst.msk [vmem:[#allocation2 + $0x78] sm:$0xf] %vm13801_vm8, %v8074_v26  ;;  %v2093_v12 = vsel %vm10892_vm6, %v10974_v39, 0  ;;  %vm13802_vm12 = vsmask.f32 4352  ;;  %v4994_v31 = vrot.slane %v4992_v42, 1  ;;  %vm13804_vm8 = vmpackc.low %vm10960_vm2, %vm10960_vm2  ;;  %v8186_v23 = vadd.f32 %v8185_v57, %v8184_v9  ;;  %v8187_v42 = vpop.f32.mrf.mxu0 }
 0x1da   : > { %v2306_v3 = vsel %vm13802_vm12, %v2296_v0, %v2305_v28  ;;  %v7715_v10 = vcombine.low %v2092_v37, %v2093_v12  ;;  %v13803_v17 = vmov 0   ;;  %v8075_v27 = vpack.c.bf16 %v10980_v61, %v10980_v61  ;;  %v4771_v54 = vld [vmem:[#allocation2 + $0x74] sm:$0xf] }
 0x1db   : > { %v1709_v26 = vsel %vm13804_vm8, 65537, %v13803_v17  ;;  %v855_v16 = vadd.f32 %v10725_v22, %v816_v53  ;;  %vm13805_vm6 = vcmask 523264   ;;  %vm13334_vm12 = vcmp.ne.s16.totalorder %v13806_v52, 0 }
 0x1dc   : > { %8402 = vmatmul.mubr.msk.bf16.gmra.mxu1 %vm13805_vm6, %v2306_v3  ;;  %v2014_v0 = vshll.u32 %v1709_v26, 16  ;;  %vm13807_vm13 = vsmask.f32 7424  ;;  %v2308_v12 = vshrl.u32 %v7715_v10, 16  ;;  %v2311_v56 = vshll.u32 %v7715_v10, 16 }
 0x1dd   : > { %v4995_v37 = vsel %vm13807_vm13, %v4990_v47, %v4994_v31  ;;  %v4996_v34 = vshrl.u32 %v7880_v29, 16  ;;  %v13808_v60 = vsel %vm9483_vm4, %v9468_v32, %v10840_v24  ;;  %v13809_v53 = vmov 0  ;;  %v11018_v3 = vld [vmem:[#allocation2 + $0x74] sm:$0xf] }
 0x1de   : > { %vm11005_vm2 = vcmp.ne.s16.totalorder %v13808_v60, 0  ;;  %vm13812_vm6 = vcmask 519168   ;;  %v11010_v9 = vmax.f32 %v855_v16, 0.0  ;;  %v817_v57 = vmul.f32 %v10700_v33, %v8186_v23  ;;  %v8188_v60 = vpop.f32.mrf.mxu0 }
 0x1df   : > { %v13810_v53 = vsel %vm11005_vm2, 4294967295, %v13809_v53  ;;  %1051 = vst.msk [vmem:[#allocation2 + $0x7c] sm:$0xf] %vm13812_vm6, %v8075_v27  ;;  %vm13813_vm13 = vcmask 523264   ;;  %vm13814_vm8 = vcmp.ne.s16.totalorder %v13783_v13, 0  ;;  %v4804_v47 = vsel %vm10936_vm7, %v4771_v54, 0 }
 0x1e0   : > { %13811 = vst [vmem:[#allocation102_spill] sm:$0xff] %v13810_v53  ;;  %8601 = vmatprep.mubr.msk.bf16.mxu0 %vm13813_vm13, %v4995_v37  ;;  %v4803_v29 = vsel %vm13814_vm8, %v4770_v21, 0  ;;  %v2310_v24 = vrot.slane %v2308_v12, 3  ;;  %v2313_v10 = vrot.slane %v2311_v56, 4  ;;  %v2016_v2 = vrot.slane %v2014_v0, 5  ;;  %v8190_v6 = vpop.f32.mrf.mxu0 }
 0x1e1   : > { %v7881_v39 = vcombine.low %v4803_v29, %v4804_v47  ;;  %v8076_v27 = vpack.c.bf16 %v11010_v9, %v11010_v9  ;;  %v856_v23 = vadd.f32 %v10725_v22, %v817_v57  ;;  %v8189_v16 = vadd.f32 %v8188_v60, %v8187_v42  ;;  %v11023_v5 = vld [vmem:[#allocation2 + $0x78] sm:$0xf] }
 0x1e2   : > { %v2018_v37 = vshrl.u32 %v1709_v26, 16  ;;  %v2314_v13 = vor.u32 %v2313_v10, %v2310_v24  ;;  %v4998_v21 = vor.u32 %v4996_v34, %v4994_v31  ;;  %v2094_v54 = vsel %vm10954_vm0, %v11018_v3, 0  ;;  %v4772_v42 = vld [vmem:[#allocation2 + $0x78] sm:$0xf]  ;;  %v8191_v31 = vpop.f32.mrf.mxu0 }
 0x1e3   : > { %v5000_v7 = vshll.u32 %v7881_v39, 16  ;;  %1052 = vst.msk [vmem:[#allocation2 + $0x80] sm:$0xf] %vm13812_vm6, %v8076_v27  ;;  %v11029_v56 = vmax.f32 %v856_v23, 0.0  ;;  %v818_v0 = vmul.f32 %v10700_v33, %v8189_v16  ;;  %v2095_v26 = vsel %vm10967_vm3, %v11023_v5, 0 }
 0x1e4   : > { %v5004_v12 = vshrl.u32 %v7881_v39, 16  ;;  %vm13815_vm13 = vsmask.f32 4352  ;;  %v7716_v29 = vcombine.low %v2094_v54, %v2095_v26  ;;  %v2020_v47 = vrot.slane %v2018_v37, 4 }
 0x1e5   : > { %v2315_v34 = vsel %vm13815_vm13, %v2305_v28, %v2314_v13  ;;  %v5002_v57 = vrot.slane %v5000_v7, 1  ;;  %v8077_v60 = vpack.c.bf16 %v11029_v56, %v11029_v56  ;;  %v857_v24 = vadd.f32 %v10725_v22, %v818_v0 }
 0x1e6   : > { %v8192_v10 = vadd.f32 %v8191_v31, %v8190_v6  ;;  %vm13816_vm8 = vcmask 523264   ;;  %v2017_v27 = vsel %vm9451_vm11, %v9491_v45, %v2016_v2  ;;  %vm13817_vm6 = vsmask.f32 7424  ;;  %v4773_v28 = vld [vmem:[#allocation2 + $0x7c] sm:$0xf] }
 0x1e7   : > { %8405 = vmatprep.mubr.msk.bf16.mxu1 %vm13816_vm8, %v2315_v34  ;;  %v5003_v39 = vsel %vm13817_vm6, %v4998_v21, %v5002_v57  ;;  %v2317_v23 = vshrl.u32 %v7716_v29, 16  ;;  %v2320_v16 = vshll.u32 %v7716_v29, 16  ;;  %v4805_v7 = vsel %vm13334_vm12, %v4772_v42, 0  ;;  %vm13819_vm7 = vmmov %vm13816_vm8 }
 0x1e8   : > { %vm13818_vm13 = vcmask 519168   ;;  %v11047_v37 = vmax.f32 %v857_v24, 0.0  ;;  %v819_v6 = vmul.f32 %v10700_v33, %v8192_v10  ;;  %8602 = vmatmul.mubr.msk.bf16.gmra.mxu0 %vm13819_vm7, %v5003_v39  ;;  %v4806_v54 = vsel %vm11005_vm2, %v4773_v28, 0  ;;  %v11062_v33 = vld [vmem:[#allocation2 + $0x7c] sm:$0xf] }
 0x1e9   : > { %1053 = vst.msk [vmem:[#allocation2 + $0x84] sm:$0xf] %vm13818_vm13, %v8077_v60  ;;  %v2021_v0 = vor.u32 %v2020_v47, %v2016_v2  ;;  %v2319_v26 = vrot.slane %v2317_v23, 3  ;;  %v2322_v21 = vrot.slane %v2320_v16, 4  ;;  %v11053_v31 = vcombine.low %v4805_v7, %v4806_v54 }
 0x1ea   : > { %vm11055_vm8 = vcmp.ne.s16.totalorder %v2017_v27, 0  ;;  %v13820_v34 = vmov 0  ;;  %v8078_v42 = vpack.c.bf16 %v11047_v37, %v11047_v37  ;;  %v858_v29 = vadd.f32 %v10725_v22, %v819_v6  ;;  %v11067_v39 = vld [vmem:[#allocation2 + $0x80] sm:$0xf] }
 0x1eb   : > { %v13821_v34 = vsel %vm11055_vm8, 4294967295, %v13820_v34  ;;  %v2022_v60 = vrot.slane %v2021_v0, 4  ;;  %v13823_v24 = vand.u32 15, %v10251_v58  ;;  %v2323_v2 = vor.u32 %v2322_v21, %v2319_v26  ;;  %v13833_v21 = vld [vmem:[#allocation15_spill] sm:$0xff] }
 0x1ec   : > { %13822 = vst [vmem:[#allocation103_spill] sm:$0xff] %v13821_v34  ;;  %v5006_v47 = vor.u32 %v5004_v12, %v5002_v57  ;;  %v5008_v10 = vshll.u32 %v11053_v31, 16  ;;  %1054 = vst.msk [vmem:[#allocation2 + $0x88] sm:$0xf] %vm13818_vm13, %v8078_v42  ;;  %v11070_v27 = vmax.f32 %v858_v29, 0.0  ;;  %v3578_v58 = vrot.slane %v10215_v30, 4 }
 0x1ed   : > { %vm1538_vm7 = vcmp.ne.s32.totalorder %v13823_v24, 15  ;;  %v2027_v22 = vsel %vm9451_vm11, %v2022_v60, %v9455_v20  ;;  %vm13824_vm12 = vsmask.f32 4352  ;;  %v13825_v57 = vmov 0  ;;  %v13870_v34 = vld [vmem:[#allocation63_spill] sm:$0xff] }
 0x1ee   : > { %vm3290_vm6 = vmpackc.low %vm1538_vm7, %vm1538_vm7  ;;  %v2324_v16 = vsel %vm13824_vm12, %v2314_v13, %v2323_v2  ;;  %v5010_v12 = vrot.slane %v5008_v10, 1  ;;  %vm11078_vm2 = vcmp.ne.s16.totalorder %v2027_v22, 0  ;;  %v2096_v28 = vsel %vm11055_vm8, %v11062_v33, 0  ;;  %v4774_v10 = vld [vmem:[#allocation2 + $0x80] sm:$0xf] }
 0x1ef   : > { %v3322_v23 = vsel %vm3290_vm6, 65537, %v13803_v17  ;;  %v13826_v57 = vsel %vm11078_vm2, 4294967295, %v13825_v57  ;;  %v8079_v7 = vpack.c.bf16 %v11070_v27, %v11070_v27  ;;  %vm13828_vm7 = vcmask 523264   ;;  %vm13830_vm12 = vmmov %vm13818_vm13 }
 0x1f0   : > { %13827 = vst [vmem:[#allocation104_spill] sm:$0xff] %v13826_v57  ;;  %8406 = vmatmul.mubr.msk.bf16.gmra.mxu1 %vm13828_vm7, %v2324_v16  ;;  %v2097_v19 = vsel %vm11078_vm2, %v11067_v39, 0  ;;  %v3589_v20 = vshrl.u32 %v3322_v23, 16  ;;  %v3592_v30 = vshll.u32 %v3322_v23, 16  ;;  %vm13829_vm11 = vsmask.f32 7424  ;;  %vm13831_vm6 = vmmov %vm13828_vm7 }
 0x1f1   : > { %v5011_v13 = vsel %vm13829_vm11, %v5006_v47, %v5010_v12  ;;  %v7717_v6 = vcombine.low %v2096_v28, %v2097_v19  ;;  %v11092_v54 = vld [vmem:[#allocation2 + $0x84] sm:$0xf]  ;;  %1055 = vst.msk [vmem:[#allocation2 + $0x8c] sm:$0xf] %vm13830_vm12, %v8079_v7  ;;  %v11099_v0 = vsel %vm9483_vm4, %v3578_v58, %v9500_v49  ;;  %vm13337_vm13 = vcmp.ne.s16.totalorder %v9491_v45, 0 }
 0x1f2   : > { %8605 = vmatprep.mubr.msk.bf16.mxu0 %vm13831_vm6, %v5011_v13  ;;  %13832 = vst [vmem:[#allocation105_spill] sm:$0xff] %v11099_v0  ;;  %v3591_v26 = vrot.slane %v3589_v20, 7  ;;  %v1092_v42 = vadd.s32 248, %v13833_v21  ;;  %v2098_v24 = vsel %vm13337_vm13, %v11092_v54, 0  ;;  %vm13345_vm7 = vcmp.ne.s16.totalorder %v11099_v0, 0 }
 0x1f3   : > { %v2326_v29 = vshrl.u32 %v7717_v6, 16  ;;  %v2329_v60 = vshll.u32 %v7717_v6, 16  ;;  %v7718_v22 = vcombine.low %v2098_v24, %v2098_v24  ;;  %v4775_v58 = vld [vmem:[#allocation2 + $0x84] sm:$0xf]  ;;  %v5012_v7 = vshrl.u32 %v11053_v31, 16 }
 0x1f4   : > { %v3594_v47 = vor.u32 %v3592_v30, %v3591_v26  ;;  %v1314_v23 = vand.u32 15, %v1092_v42  ;;  %v13834_v30 = vmov 0  ;;  %v4807_v42 = vsel %vm13345_vm7, %v4774_v10, 0  ;;  %v11120_v21 = vld [vmem:[#allocation2 + $0x24] sm:$0xf] }
 0x1f5   : > { %v2328_v16 = vrot.slane %v2326_v29, 3  ;;  %v2331_v28 = vrot.slane %v2329_v60, 4  ;;  %v2335_v20 = vshrl.u32 %v7718_v22, 16  ;;  %v2338_v13 = vshll.u32 %v7718_v22, 16  ;;  %v11125_v0 = vld [vmem:[#allocation2 + $0x2c] sm:$0xf] }
 0x1f6   : > { %v3595_v19 = vsel %vm9483_vm4, %v9468_v32, %v3594_v47  ;;  %vm1540_vm11 = vcmp.ne.s32.totalorder %v1314_v23, 15  ;;  %v3596_v29 = vrot.slane %v3591_v26, 4  ;;  %vm13837_vm13 = vsmask.f32 4352  ;;  %v11128_v10 = vld [vmem:[#allocation2 + $0x30] sm:$0xf] }
 0x1f7   : > { %v2332_v6 = vor.u32 %v2331_v28, %v2328_v16  ;;  %vm11111_vm12 = vcmp.ne.s16.totalorder %v3595_v19, 0  ;;  %vm3292_vm6 = vmpackc.low %vm1540_vm11, %vm1540_vm11  ;;  %v2337_v60 = vrot.slane %v2335_v20, 3  ;;  %v2340_v24 = vrot.slane %v2338_v13, 4  ;;  %v11123_v19 = vld [vmem:[#allocation2 + $0x28] sm:$0xf] }
 0x1f8   : > { %v13835_v30 = vsel %vm11111_vm12, 4294967295, %v13834_v30  ;;  %v4808_v31 = vsel %vm11111_vm12, %v4775_v58, 0  ;;  %v3324_v47 = vsel %vm3292_vm6, 65537, %v13803_v17  ;;  %vm13838_vm11 = vcmask 523264  }
 0x1f9   : > { %13836 = vst [vmem:[#allocation106_spill] sm:$0xff] %v13835_v30  ;;  %v2333_v22 = vsel %vm13837_vm13, %v2323_v2, %v2332_v6  ;;  %v7883_v23 = vcombine.low %v4807_v42, %v4808_v31  ;;  %v3607_v16 = vshrl.u32 %v3324_v47, 16  ;;  %v3610_v28 = vshll.u32 %v3324_v47, 16  ;;  %v4776_v31 = vld [vmem:[#allocation2 + $0x88] sm:$0xf]  ;;  %vm13843_vm6 = vmmov %vm13838_vm11  ;;  %v13846_v47 = vld [vmem:[#allocation50_spill] sm:$0xff] }
 0x1fa   : > { %8409 = vmatprep.mubr.msk.bf16.mxu1 %vm13838_vm11, %v2333_v22  ;;  %v2341_v26 = vor.u32 %v2340_v24, %v2337_v60  ;;  %v5014_v58 = vor.u32 %v5012_v7, %v5010_v12  ;;  %v11133_v13 = vsel %vm9483_vm4, %v3596_v29, %v9500_v49  ;;  %v5338_v17 = vsel %vm10084_vm14, %v11120_v21, 0  ;;  %v4778_v49 = vld [vmem:[#allocation2 + $0x90] sm:$0x1]  ;;  %v13847_v30 = vld [vmem:[#allocation46_spill] sm:$0xff]  ;;  %v4777_v22 = vld [vmem:[#allocation2 + $0x8c] sm:$0xf] }
 0x1fb   : > { %v5016_v20 = vshll.u32 %v7883_v23, 16  ;;  %13839 = vst [vmem:[#allocation107_spill] sm:$0xff] %v11133_v13  ;;  %v3609_v2 = vrot.slane %v3607_v16, 7  ;;  %v5339_v60 = vsel %vm10097_vm15, %v11123_v19, 0  ;;  %v5340_v7 = vsel %vm10196_vm1, %v11125_v0, 0 }
 0x1fc   : > { %v2342_v42 = vsel %vm13837_vm13, %v2332_v6, %v2341_v26  ;;  %v13844_v6 = vld [vmem:[#allocation65_spill] sm:$0xff]  ;;  %v13848_v52 = vpack.c.bf16 %v13846_v47, %v13847_v30  ;;  %vm13849_vm13 = vmmov %vm13843_vm6  ;;  %vm13348_vm7 = vcmp.ne.s16.totalorder %v11133_v13, 0  ;;  %v11154_v12 = vcombine.low %v5338_v17, %v5339_v60  ;;  %v11183_v60 = vld [vmem:[#allocation2 + $0x3c] sm:$0xf] }
 0x1fd   : > { %v5018_v24 = vrot.slane %v5016_v20, 1  ;;  %8410 = vmatmul.mubr.msk.bf16.gmra.mxu1 %vm13843_vm6, %v2342_v42  ;;  %v3612_v29 = vor.u32 %v3610_v28, %v3609_v2  ;;  %v3614_v16 = vrot.slane %v3609_v2, 4  ;;  %vm13845_vm11 = vnez %v13844_v6  ;;  %v13860_v6 = vld [vmem:[#allocation75_spill] sm:$0xff] }
 0x1fe   : > { %v5341_v26 = vsel %vm13845_vm11, %v11128_v10, 0  ;;  %8421 = vmatprep.mubr.msk.bf16.mxu1 %vm13849_vm13, %v13848_v52  ;;  %vm13851_vm6 = vsmask.f32 7424  ;;  %v4809_v42 = vsel %vm13348_vm7, %v4776_v31, 0  ;;  %v13852_v30 = vmov 0  ;;  %v13865_v13 = vld [vmem:[#allocation59_spill] sm:$0xff] }
 0x1ff   : > { %v11156_v20 = vcombine.low %v5340_v7, %v5341_v26  ;;  %v5019_v28 = vsel %vm13851_vm6, %v5014_v58, %v5018_v24  ;;  %v3613_v2 = vsel %vm9483_vm4, %v9468_v32, %v3612_v29  ;;  %vm11164_vm1 = vcmp.ne.s16.totalorder %v3614_v16, 0  ;;  %v11168_v52 = vld [vmem:[#allocation2 + $0x34] sm:$0xf]  ;;  %v11179_v32 = vld [vmem:[#allocation2 + $0x40] sm:$0xf] }
 0x200   : > { %v13853_v30 = vsel %vm11164_vm1, 4294967295, %v13852_v30  ;;  %8606 = vmatmul.mubr.msk.bf16.gmra.mxu0 %vm13849_vm13, %v5019_v28  ;;  %vm11171_vm14 = vcmp.ne.s16.totalorder %v3613_v2, 0  ;;  %v13855_v17 = vmov 0  ;;  %v4811_v58 = vsel %vm11164_vm1, %v4778_v49, 0  ;;  %v8847_v16 = vld [vmem:[#allocation6 + $0x30] sm:$0xff]  }
 0x201   : > { %13850 = vst [vmem:[#allocation50_spill] sm:$0xff] %v11156_v20  ;;  %13854 = vst [vmem:[#allocation46_spill] sm:$0xff] %v13853_v30  ;;  %v13856_v17 = vsel %vm11171_vm14, 4294967295, %v13855_v17  ;;  %v4810_v31 = vsel %vm11171_vm14, %v4777_v22, 0  ;;  %v7885_v47 = vcombine.low %v4811_v58, %v4811_v58  ;;  %v5020_v29 = vshrl.u32 %v7883_v23, 16 }
 0x202   : > { %13857 = vst [vmem:[#allocation108_spill] sm:$0xff] %v13856_v17  ;;  %v7884_v7 = vcombine.low %v4809_v42, %v4810_v31  ;;  %v11185_v26 = vld [vmem:[#allocation2 + $0x44] sm:$0xf]  ;;  %vm13858_vm4 = vnez %v13551_v15  ;;  %vm13859_vm6 = vnez %v13555_v63  ;;  %vm13861_vm13 = vnez %v13860_v6  ;;  %v11196_v58 = vld [vmem:[#allocation2 + $0x48] sm:$0xf]  ;;  %v13862_v31 = vld [vmem:[#allocation74_spill] sm:$0xff] }
 0x203   : > { %v5032_v28 = vshll.u32 %v7885_v47, 16  ;;  %v5342_v49 = vsel %vm13858_vm4, %v11168_v52, 0  ;;  %v5343_v2 = vsel %vm13859_vm6, %v11177_v38, 0  ;;  %v5345_v22 = vsel %vm13861_vm13, %v11179_v32, 0  ;;  %v11203_v15 = vld [vmem:[#allocation2 + $0x4c] sm:$0xf] }
 0x204   : > { %v5024_v42 = vshll.u32 %v7884_v7, 16  ;;  %v5028_v23 = vshrl.u32 %v7884_v7, 16  ;;  %vm13863_vm7 = vnez %v13862_v31  ;;  %v11201_v30 = vcombine.low %v5342_v49, %v5343_v2  ;;  %v13866_v17 = vld [vmem:[#allocation54_spill] sm:$0xff]  ;;  %v11211_v6 = vld [vmem:[#allocation2 + $0x50] sm:$0xf] }
 0x205   : > { %v5344_v47 = vsel %vm13863_vm7, %v11183_v60, 0  ;;  %v13867_v63 = vpack.c.bf16 %v13865_v13, %v13866_v17  ;;  %vm13868_vm4 = vcmask 523264   ;;  %v5022_v45 = vor.u32 %v5020_v29, %v5018_v24  ;;  %v8893_v7 = vld [vmem:[#allocation6 + $0x38] sm:$0xff]  }
 0x206   : > { %13864 = vst [vmem:[#allocation109_spill] sm:$0xff] %v11201_v30  ;;  %v11209_v53 = vcombine.low %v5344_v47, %v5345_v22  ;;  %v5026_v20 = vrot.slane %v5024_v42, 1  ;;  %v5034_v57 = vrot.slane %v5032_v28, 1  ;;  %v13869_v31 = vld [vmem:[#allocation66_spill] sm:$0xff]  ;;  %vm13872_vm7 = vmmov %vm13868_vm4  ;;  %v11219_v30 = vld [vmem:[#allocation2 + $0x54] sm:$0xf]  ;;  %vm13874_vm13 = vnez %v13598_v11 }
 0x207   : > { %8422 = vmatmul.mubr.msk.bf16.vlgmr.msra.gmra.mxu1 %vm13868_vm4, %v13867_v63  ;;  %v13871_v49 = vpack.c.bf16 %v13869_v31, %v13870_v34  ;;  %v11217_v2 = vld [vmem:[#allocation2 + $0x1c] sm:$0xf]  ;;  %vm13873_vm4 = vnez %v13593_v62  ;;  %v5347_v13 = vsel %vm13874_vm13, %v11196_v58, 0  ;;  %v5348_v24 = vsel %vm10489_vm10, %v11203_v15, 0  ;;  %v8852_v34 = vld [vmem:[#allocation6 + $0x28] sm:$0xff]  }
 0x208   : > { %8454 = vmatpush3.bf16.msra.mxu1 %v8893_v7  ;;  %v5346_v63 = vsel %vm13873_vm4, %v11185_v26, 0  ;;  %v11230_v17 = vld [vmem:[#allocation2 + $0x58] sm:$0xf]  ;;  %v5030_v28 = vor.u32 %v5028_v23, %v5026_v20  ;;  %vm13876_vm6 = vnez %v13624_v25  ;;  %v11238_v31 = vld [vmem:[#allocation2 + $0x5c] sm:$0xf]  ;;  %vm13877_vm4 = vcmask 523264  }
 0x209   : > { %8425 = vmatprep.mubr.msk.bf16.mxu1 %vm13872_vm7, %v13871_v49  ;;  %8455 = vmatprep.subr.bf16.mxu1 %v8847_v16  ;;  %vm13875_vm7 = vsmask.f32 7424  ;;  %v5349_v22 = vsel %vm13876_vm6, %v11211_v6, 0  ;;  %v11236_v42 = vcombine.low %v5346_v63, %v5347_v13  ;;  %v11240_v47 = vld [vmem:[#allocation2 + $0x60] sm:$0xf]  ;;  %vm13884_vm6 = vnez %v13668_v46 }
 0x20a   : > { %v5027_v29 = vsel %vm13875_vm7, %v5022_v45, %v5026_v20  ;;  %v5302_v7 = vld [vmem:[#allocation2 + $0x18] sm:$0xf]  ;;  %v11243_v49 = vcombine.low %v5348_v24, %v5349_v22  ;;  %vm13878_vm10 = vmmov %vm13875_vm7  ;;  %v13879_v20 = vld [vmem:[#allocation68_spill] sm:$0xff]  ;;  %v5350_v24 = vsel %vm10543_vm5, %v11219_v30, 0  ;;  %vm13889_vm5 = vnez %v13688_v55 }
 0x20b   : > { %8609 = vmatprep.mubr.msk.bf16.mxu0 %vm13877_vm4, %v5027_v29  ;;  %v5035_v62 = vsel %vm13878_vm10, %v5030_v28, %v5034_v57  ;;  %v7943_v45 = vcombine.low %v5302_v7, %v11217_v2  ;;  %v13880_v23 = vld [vmem:[#allocation71_spill] sm:$0xff]  ;;  %v11251_v13 = vld [vmem:[#allocation2 + $0x68] sm:$0xf]  ;;  %v11253_v11 = vld [vmem:[#allocation2 + $0x6c] sm:$0xf]  ;;  %vm13882_vm10 = vnez %v13646_v35  ;;  %v5353_v29 = vsel %vm13884_vm6, %v11240_v47, 0 }
 0x20c   : > { %v894_v25 = vpack.c.bf16 %v13880_v23, %v13879_v20  ;;  %8456 = vmatpush3.bf16.msra.mxu1 %v8847_v16  ;;  %v11249_v63 = vld [vmem:[#allocation2 + $0x64] sm:$0xf]  ;;  %vm13881_vm7 = vmmov %vm13877_vm4  ;;  %v5351_v57 = vsel %vm13882_vm10, %v11230_v17, 0  ;;  %vm13883_vm4 = vnez %v13658_v1  ;;  %v11268_v28 = vld [vmem:[#allocation2 + $0x70] sm:$0xf]  ;;  %vm13891_vm6 = vnez %v13726_v14 }
 0x20d   : > { %8610 = vmatmul.mubr.msk.bf16.gmra.mxu0 %vm13881_vm7, %v5035_v62  ;;  %8457 = vmatprep.subr.bf16.mxu1 %v8852_v34  ;;  %v5352_v16 = vsel %vm13883_vm4, %v11238_v31, 0  ;;  %v13885_v62 = vld [vmem:[#allocation73_spill] sm:$0xff]  ;;  %v13886_v22 = vld [vmem:[#allocation76_spill] sm:$0xff]  ;;  %v11273_v20 = vcombine.low %v5350_v24, %v5351_v57  ;;  %vm13887_vm4 = vmmov %vm13881_vm7  ;;  %v5354_v57 = vsel %vm13889_vm5, %v11249_v63, 0  ;;  %v905_v46 = vpack.c.bf16 %v11029_v56, %v11010_v9 }
 0x20e   : > { %8661 = vmatprep.mubr.msk.bf16.mxu0 %vm13881_vm7, %v7943_v45  ;;  %v895_v7 = vpack.c.bf16 %v13886_v22, %v13885_v62  ;;  %v11275_v23 = vcombine.low %v5352_v16, %v5353_v29  ;;  %v11279_v1 = vld [vmem:[#allocation2 + $0x74] sm:$0xf]  ;;  %v5355_v45 = vsel %vm10677_vm9, %v11251_v13, 0  ;;  %v11287_v35 = vld [vmem:[#allocation2 + $0x78] sm:$0xf]  ;;  %vm13888_vm7 = vmmov %vm13887_vm4  ;;  %v5357_v16 = vsel %vm13891_vm6, %v11268_v28, 0 }
 0x20f   : > { %8426 = vmatmul.mubr.msk.bf16.gmra.mxu1 %vm13887_vm4, %v894_v25  ;;  %v11289_v24 = vld [vmem:[#allocation2 + $0x7c] sm:$0xf]  ;;  %vm13890_vm4 = vnez %v13722_v4  ;;  %v11301_v29 = vld [vmem:[#allocation2 + $0x80] sm:$0xf]  ;;  %v11305_v22 = vcombine.low %v5354_v57, %v5355_v45  ;;  %v11316_v4 = vld [vmem:[#allocation2 + $0x84] sm:$0xf] }
 0x210   : > { %8429 = vmatprep.mubr.msk.bf16.mxu1 %vm13888_vm7, %v895_v7  ;;  %8458 = vmatpush3.bf16.msra.mxu1 %v8852_v34  ;;  %v5356_v25 = vsel %vm13890_vm4, %v11253_v11, 0  ;;  %v11303_v62 = vld [vmem:[#allocation2 + $0x20] sm:$0xf]  ;;  %v904_v34 = vpack.c.bf16 %v10980_v61, %v10941_v44  ;;  %vm13892_vm7 = vnez %v13750_v36  ;;  %v11318_v14 = vld [vmem:[#allocation2 + $0x88] sm:$0xf]  ;;  %v13897_v9 = vld [vmem:[#allocation98_spill] sm:$0xff] }
 0x211   : > { %v11307_v7 = vcombine.low %v5356_v25, %v5357_v16  ;;  %8459 = vmatprep.subr.bf16.mxu1 %v8857_v41  ;;  %v5359_v50 = vsel %vm13892_vm7, %v11287_v35, 0  ;;  %v7944_v45 = vcombine.low %v11303_v62, %v11120_v21  ;;  %v13893_v57 = vld [vmem:[#allocation95_spill] sm:$0xff]  ;;  %v13895_v44 = vld [vmem:[#allocation48_spill] sm:$0xff]  ;;  %vm13898_vm5 = vnez %v13897_v9 }
 0x212   : > { %vm13894_vm4 = vnez %v13893_v57  ;;  %vm13896_vm6 = vnez %v13895_v44  ;;  %v5361_v56 = vsel %vm13898_vm5, %v11301_v29, 0  ;;  %v7945_v16 = vcombine.low %v11123_v19, %v11125_v0  ;;  %v13900_v57 = vld [vmem:[#allocation78_spill] sm:$0xff]  ;;  %v13901_v44 = vld [vmem:[#allocation80_spill] sm:$0xff]  ;;  %v13903_v0 = vld [vmem:[#allocation81_spill] sm:$0xff] }
 0x213   : > { %v5358_v25 = vsel %vm13894_vm4, %v11279_v1, 0  ;;  %v5360_v61 = vsel %vm13896_vm6, %v11289_v24, 0  ;;  %v906_v21 = vpack.c.bf16 %v11070_v27, %v11047_v37  ;;  %vm13899_vm4 = vcmask 523264   ;;  %v13904_v19 = vld [vmem:[#allocation82_spill] sm:$0xff] }
 0x214   : > { %8460 = vmatpush3.bf16.msra.mxu1 %v8857_v41  ;;  %v11333_v36 = vcombine.low %v5358_v25, %v5359_v50  ;;  %v11335_v55 = vcombine.low %v5360_v61, %v5361_v56  ;;  %v896_v51 = vpack.c.bf16 %v13901_v44, %v13900_v57  ;;  %v5362_v9 = vsel %vm10954_vm0, %v11316_v4, 0  ;;  %v8894_v50 = vld [vmem:[#allocation6 + $0x58] sm:$0xff]   ;;  %vm13902_vm6 = vmmov %vm13899_vm4  ;;  %v13906_v57 = vld [vmem:[#allocation101_spill] sm:$0xff] }
 0x215   : > { %8662 = vmatmul.mubr.msk.bf16.vlgmr.msra.gmra.mxu0 %vm13899_vm4, %v7944_v45  ;;  %v5363_v41 = vsel %vm10967_vm3, %v11318_v14, 0  ;;  %8733 = vmatprep.subr.bf16.mxu1 %v8894_v50  ;;  %v897_v37 = vpack.c.bf16 %v13904_v19, %v13903_v0  ;;  %vm13905_vm5 = vmmov %vm13899_vm4  ;;  %v7946_v45 = vcombine.low %v11128_v10, %v11168_v52  ;;  %v7772_v25 = vcombine.low %v13906_v57, %v11018_v3  ;;  %v13909_v56 = vld [vmem:[#allocation85_spill] sm:$0xff]  ;;  %v13911_v10 = vld [vmem:[#allocation87_spill] sm:$0xff] }
 0x216   : > { %8665 = vmatprep.mubr.msk.bf16.mxu0 %vm13902_vm6, %v7945_v16  ;;  %v11351_v27 = vcombine.low %v5362_v9, %v5363_v41  ;;  %v7773_v44 = vcombine.low %v11023_v5, %v11062_v33  ;;  %v7774_v61 = vcombine.low %v11067_v39, %v11092_v54  ;;  %v7947_v9 = vcombine.low %v11177_v38, %v11183_v60  ;;  %vm13907_vm6 = vmmov %vm13899_vm4  ;;  %v13912_v52 = vld [vmem:[#allocation88_spill] sm:$0xff]  ;;  %v13915_v60 = vld [vmem:[#allocation89_spill] sm:$0xff] }
 0x217   : > { %8430 = vmatmul.mubr.msk.bf16.gmra.mxu1 %vm13899_vm4, %v896_v51  ;;  %v13908_v51 = vld [vmem:[#allocation83_spill] sm:$0xff]  ;;  %v899_v41 = vpack.c.bf16 %v13912_v52, %v13911_v10  ;;  %vm13913_vm0 = vmmov %vm13899_vm4  ;;  %v7948_v0 = vcombine.low %v11179_v32, %v11185_v26  ;;  %v7949_v38 = vcombine.low %v11196_v58, %v11203_v15  ;;  %v13916_v19 = vld [vmem:[#allocation90_spill] sm:$0xff]  ;;  %v7950_v32 = vcombine.low %v11211_v6, %v11219_v30 }
 0x218   : > { %8433 = vmatprep.mubr.msk.bf16.mxu1 %vm13905_vm5, %v897_v37  ;;  %v898_v16 = vpack.c.bf16 %v13909_v56, %v13908_v51  ;;  %vm13910_vm5 = vmmov %vm13899_vm4  ;;  %v900_v37 = vpack.c.bf16 %v13916_v19, %v13915_v60  ;;  %v7951_v15 = vcombine.low %v11230_v17, %v11238_v31  ;;  %v13923_v26 = vpack.c.bf16 %v10843_v48, %v10806_v18  ;;  %v8898_v31 = vld [vmem:[#allocation2 + $0x1c] sm:$0xf]  ;;  %v8901_v10 = vld [vmem:[#allocation2 + $0x24] sm:$0xf] }
 0x219   : > { %vm13914_vm3 = vmmov %vm13913_vm0  ;;  %v13925_v58 = vpack.c.bf16 %v10910_v40, %v10867_v43  ;;  %v7952_v6 = vcombine.low %v11240_v47, %v11249_v63  ;;  %v7953_v30 = vcombine.low %v11251_v13, %v11253_v11  ;;  %v7954_v18 = vcombine.low %v11268_v28, %v11279_v1  ;;  %v8895_v43 = vld [vmem:[#allocation2 + $0x8] sm:$0xf]  ;;  %v8896_v40 = vld [vmem:[#allocation2 + $0xc] sm:$0xf] }
 0x21a   : > { %vm13929_vm7 = vmmov %vm13913_vm0  ;;  %v7955_v48 = vcombine.low %v11287_v35, %v11289_v24  ;;  %v7759_v17 = vcombine.low %v8895_v43, %v8896_v40  ;;  %v5331_v11 = vld [vmem:[#allocation2 + $0x8c] sm:$0xf]  ;;  %v7956_v1 = vcombine.low %v11301_v29, %v11316_v4  ;;  %v8897_v35 = vld [vmem:[#allocation2 + $0x18] sm:$0xf]  ;;  %v5477_v24 = vshrl.u32 %v11154_v12, 16 }
 0x21b   : > { %v7761_v47 = vcombine.low %v8897_v35, %v8898_v31  ;;  %v13935_v63 = vld [vmem:[#allocation58_spill] sm:$0xff]  ;;  %v13936_v13 = vld [vmem:[#allocation61_spill] sm:$0xff]  ;;  %v8904_v60 = vld [vmem:[#allocation2 + $0x2c] sm:$0xf]  ;;  %v5534_v43 = vshll.u32 %v11273_v20, 16  ;;  %v5549_v40 = vshrl.u32 %v11305_v22, 16 }
 0x21c   : > { %v13937_v28 = vcombine.low %v13935_v63, %v13936_v13  ;;  %v8899_v4 = vld [vmem:[#allocation6 + $0x50] sm:$0xff]   ;;  %v5570_v35 = vshll.u32 %v11333_v36, 16  ;;  %v13986_v3 = vld [vmem:[#allocation43_spill] sm:$0xff]  ;;  %v3184_v5 = vld [vmem:[#allocation2 + $0x58] sm:$0xf] }
 0x21d   : > { %8666 = vmatmul.mubr.msk.bf16.gmra.mxu0 %vm13907_vm6, %v7946_v45  ;;  %vm13917_vm6 = vmmov %vm13913_vm0  ;;  %v13918_v45 = vld [vmem:[#allocation91_spill] sm:$0xff]  ;;  %v8906_v13 = vld [vmem:[#allocation2 + $0x30] sm:$0xf] }
 0x21e   : > { %8669 = vmatprep.mubr.msk.bf16.mxu0 %vm13910_vm5, %v7947_v9  ;;  %v13919_v9 = vld [vmem:[#allocation93_spill] sm:$0xff]  ;;  %vm13920_vm5 = vmmov %vm13913_vm0  ;;  %v3187_v33 = vld [vmem:[#allocation2 + $0x64] sm:$0xf] }
 0x21f   : > { %8434 = vmatmul.mubr.msk.bf16.gmra.mxu1 %vm13899_vm4, %v898_v16  ;;  %v901_v51 = vpack.c.bf16 %v13919_v9, %v13918_v45  ;;  %vm13921_vm4 = vmmov %vm13913_vm0  ;;  %v8900_v16 = vld [vmem:[#allocation2 + $0x20] sm:$0xf]  ;;  %v13945_v45 = vld [vmem:[#allocation109_spill] sm:$0xff] }
 0x220   : > { %8437 = vmatprep.mubr.msk.bf16.mxu1 %vm13913_vm0, %v899_v41  ;;  %v7762_v52 = vcombine.low %v8900_v16, %v8901_v10  ;;  %v8902_v41 = vld [vmem:[#allocation6 + $0x48] sm:$0xff]   ;;  %v5495_v9 = vshrl.u32 %v13945_v45, 16 }
 0x221   : > { %v13998_v39 = vld [vmem:[#allocation52_spill] sm:$0xff] }
 0x222   : > { %v5497_v10 = vrot.slane %v5495_v9, 3 }
 0x225   : > { %8670 = vmatmul.mubr.msk.bf16.gmra.mxu0 %vm13914_vm3, %v7948_v0  ;;  %vm13922_vm3 = vmmov %vm13913_vm0  ;;  %v13942_v0 = vld [vmem:[#allocation21_spill] sm:$0xff] }
 0x226   : > { %8673 = vmatprep.mubr.msk.bf16.mxu0 %vm13917_vm6, %v7949_v38  ;;  %vm13924_vm6 = vmmov %vm13913_vm0  ;;  %v8903_v38 = vld [vmem:[#allocation2 + $0x28] sm:$0xf] }
 0x227   : > { %8438 = vmatmul.mubr.msk.bf16.gmra.mxu1 %vm13920_vm5, %v900_v37  ;;  %vm13926_vm5 = vmmov %vm13913_vm0  ;;  %v7763_v19 = vcombine.low %v8903_v38, %v8904_v60  ;;  %v5504_v38 = vshrl.u32 %v11209_v53, 16  ;;  %v8910_v60 = vld [vmem:[#allocation2 + $0x40] sm:$0xf] }
 0x228   : > { %8441 = vmatprep.mubr.msk.bf16.mxu1 %vm13921_vm4, %v901_v51  ;;  %vm13927_vm4 = vmmov %vm13913_vm0  ;;  %v5498_v51 = vshll.u32 %v13945_v45, 16  ;;  %v5507_v45 = vshll.u32 %v11209_v53, 16 }
 0x22d   : > { %8674 = vmatmul.mubr.msk.bf16.gmra.mxu0 %vm13913_vm0, %v7950_v32  ;;  %v5513_v32 = vshrl.u32 %v11236_v42, 16 }
 0x22e   : > { %8677 = vmatprep.mubr.msk.bf16.mxu0 %vm13922_vm3, %v7951_v15  ;;  %vm13928_vm3 = vmmov %vm13913_vm0  ;;  %v13946_v15 = vld [vmem:[#allocation103_spill] sm:$0xff] }
 0x22f   : > { %8442 = vmatmul.mubr.msk.bf16.gmra.mxu1 %vm13924_vm6, %v13923_v26  ;;  %vm13930_vm6 = vmmov %vm13913_vm0  ;;  %v13947_v26 = vld [vmem:[#allocation104_spill] sm:$0xff] }
 0x230   : > { %8445 = vmatprep.mubr.msk.bf16.mxu1 %vm13926_vm5, %v13925_v58  ;;  %vm13931_vm5 = vmmov %vm13913_vm0 }
 0x235   : > { %8678 = vmatmul.mubr.msk.bf16.gmra.mxu0 %vm13927_vm4, %v7952_v6  ;;  %vm13932_vm4 = vmmov %vm13913_vm0  ;;  %v8905_v6 = vld [vmem:[#allocation6 + $0x40] sm:$0xff]  }
 0x236   : > { %8681 = vmatprep.mubr.msk.bf16.mxu0 %vm13913_vm0, %v7953_v30  ;;  %v11445_v30 = vld [vmem:[#allocation6 + $0x78] sm:$0xff]  }
 0x237   : > { %8446 = vmatmul.mubr.msk.bf16.gmra.mxu1 %vm13928_vm3, %v904_v34  ;;  %vm13934_vm3 = vmmov %vm13913_vm0  ;;  %v5480_v34 = vshll.u32 %v11154_v12, 16 }
 0x238   : > { %8449 = vmatprep.mubr.msk.bf16.mxu1 %vm13929_vm7, %v905_v46  ;;  %v7957_v46 = vcombine.low %v11318_v14, %v5331_v11  ;;  %vm13933_vm7 = vmmov %vm13913_vm0  ;;  %v13940_v14 = vld [vmem:[#allocation47_spill] sm:$0xff] }
 0x239   : > { %v5482_v56 = vrot.slane %v5480_v34, 4 }
 0x23d   : > { %8682 = vmatmul.mubr.msk.bf16.gmra.mxu0 %vm13930_vm6, %v7954_v18  ;;  %vm13938_vm6 = vmmov %vm13913_vm0  ;;  %v5516_v18 = vshll.u32 %v11236_v42, 16  ;;  %v13948_v42 = vld [vmem:[#allocation50_spill] sm:$0xff] }
 0x23e   : > { %8685 = vmatprep.mubr.msk.bf16.mxu0 %vm13931_vm5, %v7955_v48  ;;  %vm13939_vm5 = vmmov %vm13913_vm0  ;;  %v5531_v48 = vshrl.u32 %v11273_v20, 16  ;;  %v5486_v63 = vshrl.u32 %v13948_v42, 16  ;;  %v5489_v34 = vshll.u32 %v13948_v42, 16 }
 0x23f   : > { %8450 = vmatmul.mubr.msk.bf16.gmra.mxu1 %vm13932_vm4, %v906_v21  ;;  %vm13941_vm4 = vnez %v13940_v14  ;;  %v5479_v21 = vrot.slane %v5477_v24, 3 }
 0x240   : > { %8461 = vmatprep.mubr.msk.bf16.mxu1 %vm13913_vm0, %v7759_v17  ;;  %v5337_v29 = vsel %vm13941_vm4, %v11303_v62, 0  ;;  %vm13943_vm0 = vnez %v13942_v0  ;;  %v5552_v17 = vshll.u32 %v11305_v22, 16  ;;  %v5488_v16 = vrot.slane %v5486_v63, 3 }
 0x241   : > { %v5336_v12 = vsel %vm13943_vm0, %v11217_v2, 0  ;;  %v5483_v62 = vor.u32 %v5482_v56, %v5479_v21  ;;  %v5364_v2 = vsel %vm11055_vm8, %v5331_v11, 0  ;;  %v5567_v11 = vshrl.u32 %v11333_v36, 16  ;;  %v8909_v21 = vld [vmem:[#allocation2 + $0x3c] sm:$0xf] }
 0x242   : > { %v7907_v37 = vcombine.low %v5336_v12, %v5337_v29  ;;  %v8908_v29 = vld [vmem:[#allocation2 + $0x38] sm:$0xf]  ;;  %v5500_v12 = vrot.slane %v5498_v51, 4  ;;  %v5506_v63 = vrot.slane %v5504_v38, 3 }
 0x243   : > { %v7765_v56 = vcombine.low %v8908_v29, %v8909_v21  ;;  %v5536_v29 = vrot.slane %v5534_v43, 4  ;;  %v5540_v21 = vshrl.u32 %v11275_v23, 16 }
 0x244   : > { %v5501_v51 = vor.u32 %v5500_v12, %v5497_v10  ;;  %v5551_v10 = vrot.slane %v5549_v40, 3  ;;  %v11481_v12 = vpop.f32.mrf.mxu1  ;;  %v5569_v40 = vrot.slane %v5567_v11, 3  ;;  %v5579_v11 = vshll.u32 %v11335_v55, 16 }
 0x245   : > { %8686 = vmatmul.mubr.msk.bf16.gmra.mxu0 %vm13933_vm7, %v7956_v1  ;;  %vm13944_vm7 = vmmov %vm13934_vm3  ;;  %v5471_v1 = vshll.u32 %v7907_v37, 16 }
 0x246   : > { %8689 = vmatprep.mubr.msk.bf16.mxu0 %vm13934_vm3, %v7957_v46  ;;  %v5468_v46 = vshrl.u32 %v7907_v37, 16 }
 0x247   : > { %8462 = vmatmul.mubr.msk.bf16.vlgmr.msra.gmra.mxu1 %vm13938_vm6, %v13937_v28  ;;  %v8907_v28 = vld [vmem:[#allocation2 + $0x34] sm:$0xf]  ;;  %v5473_v22 = vrot.slane %v5471_v1, 4  ;;  %vm13949_vm6 = vmmov %vm13934_vm3 }
 0x248   : > { %8737 = vmatpush3.bf16.msra.mxu1 %v8894_v50  ;;  %8465 = vmatprep.mubr.msk.bf16.mxu1 %vm13939_vm5, %v7761_v47  ;;  %v11433_v50 = vld [vmem:[#allocation2 + $0x90] sm:$0xf]  ;;  %v5585_v47 = vshrl.u32 %v11351_v27, 16  ;;  %v7764_v20 = vcombine.low %v8906_v13, %v8907_v28  ;;  %v5470_v24 = vrot.slane %v5468_v46, 3  ;;  %vm13950_vm5 = vmmov %vm13934_vm3  ;;  %v8913_v46 = vld [vmem:[#allocation2 + $0x4c] sm:$0xf] }
 0x249   : > { %8734 = vmatprep.subr.bf16.mxu1 %v8899_v4  ;;  %v5365_v58 = vsel %vm11078_vm2, %v11433_v50, 0  ;;  %v5509_v13 = vrot.slane %v5507_v45, 4  ;;  %v5558_v45 = vshrl.u32 %v11307_v7, 16 }
 0x24a   : > { %v11454_v31 = vcombine.low %v5364_v2, %v5365_v58  ;;  %v5515_v2 = vrot.slane %v5513_v32, 3  ;;  %v5518_v58 = vrot.slane %v5516_v18, 4  ;;  %v5525_v32 = vshll.u32 %v11243_v49, 16 }
 0x24b   : > { %v5533_v18 = vrot.slane %v5531_v48, 3  ;;  %v5542_v48 = vrot.slane %v5540_v21, 3  ;;  %v8917_v21 = vld [vmem:[#allocation2 + $0x5c] sm:$0xf] }
 0x24c   : > { %8738 = vmatpush3.bf16.msra.mxu1 %v8899_v4  ;;  %v5588_v4 = vshll.u32 %v11351_v27, 16  ;;  %v5519_v28 = vor.u32 %v5518_v58, %v5515_v2  ;;  %v5576_v2 = vshrl.u32 %v11335_v55, 16  ;;  %v8915_v55 = vld [vmem:[#allocation2 + $0x54] sm:$0xf] }
 0x24d   : > { %8735 = vmatprep.subr.bf16.mxu1 %v8902_v41 }
 0x24f   : > { %8466 = vmatmul.mubr.msk.bf16.gmra.mxu1 %vm13944_vm7, %v7762_v52  ;;  %v11462_v52 = vor.u32 %v5473_v22, %v5470_v24  ;;  %vm13951_vm7 = vsmask.f32 4352  ;;  %v5510_v22 = vor.u32 %v5509_v13, %v5506_v63  ;;  %v5587_v63 = vrot.slane %v5585_v47, 3 }
 0x250   : > { %8469 = vmatprep.mubr.msk.bf16.mxu1 %vm13934_vm3, %v7763_v19  ;;  %8739 = vmatpush3.bf16.msra.mxu1 %v8902_v41  ;;  %v5491_v41 = vrot.slane %v5489_v34, 4  ;;  %v8911_v19 = vld [vmem:[#allocation2 + $0x44] sm:$0xf]  ;;  %vm13952_vm3 = vmmov %vm13951_vm7  ;;  %v5590_v13 = vrot.slane %v5588_v4, 4 }
 0x251   : > { %8736 = vmatprep.subr.bf16.mxu1 %v8905_v6  ;;  %v7766_v37 = vcombine.low %v8910_v60, %v8911_v19  ;;  %v11469_v1 = vsel %vm13951_vm7, %v11462_v52, %v5483_v62  ;;  %vm13955_vm7 = vmmov %vm13952_vm3 }
 0x252   : > { %v5492_v42 = vor.u32 %v5491_v41, %v5488_v16  ;;  %v5543_v16 = vshll.u32 %v11275_v23, 16  ;;  %v5554_v41 = vrot.slane %v5552_v17, 4  ;;  %v11487_v38 = vsel %vm13955_vm7, %v5510_v22, %v5519_v28 }
 0x253   : > { %v5561_v23 = vshll.u32 %v11307_v7, 16  ;;  %v5572_v17 = vrot.slane %v5570_v35, 4 }
 0x254   : > { %8740 = vmatpush3.bf16.msra.mxu1 %v8905_v6  ;;  %v8912_v6 = vld [vmem:[#allocation2 + $0x48] sm:$0xf]  ;;  %v11473_v24 = vsel %vm13952_vm3, %v5483_v62, %v5492_v42  ;;  %v5545_v60 = vrot.slane %v5543_v16, 4  ;;  %v5555_v19 = vor.u32 %v5554_v41, %v5551_v10  ;;  %v5591_v16 = vor.u32 %v5590_v13, %v5587_v63  ;;  %v13977_v13 = vld [vmem:[#allocation37_spill] sm:$0xff] }
 0x255   : > { %8533 = vmatprep.subr.bf16.mxu1 %v11445_v30  ;;  %v7767_v9 = vcombine.low %v8912_v6, %v8913_v46  ;;  %v5560_v46 = vrot.slane %v5558_v45, 3  ;;  %v5573_v7 = vor.u32 %v5572_v17, %v5569_v40  ;;  %v13970_v40 = vld [vmem:[#allocation97_spill] sm:$0xff] }
 0x256   : > { %v5546_v6 = vor.u32 %v5545_v60, %v5542_v48 }
 0x257   : > { %8470 = vmatmul.mubr.msk.bf16.gmra.mxu1 %vm13949_vm6, %v7764_v20  ;;  %v5522_v20 = vshrl.u32 %v11243_v49, 16  ;;  %vm13953_vm6 = vmmov %vm13952_vm3  ;;  %v5537_v49 = vor.u32 %v5536_v29, %v5533_v18  ;;  %v5597_v18 = vshll.u32 %v11454_v31, 16  ;;  %v8916_v29 = vld [vmem:[#allocation2 + $0x58] sm:$0xf] }
 0x258   : > { %8473 = vmatprep.mubr.msk.bf16.mxu1 %vm13950_vm5, %v7765_v56  ;;  %v11476_v53 = vsel %vm13953_vm6, %v5492_v42, %v5501_v51  ;;  %v5527_v56 = vrot.slane %v5525_v32, 4  ;;  %vm13954_vm5 = vmmov %vm13952_vm3  ;;  %vm13956_vm3 = vcmask 523264   ;;  %v11504_v42 = vpop.f32.mrf.mxu1  ;;  %v5594_v32 = vshrl.u32 %v11454_v31, 16 }
 0x259   : > { %v5524_v34 = vrot.slane %v5522_v20, 3  ;;  %v11484_v62 = vsel %vm13954_vm5, %v5501_v51, %v5510_v22  ;;  %vm13957_vm6 = vmmov %vm13956_vm3  ;;  %v5578_v51 = vrot.slane %v5576_v2, 3  ;;  %v5581_v20 = vrot.slane %v5579_v11, 4  ;;  %v8914_v22 = vld [vmem:[#allocation2 + $0x50] sm:$0xf]  ;;  %v13975_v11 = vld [vmem:[#allocation34_spill] sm:$0xff] }
 0x25a   : > { %vm13958_vm7 = vmmov %vm13954_vm5  ;;  %v11519_v10 = vpop.f32.mrf.mxu1  ;;  %v5596_v41 = vrot.slane %v5594_v32, 3  ;;  %v5599_v31 = vrot.slane %v5597_v18, 4  ;;  %v3179_v2 = vld [vmem:[#allocation2 + $0x44] sm:$0xf] }
 0x25b   : > { %v5528_v43 = vor.u32 %v5527_v56, %v5524_v34  ;;  %v7768_v34 = vcombine.low %v8914_v22, %v8915_v55  ;;  %v7769_v56 = vcombine.low %v8916_v29, %v8917_v21  ;;  %v5582_v4 = vor.u32 %v5581_v20, %v5578_v51  ;;  %v3181_v20 = vld [vmem:[#allocation2 + $0x4c] sm:$0xf]  ;;  %v3180_v22 = vld [vmem:[#allocation2 + $0x48] sm:$0xf]  ;;  %v3183_v55 = vld [vmem:[#allocation2 + $0x54] sm:$0xf] }
 0x25c   : > { %v11537_v60 = vpop.f32.mrf.mxu1 }
 0x25d   : > { %v11499_v58 = vsel %vm13954_vm5, %v5519_v28, %v5528_v43 }
 0x25e   : > { %v11543_v45 = vpop.f32.mrf.mxu1 }
 0x25f   : > { %8474 = vmatmul.mubr.msk.bf16.gmra.mxu1 %vm13956_vm3, %v7766_v37  ;;  %v11502_v37 = vsel %vm13958_vm7, %v5528_v43, %v5537_v49  ;;  %vm13959_vm3 = vmmov %vm13954_vm5  ;;  %v11535_v43 = vor.u32 %v5599_v31, %v5596_v41  ;;  %v13984_v31 = vld [vmem:[#allocation41_spill] sm:$0xff] }
 0x260   : > { %8477 = vmatprep.mubr.msk.bf16.mxu1 %vm13957_vm6, %v7767_v9  ;;  %v5563_v9 = vrot.slane %v5561_v23, 4  ;;  %v11508_v36 = vsel %vm13959_vm3, %v5537_v49, %v5546_v6  ;;  %vm13960_vm6 = vmmov %vm13959_vm3  ;;  %v8918_v23 = vld [vmem:[#allocation2 + $0x60] sm:$0xf]  ;;  %v11549_v51 = vpop.f32.mrf.mxu1 }
 0x261   : > { %v11511_v35 = vsel %vm13960_vm6, %v5546_v6, %v5555_v19  ;;  %vm13961_vm5 = vmmov %vm13959_vm3  ;;  %v7770_v17 = vcombine.low %v8918_v23, %v13970_v40  ;;  %v13971_v6 = vld [vmem:[#allocation100_spill] sm:$0xff] }
 0x262   : > { %v5564_v28 = vor.u32 %v5563_v9, %v5560_v46  ;;  %vm13962_vm7 = vmmov %vm13959_vm3  ;;  %vm13963_vm3 = vcmask 523264   ;;  %v13972_v46 = vld [vmem:[#allocation99_spill] sm:$0xff]  ;;  %v11556_v18 = vpop.f32.mrf.mxu1 }
 0x263   : > { %vm13964_vm6 = vmmov %vm13963_vm3  ;;  %v7771_v9 = vcombine.low %v13972_v46, %v13971_v6 }
 0x264   : > { %v11522_v47 = vsel %vm13961_vm5, %v5555_v19, %v5564_v28  ;;  %v11525_v27 = vsel %vm13962_vm7, %v5564_v28, %v5573_v7  ;;  %vm13965_vm8 = vmmov %vm13961_vm5  ;;  %vm13976_vm7 = vnez %v13975_v11  ;;  %v11566_v41 = vpop.f32.mrf.mxu1 }
 0x265   : > { %v11530_v49 = vsel %vm13965_vm8, %v5573_v7, %v5582_v4  ;;  %vm13966_vm2 = vmmov %vm13961_vm5  ;;  %v3178_v7 = vld [vmem:[#allocation2 + $0x40] sm:$0xf]  ;;  %v3663_v63 = vsel %vm13976_vm7, %v3179_v2, 0 }
 0x266   : > { %v11533_v48 = vsel %vm13966_vm2, %v5582_v4, %v5591_v16  ;;  %vm13968_vm5 = vmmov %vm13966_vm2 }
 0x267   : > { %8478 = vmatmul.mubr.msk.bf16.gmra.mxu1 %vm13963_vm3, %v7768_v34  ;;  %13967 = vst [vmem:[#allocation59_spill] sm:$0xff] %v11533_v48  ;;  %v11541_v19 = vsel %vm13968_vm5, %v5591_v16, %v11535_v43  ;;  %vm13973_vm8 = vmmov %vm13963_vm3  ;;  %v13979_v34 = vld [vmem:[#allocation38_spill] sm:$0xff]  ;;  %v13982_v16 = vld [vmem:[#allocation40_spill] sm:$0xff] }
 0x268   : > { %8481 = vmatprep.mubr.msk.bf16.mxu1 %vm13964_vm6, %v7769_v56  ;;  %13969 = vst [vmem:[#allocation54_spill] sm:$0xff] %v11541_v19  ;;  %vm13974_vm2 = vmmov %vm13963_vm3  ;;  %vm13978_vm3 = vcmp.ne.s16.totalorder %v13977_v13, 0  ;;  %vm13980_vm6 = vnez %v13979_v34  ;;  %v3182_v56 = vld [vmem:[#allocation2 + $0x50] sm:$0xf]  ;;  %v14013_v34 = vld [vmem:[#allocation62_spill] sm:$0xff] }
 0x269   : > { %v3662_v28 = vsel %vm13978_vm3, %v3178_v7, 0  ;;  %v3665_v29 = vsel %vm13980_vm6, %v3181_v20, 0  ;;  %vm13981_vm5 = vmmov %vm13974_vm2  ;;  %vm13985_vm3 = vnez %v13984_v31  ;;  %v13989_v7 = vld [vmem:[#allocation86_spill] sm:$0xff] }
 0x26a   : > { %v7802_v32 = vcombine.low %v3662_v28, %v3663_v63  ;;  %v3667_v23 = vsel %vm13985_vm3, %v3183_v55, 0  ;;  %v13990_v20 = vld [vmem:[#allocation94_spill] sm:$0xff]  ;;  %vm13993_vm3 = vmmov %vm13974_vm2 }
 0x26c   : > { %v3830_v21 = vshll.u32 %v7802_v32, 16 }
 0x26e   : > { %v3832_v6 = vrot.slane %v3830_v21, 1  ;;  %v3186_v21 = vld [vmem:[#allocation2 + $0x60] sm:$0xf] }
 0x26f   : > { %8482 = vmatmul.mubr.msk.bf16.gmra.mxu1 %vm13973_vm8, %v7770_v17  ;;  %vm13983_vm8 = vcmp.ne.s16.totalorder %v13982_v16, 0  ;;  %v11574_v17 = vpop.f32.mrf.mxu1  ;;  %v3188_v16 = vld [vmem:[#allocation2 + $0x68] sm:$0xf] }
 0x270   : > { %8485 = vmatprep.mubr.msk.bf16.mxu1 %vm13974_vm2, %v7771_v9  ;;  %v3664_v4 = vsel %vm13983_vm8, %v3180_v22, 0  ;;  %v3185_v9 = vld [vmem:[#allocation2 + $0x5c] sm:$0xf]  ;;  %vm13991_vm8 = vnez %v13990_v20 }
 0x271   : > { %v7803_v40 = vcombine.low %v3664_v4, %v3665_v29  ;;  %v3669_v22 = vsel %vm13991_vm8, %v3185_v9, 0  ;;  %vm13999_vm8 = vcmp.ne.s16.totalorder %v13998_v39, 0 }
 0x272   : > { %v3670_v54 = vsel %vm13999_vm8, %v3186_v21, 0  ;;  %vm14003_vm8 = vmmov %vm13974_vm2  ;;  %v14005_v21 = vld [vmem:[#allocation18_spill] sm:$0xff] }
 0x273   : > { %v3838_v28 = vshll.u32 %v7803_v40, 16 }
 0x277   : > { %8486 = vmatmul.mubr.msk.bf16.gmra.mxu1 %vm13981_vm5, %v7772_v25  ;;  %vm13987_vm5 = vcmp.ne.s16.totalorder %v13986_v3, 0  ;;  %v13988_v25 = vld [vmem:[#allocation84_spill] sm:$0xff] }
 0x278   : > { %8489 = vmatprep.mubr.msk.bf16.mxu1 %vm13974_vm2, %v7773_v44  ;;  %v3666_v57 = vsel %vm13987_vm5, %v3182_v56, 0  ;;  %v3826_v2 = vshrl.u32 %v13988_v25, 16  ;;  %v11580_v44 = vpop.f32.mrf.mxu1  ;;  %vm13992_vm5 = vsmask.f32 7424  ;;  %v13994_v56 = vld [vmem:[#allocation45_spill] sm:$0xff]  ;;  %v3840_v25 = vrot.slane %v3838_v28, 1 }
 0x279   : > { %v7804_v46 = vcombine.low %v3666_v57, %v3667_v23  ;;  %vm13995_vm6 = vcmp.ne.s16.totalorder %v13994_v56, 0  ;;  %v13996_v23 = vld [vmem:[#allocation49_spill] sm:$0xff]  ;;  %v3189_v3 = vld [vmem:[#allocation2 + $0x6c] sm:$0xf] }
 0x27a   : > { %v3828_v63 = vor.u32 %v3826_v2, %v13989_v7  ;;  %v3668_v4 = vsel %vm13995_vm6, %v3184_v5, 0  ;;  %vm13997_vm7 = vnez %v13996_v23  ;;  %v11594_v9 = vpop.f32.mrf.mxu1  ;;  %v3834_v7 = vshrl.u32 %v7802_v32, 16  ;;  %v8866_v5 = vld [vmem:[#allocation6 + $0x70] sm:$0xff]   ;;  %vm14000_vm6 = vmmov %vm13992_vm5 }
 0x27b   : > { %v3846_v29 = vshll.u32 %v7804_v46, 16  ;;  %v3671_v57 = vsel %vm13997_vm7, %v3187_v33, 0  ;;  %v7805_v2 = vcombine.low %v3668_v4, %v3669_v22  ;;  %v3191_v23 = vld [vmem:[#allocation2 + $0x74] sm:$0xf]  ;;  %v3850_v39 = vshrl.u32 %v7804_v46, 16 }
 0x27c   : > { %v3833_v55 = vsel %vm13992_vm5, %v3828_v63, %v3832_v6  ;;  %v11598_v20 = vcombine.low %v3670_v54, %v3671_v57  ;;  %v11600_v33 = vpop.f32.mrf.mxu1  ;;  %v14001_v22 = vld [vmem:[#allocation53_spill] sm:$0xff]  ;;  %v14011_v54 = vld [vmem:[#allocation102_spill] sm:$0xff] }
 0x27d   : > { %v3848_v63 = vrot.slane %v3846_v29, 1  ;;  %v3854_v56 = vshll.u32 %v7805_v2, 16  ;;  %v11605_v4 = vld [vmem:[#allocation2 + $0x94] sm:$0xf]  ;;  %v3190_v29 = vld [vmem:[#allocation2 + $0x70] sm:$0xf] }
 0x27e   : > { %v3192_v46 = vld [vmem:[#allocation2 + $0x78] sm:$0xf] }
 0x27f   : > { %8490 = vmatmul.mubr.msk.bf16.gmra.mxu1 %vm13974_vm2, %v7774_v61  ;;  %v3842_v61 = vshrl.u32 %v7803_v40, 16  ;;  %vm14004_vm2 = vmmov %vm13992_vm5  ;;  %vm14006_vm5 = vcmp.ne.s16.totalorder %v14005_v21, 0 }
 0x280   : > { %8513 = vmatprep.mubr.msk.bf16.mxu1 %vm13993_vm3, %v3833_v55  ;;  %v3836_v55 = vor.u32 %v3834_v7, %v3832_v6  ;;  %vm14002_vm3 = vnez %v14001_v22  ;;  %v3862_v6 = vshll.u32 %v11598_v20, 16  ;;  %v5366_v57 = vsel %vm14006_vm5, %v11605_v4, 0  ;;  %v11613_v7 = vpop.f32.mrf.mxu1  ;;  %v8867_v22 = vld [vmem:[#allocation6 + $0x68] sm:$0xff]  }
 0x281   : > { %v3844_v31 = vor.u32 %v3842_v61, %v3840_v25  ;;  %v3673_v32 = vsel %vm14002_vm3, %v3189_v3, 0  ;;  %14007 = vst [vmem:[#allocation66_spill] sm:$0xff] %v11613_v7  ;;  %v14009_v3 = vld [vmem:[#allocation57_spill] sm:$0xff] }
 0x282   : > { %v3841_v28 = vsel %vm14000_vm6, %v3836_v55, %v3840_v25  ;;  %vm14008_vm6 = vmmov %vm14003_vm8  ;;  %vm14010_vm3 = vcmp.ne.s16.totalorder %v14009_v3, 0  ;;  %v3856_v55 = vrot.slane %v3854_v56, 1  ;;  %v3864_v48 = vrot.slane %v3862_v6, 1  ;;  %v3193_v3 = vld [vmem:[#allocation2 + $0x7c] sm:$0xf] }
 0x283   : > { %v3849_v40 = vsel %vm14004_vm2, %v3844_v31, %v3848_v63  ;;  %v3672_v25 = vsel %vm14010_vm3, %v3188_v16, 0  ;;  %v7922_v31 = vcombine.low %v5366_v57, %v5366_v57  ;;  %vm14014_vm2 = vcmp.ne.s16.totalorder %v14013_v34, 0  ;;  %v11625_v16 = vpop.f32.mrf.mxu1  ;;  %v8868_v34 = vld [vmem:[#allocation6 + $0x60] sm:$0xff]   ;;  %vm14018_vm5 = vmmov %vm14008_vm6 }
 0x284   : > { %v3674_v13 = vsel %vm14014_vm2, %v3190_v29, 0  ;;  %14015 = vst [vmem:[#allocation63_spill] sm:$0xff] %v11625_v16  ;;  %vm14016_vm3 = vsmask.f32 7424  ;;  %vm14021_vm2 = vmmov %vm14018_vm5 }
 0x285   : > { %v5603_v11 = vshrl.u32 %v7922_v31, 16  ;;  %v5606_v19 = vshll.u32 %v7922_v31, 16 }
 0x287   : > { %8514 = vmatmul.mubr.msk.bf16.vlgmr.msra.gmra.mxu1 %vm14003_vm8, %v3841_v28  ;;  %vm14012_vm8 = vnez %v14011_v54  ;;  %v7807_v28 = vcombine.low %v3672_v25, %v3673_v32  ;;  %v3852_v54 = vor.u32 %v3850_v39, %v3848_v63  ;;  %v5608_v56 = vrot.slane %v5606_v19, 4  ;;  %v3195_v25 = vld [vmem:[#allocation2 + $0x84] sm:$0xf]  ;;  %v11633_v19 = vpop.f32.mrf.mxu1  ;;  %v14022_v63 = vld [vmem:[#allocation105_spill] sm:$0xff] }
 0x288   : > { %8534 = vmatpush3.bf16.msra.mxu1 %v11445_v30  ;;  %8517 = vmatprep.mubr.msk.bf16.mxu1 %vm14008_vm6, %v3849_v40  ;;  %v3675_v61 = vsel %vm14012_vm8, %v3191_v23, 0  ;;  %v3858_v30 = vshrl.u32 %v7805_v2, 16  ;;  %v5605_v23 = vrot.slane %v5603_v11, 3  ;;  %v3677_v2 = vsel %vm11111_vm12, %v3193_v3, 0  ;;  %vm14019_vm6 = vmmov %vm14016_vm3  ;;  %v3194_v11 = vld [vmem:[#allocation2 + $0x80] sm:$0xf] }
 0x289   : > { %8535 = vmatprep.subr.bf16.mxu1 %v8866_v5  ;;  %v11623_v40 = vcombine.low %v3674_v13, %v3675_v61  ;;  %v3870_v32 = vshll.u32 %v7807_v28, 16  ;;  %v3857_v29 = vsel %vm14016_vm3, %v3852_v54, %v3856_v55  ;;  %14020 = vst [vmem:[#allocation68_spill] sm:$0xff] %v11633_v19  ;;  %vm14023_vm8 = vcmp.ne.s16.totalorder %v14022_v63, 0  ;;  %v4173_v63 = vld [vmem:[#allocation2 + $0x14] sm:$0xf] }
 0x28a   : > { %v3860_v57 = vor.u32 %v3858_v30, %v3856_v55  ;;  %v5609_v13 = vor.u32 %v5608_v56, %v5605_v23  ;;  %v3679_v61 = vsel %vm11171_vm14, %v3195_v25, 0  ;;  %vm14025_vm3 = vsmask.f32 4352  ;;  %v4174_v23 = vld [vmem:[#allocation2 + $0x18] sm:$0xf] }
 0x28b   : > { %v3878_v39 = vshll.u32 %v11623_v40, 16  ;;  %v3872_v55 = vrot.slane %v3870_v32, 1  ;;  %v11644_v56 = vld [vmem:[#allocation6 + $0xd8] sm:$0xff]   ;;  %v4172_v25 = vld [vmem:[#allocation2 + $0x10] sm:$0xf] }
 0x28c   : > { %8536 = vmatpush3.bf16.msra.mxu1 %v8866_v5  ;;  %v3865_v6 = vsel %vm14019_vm6, %v3860_v57, %v3864_v48  ;;  %v3676_v5 = vsel %vm14023_vm8, %v3192_v46, 0  ;;  %v11642_v3 = vsel %vm14025_vm3, %v11535_v43, %v5609_v13  ;;  %v3866_v57 = vshrl.u32 %v11598_v20, 16  ;;  %v11651_v43 = vpop.f32.mrf.mxu1  ;;  %vm14031_vm8 = vmmov %vm14019_vm6 }
 0x28d   : > { %8537 = vmatprep.subr.bf16.mxu1 %v8867_v22  ;;  %14026 = vst [vmem:[#allocation71_spill] sm:$0xff] %v11642_v3  ;;  %v7809_v30 = vcombine.low %v3676_v5, %v3677_v2  ;;  %v3874_v46 = vshrl.u32 %v7807_v28, 16  ;;  %v3880_v31 = vrot.slane %v3878_v39, 1  ;;  %14029 = vst [vmem:[#allocation73_spill] sm:$0xff] %v11651_v43  ;;  %v3196_v2 = vld [vmem:[#allocation2 + $0x88] sm:$0x1] }
 0x28e   : > { %v3868_v32 = vor.u32 %v3866_v57, %v3864_v48  ;;  %v4207_v13 = vsel %vm13941_vm4, %v4174_v23, 0  ;;  %v14032_v39 = vld [vmem:[#allocation16_spill] sm:$0xff]  ;;  %v4206_v48 = vsel %vm13943_vm0, %v4173_v63, 0  ;;  %vm14036_vm3 = vcmask 523264   ;;  %vm14037_vm4 = vmmov %vm14031_vm8 }
 0x28f   : > { %8518 = vmatmul.mubr.msk.bf16.gmra.mxu1 %vm14018_vm5, %v3857_v29  ;;  %v14027_v29 = vld [vmem:[#allocation107_spill] sm:$0xff]  ;;  %v3876_v5 = vor.u32 %v3874_v46, %v3872_v55  ;;  %v3886_v20 = vshll.u32 %v7809_v30, 16  ;;  %vm14033_vm6 = vcmp.ne.s16.totalorder %v14032_v39, 0  ;;  %v3680_v46 = vsel %vm11164_vm1, %v3196_v2, 0  ;;  %v4178_v3 = vld [vmem:[#allocation2 + $0x28] sm:$0xf] }
 0x290   : > { %8521 = vmatprep.mubr.msk.bf16.mxu1 %vm14021_vm2, %v3865_v6  ;;  %8538 = vmatpush3.bf16.msra.mxu1 %v8867_v22  ;;  %vm14028_vm5 = vcmp.ne.s16.totalorder %v14027_v29, 0  ;;  %v4171_v6 = vld [vmem:[#allocation2 + $0xc] sm:$0x8]  ;;  %v3873_v28 = vsel %vm14031_vm8, %v3868_v32, %v3872_v55  ;;  %v7833_v55 = vcombine.low %v4206_v48, %v4207_v13  ;;  %v3890_v43 = vshrl.u32 %v7809_v30, 16  ;;  %v4177_v2 = vld [vmem:[#allocation2 + $0x24] sm:$0xf] }
 0x291   : > { %8539 = vmatprep.subr.bf16.mxu1 %v8868_v34  ;;  %v3678_v22 = vsel %vm14028_vm5, %v3194_v11, 0  ;;  %v11656_v11 = vpop.f32.mrf.mxu1  ;;  %v3881_v14 = vsel %vm14037_vm4, %v3876_v5, %v3880_v31  ;;  %vm14039_vm5 = vmmov %vm14036_vm3  ;;  %v7811_v5 = vcombine.low %v3680_v46, %v3680_v46 }
 0x292   : > { %v11649_v54 = vcombine.low %v3678_v22, %v3679_v61  ;;  %14030 = vst [vmem:[#allocation76_spill] sm:$0xff] %v11656_v11  ;;  %v4204_v61 = vsel %vm14033_vm6, %v4171_v6, 0  ;;  %v14034_v22 = vld [vmem:[#allocation17_spill] sm:$0xff]  ;;  %v3888_v6 = vrot.slane %v3886_v20, 1  ;;  %v4338_v16 = vshrl.u32 %v7833_v55, 16  ;;  %vm14049_vm6 = vmmov %vm14036_vm3 }
 0x293   : > { %vm14035_vm2 = vnez %v14034_v22  ;;  %v11673_v63 = vpop.f32.mrf.mxu1  ;;  %v4341_v57 = vshll.u32 %v7833_v55, 16  ;;  %v4211_v20 = vsel %vm13845_vm11, %v4178_v3, 0  ;;  %v3902_v30 = vshll.u32 %v7811_v5, 16  ;;  %vm14051_vm11 = vmmov %vm14039_vm5 }
 0x294   : > { %8540 = vmatpush3.bf16.msra.mxu1 %v8868_v34  ;;  %v4205_v29 = vsel %vm14035_vm2, %v4172_v25, 0  ;;  %v4176_v34 = vld [vmem:[#allocation2 + $0x20] sm:$0xf]  ;;  %v3894_v23 = vshll.u32 %v11649_v54, 16  ;;  %v4175_v25 = vld [vmem:[#allocation2 + $0x1c] sm:$0xf] }
 0x295   : > { %8613 = vmatprep.subr.bf16.mxu1 %v11644_v56  ;;  %v7832_v32 = vcombine.low %v4204_v61, %v4205_v29  ;;  %v4209_v0 = vsel %vm10097_vm15, %v4176_v34, 0  ;;  %14041 = vst [vmem:[#allocation78_spill] sm:$0xff] %v11673_v63  ;;  %v14043_v29 = vld [vmem:[#allocation55_spill] sm:$0xff]  ;;  %v11680_v63 = vpop.f32.mrf.mxu1  ;;  %vm14046_vm15 = vmmov %vm14037_vm4  ;;  %v4340_v3 = vrot.slane %v4338_v16, 3  ;;  %v4343_v55 = vrot.slane %v4341_v57, 4 }
 0x296   : > { %v3896_v19 = vrot.slane %v3894_v23, 1  ;;  %vm14044_vm0 = vnez %v14043_v29  ;;  %14045 = vst [vmem:[#allocation80_spill] sm:$0xff] %v11680_v63  ;;  %v14047_v23 = vld [vmem:[#allocation64_spill] sm:$0xff] }
 0x297   : > { %8522 = vmatmul.mubr.msk.bf16.gmra.mxu1 %vm14036_vm3, %v3873_v28  ;;  %v3882_v28 = vshrl.u32 %v11623_v40, 16  ;;  %v4208_v61 = vsel %vm14044_vm0, %v4175_v25, 0  ;;  %v4330_v11 = vshrl.u32 %v7832_v32, 16  ;;  %v4333_v34 = vshll.u32 %v7832_v32, 16  ;;  %vm14050_vm3 = vmmov %vm14037_vm4  ;;  %v4180_v25 = vld [vmem:[#allocation2 + $0x30] sm:$0xf]  ;;  %v11689_v5 = vpop.f32.mrf.mxu1 }
 0x298   : > { %8525 = vmatprep.mubr.msk.bf16.mxu1 %vm14039_vm5, %v3881_v14  ;;  %v3892_v14 = vor.u32 %v3890_v43, %v3888_v6  ;;  %v7834_v7 = vcombine.low %v4208_v61, %v4209_v0  ;;  %vm14048_vm8 = vnez %v14047_v23  ;;  %v4179_v43 = vld [vmem:[#allocation2 + $0x2c] sm:$0xf]  ;;  %v3898_v32 = vshrl.u32 %v11649_v54, 16  ;;  %14052 = vst [vmem:[#allocation81_spill] sm:$0xff] %v11689_v5  ;;  %v14053_v61 = vld [vmem:[#allocation70_spill] sm:$0xff] }
 0x299   : > { %v3884_v13 = vor.u32 %v3882_v28, %v3880_v31  ;;  %v4210_v46 = vsel %vm14048_vm8, %v4177_v2, 0  ;;  %v4332_v0 = vrot.slane %v4330_v11, 3  ;;  %v4335_v48 = vrot.slane %v4333_v34, 4  ;;  %v14058_v11 = vld [vmem:[#allocation75_spill] sm:$0xff] }
 0x29a   : > { %v3897_v31 = vsel %vm14050_vm3, %v3892_v14, %v3896_v19  ;;  %v7835_v28 = vcombine.low %v4210_v46, %v4211_v20  ;;  %v4347_v2 = vshrl.u32 %v7834_v7, 16  ;;  %v4350_v29 = vshll.u32 %v7834_v7, 16 }
 0x29b   : > { %v3889_v40 = vsel %vm14046_vm15, %v3884_v13, %v3888_v6  ;;  %v4182_v6 = vld [vmem:[#allocation2 + $0x38] sm:$0xf]  ;;  %v3904_v13 = vrot.slane %v3902_v30, 1  ;;  %vm14054_vm4 = vnez %v14053_v61  ;;  %v4344_v16 = vor.u32 %v4343_v55, %v4340_v3  ;;  %vm14060_vm15 = vmmov %vm14050_vm3 }
 0x29c   : > { %v4213_v14 = vsel %vm14054_vm4, %v4180_v25, 0  ;;  %v4356_v57 = vshrl.u32 %v7835_v28, 16  ;;  %v4359_v20 = vshll.u32 %v7835_v28, 16  ;;  %v3900_v23 = vor.u32 %v3898_v32, %v3896_v19  ;;  %v11693_v46 = vpop.f32.mrf.mxu1  ;;  %v14061_v25 = vld [vmem:[#allocation74_spill] sm:$0xff] }
 0x29d   : > { %14055 = vst [vmem:[#allocation82_spill] sm:$0xff] %v11693_v46  ;;  %vm14059_vm0 = vnez %v14058_v11  ;;  %v4336_v5 = vor.u32 %v4335_v48, %v4332_v0  ;;  %v4349_v63 = vrot.slane %v4347_v2, 3  ;;  %v4352_v61 = vrot.slane %v4350_v29, 4  ;;  %v4184_v0 = vld [vmem:[#allocation2 + $0x40] sm:$0xf]  ;;  %v14068_v11 = vld [vmem:[#allocation33_spill] sm:$0xff] }
 0x29e   : > { %v4215_v34 = vsel %vm14059_vm0, %v4182_v6, 0  ;;  %v3905_v7 = vsel %vm14060_vm15, %v3900_v23, %v3904_v13  ;;  %vm14062_vm8 = vnez %v14061_v25  ;;  %vm14063_vm3 = vsmask.f32 4352  ;;  %v4186_v13 = vld [vmem:[#allocation2 + $0x48] sm:$0xf] }
 0x29f   : > { %8526 = vmatmul.mubr.msk.bf16.gmra.mxu1 %vm14049_vm6, %v3889_v40  ;;  %v4181_v40 = vld [vmem:[#allocation2 + $0x34] sm:$0xf]  ;;  %v4345_v19 = vsel %vm14063_vm3, %v4336_v5, %v4344_v16  ;;  %v4358_v55 = vrot.slane %v4356_v57, 3  ;;  %v4361_v28 = vrot.slane %v4359_v20, 4  ;;  %v4353_v2 = vor.u32 %v4352_v61, %v4349_v63  ;;  %v4183_v29 = vld [vmem:[#allocation2 + $0x3c] sm:$0xf]  ;;  %vm14074_vm15 = vmmov %vm14063_vm3 }
 0x2a0   : > { %8529 = vmatprep.mubr.msk.bf16.mxu1 %vm14051_vm11, %v3897_v31  ;;  %v14056_v31 = vld [vmem:[#allocation69_spill] sm:$0xff]  ;;  %v4214_v3 = vsel %vm14062_vm8, %v4181_v40, 0  ;;  %vm14065_vm11 = vmmov %vm14049_vm6  ;;  %v4217_v57 = vsel %vm13874_vm13, %v4184_v0, 0  ;;  %v4185_v20 = vld [vmem:[#allocation2 + $0x44] sm:$0xf]  ;;  %vm14069_vm4 = vnez %v14068_v11 }
 0x2a1   : > { %vm14057_vm5 = vnez %v14056_v31  ;;  %v7837_v32 = vcombine.low %v4214_v3, %v4215_v34  ;;  %v4362_v40 = vor.u32 %v4361_v28, %v4358_v55  ;;  %v4219_v34 = vsel %vm14069_vm4, %v4186_v13, 0  ;;  %v14071_v61 = vld [vmem:[#allocation79_spill] sm:$0xff]  ;;  %v4188_v13 = vld [vmem:[#allocation2 + $0x50] sm:$0xf]  ;;  %v4187_v11 = vld [vmem:[#allocation2 + $0x4c] sm:$0xf] }
 0x2a2   : > { %v4212_v54 = vsel %vm14057_vm5, %v4179_v43, 0  ;;  %v11704_v43 = vpop.f32.mrf.mxu1  ;;  %vm14070_vm5 = vmmov %vm14049_vm6  ;;  %vm14072_vm0 = vnez %v14071_v61  ;;  %v4354_v25 = vsel %vm14074_vm15, %v4344_v16, %v4353_v2  ;;  %v4190_v16 = vld [vmem:[#allocation2 + $0x58] sm:$0xf]  ;;  %v4221_v61 = vsel %vm13882_vm10, %v4188_v13, 0 }
 0x2a3   : > { %v7836_v30 = vcombine.low %v4212_v54, %v4213_v14  ;;  %14064 = vst [vmem:[#allocation101_spill] sm:$0xff] %v11704_v43  ;;  %v7958_v14 = vcombine.low %v11433_v50, %v11605_v4  ;;  %v4374_v23 = vshrl.u32 %v7837_v32, 16  ;;  %v4377_v31 = vshll.u32 %v7837_v32, 16  ;;  %vm14077_vm8 = vmmov %vm14070_vm5 }
 0x2a4   : > { %v11711_v54 = vpop.f32.mrf.mxu1  ;;  %v4216_v50 = vsel %vm14072_vm0, %v4183_v29, 0  ;;  %v14073_v4 = vmov 0  }
 0x2a5   : > { %v4365_v48 = vshrl.u32 %v7836_v30, 16  ;;  %v4368_v6 = vshll.u32 %v7836_v30, 16  ;;  %14067 = vst [vmem:[#allocation83_spill] sm:$0xff] %v11711_v54  ;;  %8690 = vmatmul.mubr.msk.bf16.gmra.mxu0 %vm14070_vm5, %v7958_v14  ;;  %v7838_v3 = vcombine.low %v4216_v50, %v4217_v57  ;;  %v4376_v32 = vrot.slane %v4374_v23, 3  ;;  %v8871_v14 = vld [vmem:[#allocation6 + $0xc8] sm:$0xff]  }
 0x2a6   : > { %7039 = vmatprep.mubr.bf16.mxu0 %v14073_v4  ;;  %v4379_v0 = vrot.slane %v4377_v31, 4  ;;  %v4189_v50 = vld [vmem:[#allocation2 + $0x54] sm:$0xf]  ;;  %v4192_v4 = vld [vmem:[#allocation2 + $0x60] sm:$0xf] }
 0x2a7   : > { %8530 = vmatmul.mubr.msk.bf16.gmra.mxu1 %vm14049_vm6, %v3905_v7  ;;  %v4367_v30 = vrot.slane %v4365_v48, 3  ;;  %v4370_v63 = vrot.slane %v4368_v6, 4  ;;  %v8870_v7 = vld [vmem:[#allocation6 + $0xd0] sm:$0xff]   ;;  %vm14078_vm6 = vmmov %vm14063_vm3  ;;  %v11724_v6 = vpop.f32.mrf.mxu1  ;;  %v4383_v57 = vshrl.u32 %v7838_v3, 16 }
 0x2a8   : > { %8541 = vmatprep.mubr.msk.bf16.mxu1 %vm14065_vm11, %v4345_v19  ;;  %v14075_v19 = vld [vmem:[#allocation27_spill] sm:$0xff]  ;;  %v4363_v28 = vsel %vm14078_vm6, %v4353_v2, %v4362_v40  ;;  %14079 = vst [vmem:[#allocation85_spill] sm:$0xff] %v11724_v6  ;;  %vm14080_vm3 = vmmov %vm14070_vm5  ;;  %v4380_v2 = vor.u32 %v4379_v0, %v4376_v32 }
 0x2a9   : > { %vm14076_vm13 = vnez %v14075_v19  ;;  %v4371_v29 = vor.u32 %v4370_v63, %v4367_v30  ;;  %vm14086_vm4 = vmmov %vm14078_vm6  ;;  %v14087_v19 = vld [vmem:[#allocation30_spill] sm:$0xff]  ;;  %v14110_v6 = vld [vmem:[#allocation95_spill] sm:$0xff] }
 0x2aa   : > { %v4218_v55 = vsel %vm14076_vm13, %v4185_v20, 0  ;;  %v4386_v20 = vshll.u32 %v7838_v3, 16  ;;  %vm14088_vm5 = vnez %v14087_v19  ;;  %v8872_v3 = vld [vmem:[#allocation6 + $0xc0] sm:$0xff]   ;;  %vm14091_vm10 = vmmov %vm14080_vm3 }
 0x2ab   : > { %v7839_v48 = vcombine.low %v4218_v55, %v4219_v34  ;;  %v4372_v63 = vsel %vm14086_vm4, %v4362_v40, %v4371_v29  ;;  %v4220_v55 = vsel %vm14088_vm5, %v4187_v11, 0  ;;  %vm14092_vm15 = vmmov %vm14086_vm4  ;;  %v4191_v11 = vld [vmem:[#allocation2 + $0x5c] sm:$0xf] }
 0x2ac   : > { %v4388_v32 = vrot.slane %v4386_v20, 4  ;;  %v7840_v0 = vcombine.low %v4220_v55, %v4221_v61  ;;  %vm14093_vm13 = vmmov %vm14080_vm3  ;;  %v11746_v20 = vld [vmem:[#allocation6 + $0x118] sm:$0xff]   ;;  %v4193_v55 = vld [vmem:[#allocation2 + $0x64] sm:$0xf] }
 0x2ad   : > { %v4392_v23 = vshrl.u32 %v7839_v48, 16  ;;  %v4395_v31 = vshll.u32 %v7839_v48, 16  ;;  %v14089_v48 = vld [vmem:[#allocation31_spill] sm:$0xff]  ;;  %vm14105_vm5 = vmmov %vm14091_vm10 }
 0x2ae   : > { %vm14090_vm0 = vnez %v14089_v48  ;;  %v4404_v19 = vshll.u32 %v7840_v0, 16  ;;  %v14096_v48 = vld [vmem:[#allocation35_spill] sm:$0xff] }
 0x2af   : > { %8542 = vmatmul.mubr.msk.bf16.vlgmr.msra.gmra.mxu1 %vm14077_vm8, %v4354_v25  ;;  %v4222_v13 = vsel %vm14090_vm0, %v4189_v50, 0  ;;  %v4397_v34 = vrot.slane %v4395_v31, 4  ;;  %v4401_v50 = vshrl.u32 %v7840_v0, 16  ;;  %vm14097_vm8 = vnez %v14096_v48  ;;  %v14101_v0 = vld [vmem:[#allocation44_spill] sm:$0xff] }
 0x2b0   : > { %8614 = vmatpush3.bf16.msra.mxu1 %v11644_v56  ;;  %8545 = vmatprep.mubr.msk.bf16.mxu1 %vm14080_vm3, %v4363_v28  ;;  %v11728_v5 = vpop.f32.mrf.mxu1  ;;  %v14083_v56 = vld [vmem:[#allocation39_spill] sm:$0xff]  ;;  %v4385_v28 = vrot.slane %v4383_v57, 3  ;;  %v4194_v57 = vld [vmem:[#allocation2 + $0x68] sm:$0xf]  ;;  %vm14100_vm3 = vmmov %vm14086_vm4 }
 0x2b1   : > { %8615 = vmatprep.subr.bf16.mxu1 %v8870_v7  ;;  %14081 = vst [vmem:[#allocation87_spill] sm:$0xff] %v11728_v5  ;;  %vm14084_vm11 = vnez %v14083_v56  ;;  %vm14104_vm4 = vmmov %vm14100_vm3  ;;  %v14106_v5 = vld [vmem:[#allocation96_spill] sm:$0xff] }
 0x2b2   : > { %v4223_v25 = vsel %vm14084_vm11, %v4190_v16, 0  ;;  %v11734_v30 = vpop.f32.mrf.mxu1  ;;  %v4394_v16 = vrot.slane %v4392_v23, 3  ;;  %v4389_v61 = vor.u32 %v4388_v32, %v4385_v28  ;;  %v4403_v32 = vrot.slane %v4401_v50, 3  ;;  %vm14103_vm11 = vmmov %vm14091_vm10  ;;  %v4198_v50 = vld [vmem:[#allocation2 + $0x78] sm:$0xf] }
 0x2b3   : > { %14085 = vst [vmem:[#allocation88_spill] sm:$0xff] %v11734_v30  ;;  %v7841_v56 = vcombine.low %v4222_v13, %v4223_v25  ;;  %v14098_v13 = vld [vmem:[#allocation92_spill] sm:$0xff]  ;;  %vm14107_vm0 = vnez %v14106_v5 }
 0x2b4   : > { %8616 = vmatpush3.bf16.msra.mxu1 %v8870_v7  ;;  %v4381_v7 = vsel %vm14092_vm15, %v4371_v29, %v4380_v2  ;;  %v11744_v40 = vpop.f32.mrf.mxu1  ;;  %v4225_v29 = vsel %vm10677_vm9, %v4192_v4, 0  ;;  %v4398_v23 = vor.u32 %v4397_v34, %v4394_v16  ;;  %vm14099_vm6 = vnez %v14098_v13 }
 0x2b5   : > { %8617 = vmatprep.subr.bf16.mxu1 %v8871_v14  ;;  %14094 = vst [vmem:[#allocation89_spill] sm:$0xff] %v11744_v40  ;;  %v4410_v31 = vshrl.u32 %v7841_v56, 16  ;;  %v4413_v25 = vshll.u32 %v7841_v56, 16  ;;  %v4390_v28 = vsel %vm14100_vm3, %v4380_v2, %v4389_v61  ;;  %v4406_v4 = vrot.slane %v4404_v19, 4 }
 0x2b6   : > { %v11754_v40 = vpop.f32.mrf.mxu1  ;;  %vm14102_vm9 = vnez %v14101_v0  ;;  %v4399_v56 = vsel %vm14104_vm4, %v4389_v61, %v4398_v23  ;;  %vm14111_vm15 = vnez %v14110_v6  ;;  %v4200_v6 = vld [vmem:[#allocation2 + $0x80] sm:$0xf]  ;;  %vm14118_vm4 = vnez %v13947_v26 }
 0x2b7   : > { %8546 = vmatmul.mubr.msk.bf16.gmra.mxu1 %vm14091_vm10, %v4372_v63  ;;  %v4226_v16 = vsel %vm14102_vm9, %v4193_v55, 0  ;;  %v4196_v63 = vld [vmem:[#allocation2 + $0x70] sm:$0xf]  ;;  %v4407_v19 = vor.u32 %v4406_v4, %v4403_v32  ;;  %vm14116_vm9 = vmmov %vm14105_vm5 }
 0x2b8   : > { %8549 = vmatprep.mubr.msk.bf16.mxu1 %vm14093_vm13, %v4381_v7  ;;  %8618 = vmatpush3.bf16.msra.mxu1 %v8871_v14  ;;  %v4224_v14 = vsel %vm14097_vm8, %v4191_v11, 0  ;;  %v4227_v7 = vsel %vm14099_vm6, %v4194_v57, 0  ;;  %v4412_v11 = vrot.slane %v4410_v31, 3  ;;  %v4229_v61 = vsel %vm14107_vm0, %v4196_v63, 0  ;;  %v4197_v31 = vld [vmem:[#allocation2 + $0x74] sm:$0xf]  ;;  %vm14112_vm13 = vmmov %vm14100_vm3 }
 0x2b9   : > { %8619 = vmatprep.subr.bf16.mxu1 %v8872_v3  ;;  %v7842_v30 = vcombine.low %v4224_v14, %v4225_v29  ;;  %v7843_v57 = vcombine.low %v4226_v16, %v4227_v7  ;;  %v4195_v14 = vld [vmem:[#allocation2 + $0x6c] sm:$0xf]  ;;  %vm14115_vm6 = vmmov %vm14105_vm5  ;;  %vm14120_vm0 = vnez %v13946_v15 }
 0x2ba   : > { %v4228_v32 = vsel %vm14111_vm15, %v4195_v14, 0  ;;  %vm14122_vm15 = vmmov %vm14115_vm6 }
 0x2bb   : > { %v4419_v2 = vshrl.u32 %v7842_v30, 16  ;;  %v4422_v48 = vshll.u32 %v7842_v30, 16  ;;  %v4428_v0 = vshrl.u32 %v7843_v57, 16  ;;  %v4408_v30 = vsel %vm14112_vm13, %v4398_v23, %v4407_v19  ;;  %v4202_v23 = vld [vmem:[#allocation2 + $0x88] sm:$0xf]  ;;  %vm14123_vm13 = vmmov %vm14100_vm3 }
 0x2bc   : > { %8620 = vmatpush3.bf16.msra.mxu1 %v8872_v3  ;;  %v4415_v3 = vrot.slane %v4413_v25, 4  ;;  %v14108_v25 = vld [vmem:[#allocation98_spill] sm:$0xff]  ;;  %v7844_v54 = vcombine.low %v4228_v32, %v4229_v61 }
 0x2bd   : > { %8693 = vmatprep.subr.bf16.mxu1 %v11746_v20  ;;  %v11760_v34 = vpop.f32.mrf.mxu1  ;;  %vm14109_vm10 = vnez %v14108_v25  ;;  %v4424_v4 = vrot.slane %v4422_v48, 4  ;;  %v4430_v63 = vrot.slane %v4428_v0, 3  ;;  %v4199_v32 = vld [vmem:[#allocation2 + $0x7c] sm:$0xf]  ;;  %v4235_v0 = vsel %vm14118_vm4, %v4202_v23, 0 }
 0x2be   : > { %v4416_v13 = vor.u32 %v4415_v3, %v4412_v11  ;;  %v4231_v7 = vsel %vm14109_vm10, %v4198_v50, 0  ;;  %v14113_v11 = vld [vmem:[#allocation48_spill] sm:$0xff]  ;;  %v4437_v14 = vshrl.u32 %v7844_v54, 16  ;;  %v4440_v61 = vshll.u32 %v7844_v54, 16  ;;  %vm14121_vm10 = vmmov %vm14100_vm3 }
 0x2bf   : > { %8550 = vmatmul.mubr.msk.bf16.gmra.mxu1 %vm14103_vm11, %v4390_v28  ;;  %v11765_v29 = vpop.f32.mrf.mxu1  ;;  %v4431_v28 = vshll.u32 %v7843_v57, 16  ;;  %vm14114_vm8 = vnez %v14113_v11  ;;  %vm14117_vm11 = vnez %v13799_v8  ;;  %vm14128_vm4 = vcmp.ne.s16.totalorder %v14032_v39, 0 }
 0x2c0   : > { %8553 = vmatprep.mubr.msk.bf16.mxu1 %vm14105_vm5, %v4399_v56  ;;  %v4421_v56 = vrot.slane %v4419_v2, 3  ;;  %v4230_v3 = vsel %vm14114_vm8, %v4197_v31, 0  ;;  %v4417_v5 = vsel %vm14100_vm3, %v4407_v19, %v4416_v13  ;;  %v4201_v31 = vld [vmem:[#allocation2 + $0x84] sm:$0xf]  ;;  %v4233_v19 = vsel %vm14117_vm11, %v4200_v6, 0  ;;  %vm14124_vm8 = vmmov %vm14115_vm6 }
 0x2c1   : > { %v11767_v55 = vpop.f32.mrf.mxu1  ;;  %v4433_v50 = vrot.slane %v4431_v28, 4  ;;  %v7845_v25 = vcombine.low %v4230_v3, %v4231_v7  ;;  %vm14119_vm5 = vnez %v13794_v59  ;;  %v4234_v54 = vsel %vm14120_vm0, %v4201_v31, 0  ;;  %v4203_v59 = vld [vmem:[#allocation2 + $0x8c] sm:$0xf]  ;;  %vm14127_vm11 = vmmov %vm14100_vm3 }
 0x2c2   : > { %v4425_v48 = vor.u32 %v4424_v4, %v4421_v56  ;;  %v4232_v7 = vsel %vm14119_vm5, %v4199_v32, 0  ;;  %v4439_v4 = vrot.slane %v4437_v14, 3  ;;  %v4442_v3 = vrot.slane %v4440_v61, 4  ;;  %vm14129_vm5 = vmmov %vm14124_vm8 }
 0x2c3   : > { %v11773_v16 = vpop.f32.mrf.mxu1  ;;  %v4434_v43 = vor.u32 %v4433_v50, %v4430_v63  ;;  %v4449_v46 = vshll.u32 %v7845_v25, 16  ;;  %vm14131_vm0 = vmmov %vm14129_vm5 }
 0x2c4   : > { %v4426_v56 = vsel %vm14121_vm10, %v4416_v13, %v4425_v48  ;;  %v4443_v15 = vor.u32 %v4442_v3, %v4439_v4 }
 0x2c5   : > { %v4435_v8 = vsel %vm14123_vm13, %v4425_v48, %v4434_v43  ;;  %v4451_v50 = vrot.slane %v4449_v46, 4  ;;  %v5301_v48 = vld [vmem:[#allocation2 + $0x14] sm:$0x8] }
 0x2c7   : > { %v11780_v57 = vpop.f32.mrf.mxu1  ;;  %8554 = vmatmul.mubr.msk.bf16.gmra.mxu1 %vm14115_vm6, %v4408_v30  ;;  %v4446_v30 = vshrl.u32 %v7845_v25, 16  ;;  %v7847_v25 = vcombine.low %v4234_v54, %v4235_v0  ;;  %vm14125_vm6 = vcmp.ne.s16.totalorder %v14005_v21, 0 }
 0x2c8   : > { %8557 = vmatprep.mubr.msk.bf16.mxu1 %vm14116_vm9, %v4417_v5  ;;  %v7846_v5 = vcombine.low %v4232_v7, %v4233_v19  ;;  %v4236_v19 = vsel %vm14125_vm6, %v4203_v59, 0  ;;  %v4444_v7 = vsel %vm14100_vm3, %v4434_v43, %v4443_v15  ;;  %vm14126_vm9 = vmmov %vm14124_vm8 }
 0x2c9   : > { %v11785_v2 = vpop.f32.mrf.mxu1  ;;  %v4448_v26 = vrot.slane %v4446_v30, 3  ;;  %v4464_v32 = vshrl.u32 %v7847_v25, 16  ;;  %v4467_v31 = vshll.u32 %v7847_v25, 16  ;;  %v8919_v30 = vld [vmem:[#allocation2 + $0x18] sm:$0xf]  ;;  %v7848_v4 = vcombine.low %v4236_v19, %v4236_v19 }
 0x2ca   : > { %v4455_v23 = vshrl.u32 %v7846_v5, 16  ;;  %v4458_v13 = vshll.u32 %v7846_v5, 16  ;;  %v5335_v46 = vsel %vm14035_vm2, %v8919_v30, 0  ;;  %vm14130_vm2 = vmmov %vm14100_vm3 }
 0x2cb   : > { %v11787_v11 = vpop.f32.mrf.mxu1  ;;  %v4452_v61 = vor.u32 %v4451_v50, %v4448_v26  ;;  %v4466_v21 = vrot.slane %v4464_v32, 3  ;;  %v5334_v26 = vsel %vm14128_vm4, %v5301_v48, 0  ;;  %v4473_v25 = vshrl.u32 %v7848_v4, 16  ;;  %vm14132_vm10 = vmmov %vm14130_vm2 }
 0x2cc   : > { %v4457_v54 = vrot.slane %v4455_v23, 3  ;;  %v7906_v22 = vcombine.low %v5334_v26, %v5335_v46  ;;  %v4476_v59 = vshll.u32 %v7848_v4, 16  ;;  %vm14134_vm13 = vmmov %vm14130_vm2 }
 0x2cd   : > { %v11793_v28 = vpop.f32.mrf.mxu1  ;;  %v4453_v5 = vsel %vm14127_vm11, %v4443_v15, %v4452_v61  ;;  %vm14136_vm6 = vmmov %vm14130_vm2 }
 0x2ce   : > { %v5460_v30 = vshrl.u32 %v7906_v22, 16  ;;  %v5463_v15 = vshll.u32 %v7906_v22, 16  ;;  %v4478_v39 = vrot.slane %v4476_v59, 4  ;;  %vm14137_vm3 = vmmov %vm14131_vm0 }
 0x2cf   : > { %v11800_v63 = vpop.f32.mrf.mxu1  ;;  %8558 = vmatmul.mubr.msk.bf16.gmra.mxu1 %vm14122_vm15, %v4426_v56  ;;  %v4460_v56 = vrot.slane %v4458_v13, 4  ;;  %vm14133_vm15 = vmmov %vm14131_vm0 }
 0x2d0   : > { %8561 = vmatprep.mubr.msk.bf16.mxu1 %vm14124_vm8, %v4435_v8  ;;  %v4469_v8 = vrot.slane %v4467_v31, 4  ;;  %v4475_v31 = vrot.slane %v4473_v25, 3  ;;  %vm14135_vm8 = vmmov %vm14131_vm0 }
 0x2d1   : > { %v11805_v6 = vpop.f32.mrf.mxu1  ;;  %v4461_v43 = vor.u32 %v4460_v56, %v4457_v54  ;;  %v5462_v54 = vrot.slane %v5460_v30, 3  ;;  %v5465_v56 = vrot.slane %v5463_v15, 4  ;;  %v8874_v30 = vld [vmem:[#allocation6 + $0x110] sm:$0xff]   ;;  %vm14139_vm11 = vmmov %vm14131_vm0 }
 0x2d2   : > { %v4470_v13 = vor.u32 %v4469_v8, %v4466_v21  ;;  %v4479_v4 = vor.u32 %v4478_v39, %v4475_v31  ;;  %v8876_v39 = vld [vmem:[#allocation6 + $0x100] sm:$0xff]   ;;  %vm14140_vm4 = vmmov %vm14131_vm0 }
 0x2d3   : > { %v11807_v14 = vpop.f32.mrf.mxu1  ;;  %v4462_v32 = vsel %vm14130_vm2, %v4452_v61, %v4461_v43  ;;  %v5466_v61 = vor.u32 %v5465_v56, %v5462_v54  ;;  %vm14142_vm2 = vmmov %vm14131_vm0 }
 0x2d4   : > { %v4471_v46 = vsel %vm14132_vm10, %v4461_v43, %v4470_v13  ;;  %v4480_v8 = vsel %vm14134_vm13, %v4470_v13, %v4479_v4  ;;  %v8875_v13 = vld [vmem:[#allocation6 + $0x108] sm:$0xff]   ;;  %vm14143_vm10 = vmmov %vm14131_vm0 }
 0x2d5   : > { %v11813_v0 = vpop.f32.mrf.mxu1  ;;  %v5475_v22 = vsel %vm14136_vm6, %v5466_v61, %v11462_v52  ;;  %vm14145_vm13 = vmmov %vm14131_vm0 }
 0x2d7   : > { %v11816_v3 = vpop.f32.mrf.mxu1  ;;  %8562 = vmatmul.mubr.msk.bf16.gmra.mxu1 %vm14126_vm9, %v4444_v7  ;;  %vm14138_vm9 = vmmov %vm14131_vm0 }
 0x2d8   : > { %8565 = vmatprep.mubr.msk.bf16.mxu1 %vm14129_vm5, %v4453_v5  ;;  %vm14141_vm5 = vmmov %vm14131_vm0 }
 0x2d9   : > { %v11823_v50 = vpop.f32.mrf.mxu1 }
 0x2db   : > { %v11825_v23 = vpop.f32.mrf.mxu1 }
 0x2dd   : > { %v11827_v19 = vpop.f32.mrf.mxu1 }
 0x2df   : > { %v11830_v48 = vpop.f32.mrf.mxu1  ;;  %8566 = vmatmul.mubr.msk.bf16.gmra.mxu1 %vm14131_vm0, %v4462_v32 }
 0x2e0   : > { %8569 = vmatprep.mubr.msk.bf16.mxu1 %vm14133_vm15, %v4471_v46  ;;  %vm14144_vm15 = vmmov %vm14131_vm0 }
 0x2e1   : > { %v11835_v7 = vpop.f32.mrf.mxu1 }
 0x2e3   : > { %v11837_v5 = vpop.f32.mrf.mxu1 }
 0x2e5   : > { %v11839_v21 = vpop.f32.mrf.mxu1 }
 0x2e7   : > { %v11842_v26 = vpop.f32.mrf.mxu1  ;;  %8570 = vmatmul.mubr.msk.bf16.gmra.mxu1 %vm14135_vm8, %v4480_v8  ;;  %vm14146_vm8 = vmmov %vm14131_vm0 }
 0x2e8   : > { %8621 = vmatprep.mubr.msk.bf16.mxu1 %vm14137_vm3, %v5475_v22  ;;  %v2692_v22 = vadd.f32 %v11780_v57, %v11481_v12  ;;  %v2695_v12 = vadd.f32 %v11787_v11, %v11519_v10  ;;  %v2700_v11 = vadd.f32 %v11805_v6, %v11549_v51  ;;  %v6230_v6 = vld [vmem:[#allocation2 + $0x18] sm:$0xf]  ;;  %vm14149_vm3 = vmmov %vm14131_vm0 }
 0x2e9   : > { %v11848_v43 = vpop.f32.mrf.mxu1 }
 0x2eb   : > { %v11850_v25 = vpop.f32.mrf.mxu1 }
 0x2ed   : > { %v11852_v59 = vpop.f32.mrf.mxu1 }
 0x2ef   : > { %v11854_v15 = vpop.f32.mrf.mxu1  ;;  %8622 = vmatmul.mubr.msk.bf16.vlgmr.msra.gmra.mxu1 %vm14138_vm9, %v11469_v1  ;;  %vm14150_vm9 = vmmov %vm14131_vm0 }
 0x2f0   : > { %8694 = vmatpush3.bf16.msra.mxu1 %v11746_v20  ;;  %8625 = vmatprep.mubr.msk.bf16.mxu1 %vm14139_vm11, %v11473_v24 }
 0x2f1   : > { %v11861_v52 = vpop.f32.mrf.mxu1  ;;  %8695 = vmatprep.subr.bf16.mxu1 %v8874_v30 }
 0x2f3   : > { %v11863_v32 = vpop.f32.mrf.mxu1 }
 0x2f4   : > { %8696 = vmatpush3.bf16.msra.mxu1 %v8874_v30 }
 0x2f5   : > { %v11865_v31 = vpop.f32.mrf.mxu1  ;;  %8697 = vmatprep.subr.bf16.mxu1 %v8875_v13 }
 0x2f7   : > { %v11867_v46 = vpop.f32.mrf.mxu1  ;;  %8626 = vmatmul.mubr.msk.bf16.gmra.mxu1 %vm14140_vm4, %v11476_v53 }
 0x2f8   : > { %8629 = vmatprep.mubr.msk.bf16.mxu1 %vm14141_vm5, %v11484_v62  ;;  %8698 = vmatpush3.bf16.msra.mxu1 %v8875_v13 }
 0x2f9   : > { %v11873_v1 = vpop.f32.mrf.mxu1  ;;  %8699 = vmatprep.subr.bf16.mxu1 %v8876_v39 }
 0x2fb   : > { %v11875_v24 = vpop.f32.mrf.mxu1 }
 0x2fc   : > { %8700 = vmatpush3.bf16.msra.mxu1 %v8876_v39 }
 0x2fd   : > { %v2782_v20 = vpop.f32.mrf.mxu1 }
 0x2fe   : > { %v11878_v54 = vadd.f32 %v2782_v20, %v11754_v40 }
 0x2ff   : > { %v8451_v56 = vpop.f32.mrf.mxu1  ;;  %8630 = vmatmul.mubr.msk.bf16.gmra.mxu1 %vm14142_vm2, %v11487_v38 }
 0x300   : > { %v11883_v53 = vadd.f32 %v8451_v56, %v11760_v34  ;;  %8633 = vmatprep.mubr.msk.bf16.mxu1 %vm14131_vm0, %v11499_v58  ;;  %v11900_v58 = vpop.f32.mrf.mxu0 }
 0x301   : > { %v2795_v62 = vpop.f32.mrf.mxu1 }
 0x302   : > { %v11888_v4 = vadd.f32 %v2795_v62, %v11765_v29  ;;  %v2684_v29 = vadd.f32 %v11785_v2, %v11504_v42  ;;  %v11912_v13 = vpop.f32.mrf.mxu0  ;;  %v2708_v2 = vadd.f32 %v11800_v63, %v11543_v45  ;;  %v2711_v45 = vadd.f32 %v11807_v14, %v11556_v18  ;;  %v6231_v62 = vld [vmem:[#allocation2 + $0x1c] sm:$0xf]  ;;  %v14147_v14 = vld [vmem:[#allocation20_spill] sm:$0xff] }
 0x303   : > { %v8452_v61 = vpop.f32.mrf.mxu1  ;;  %vm14148_vm6 = vnez %v14147_v14 }
 0x304   : > { %v11891_v8 = vadd.f32 %v8452_v61, %v11767_v55  ;;  %v11924_v10 = vpop.f32.mrf.mxu0 }
 0x305   : > { %v2798_v40 = vpop.f32.mrf.mxu1 }
 0x306   : > { %v11896_v38 = vadd.f32 %v2798_v40, %v11773_v16  ;;  %v11936_v61 = vpop.f32.mrf.mxu0 }
 0x307   : > { %v8463_v34 = vpop.f32.mrf.mxu1  ;;  %8634 = vmatmul.mubr.msk.bf16.gmra.mxu1 %vm14143_vm10, %v11502_v37  ;;  %v2687_v37 = vadd.f32 %v11793_v28, %v11537_v60  ;;  %vm14166_vm10 = vmmov %vm14131_vm0 }
 0x308   : > { %v11904_v30 = vadd.f32 %v8463_v34, %v2692_v22  ;;  %8637 = vmatprep.mubr.msk.bf16.mxu1 %vm14144_vm15, %v11508_v36  ;;  %v6233_v22 = vld [vmem:[#allocation2 + $0x24] sm:$0xf]  ;;  %v11942_v34 = vpop.f32.mrf.mxu0 }
 0x309   : > { %v3005_v55 = vpop.f32.mrf.mxu1 }
 0x30a   : > { %v11910_v16 = vadd.f32 %v3005_v55, %v2684_v29  ;;  %v6264_v29 = vsel %vm14148_vm6, %v6231_v62, 0 }
 0x30b   : > { %v8464_v57 = vpop.f32.mrf.mxu1 }
 0x30c   : > { %v11916_v39 = vadd.f32 %v8464_v57, %v2695_v12  ;;  %v14151_v57 = vld [vmem:[#allocation19_spill] sm:$0xff] }
 0x30d   : > { %v3008_v42 = vpop.f32.mrf.mxu1  ;;  %vm14152_vm11 = vcmp.ne.s16.totalorder %v14151_v57, 0  ;;  %v14164_v57 = vld [vmem:[#allocation63_spill] sm:$0xff] }
 0x30e   : > { %v11920_v20 = vadd.f32 %v3008_v42, %v2687_v37 }
 0x30f   : > { %v8467_v36 = vpop.f32.mrf.mxu1  ;;  %8638 = vmatmul.mubr.msk.bf16.gmra.mxu1 %vm14145_vm13, %v11511_v35  ;;  %v2703_v35 = vadd.f32 %v11813_v0, %v11566_v41  ;;  %v6232_v41 = vld [vmem:[#allocation2 + $0x20] sm:$0xf]  ;;  %v2716_v0 = vadd.f32 %v11823_v50, %v11580_v44  ;;  %v14156_v44 = vld [vmem:[#allocation22_spill] sm:$0xff] }
 0x310   : > { %v11928_v56 = vadd.f32 %v8467_v36, %v2708_v2  ;;  %8641 = vmatprep.mubr.msk.bf16.mxu1 %vm14146_vm8, %v11522_v47  ;;  %v2724_v47 = vadd.f32 %v11816_v3, %v11574_v17  ;;  %v6263_v17 = vsel %vm14152_vm11, %v6230_v6, 0  ;;  %v14153_v3 = vld [vmem:[#allocation51_spill] sm:$0xff]  ;;  %v11962_v36 = vpop.f32.mrf.mxu0  ;;  %vm14157_vm5 = vcmp.ne.s16.totalorder %v14156_v44, 0  ;;  %v6234_v6 = vld [vmem:[#allocation2 + $0x28] sm:$0xf]  ;;  %vm14184_vm11 = vmmov %vm14131_vm0 }
 0x311   : > { %v3021_v60 = vpop.f32.mrf.mxu1  ;;  %vm14154_vm4 = vnez %v14153_v3  ;;  %v7979_v2 = vcombine.low %v6263_v17, %v6264_v29  ;;  %v6265_v50 = vsel %vm14157_vm5, %v6232_v41, 0  ;;  %v14161_v29 = vld [vmem:[#allocation60_spill] sm:$0xff]  ;;  %v2732_v17 = vadd.f32 %v11835_v7, %v14164_v57 }
 0x312   : > { %v11934_v28 = vadd.f32 %v3021_v60, %v2700_v11  ;;  %v6266_v37 = vsel %vm14154_vm4, %v6233_v22, 0  ;;  %v6237_v22 = vld [vmem:[#allocation2 + $0x34] sm:$0xf]  ;;  %vm14162_vm2 = vnez %v14161_v29 }
 0x313   : > { %v8468_v63 = vpop.f32.mrf.mxu1 }
 0x314   : > { %v11940_v40 = vadd.f32 %v8468_v63, %v2711_v45  ;;  %v6235_v45 = vld [vmem:[#allocation2 + $0x2c] sm:$0xf]  ;;  %v2719_v63 = vadd.f32 %v11827_v19, %v11600_v33  ;;  %v6236_v19 = vld [vmem:[#allocation2 + $0x30] sm:$0xf] }
 0x315   : > { %v3024_v51 = vpop.f32.mrf.mxu1 }
 0x316   : > { %v11946_v18 = vadd.f32 %v3024_v51, %v2703_v35  ;;  %v6391_v51 = vshll.u32 %v7979_v2, 16 }
 0x317   : > { %v8471_v55 = vpop.f32.mrf.mxu1  ;;  %8642 = vmatmul.mubr.msk.bf16.gmra.mxu1 %vm14149_vm3, %v11525_v27  ;;  %v2727_v27 = vadd.f32 %v11825_v23, %v11594_v9  ;;  %v14159_v9 = vld [vmem:[#allocation66_spill] sm:$0xff]  ;;  %vm14180_vm3 = vmmov %vm14131_vm0 }
 0x318   : > { %v11954_v12 = vadd.f32 %v8471_v55, %v2724_v47  ;;  %8645 = vmatprep.mubr.msk.bf16.mxu1 %vm14150_vm9, %v11530_v49  ;;  %v11970_v49 = vcombine.low %v6265_v50, %v6266_v37  ;;  %v11976_v47 = vpop.f32.mrf.mxu0  ;;  %v2740_v23 = vadd.f32 %v11830_v48, %v14159_v9  ;;  %v6268_v55 = vsel %vm14162_vm2, %v6235_v45, 0  ;;  %v14165_v37 = vld [vmem:[#allocation54_spill] sm:$0xff]  ;;  %v14167_v48 = vld [vmem:[#allocation23_spill] sm:$0xff] }
 0x319   : > { %v3037_v42 = vpop.f32.mrf.mxu1  ;;  %vm14168_vm15 = vcmp.ne.s16.totalorder %v14167_v48, 0  ;;  %vm14181_vm9 = vsmask.f32 7424 }
 0x31a   : > { %v11966_v11 = vadd.f32 %v3037_v42, %v2716_v0  ;;  %v14163_v0 = vld [vmem:[#allocation59_spill] sm:$0xff]  ;;  %v6396_v33 = vshll.u32 %v11970_v49, 16  ;;  %v6267_v42 = vsel %vm14168_vm15, %v6234_v6, 0  ;;  %vm14198_vm15 = vmmov %vm14180_vm3 }
 0x31b   : > { %v8472_v60 = vpop.f32.mrf.mxu1  ;;  %v7981_v45 = vcombine.low %v6267_v42, %v6268_v55 }
 0x31c   : > { %14155 = vst [vmem:[#allocation90_spill] sm:$0xff] %v11966_v11  ;;  %v11974_v62 = vadd.f32 %v8472_v60, %v2727_v27  ;;  %v14169_v27 = vld [vmem:[#allocation67_spill] sm:$0xff]  ;;  %v6393_v60 = vrot.slane %v6391_v51, 1  ;;  %v6398_v57 = vrot.slane %v6396_v33, 1  ;;  %v14175_v51 = vld [vmem:[#allocation73_spill] sm:$0xff]  ;;  %v14177_v33 = vld [vmem:[#allocation72_spill] sm:$0xff] }
 0x31d   : > { %v3040_v35 = vpop.f32.mrf.mxu1  ;;  %vm14170_vm13 = vnez %v14169_v27  ;;  %v2735_v55 = vadd.f32 %v11839_v21, %v14175_v51  ;;  %v6238_v27 = vld [vmem:[#allocation2 + $0x38] sm:$0xf]  ;;  %vm14178_vm6 = vnez %v14177_v33 }
 0x31e   : > { %14158 = vst [vmem:[#allocation91_spill] sm:$0xff] %v11974_v62  ;;  %v11980_v14 = vadd.f32 %v3040_v35, %v2719_v63  ;;  %v6270_v44 = vsel %vm14170_vm13, %v6237_v22, 0  ;;  %v11997_v63 = vpop.f32.mrf.mxu0  ;;  %v14171_v35 = vld [vmem:[#allocation68_spill] sm:$0xff] }
 0x31f   : > { %v8475_v41 = vpop.f32.mrf.mxu1  ;;  %8646 = vmatmul.mubr.msk.bf16.gmra.mxu1 %vm14131_vm0, %v14163_v0  ;;  %v2743_v9 = vadd.f32 %v11837_v5, %v14171_v35  ;;  %v6389_v0 = vshrl.u32 %v7979_v2, 16  ;;  %v14176_v35 = vld [vmem:[#allocation76_spill] sm:$0xff]  ;;  %vm14195_vm0 = vmmov %vm14181_vm9 }
 0x320   : > { %14160 = vst [vmem:[#allocation93_spill] sm:$0xff] %v11980_v14  ;;  %v11989_v3 = vadd.f32 %v8475_v41, %v2740_v23  ;;  %8649 = vmatprep.mubr.msk.bf16.mxu1 %vm14166_vm10, %v14165_v37  ;;  %v14172_v23 = vld [vmem:[#allocation24_spill] sm:$0xff]  ;;  %v6239_v37 = vld [vmem:[#allocation2 + $0x3c] sm:$0xf]  ;;  %v12007_v22 = vpop.f32.mrf.mxu0  ;;  %vm14199_vm13 = vmmov %vm14195_vm0 }
 0x321   : > { %v3053_v50 = vpop.f32.mrf.mxu1  ;;  %vm14173_vm8 = vcmp.ne.s16.totalorder %v14172_v23, 0  ;;  %14174 = vst [vmem:[#allocation58_spill] sm:$0xff] %v12007_v22  ;;  %v6394_v5 = vor.u32 %v6393_v60, %v6389_v0  ;;  %v6240_v60 = vld [vmem:[#allocation2 + $0x40] sm:$0xf]  ;;  %v14183_v0 = vld [vmem:[#allocation78_spill] sm:$0xff]  ;;  %v14189_v14 = vld [vmem:[#allocation80_spill] sm:$0xff] }
 0x322   : > { %v12001_v7 = vadd.f32 %v3053_v50, %v2732_v17  ;;  %v6269_v29 = vsel %vm14173_vm8, %v6236_v19, 0  ;;  %v6404_v17 = vshll.u32 %v7981_v45, 16  ;;  %v6241_v50 = vld [vmem:[#allocation2 + $0x44] sm:$0xf]  ;;  %v2756_v19 = vadd.f32 %v11842_v26, %v14176_v35  ;;  %vm14202_vm8 = vmmov %vm14180_vm3 }
 0x323   : > { %v8476_v41 = vpop.f32.mrf.mxu1  ;;  %v12005_v6 = vcombine.low %v6269_v29, %v6270_v44  ;;  %v6272_v44 = vsel %vm14178_vm6, %v6239_v37, 0  ;;  %v14179_v29 = vld [vmem:[#allocation71_spill] sm:$0xff]  ;;  %v6399_v21 = vsel %vm14181_vm9, %v6394_v5, %v6398_v57  ;;  %v2748_v51 = vadd.f32 %v11848_v43, %v14183_v0  ;;  %v14190_v43 = vld [vmem:[#allocation26_spill] sm:$0xff] }
 0x324   : > { %v12011_v48 = vadd.f32 %v8476_v41, %v2743_v9  ;;  %v12023_v41 = vpop.f32.mrf.mxu0  ;;  %v6406_v5 = vrot.slane %v6404_v17, 1  ;;  %v2759_v62 = vadd.f32 %v11850_v25, %v14189_v14  ;;  %vm14191_vm2 = vcmp.ne.s16.totalorder %v14190_v43, 0  ;;  %v14193_v17 = vld [vmem:[#allocation81_spill] sm:$0xff]  ;;  %v14196_v43 = vld [vmem:[#allocation32_spill] sm:$0xff] }
 0x325   : > { %v3056_v42 = vpop.f32.mrf.mxu1  ;;  %v6412_v9 = vshll.u32 %v12005_v6, 16  ;;  %14182 = vst [vmem:[#allocation61_spill] sm:$0xff] %v12023_v41  ;;  %v6400_v41 = vshrl.u32 %v11970_v49, 16  ;;  %vm14197_vm10 = vnez %v14196_v43  ;;  %v6416_v43 = vshrl.u32 %v12005_v6, 16 }
 0x326   : > { %v12015_v2 = vadd.f32 %v3056_v42, %v2735_v55  ;;  %v14185_v55 = vld [vmem:[#allocation25_spill] sm:$0xff] }
 0x327   : > { %v8479_v23 = vpop.f32.mrf.mxu1  ;;  %8650 = vmatmul.mubr.msk.bf16.gmra.mxu1 %vm14180_vm3, %v14179_v29  ;;  %vm14186_vm4 = vcmp.ne.s16.totalorder %v14185_v55, 0  ;;  %v14187_v42 = vld [vmem:[#allocation77_spill] sm:$0xff]  ;;  %v6414_v0 = vrot.slane %v6412_v9, 1  ;;  %v6243_v55 = vld [vmem:[#allocation2 + $0x4c] sm:$0xf] }
 0x328   : > { %v12027_v26 = vadd.f32 %v8479_v23, %v2756_v19  ;;  %8701 = vmatprep.mubr.msk.bf16.mxu1 %vm14184_vm11, %v6399_v21  ;;  %v6271_v37 = vsel %vm14186_vm4, %v6238_v27, 0  ;;  %vm14188_vm5 = vnez %v14187_v42  ;;  %v6273_v19 = vsel %vm14191_vm2, %v6240_v60, 0  ;;  %v6242_v42 = vld [vmem:[#allocation2 + $0x48] sm:$0xf]  ;;  %v14194_v60 = vld [vmem:[#allocation82_spill] sm:$0xff]  ;;  %vm14213_vm11 = vmmov %vm14195_vm0 }
 0x329   : > { %v6274_v35 = vsel %vm14188_vm5, %v6241_v50, 0  ;;  %v3069_v33 = vpop.f32.mrf.mxu1  ;;  %v7983_v29 = vcombine.low %v6271_v37, %v6272_v44  ;;  %v6408_v21 = vshrl.u32 %v7981_v45, 16  ;;  %v12043_v50 = vpop.f32.mrf.mxu0  ;;  %v2751_v44 = vadd.f32 %v11852_v59, %v14193_v17  ;;  %v14205_v17 = vld [vmem:[#allocation34_spill] sm:$0xff]  ;;  %vm14216_vm5 = vmmov %vm14202_vm8 }
 0x32a   : > { %v12037_v11 = vadd.f32 %v3069_v33, %v2748_v51  ;;  %v12041_v27 = vcombine.low %v6273_v19, %v6274_v35  ;;  %14192 = vst [vmem:[#allocation47_spill] sm:$0xff] %v12043_v50  ;;  %v6402_v37 = vor.u32 %v6400_v41, %v6398_v57  ;;  %v6245_v33 = vld [vmem:[#allocation2 + $0x54] sm:$0xf]  ;;  %v2772_v45 = vadd.f32 %v11854_v15, %v14194_v60  ;;  %v6244_v57 = vld [vmem:[#allocation2 + $0x50] sm:$0xf]  ;;  %v14207_v60 = vld [vmem:[#allocation83_spill] sm:$0xff] }
 0x32b   : > { %v8480_v23 = vpop.f32.mrf.mxu1  ;;  %v6410_v14 = vor.u32 %v6408_v21, %v6406_v5  ;;  %v6420_v51 = vshll.u32 %v7983_v29, 16  ;;  %v6276_v19 = vsel %vm14197_vm10, %v6243_v55, 0  ;;  %v12059_v41 = vpop.f32.mrf.mxu0  ;;  %vm14206_vm3 = vnez %v14205_v17  ;;  %vm14217_vm2 = vmmov %vm14195_vm0 }
 0x32c   : > { %v12047_v25 = vadd.f32 %v8480_v23, %v2759_v62  ;;  %v6407_v35 = vsel %vm14195_vm0, %v6402_v37, %v6406_v5  ;;  %v6428_v62 = vshll.u32 %v12041_v27, 16  ;;  %14200 = vst [vmem:[#allocation21_spill] sm:$0xff] %v12059_v41  ;;  %v14201_v23 = vld [vmem:[#allocation101_spill] sm:$0xff]  ;;  %vm14219_vm0 = vmmov %vm14216_vm5 }
 0x32d   : > { %v3072_v49 = vpop.f32.mrf.mxu1  ;;  %v6415_v59 = vsel %vm14199_vm13, %v6410_v14, %v6414_v0  ;;  %v2764_v15 = vadd.f32 %v11861_v52, %v14201_v23  ;;  %v14203_v5 = vld [vmem:[#allocation29_spill] sm:$0xff] }
 0x32e   : > { %v12051_v9 = vadd.f32 %v3072_v49, %v2751_v44  ;;  %vm14204_vm6 = vcmp.ne.s16.totalorder %v14203_v5, 0  ;;  %v6278_v44 = vsel %vm14206_vm3, %v6245_v33, 0  ;;  %v6422_v49 = vrot.slane %v6420_v51, 1  ;;  %v14208_v52 = vld [vmem:[#allocation37_spill] sm:$0xff]  ;;  %v6247_v5 = vld [vmem:[#allocation2 + $0x5c] sm:$0xf]  ;;  %v12079_v33 = vpop.f32.mrf.mxu0  ;;  %vm14230_vm3 = vmmov %vm14219_vm0 }
 0x32f   : > { %v8483_v50 = vpop.f32.mrf.mxu1  ;;  %8702 = vmatmul.mubr.msk.bf16.vlgmr.msra.gmra.mxu1 %vm14198_vm15, %v6407_v35  ;;  %v6275_v55 = vsel %vm14204_vm6, %v6242_v42, 0  ;;  %v2775_v35 = vadd.f32 %v11863_v32, %v14207_v60  ;;  %vm14209_vm9 = vcmp.ne.s16.totalorder %v14208_v52, 0  ;;  %v6430_v23 = vrot.slane %v6428_v62, 1  ;;  %14210 = vst [vmem:[#allocation109_spill] sm:$0xff] %v12079_v33  ;;  %v14211_v51 = vld [vmem:[#allocation85_spill] sm:$0xff]  ;;  %v14214_v52 = vld [vmem:[#allocation38_spill] sm:$0xff] }
 0x330   : > { %v12063_v21 = vadd.f32 %v8483_v50, %v2772_v45  ;;  %8705 = vmatprep.mubr.msk.bf16.mxu1 %vm14202_vm8, %v6415_v59  ;;  %v7985_v14 = vcombine.low %v6275_v55, %v6276_v19  ;;  %v6277_v50 = vsel %vm14209_vm9, %v6244_v57, 0  ;;  %v6424_v59 = vshrl.u32 %v7983_v29, 16  ;;  %v6249_v60 = vld [vmem:[#allocation2 + $0x64] sm:$0xf]  ;;  %vm14227_vm8 = vmmov %vm14217_vm2 }
 0x331   : > { %v3085_v37 = vpop.f32.mrf.mxu1  ;;  %v12077_v42 = vcombine.low %v6277_v50, %v6278_v44  ;;  %v2767_v19 = vadd.f32 %v11865_v31, %v14211_v51  ;;  %v6418_v55 = vor.u32 %v6416_v43, %v6414_v0  ;;  %v14212_v57 = vld [vmem:[#allocation87_spill] sm:$0xff]  ;;  %vm14215_vm4 = vnez %v14214_v52  ;;  %v12095_v43 = vpop.f32.mrf.mxu0  ;;  %v14222_v51 = vld [vmem:[#allocation41_spill] sm:$0xff]  ;;  %vm14231_vm9 = vmmov %vm14217_vm2 }
 0x332   : > { %v12073_v41 = vadd.f32 %v3085_v37, %v2764_v15  ;;  %v6426_v15 = vor.u32 %v6424_v59, %v6422_v49  ;;  %v6436_v17 = vshll.u32 %v7985_v14, 16  ;;  %v6246_v37 = vld [vmem:[#allocation2 + $0x58] sm:$0xf]  ;;  %v2788_v29 = vadd.f32 %v11867_v46, %v14212_v57  ;;  %v14224_v57 = vld [vmem:[#allocation89_spill] sm:$0xff] }
 0x333   : > { %v8484_v45 = vpop.f32.mrf.mxu1  ;;  %v6423_v44 = vsel %vm14213_vm11, %v6418_v55, %v6422_v49  ;;  %v6280_v50 = vsel %vm14215_vm4, %v6247_v5, 0  ;;  %v6444_v0 = vshll.u32 %v12077_v42, 16  ;;  %v14220_v49 = vld [vmem:[#allocation40_spill] sm:$0xff]  ;;  %vm14223_vm15 = vnez %v14222_v51  ;;  %vm14233_vm11 = vmmov %vm14219_vm0 }
 0x334   : > { %v12083_v32 = vadd.f32 %v8484_v45, %v2775_v35  ;;  %v6431_v31 = vsel %vm14217_vm2, %v6426_v15, %v6430_v23  ;;  %v6248_v35 = vld [vmem:[#allocation2 + $0x60] sm:$0xf]  ;;  %v14218_v45 = vld [vmem:[#allocation88_spill] sm:$0xff]  ;;  %vm14221_vm10 = vcmp.ne.s16.totalorder %v14220_v49, 0  ;;  %v6432_v52 = vshrl.u32 %v12041_v27, 16 }
 0x335   : > { %v3088_v6 = vpop.f32.mrf.mxu1  ;;  %v2780_v46 = vadd.f32 %v11873_v1, %v14218_v45  ;;  %v6279_v5 = vsel %vm14221_vm10, %v6246_v37, 0  ;;  %v14225_v1 = vld [vmem:[#allocation43_spill] sm:$0xff]  ;;  %v6446_v45 = vrot.slane %v6444_v0, 1  ;;  %v6251_v49 = vld [vmem:[#allocation2 + $0x6c] sm:$0xf] }
 0x336   : > { %v12087_v62 = vadd.f32 %v3088_v6, %v2767_v19  ;;  %v6282_v19 = vsel %vm14223_vm15, %v6249_v60, 0  ;;  %v6438_v6 = vrot.slane %v6436_v17, 1  ;;  %v7987_v15 = vcombine.low %v6279_v5, %v6280_v50  ;;  %v12115_v60 = vpop.f32.mrf.mxu0  ;;  %v6250_v27 = vld [vmem:[#allocation2 + $0x68] sm:$0xf]  ;;  %vm14245_vm15 = vmmov %vm14219_vm0 }
 0x337   : > { %v8487_v33 = vpop.f32.mrf.mxu1  ;;  %8706 = vmatmul.mubr.msk.bf16.gmra.mxu1 %vm14216_vm5, %v6423_v44  ;;  %v2791_v44 = vadd.f32 %v11875_v24, %v14224_v57  ;;  %vm14226_vm13 = vcmp.ne.s16.totalorder %v14225_v1, 0  ;;  %v6434_v17 = vor.u32 %v6432_v52, %v6430_v23 }
 0x338   : > { %v12099_v59 = vadd.f32 %v8487_v33, %v2788_v29  ;;  %8709 = vmatprep.mubr.msk.bf16.mxu1 %vm14219_vm0, %v6431_v31  ;;  %v6281_v33 = vsel %vm14226_vm13, %v6248_v35, 0  ;;  %v6440_v31 = vshrl.u32 %v7985_v14, 16  ;;  %v6452_v51 = vshll.u32 %v7987_v15, 16  ;;  %v14228_v14 = vld [vmem:[#allocation94_spill] sm:$0xff]  ;;  %v12128_v52 = vpop.f32.mrf.mxu0 }
 0x339   : > { %v3101_v55 = vpop.f32.mrf.mxu1  ;;  %v12113_v37 = vcombine.low %v6281_v33, %v6282_v19  ;;  %v6439_v35 = vsel %vm14227_vm8, %v6434_v17, %v6438_v6  ;;  %vm14229_vm6 = vnez %v14228_v14  ;;  %14232 = vst [vmem:[#allocation103_spill] sm:$0xff] %v12128_v52  ;;  %v6255_v33 = vld [vmem:[#allocation2 + $0x7c] sm:$0xf] }
 0x33a   : > { %v12109_v22 = vadd.f32 %v3101_v55, %v2780_v46  ;;  %v6442_v24 = vor.u32 %v6440_v31, %v6438_v6  ;;  %v6253_v46 = vld [vmem:[#allocation2 + $0x74] sm:$0xf]  ;;  %v6284_v0 = vsel %vm14229_vm6, %v6251_v49, 0  ;;  %v8878_v31 = vld [vmem:[%s13137_s7 + $0x30] ss:$8 sps:$4 sm:$0xff]   ;;  %v12152_v52 = vpop.f32.mrf.mxu0 }
 0x33b   : > { %v8488_v29 = vpop.f32.mrf.mxu1  ;;  %v6460_v57 = vshll.u32 %v12113_v37, 16  ;;  %v8880_v49 = vld [vmem:[%s13137_s7 + $0x34] ss:$8 sps:$4 sm:$0xff]   ;;  %14239 = vst [vmem:[#allocation104_spill] sm:$0xff] %v12152_v52 }
 0x33c   : > { %v12117_v50 = vadd.f32 %v8488_v29, %v2791_v44  ;;  %v6447_v23 = vsel %vm14231_vm9, %v6442_v24, %v6446_v45  ;;  %v6252_v44 = vld [vmem:[#allocation2 + $0x70] sm:$0xf]  ;;  %v6286_v29 = vsel %vm13997_vm7, %v6253_v46, 0  ;;  %v6448_v24 = vshrl.u32 %v12077_v42, 16  ;;  %7015 = vmatprep.subr.bf16.mxu0 %v8880_v49  ;;  %vm14240_vm7 = vmmov %vm14217_vm2  ;;  %v6256_v49 = vld [vmem:[#allocation2 + $0x80] sm:$0xf] }
 0x33d   : > { %v3104_v5 = vpop.f32.mrf.mxu1  ;;  %7016 = vmatpush1.bf16.msra.mxu0 %v8878_v31  ;;  %vm14243_vm10 = vmmov %vm14240_vm7 }
 0x33e   : > { %v12120_v55 = vadd.f32 %v3104_v5, %v11878_v54  ;;  %v14234_v54 = vld [vmem:[#allocation45_spill] sm:$0xff]  ;;  %v6454_v5 = vrot.slane %v6452_v51, 1  ;;  %v6450_v51 = vor.u32 %v6448_v24, %v6446_v45  ;;  %v12166_v24 = vpop.f32.mrf.mxu0 }
 0x33f   : > { %v8491_v19 = vpop.f32.mrf.mxu1  ;;  %8710 = vmatmul.mubr.msk.bf16.gmra.mxu1 %vm14230_vm3, %v6439_v35  ;;  %vm14235_vm4 = vcmp.ne.s16.totalorder %v14234_v54, 0  ;;  %14244 = vst [vmem:[#allocation50_spill] sm:$0xff] %v12166_v24  ;;  %vm14253_vm3 = vmmov %vm14240_vm7 }
 0x340   : > { %v12131_v1 = vadd.f32 %v8491_v19, %v11883_v53  ;;  %8713 = vmatprep.mubr.msk.bf16.mxu1 %vm14233_vm11, %v6447_v23  ;;  %v6283_v6 = vsel %vm14235_vm4, %v6250_v27, 0  ;;  %v14237_v27 = vld [vmem:[#allocation52_spill] sm:$0xff]  ;;  %v6456_v19 = vshrl.u32 %v7987_v15, 16  ;;  %v6462_v23 = vrot.slane %v6460_v57, 1  ;;  %v14241_v57 = vld [vmem:[#allocation53_spill] sm:$0xff]  ;;  %vm14257_vm11 = vmmov %vm14219_vm0 }
 0x341   : > { %v3117_v17 = vpop.f32.mrf.mxu1  ;;  %v7989_v53 = vcombine.low %v6283_v6, %v6284_v0  ;;  %vm14238_vm5 = vcmp.ne.s16.totalorder %v14237_v27, 0  ;;  %v6257_v27 = vld [vmem:[#allocation2 + $0x84] sm:$0xf]  ;;  %v6455_v15 = vsel %vm14240_vm7, %v6450_v51, %v6454_v5  ;;  %vm14242_vm2 = vnez %v14241_v57  ;;  %v14250_v57 = vld [vmem:[#allocation62_spill] sm:$0xff]  ;;  %vm14258_vm4 = vmmov %vm14253_vm3 }
 0x342   : > { %v12146_v35 = vadd.f32 %v3117_v17, %v11888_v4  ;;  %v6285_v14 = vsel %vm14238_vm5, %v6252_v44, 0  ;;  %v6458_v4 = vor.u32 %v6456_v19, %v6454_v5  ;;  %v6254_v17 = vld [vmem:[#allocation2 + $0x78] sm:$0xf]  ;;  %vm14251_vm6 = vcmp.ne.s16.totalorder %v14250_v57, 0  ;;  %vm14260_vm5 = vmmov %vm14219_vm0 }
 0x343   : > { %v8492_v46 = vpop.f32.mrf.mxu1  ;;  %v12150_v54 = vcombine.low %v6285_v14, %v6286_v29  ;;  %v6468_v6 = vshll.u32 %v7989_v53, 16  ;;  %v6288_v29 = vsel %vm14242_vm2, %v6255_v33, 0  ;;  %v6472_v24 = vshrl.u32 %v7989_v53, 16  ;;  %vm14267_vm2 = vmmov %vm14253_vm3 }
 0x344   : > { %v12155_v0 = vadd.f32 %v8492_v46, %v11891_v8  ;;  %v6463_v45 = vsel %vm14243_vm10, %v6458_v4, %v6462_v23  ;;  %v14248_v46 = vld [vmem:[#allocation102_spill] sm:$0xff]  ;;  %v6464_v4 = vshrl.u32 %v12113_v37, 16  ;;  %vm14269_vm10 = vmmov %vm14219_vm0 }
 0x345   : > { %v3120_v42 = vpop.f32.mrf.mxu1  ;;  %v6476_v8 = vshll.u32 %v12150_v54, 16  ;;  %vm14249_vm8 = vnez %v14248_v46  ;;  %v6470_v51 = vrot.slane %v6468_v6, 1  ;;  %v12184_v46 = vpop.f32.mrf.mxu0 }
 0x346   : > { %v12158_v44 = vadd.f32 %v3120_v42, %v11896_v38  ;;  %v14246_v38 = vld [vmem:[#allocation57_spill] sm:$0xff]  ;;  %v6290_v19 = vsel %vm14249_vm8, %v6257_v27, 0  ;;  %14252 = vst [vmem:[#allocation97_spill] sm:$0xff] %v12184_v46  ;;  %v6466_v27 = vor.u32 %v6464_v4, %v6462_v23 }
 0x347   : > { %v8515_v31 = vpop.f32.mrf.mxu1  ;;  %8714 = vmatmul.mubr.msk.bf16.gmra.mxu1 %vm14219_vm0, %v6455_v15  ;;  %vm14247_vm13 = vcmp.ne.s16.totalorder %v14246_v38, 0  ;;  %v6259_v38 = vld [vmem:[#allocation2 + $0x8c] sm:$0xf]  ;;  %v12200_v4 = vpop.f32.mrf.mxu0 }
 0x348   : > { %v12169_v14 = vadd.f32 %v8515_v31, %v11989_v3  ;;  %8717 = vmatprep.mubr.msk.bf16.mxu1 %vm14245_vm15, %v6463_v45  ;;  %v6287_v5 = vsel %vm14247_vm13, %v6254_v17, 0  ;;  %v6289_v3 = vsel %vm14251_vm6, %v6256_v49, 0  ;;  %v6478_v45 = vrot.slane %v6476_v8, 1  ;;  %v6258_v17 = vld [vmem:[#allocation2 + $0x88] sm:$0xf]  ;;  %v14254_v8 = vld [vmem:[#allocation105_spill] sm:$0xff]  ;;  %vm14271_vm13 = vmmov %vm14219_vm0 }
 0x349   : > { %v4060_v33 = vpop.f32.mrf.mxu1  ;;  %v7991_v42 = vcombine.low %v6287_v5, %v6288_v29  ;;  %v12182_v52 = vcombine.low %v6289_v3, %v6290_v19  ;;  %v6474_v29 = vor.u32 %v6472_v24, %v6470_v51  ;;  %v6260_v5 = vld [vmem:[#allocation2 + $0x90] sm:$0xf]  ;;  %v6471_v53 = vsel %vm14253_vm3, %v6466_v27, %v6470_v51  ;;  %14259 = vst [vmem:[#allocation100_spill] sm:$0xff] %v12200_v4  ;;  %v14261_v51 = vld [vmem:[#allocation107_spill] sm:$0xff]  ;;  %vm14273_vm6 = vmmov %vm14219_vm0 }
 0x34a   : > { %v12178_v15 = vadd.f32 %v4060_v33, %v12001_v7  ;;  %v6261_v33 = vld [vmem:[#allocation2 + $0x94] sm:$0xf]  ;;  %vm14255_vm9 = vcmp.ne.s16.totalorder %v14254_v8, 0  ;;  %v6292_v3 = vsel %vm11111_vm12, %v6259_v38, 0  ;;  %vm14262_vm7 = vcmp.ne.s16.totalorder %v14261_v51, 0  ;;  %vm14266_vm12 = vmmov %vm14219_vm0 }
 0x34b   : > { %v8516_v31 = vpop.f32.mrf.mxu1  ;;  %v6484_v7 = vshll.u32 %v7991_v42, 16  ;;  %v6291_v19 = vsel %vm14255_vm9, %v6258_v17, 0  ;;  %v6492_v24 = vshll.u32 %v12182_v52, 16  ;;  %v6294_v38 = vsel %vm11171_vm14, %v6261_v33, 0  ;;  %v8881_v27 = vld [vmem:[%s13137_s7 + $0x20] ss:$8 sps:$4 sm:$0xff]   ;;  %v12220_v17 = vpop.f32.mrf.mxu0  ;;  %vm14265_vm14 = vmmov %vm14253_vm3 }
 0x34c   : > { %v12187_v6 = vadd.f32 %v8516_v31, %v12011_v48  ;;  %v6479_v48 = vsel %vm14258_vm4, %v6474_v29, %v6478_v45  ;;  %v6293_v31 = vsel %vm14262_vm7, %v6260_v5, 0  ;;  %v6480_v8 = vshrl.u32 %v12150_v54, 16  ;;  %v6262_v5 = vld [vmem:[#allocation2 + $0x98] sm:$0x1]  ;;  %vm14307_vm3 = vmmov %vm14219_vm0 }
 0x34d   : > { %v4063_v37 = vpop.f32.mrf.mxu1  ;;  %v6488_v33 = vshrl.u32 %v7991_v42, 16  ;;  %v7994_v51 = vcombine.low %v6293_v31, %v6294_v38  ;;  %vm14309_vm9 = vmmov %vm14219_vm0 }
 0x34e   : > { %v12190_v49 = vadd.f32 %v4063_v37, %v12015_v2  ;;  %v8883_v37 = vld [vmem:[%s13137_s7 + $0x24] ss:$8 sps:$4 sm:$0xff]   ;;  %v6482_v4 = vor.u32 %v6480_v8, %v6478_v45  ;;  %vm14311_vm4 = vmmov %vm14219_vm0 }
 0x34f   : > { %v8519_v23 = vpop.f32.mrf.mxu1  ;;  %8718 = vmatmul.mubr.msk.bf16.gmra.mxu1 %vm14257_vm11, %v6471_v53  ;;  %v6486_v53 = vrot.slane %v6484_v7, 1  ;;  %7017 = vmatprep.subr.bf16.mxu0 %v8883_v37  ;;  %v6508_v38 = vshll.u32 %v7994_v51, 16  ;;  %vm14310_vm11 = vmmov %vm14219_vm0 }
 0x350   : > { %v12203_v2 = vadd.f32 %v8519_v23, %v12027_v26  ;;  %8721 = vmatprep.mubr.msk.bf16.mxu1 %vm14260_vm5, %v6479_v48  ;;  %v7993_v26 = vcombine.low %v6291_v19, %v6292_v3  ;;  %v6494_v48 = vrot.slane %v6492_v24, 1  ;;  %7018 = vmatpush1.bf16.msra.mxu0 %v8881_v27  ;;  %vm14312_vm5 = vmmov %vm14219_vm0 }
 0x351   : > { %v4076_v29 = vpop.f32.mrf.mxu1  ;;  %v6490_v19 = vor.u32 %v6488_v33, %v6486_v53  ;;  %v6487_v42 = vsel %vm14265_vm14, %v6482_v4, %v6486_v53  ;;  %v6510_v33 = vrot.slane %v6508_v38, 1  ;;  %vm14313_vm7 = vmmov %vm14219_vm0 }
 0x352   : > { %v12218_v57 = vadd.f32 %v4076_v29, %v12037_v11  ;;  %v6500_v3 = vshll.u32 %v7993_v26, 16  ;;  %v6295_v11 = vsel %vm11164_vm1, %v6262_v5, 0  ;;  %v6504_v45 = vshrl.u32 %v7993_v26, 16  ;;  %vm14268_vm1 = vmmov %vm14267_vm2 }
 0x353   : > { %v8520_v23 = vpop.f32.mrf.mxu1  ;;  %v6495_v31 = vsel %vm14267_vm2, %v6490_v19, %v6494_v48  ;;  %v7995_v37 = vcombine.low %v6295_v11, %v6295_v11  ;;  %v6496_v5 = vshrl.u32 %v12182_v52, 16  ;;  %vm14270_vm15 = vmmov %vm14268_vm1 }
 0x354   : > { %v12223_v46 = vadd.f32 %v8520_v23, %v12047_v25  ;;  %v12233_v25 = vpop.f32.mrf.mxu0  ;;  %vm14272_vm8 = vmmov %vm14268_vm1 }
 0x355   : > { %v4079_v7 = vpop.f32.mrf.mxu1  ;;  %v6516_v54 = vshll.u32 %v7995_v37, 16  ;;  %vm14314_vm14 = vmmov %vm14219_vm0 }
 0x356   : > { %v12228_v29 = vadd.f32 %v4079_v7, %v12051_v9  ;;  %v6502_v9 = vrot.slane %v6500_v3, 1  ;;  %v12243_v26 = vpop.f32.mrf.mxu0  ;;  %v6498_v7 = vor.u32 %v6496_v5, %v6494_v48  ;;  %vm14316_vm2 = vmmov %vm14219_vm0 }
 0x357   : > { %v8523_v24 = vpop.f32.mrf.mxu1  ;;  %8722 = vmatmul.mubr.msk.bf16.gmra.mxu1 %vm14266_vm12, %v6487_v42  ;;  %vm14315_vm12 = vmmov %vm14219_vm0 }
 0x358   : > { %v12236_v27 = vadd.f32 %v8523_v24, %v12063_v21  ;;  %8725 = vmatprep.mubr.msk.bf16.mxu1 %vm14219_vm0, %v6495_v31  ;;  %v6506_v23 = vor.u32 %v6504_v45, %v6502_v9  ;;  %v6512_v21 = vshrl.u32 %v7994_v51, 16  ;;  %v6503_v52 = vsel %vm14268_vm1, %v6498_v7, %v6502_v9  ;;  %v12254_v24 = vpop.f32.mrf.mxu0  ;;  %v8886_v31 = vld [vmem:[%s13137_s7 + $0x14] ss:$8 sps:$4 sm:$0xff]   ;;  %vm14317_vm1 = vmmov %vm14219_vm0 }
 0x359   : > { %v4092_v8 = vpop.f32.mrf.mxu1  ;;  %v6518_v51 = vrot.slane %v6516_v54, 1  ;;  %7019 = vmatprep.subr.bf16.mxu0 %v8886_v31 }
 0x35a   : > { %v12241_v4 = vadd.f32 %v4092_v8, %v12073_v41  ;;  %v6511_v41 = vsel %vm14270_vm15, %v6506_v23, %v6510_v33  ;;  %vm14319_vm15 = vmmov %vm14219_vm0 }
 0x35b   : > { %v8524_v53 = vpop.f32.mrf.mxu1 }
 0x35c   : > { %v12246_v19 = vadd.f32 %v8524_v53, %v12083_v32  ;;  %v6514_v32 = vor.u32 %v6512_v21, %v6510_v33 }
 0x35d   : > { %v4095_v42 = vpop.f32.mrf.mxu1 }
 0x35e   : > { %v12249_v11 = vadd.f32 %v4095_v42, %v12087_v62  ;;  %v8884_v62 = vld [vmem:[%s13137_s7 + $0x10] ss:$8 sps:$4 sm:$0xff]   ;;  %v6519_v9 = vsel %vm14272_vm8, %v6514_v32, %v6518_v51  ;;  %vm14321_vm8 = vmmov %vm14219_vm0 }
 0x35f   : > { %v8527_v3 = vpop.f32.mrf.mxu1  ;;  %8726 = vmatmul.mubr.msk.bf16.gmra.mxu1 %vm14269_vm10, %v6503_v52  ;;  %7020 = vmatpush1.bf16.msra.mxu0 %v8884_v62  ;;  %vm14318_vm10 = vmmov %vm14219_vm0 }
 0x360   : > { %v12257_v48 = vadd.f32 %v8527_v3, %v12099_v59  ;;  %8729 = vmatprep.mubr.msk.bf16.mxu1 %vm14271_vm13, %v6511_v41  ;;  %v12269_v59 = vpop.f32.mrf.mxu0  ;;  %v4141_v3 = vadd.f32 %v11900_v58, %v11904_v30  ;;  %v4140_v58 = vadd.f32 %v11936_v61, %v11920_v20  ;;  %v4143_v61 = vadd.f32 %v11962_v36, %v11934_v28  ;;  %v14275_v28 = vld [vmem:[#allocation58_spill] sm:$0xff]  ;;  %vm14320_vm13 = vmmov %vm14219_vm0 }
 0x361   : > { %v4108_v45 = vpop.f32.mrf.mxu1  ;;  %v4149_v36 = vadd.f32 %v14275_v28, %v11954_v12  ;;  %v14280_v12 = vld [vmem:[#allocation93_spill] sm:$0xff] }
 0x362   : > { %v12267_v38 = vadd.f32 %v4108_v45, %v12109_v22  ;;  %v12279_v33 = vpop.f32.mrf.mxu0 }
 0x363   : > { %v8528_v37 = vpop.f32.mrf.mxu1 }
 0x364   : > { %v12272_v8 = vadd.f32 %v8528_v37, %v12117_v50  ;;  %v12287_v54 = vpop.f32.mrf.mxu0 }
 0x365   : > { %v4111_v5 = vpop.f32.mrf.mxu1 }
 0x366   : > { %v12276_v53 = vadd.f32 %v4111_v5, %v12120_v55 }
 0x367   : > { %v8531_v23 = vpop.f32.mrf.mxu1  ;;  %8730 = vmatmul.mubr.msk.bf16.gmra.mxu1 %vm14273_vm6, %v6519_v9  ;;  %vm14322_vm6 = vmmov %vm14219_vm0 }
 0x368   : > { %v12282_v22 = vadd.f32 %v8531_v23, %v12131_v1  ;;  %v12297_v1 = vpop.f32.mrf.mxu0 }
 0x369   : > { %v4124_v7 = vpop.f32.mrf.mxu1 }
 0x36a   : > { %v12285_v21 = vadd.f32 %v4124_v7, %v12146_v35  ;;  %v4139_v35 = vadd.f32 %v11912_v13, %v11910_v16  ;;  %v12305_v45 = vpop.f32.mrf.mxu0  ;;  %v4145_v16 = vadd.f32 %v11942_v34, %v11928_v56  ;;  %v8887_v13 = vld [vmem:[%s13137_s7] ss:$8 sps:$4 sm:$0xff]   ;;  %v4146_v34 = vadd.f32 %v11976_v47, %v11940_v40  ;;  %v14276_v40 = vld [vmem:[#allocation90_spill] sm:$0xff]  ;;  %v14277_v47 = vld [vmem:[#allocation61_spill] sm:$0xff] }
 0x36b   : > { %v8532_v50 = vpop.f32.mrf.mxu1 }
 0x36c   : > { %v12290_v42 = vadd.f32 %v8532_v50, %v12155_v0  ;;  %v4142_v0 = vadd.f32 %v11924_v10, %v11916_v39  ;;  %v8889_v39 = vld [vmem:[%s13137_s7 + $0x4] ss:$8 sps:$4 sm:$0xff]   ;;  %v12324_v5 = vpop.f32.mrf.mxu0 }
 0x36d   : > { %v4127_v55 = vpop.f32.mrf.mxu1  ;;  %7021 = vmatprep.subr.bf16.mxu0 %v8889_v39 }
 0x36e   : > { %v12293_v52 = vadd.f32 %v4127_v55, %v12158_v44  ;;  %7022 = vmatpush1.bf16.msra.mxu0 %v8887_v13  ;;  %v12334_v7 = vpop.f32.mrf.mxu0  ;;  %v4144_v55 = vadd.f32 %v11997_v63, %v11946_v18  ;;  %v14278_v18 = vld [vmem:[#allocation91_spill] sm:$0xff] }
 0x36f   : > { %v8543_v41 = vpop.f32.mrf.mxu1  ;;  %v14279_v63 = vld [vmem:[#allocation47_spill] sm:$0xff] }
 0x370   : > { %v12299_v32 = vadd.f32 %v8543_v41, %v4141_v3 }
 0x371   : > { %v4587_v51 = vpop.f32.mrf.mxu1 }
 0x372   : > { %v4714_v62 = vadd.f32 %v4587_v51, %v4139_v35  ;;  %v12344_v51 = vpop.f32.mrf.mxu0 }
 0x373   : > { %v8544_v31 = vpop.f32.mrf.mxu1 }
 0x374   : > { %v12307_v44 = vadd.f32 %v8544_v31, %v4142_v0  ;;  %v12312_v30 = vadd.f32 %v12095_v43, %v4714_v62  ;;  %v4147_v0 = vadd.f32 %v14277_v47, %v14276_v40 }
 0x375   : > { %v4590_v37 = vpop.f32.mrf.mxu1 }
 0x376   : > { %v12314_v9 = vadd.f32 %v4590_v37, %v4140_v58  ;;  %v12350_v58 = vpop.f32.mrf.mxu0 }
 0x377   : > { %v8547_v10 = vpop.f32.mrf.mxu1 }
 0x378   : > { %14274 = vst [vmem:[#allocation99_spill] sm:$0xff] %v12314_v9  ;;  %v12326_v20 = vadd.f32 %v8547_v10, %v4145_v16  ;;  %v4150_v16 = vadd.f32 %v14279_v63, %v14278_v18  ;;  %v14281_v10 = vld [vmem:[#allocation21_spill] sm:$0xff] }
 0x379   : > { %v4603_v43 = vpop.f32.mrf.mxu1 }
 0x37a   : > { %v12330_v56 = vadd.f32 %v4603_v43, %v4143_v61  ;;  %v4148_v61 = vadd.f32 %v14281_v10, %v14280_v12 }
 0x37b   : > { %v8548_v23 = vpop.f32.mrf.mxu1 }
 0x37c   : > { %v12336_v50 = vadd.f32 %v8548_v23, %v4146_v34  ;;  %v12360_v34 = vpop.f32.mrf.mxu0 }
 0x37d   : > { %v4606_v3 = vpop.f32.mrf.mxu1 }
 0x37e   : > { %v12340_v41 = vadd.f32 %v4606_v3, %v4144_v55 }
 0x37f   : > { %v8551_v35 = vpop.f32.mrf.mxu1 }
 0x380   : > { %v12346_v62 = vadd.f32 %v8551_v35, %v4149_v36  ;;  %v12367_v36 = vpop.f32.mrf.mxu0 }
 0x381   : > { %v4619_v31 = vpop.f32.mrf.mxu1 }
 0x382   : > { %v12352_v37 = vadd.f32 %v4619_v31, %v4147_v0  ;;  %v12375_v31 = vpop.f32.mrf.mxu0 }
 0x383   : > { %v8552_v13 = vpop.f32.mrf.mxu1 }
 0x384   : > { %v12356_v39 = vadd.f32 %v8552_v13, %v4150_v16  ;;  %v12380_v16 = vpop.f32.mrf.mxu0 }
 0x385   : > { %v4622_v43 = vpop.f32.mrf.mxu1 }
 0x386   : > { %v12362_v23 = vadd.f32 %v4622_v43, %v4148_v61  ;;  %v12388_v10 = vpop.f32.mrf.mxu0 }
 0x387   : > { %v8555_v55 = vpop.f32.mrf.mxu1 }
 0x388   : > { %v12365_v3 = vadd.f32 %v8555_v55, %v12169_v14  ;;  %v12396_v55 = vpop.f32.mrf.mxu0 }
 0x389   : > { %v4635_v28 = vpop.f32.mrf.mxu1 }
 0x38a   : > { %v12370_v35 = vadd.f32 %v4635_v28, %v12178_v15 }
 0x38b   : > { %v8556_v40 = vpop.f32.mrf.mxu1 }
 0x38c   : > { %v12373_v47 = vadd.f32 %v8556_v40, %v12187_v6 }
 0x38d   : > { %v4638_v0 = vpop.f32.mrf.mxu1 }
 0x38e   : > { %v12378_v18 = vadd.f32 %v4638_v0, %v12190_v49  ;;  %v12404_v0 = vpop.f32.mrf.mxu0 }
 0x38f   : > { %v8559_v63 = vpop.f32.mrf.mxu1 }
 0x390   : > { %v12383_v14 = vadd.f32 %v8559_v63, %v12203_v2 }
 0x391   : > { %v4651_v13 = vpop.f32.mrf.mxu1 }
 0x392   : > { %v12386_v15 = vadd.f32 %v4651_v13, %v12218_v57  ;;  %v12409_v13 = vpop.f32.mrf.mxu0 }
 0x393   : > { %v8560_v12 = vpop.f32.mrf.mxu1  ;;  %14282 = vst [vmem:[#allocation84_spill] sm:$0xff] %v12409_v13 }
 0x394   : > { %v12391_v6 = vadd.f32 %v8560_v12, %v12223_v46 }
 0x395   : > { %v4654_v61 = vpop.f32.mrf.mxu1 }
 0x396   : > { %v12394_v49 = vadd.f32 %v4654_v61, %v12228_v29 }
 0x397   : > { %v8563_v43 = vpop.f32.mrf.mxu1 }
 0x398   : > { %v12399_v2 = vadd.f32 %v8563_v43, %v12236_v27  ;;  %v12417_v43 = vpop.f32.mrf.mxu0 }
 0x399   : > { %v4667_v28 = vpop.f32.mrf.mxu1  ;;  %14283 = vst [vmem:[#allocation86_spill] sm:$0xff] %v12417_v43 }
 0x39a   : > { %v12402_v57 = vadd.f32 %v4667_v28, %v12241_v4  ;;  %v12425_v9 = vpop.f32.mrf.mxu0 }
 0x39b   : > { %v8564_v40 = vpop.f32.mrf.mxu1  ;;  %14284 = vst [vmem:[#allocation18_spill] sm:$0xff] %v12425_v9 }
 0x39c   : > { %v12407_v46 = vadd.f32 %v8564_v40, %v12246_v19  ;;  %v12433_v13 = vpop.f32.mrf.mxu0 }
 0x39d   : > { %v4670_v63 = vpop.f32.mrf.mxu1  ;;  %14286 = vst [vmem:[#allocation17_spill] sm:$0xff] %v12433_v13 }
 0x39e   : > { %v12412_v29 = vadd.f32 %v4670_v63, %v12249_v11  ;;  %v12441_v43 = vpop.f32.mrf.mxu0 }
 0x39f   : > { %v8567_v12 = vpop.f32.mrf.mxu1 }
 0x3a0   : > { %v12415_v27 = vadd.f32 %v8567_v12, %v12257_v48 }
 0x3a1   : > { %v4683_v61 = vpop.f32.mrf.mxu1 }
 0x3a2   : > { %v12420_v4 = vadd.f32 %v4683_v61, %v12267_v38 }
 0x3a3   : > { %v8568_v28 = vpop.f32.mrf.mxu1 }
 0x3a4   : > { %v12423_v19 = vadd.f32 %v8568_v28, %v12272_v8 }
 0x3a5   : > { %v4686_v40 = vpop.f32.mrf.mxu1 }
 0x3a6   : > { %v12428_v11 = vadd.f32 %v4686_v40, %v12276_v53  ;;  %v14287_v40 = vld [vmem:[#allocation109_spill] sm:$0xff] }
 0x3a7   : > { %v8571_v63 = vpop.f32.mrf.mxu1 }
 0x3a8   : > { %v12431_v48 = vadd.f32 %v8571_v63, %v12282_v22  ;;  %v5271_v22 = vadd.f32 %v14287_v40, %v12299_v32  ;;  %v14292_v32 = vld [vmem:[#allocation104_spill] sm:$0xff] }
 0x3a9   : > { %v4699_v12 = vpop.f32.mrf.mxu1  ;;  %v5275_v40 = vadd.f32 %v14292_v32, %v12326_v20 }
 0x3aa   : > { %14285 = vst [vmem:[#allocation16_spill] sm:$0xff] %v12431_v48  ;;  %v12436_v38 = vadd.f32 %v4699_v12, %v12285_v21  ;;  %v12450_v48 = vpop.f32.mrf.mxu0 }
 0x3ab   : > { %v8572_v61 = vpop.f32.mrf.mxu1  ;;  %14288 = vst [vmem:[#allocation56_spill] sm:$0xff] %v12450_v48  ;;  %v14293_v48 = vld [vmem:[#allocation50_spill] sm:$0xff] }
 0x3ac   : > { %v12439_v8 = vadd.f32 %v8572_v61, %v12290_v42  ;;  %v5272_v42 = vadd.f32 %v12115_v60, %v12307_v44  ;;  %v14294_v44 = vld [vmem:[#allocation97_spill] sm:$0xff] }
 0x3ad   : > { %v4702_v28 = vpop.f32.mrf.mxu1 }
 0x3ae   : > { %v12444_v53 = vadd.f32 %v4702_v28, %v12293_v52  ;;  %v12461_v28 = vpop.f32.mrf.mxu0 }
 0x3af   : > { %v8623_v63 = vpop.f32.mrf.mxu1  ;;  %14291 = vst [vmem:[#allocation64_spill] sm:$0xff] %v12461_v28  ;;  %v14295_v28 = vld [vmem:[#allocation100_spill] sm:$0xff] }
 0x3b0   : > { %v12448_v9 = vadd.f32 %v8623_v63, %v5271_v22  ;;  %v5274_v20 = vadd.f32 %v14295_v28, %v12340_v41  ;;  %v5280_v41 = vadd.f32 %v12243_v26, %v12356_v39  ;;  %v5281_v26 = vadd.f32 %v12279_v33, %v12370_v35 }
 0x3b1   : > { %v5717_v13 = vpop.f32.mrf.mxu1  ;;  %v5287_v33 = vadd.f32 %v12305_v45, %v12383_v14  ;;  %v5286_v45 = vadd.f32 %v12344_v51, %v12394_v49  ;;  %v5292_v51 = vadd.f32 %v12367_v36, %v12407_v46  ;;  %v5293_v36 = vadd.f32 %v12388_v10, %v12420_v4  ;;  %v14296_v10 = vld [vmem:[#allocation16_spill] sm:$0xff] }
 0x3b2   : > { %v12453_v21 = vadd.f32 %v5717_v13, %v12312_v30  ;;  %v5273_v30 = vadd.f32 %v14293_v48, %v12330_v56  ;;  %v5279_v56 = vadd.f32 %v12220_v17, %v12346_v62  ;;  %v5278_v17 = vadd.f32 %v12254_v24, %v12362_v23  ;;  %v14297_v4 = vld [vmem:[#allocation84_spill] sm:$0xff] }
 0x3b3   : > { %v8624_v12 = vpop.f32.mrf.mxu1  ;;  %v5284_v24 = vadd.f32 %v12287_v54, %v12373_v47  ;;  %v5285_v54 = vadd.f32 %v12324_v5, %v12386_v15  ;;  %v5291_v5 = vadd.f32 %v12350_v58, %v12399_v2  ;;  %v5290_v58 = vadd.f32 %v12375_v31, %v12412_v29 }
 0x3b4   : > { %14289 = vst [vmem:[#allocation65_spill] sm:$0xff] %v12453_v21  ;;  %v12457_v61 = vadd.f32 %v8624_v12, %v5272_v42  ;;  %v12469_v21 = vpop.f32.mrf.mxu0  ;;  %v5276_v42 = vadd.f32 %v14294_v44, %v12336_v50  ;;  %v5277_v50 = vadd.f32 %v12233_v25, %v12352_v37  ;;  %v5283_v25 = vadd.f32 %v12269_v59, %v12365_v3 }
 0x3b5   : > { %v12459_v52 = vpop.f32.mrf.mxu1  ;;  %v5282_v59 = vadd.f32 %v12297_v1, %v12378_v18  ;;  %v5288_v1 = vadd.f32 %v12334_v7, %v12391_v6  ;;  %v5289_v7 = vadd.f32 %v12360_v34, %v12402_v57  ;;  %v5295_v34 = vadd.f32 %v12380_v16, %v12415_v27 }
 0x3b6   : > { %14290 = vst [vmem:[#allocation55_spill] sm:$0xff] %v12457_v61  ;;  %v5296_v31 = vadd.f32 %v12396_v55, %v12423_v19  ;;  %v5294_v16 = vadd.f32 %v12404_v0, %v12428_v11  ;;  %v14299_v0 = vld [vmem:[#allocation18_spill] sm:$0xff] }
 0x3b7   : > { %v8627_v22 = vpop.f32.mrf.mxu1  ;;  %v5300_v11 = vadd.f32 %v14299_v0, %v12439_v8  ;;  %v12610_v8 = vld [vmem:[%s13135_s5] ss:$0 sm:$0xff] }
 0x3b8   : > { %v12465_v63 = vadd.f32 %v8627_v22, %v5275_v40  ;;  %v12479_v40 = vpop.f32.mrf.mxu0 }
 0x3b9   : > { %v5733_v13 = vpop.f32.mrf.mxu1 }
 0x3ba   : > { %v12471_v60 = vadd.f32 %v5733_v13, %v5273_v30  ;;  %v12489_v44 = vpop.f32.mrf.mxu0 }
 0x3bb   : > { %v8628_v12 = vpop.f32.mrf.mxu1 }
 0x3bc   : > { %v12475_v61 = vadd.f32 %v8628_v12, %v5276_v42 }
 0x3bd   : > { %v5736_v32 = vpop.f32.mrf.mxu1 }
 0x3be   : > { %v12481_v22 = vadd.f32 %v5736_v32, %v5274_v20  ;;  %v12499_v20 = vpop.f32.mrf.mxu0 }
 0x3bf   : > { %v8631_v48 = vpop.f32.mrf.mxu1 }
 0x3c0   : > { %v12485_v30 = vadd.f32 %v8631_v48, %v5279_v56  ;;  %v12509_v48 = vpop.f32.mrf.mxu0 }
 0x3c1   : > { %v5749_v13 = vpop.f32.mrf.mxu1 }
 0x3c2   : > { %v12491_v42 = vadd.f32 %v5749_v13, %v5277_v50 }
 0x3c3   : > { %v8632_v28 = vpop.f32.mrf.mxu1 }
 0x3c4   : > { %v12495_v12 = vadd.f32 %v8632_v28, %v5280_v41  ;;  %v12519_v41 = vpop.f32.mrf.mxu0 }
 0x3c5   : > { %v5752_v62 = vpop.f32.mrf.mxu1 }
 0x3c6   : > { %v12501_v32 = vadd.f32 %v5752_v62, %v5278_v17  ;;  %v12529_v62 = vpop.f32.mrf.mxu0 }
 0x3c7   : > { %v8635_v37 = vpop.f32.mrf.mxu1 }
 0x3c8   : > { %v12505_v56 = vadd.f32 %v8635_v37, %v5283_v25 }
 0x3c9   : > { %v5765_v39 = vpop.f32.mrf.mxu1 }
 0x3ca   : > { %v12511_v50 = vadd.f32 %v5765_v39, %v5281_v26  ;;  %v12539_v26 = vpop.f32.mrf.mxu0 }
 0x3cb   : > { %v8636_v23 = vpop.f32.mrf.mxu1 }
 0x3cc   : > { %v12515_v13 = vadd.f32 %v8636_v23, %v5284_v24  ;;  %v12549_v23 = vpop.f32.mrf.mxu0 }
 0x3cd   : > { %v5768_v3 = vpop.f32.mrf.mxu1 }
 0x3ce   : > { %v12521_v28 = vadd.f32 %v5768_v3, %v5282_v59 }
 0x3cf   : > { %v8639_v35 = vpop.f32.mrf.mxu1 }
 0x3d0   : > { %v12525_v17 = vadd.f32 %v8639_v35, %v5287_v33  ;;  %v12559_v33 = vpop.f32.mrf.mxu0 }
 0x3d1   : > { %v5781_v47 = vpop.f32.mrf.mxu1 }
 0x3d2   : > { %v12531_v25 = vadd.f32 %v5781_v47, %v5285_v54  ;;  %v12569_v47 = vpop.f32.mrf.mxu0 }
 0x3d3   : > { %v8640_v18 = vpop.f32.mrf.mxu1 }
 0x3d4   : > { %v12535_v37 = vadd.f32 %v8640_v18, %v5288_v1 }
 0x3d5   : > { %v5784_v14 = vpop.f32.mrf.mxu1 }
 0x3d6   : > { %v12541_v39 = vadd.f32 %v5784_v14, %v5286_v45  ;;  %v12579_v45 = vpop.f32.mrf.mxu0 }
 0x3d7   : > { %v8643_v15 = vpop.f32.mrf.mxu1 }
 0x3d8   : > { %v12545_v24 = vadd.f32 %v8643_v15, %v5291_v5  ;;  %v5299_v5 = vadd.f32 %v14297_v4, %v14296_v10 }
 0x3d9   : > { %v5797_v6 = vpop.f32.mrf.mxu1 }
 0x3da   : > { %v12551_v59 = vadd.f32 %v5797_v6, %v5289_v7  ;;  %v14298_v6 = vld [vmem:[#allocation86_spill] sm:$0xff] }
 0x3db   : > { %v8644_v49 = vpop.f32.mrf.mxu1  ;;  %v5297_v55 = vadd.f32 %v14298_v6, %v12436_v38 }
 0x3dc   : > { %v12555_v3 = vadd.f32 %v8644_v49, %v5292_v51  ;;  %v12589_v51 = vpop.f32.mrf.mxu0 }
 0x3dd   : > { %v5800_v2 = vpop.f32.mrf.mxu1 }
 0x3de   : > { %v12561_v35 = vadd.f32 %v5800_v2, %v5290_v58 }
 0x3df   : > { %v8647_v57 = vpop.f32.mrf.mxu1 }
 0x3e0   : > { %v12565_v54 = vadd.f32 %v8647_v57, %v5295_v34  ;;  %v14300_v34 = vld [vmem:[#allocation17_spill] sm:$0xff] }
 0x3e1   : > { %v5813_v46 = vpop.f32.mrf.mxu1  ;;  %v5298_v57 = vadd.f32 %v14300_v34, %v12444_v53  ;;  %v12623_v34 = vld [vmem:[%s13136_s6] ss:$0 sm:$0xff] }
 0x3e2   : > { %v12571_v1 = vadd.f32 %v5813_v46, %v5293_v36  ;;  %v12599_v46 = vpop.f32.mrf.mxu0 }
 0x3e3   : > { %v8648_v29 = vpop.f32.mrf.mxu1 }
 0x3e4   : > { %v12575_v18 = vadd.f32 %v8648_v29, %v5296_v31  ;;  %v14301_v31 = vld [vmem:[#allocation99_spill] sm:$0xff] }
 0x3e5   : > { %v5816_v27 = vpop.f32.mrf.mxu1  ;;  %v14302_v29 = vld [vmem:[#allocation103_spill] sm:$0xff] }
 0x3e6   : > { %v12581_v14 = vadd.f32 %v5816_v27, %v5294_v16  ;;  %v5270_v38 = vadd.f32 %v14302_v29, %v14301_v31  ;;  %v6200_v27 = vadd.f32 %v12441_v43, %v12448_v9  ;;  %v14306_v9 = vld [vmem:[#allocation64_spill] sm:$0xff] }
 0x3e7   : > { %v8651_v15 = vpop.f32.mrf.mxu1 }
 0x3e8   : > { %v12585_v7 = vadd.f32 %v8651_v15, %v5299_v5  ;;  %v5845_v4 = vadd.f32 %v12459_v52, %v5270_v38  ;;  %v14303_v5 = vld [vmem:[#allocation65_spill] sm:$0xff]  ;;  %v14304_v15 = vld [vmem:[#allocation56_spill] sm:$0xff] }
 0x3e9   : > { %v5829_v19 = vpop.f32.mrf.mxu1  ;;  %v6198_v6 = vadd.f32 %v14304_v15, %v14303_v5  ;;  %v6204_v5 = vadd.f32 %v12479_v40, %v12465_v63 }
 0x3ea   : > { %v12591_v49 = vadd.f32 %v5829_v19, %v5297_v55  ;;  %v12615_v19 = vpop.f32.mrf.mxu0  ;;  %v6199_v31 = vadd.f32 %v12469_v21, %v5845_v4 }
 0x3eb   : > { %v8652_v58 = vpop.f32.mrf.mxu1 }
 0x3ec   : > { %v12595_v2 = vadd.f32 %v8652_v58, %v5300_v11  ;;  %v14305_v58 = vld [vmem:[#allocation55_spill] sm:$0xff]  ;;  %v12627_v38 = vpop.f32.mrf.mxu0 }
 0x3ed   : > { %v5832_v36 = vpop.f32.mrf.mxu1  ;;  %v6201_v43 = vadd.f32 %v14306_v9, %v14305_v58 }
 0x3ee   : > { %v12603_v16 = vadd.f32 %v5832_v36, %v5298_v57  ;;  %v12638_v9 = vpop.f32.mrf.mxu0 }
 0x3ef   : > { %v8703_v10 = vpop.f32.mrf.mxu1 }
 0x3f0   : > { %v6755_v53 = vadd.f32 %v8703_v10, %v6200_v27 }
 0x3f1   : > { %v6626_v55 = vpop.f32.mrf.mxu1 }
 0x3f2   : > { %v6794_v0 = vmul.f32 %v12610_v8, %v6755_v53  ;;  %v6753_v11 = vadd.f32 %v6626_v55, %v6198_v6  ;;  %v6202_v6 = vadd.f32 %v12489_v44, %v12471_v60  ;;  %v6205_v60 = vadd.f32 %v12499_v20, %v12475_v61 }
 0x3f3   : > { %v8704_v57 = vpop.f32.mrf.mxu1  ;;  %v6203_v44 = vadd.f32 %v12509_v48, %v12481_v22 }
 0x3f4   : > { %v6792_v52 = vmul.f32 %v12610_v8, %v6753_v11  ;;  %v6756_v36 = vadd.f32 %v8704_v57, %v6201_v43  ;;  %v6833_v27 = vadd.f32 %v12623_v34, %v6794_v0 }
 0x3f5   : > { %v6629_v29 = vpop.f32.mrf.mxu1 }
 0x3f6   : > { %v6795_v10 = vmul.f32 %v12610_v8, %v6756_v36  ;;  %v6754_v53 = vadd.f32 %v6629_v29, %v6199_v31  ;;  %v6831_v55 = vadd.f32 %v12623_v34, %v6792_v52  ;;  %v6865_v0 = vmax.f32 %v6833_v27, 0.0 }
 0x3f7   : > { %v8707_v15 = vpop.f32.mrf.mxu1 }
 0x3f8   : > { %v6834_v11 = vadd.f32 %v12623_v34, %v6795_v10  ;;  %v6793_v21 = vmul.f32 %v12610_v8, %v6754_v53  ;;  %v6759_v4 = vadd.f32 %v8707_v15, %v6204_v5  ;;  %v6863_v52 = vmax.f32 %v6831_v55, 0.0  ;;  %v12647_v5 = vpop.f32.mrf.mxu0 }
 0x3f9   : > { %v6642_v58 = vpop.f32.mrf.mxu1 }
 0x3fa   : > { %v6866_v43 = vmax.f32 %v6834_v11, 0.0  ;;  %v6832_v57 = vadd.f32 %v12623_v34, %v6793_v21  ;;  %v6757_v36 = vadd.f32 %v6642_v58, %v6202_v6  ;;  %v6798_v63 = vmul.f32 %v12610_v8, %v6759_v4 }
 0x3fb   : > { %v8708_v40 = vpop.f32.mrf.mxu1  ;;  %v6208_v11 = vadd.f32 %v12519_v41, %v12485_v30  ;;  %v6206_v4 = vadd.f32 %v12529_v62, %v12491_v42  ;;  %v12660_v30 = vpop.f32.mrf.mxu0 }
 0x3fc   : > { %v6896_v31 = vpack.c.bf16 %v6866_v43, %v6865_v0  ;;  %v6864_v29 = vmax.f32 %v6832_v57, 0.0  ;;  %v6796_v10 = vmul.f32 %v12610_v8, %v6757_v36  ;;  %v6760_v53 = vadd.f32 %v8708_v40, %v6205_v60 }
 0x3fd   : > { %v6645_v27 = vpop.f32.mrf.mxu1  ;;  %v6837_v61 = vadd.f32 %v12623_v34, %v6798_v63  ;;  %v14308_v43 = vmov 0   ;;  %v6209_v63 = vadd.f32 %v12539_v26, %v12495_v12  ;;  %v6212_v26 = vadd.f32 %v12559_v33, %v12505_v56 }
 0x3fe   : > { %v6895_v15 = vpack.c.bf16 %v6864_v29, %v6863_v52  ;;  %v6758_v6 = vadd.f32 %v6645_v27, %v6203_v44  ;;  %v6799_v20 = vmul.f32 %v12610_v8, %v6760_v53  ;;  %v6835_v22 = vadd.f32 %v12623_v34, %v6796_v10 }
 0x3ff   : > { %v8711_v21 = vpop.f32.mrf.mxu1  ;;  %v6869_v60 = vmax.f32 %v6837_v61, 0.0  ;;  %v6207_v53 = vadd.f32 %v12549_v23, %v12501_v32  ;;  %v6210_v32 = vadd.f32 %v12569_v47, %v12511_v50 }
 0x400   : > { %v6797_v48 = vmul.f32 %v12610_v8, %v6758_v6  ;;  %v6763_v55 = vadd.f32 %v8711_v21, %v6208_v11  ;;  %8026 = vmatmul.mubr.msk.bf16.vlgmr.msra.gmra.mxu0 %vm14307_vm3, %v6895_v15  ;;  %v6838_v58 = vadd.f32 %v12623_v34, %v6799_v20  ;;  %v6867_v52 = vmax.f32 %v6835_v22, 0.0  ;;  %v12671_v15 = vpop.f32.mrf.mxu0 }
 0x401   : > { %v6658_v0 = vpop.f32.mrf.mxu1  ;;  %7049 = vmatprep.mubr.bf16.mxu0 %v14308_v43 }
 0x402   : > { %v6836_v41 = vadd.f32 %v12623_v34, %v6797_v48  ;;  %v6802_v57 = vmul.f32 %v12610_v8, %v6763_v55  ;;  %v6761_v36 = vadd.f32 %v6658_v0, %v6206_v4  ;;  %v6870_v40 = vmax.f32 %v6838_v58, 0.0  ;;  %v12686_v56 = vpop.f32.mrf.mxu0 }
 0x403   : > { %v8712_v44 = vpop.f32.mrf.mxu1  ;;  %v6213_v4 = vadd.f32 %v12579_v45, %v12515_v13  ;;  %v6211_v13 = vadd.f32 %v12589_v51, %v12521_v28 }
 0x404   : > { %v6868_v42 = vmax.f32 %v6836_v41, 0.0  ;;  %v6764_v62 = vadd.f32 %v8712_v44, %v6209_v63  ;;  %v12666_v29 = vpack.c.bf16 %v6870_v40, %v6869_v60  ;;  %v6800_v10 = vmul.f32 %v12610_v8, %v6761_v36  ;;  %v12696_v44 = vpop.f32.mrf.mxu0 }
 0x405   : > { %v6661_v27 = vpop.f32.mrf.mxu1  ;;  %v6841_v11 = vadd.f32 %v12623_v34, %v6802_v57 }
 0x406   : > { %v6897_v6 = vpack.c.bf16 %v6868_v42, %v6867_v52  ;;  %v6803_v12 = vmul.f32 %v12610_v8, %v6764_v62  ;;  %v6762_v61 = vadd.f32 %v6661_v27, %v6207_v53  ;;  %v6839_v23 = vadd.f32 %v12623_v34, %v6800_v10 }
 0x407   : > { %v8715_v20 = vpop.f32.mrf.mxu1  ;;  %v6873_v33 = vmax.f32 %v6841_v11, 0.0  ;;  %v6216_v62 = vadd.f32 %v12599_v46, %v12525_v17  ;;  %v6167_v17 = vpop.f32.mrf.mxu0 }
 0x408   : > { %v6842_v21 = vadd.f32 %v12623_v34, %v6803_v12  ;;  %v6767_v22 = vadd.f32 %v8715_v20, %v6212_v26  ;;  %8027 = vmatmul.mubr.msk.bf16.gmra.mxu0 %vm14309_vm9, %v6896_v31  ;;  %v6801_v48 = vmul.f32 %v12610_v8, %v6762_v61  ;;  %v6871_v45 = vmax.f32 %v6839_v23, 0.0 }
 0x409   : > { %v6674_v55 = vpop.f32.mrf.mxu1  ;;  %7059 = vmatprep.mubr.bf16.mxu0 %v14308_v43  ;;  %v6214_v12 = vadd.f32 %v12615_v19, %v12531_v25  ;;  %v6217_v23 = vadd.f32 %v12627_v38, %v12535_v37  ;;  %v6220_v37 = vadd.f32 %v12647_v5, %v12545_v24 }
 0x40a   : > { %v6874_v58 = vmax.f32 %v6842_v21, 0.0  ;;  %v6806_v0 = vmul.f32 %v12610_v8, %v6767_v22  ;;  %v6765_v31 = vadd.f32 %v6674_v55, %v6210_v32  ;;  %v6840_v41 = vadd.f32 %v12623_v34, %v6801_v48 }
 0x40b   : > { %v8716_v50 = vpop.f32.mrf.mxu1 }
 0x40c   : > { %v12690_v47 = vpack.c.bf16 %v6874_v58, %v6873_v33  ;;  %v6804_v57 = vmul.f32 %v12610_v8, %v6765_v31  ;;  %v6768_v36 = vadd.f32 %v8716_v50, %v6213_v4  ;;  %v6872_v63 = vmax.f32 %v6840_v41, 0.0 }
 0x40d   : > { %v6845_v60 = vadd.f32 %v12623_v34, %v6806_v0  ;;  %v6677_v40 = vpop.f32.mrf.mxu1  ;;  %v8688_v0 = vpop.f32.mrf.mxu0 }
 0x40e   : > { %v6807_v52 = vmul.f32 %v12610_v8, %v6768_v36  ;;  %v6766_v42 = vadd.f32 %v6677_v40, %v6211_v13  ;;  %v12701_v10 = vpack.c.bf16 %v6872_v63, %v6871_v45  ;;  %v6843_v53 = vadd.f32 %v12623_v34, %v6804_v57 }
 0x40f   : > { %v8719_v27 = vpop.f32.mrf.mxu1  ;;  %v6877_v26 = vmax.f32 %v6845_v60, 0.0  ;;  %v6218_v36 = vadd.f32 %v12660_v30, %v12551_v59  ;;  %v6170_v63 = vpop.f32.mrf.mxu0  ;;  %v6221_v40 = vadd.f32 %v12671_v15, %v12555_v3 }
 0x410   : > { %v6846_v28 = vadd.f32 %v12623_v34, %v6807_v52  ;;  %v6805_v51 = vmul.f32 %v12610_v8, %v6766_v42  ;;  %v6771_v11 = vadd.f32 %v8719_v27, %v6216_v62  ;;  %8028 = vmatmul.mubr.msk.bf16.gmra.mxu0 %vm14310_vm11, %v6897_v6  ;;  %v6875_v32 = vmax.f32 %v6843_v53, 0.0 }
 0x411   : > { %v6690_v61 = vpop.f32.mrf.mxu1  ;;  %7069 = vmatprep.mubr.bf16.mxu0 %v14308_v43  ;;  %v6215_v6 = vadd.f32 %v12638_v9, %v12541_v39  ;;  %v8691_v53 = vpop.f32.mrf.mxu0 }
 0x412   : > { %v6878_v46 = vmax.f32 %v6846_v28, 0.0  ;;  %v6844_v20 = vadd.f32 %v12623_v34, %v6805_v51  ;;  %v6810_v21 = vmul.f32 %v12610_v8, %v6771_v11  ;;  %v6769_v22 = vadd.f32 %v6690_v61, %v6214_v12 }
 0x413   : > { %v8720_v48 = vpop.f32.mrf.mxu1  ;;  %v6219_v11 = vadd.f32 %v12686_v56, %v12561_v35  ;;  %v6224_v61 = vadd.f32 %v12696_v44, %v12565_v54  ;;  %v6222_v35 = vadd.f32 %v6167_v17, %v12571_v1 }
 0x414   : > { %v12716_v25 = vpack.c.bf16 %v6878_v46, %v6877_v26  ;;  %v6876_v19 = vmax.f32 %v6844_v20, 0.0  ;;  %v6849_v55 = vadd.f32 %v12623_v34, %v6810_v21  ;;  %v6808_v4 = vmul.f32 %v12610_v8, %v6769_v22  ;;  %v6183_v21 = vpop.f32.mrf.mxu0 }
 0x415   : > { %v6772_v33 = vadd.f32 %v8720_v48, %v6217_v23  ;;  %v6693_v58 = vpop.f32.mrf.mxu1  ;;  %v6225_v48 = vadd.f32 %v8688_v0, %v12575_v18 }
 0x416   : > { %v12720_v31 = vpack.c.bf16 %v6876_v19, %v6875_v32  ;;  %v6847_v41 = vadd.f32 %v12623_v34, %v6808_v4  ;;  %v6770_v50 = vadd.f32 %v6693_v58, %v6215_v6  ;;  %v6881_v52 = vmax.f32 %v6849_v55, 0.0 }
 0x417   : > { %v6811_v39 = vmul.f32 %v12610_v8, %v6772_v33  ;;  %v8723_v38 = vpop.f32.mrf.mxu1  ;;  %v6223_v33 = vadd.f32 %v6170_v63, %v12581_v14  ;;  %v6226_v14 = vadd.f32 %v6183_v21, %v12591_v49 }
 0x418   : > { %v6809_v9 = vmul.f32 %v12610_v8, %v6770_v50  ;;  %v6775_v57 = vadd.f32 %v8723_v38, %v6220_v37  ;;  %8029 = vmatmul.mubr.msk.bf16.gmra.mxu0 %vm14311_vm4, %v12666_v29  ;;  %v6879_v42 = vmax.f32 %v6847_v41, 0.0  ;;  %v6228_v37 = vadd.f32 %v8691_v53, %v12585_v7 }
 0x419   : > { %v6850_v13 = vadd.f32 %v12623_v34, %v6811_v39  ;;  %v6706_v45 = vpop.f32.mrf.mxu1  ;;  %7079 = vmatprep.mubr.bf16.mxu0 %v14308_v43 }
 0x41a   : > { %v6848_v24 = vadd.f32 %v12623_v34, %v6809_v9  ;;  %v6814_v5 = vmul.f32 %v12610_v8, %v6775_v57  ;;  %v6773_v60 = vadd.f32 %v6706_v45, %v6218_v36 }
 0x41b   : > { %v6882_v29 = vmax.f32 %v6850_v13, 0.0  ;;  %v8724_v62 = vpop.f32.mrf.mxu1 }
 0x41c   : > { %v6880_v59 = vmax.f32 %v6848_v24, 0.0  ;;  %v6853_v30 = vadd.f32 %v12623_v34, %v6814_v5  ;;  %v6812_v27 = vmul.f32 %v12610_v8, %v6773_v60  ;;  %v6776_v28 = vadd.f32 %v8724_v62, %v6221_v40 }
 0x41d   : > { %v12739_v51 = vpack.c.bf16 %v6882_v29, %v6881_v52  ;;  %v6709_v12 = vpop.f32.mrf.mxu1 }
 0x41e   : > { %v12743_v26 = vpack.c.bf16 %v6880_v59, %v6879_v42  ;;  %v6851_v3 = vadd.f32 %v12623_v34, %v6812_v27  ;;  %v6815_v15 = vmul.f32 %v12610_v8, %v6776_v28  ;;  %v6774_v46 = vadd.f32 %v6709_v12, %v6219_v11 }
 0x41f   : > { %v8727_v20 = vpop.f32.mrf.mxu1  ;;  %v6885_v6 = vmax.f32 %v6853_v30, 0.0 }
 0x420   : > { %v6854_v22 = vadd.f32 %v12623_v34, %v6815_v15  ;;  %v6779_v32 = vadd.f32 %v8727_v20, %v6224_v61  ;;  %8030 = vmatmul.mubr.msk.bf16.gmra.mxu0 %vm14312_vm5, %v12701_v10  ;;  %v6813_v56 = vmul.f32 %v12610_v8, %v6774_v46  ;;  %v8692_v10 = vpop.f32.mrf.mxu0  ;;  %v6883_v18 = vmax.f32 %v6851_v3, 0.0 }
 0x421   : > { %v6722_v23 = vpop.f32.mrf.mxu1  ;;  %7089 = vmatprep.mubr.bf16.mxu0 %v14308_v43  ;;  %v6229_v49 = vadd.f32 %v8692_v10, %v12595_v2 }
 0x422   : > { %v6886_v54 = vmax.f32 %v6854_v22, 0.0  ;;  %v6818_v44 = vmul.f32 %v12610_v8, %v6779_v32  ;;  %v6777_v19 = vadd.f32 %v6722_v23, %v6222_v35  ;;  %v6852_v55 = vadd.f32 %v12623_v34, %v6813_v56  ;;  %v6186_v13 = vpop.f32.mrf.mxu0 }
 0x423   : > { %v8728_v4 = vpop.f32.mrf.mxu1  ;;  %v6227_v29 = vadd.f32 %v6186_v13, %v12603_v16 }
 0x424   : > { %v6906_v58 = vpack.c.bf16 %v6886_v54, %v6885_v6  ;;  %v6857_v1 = vadd.f32 %v12623_v34, %v6818_v44  ;;  %v6816_v17 = vmul.f32 %v12610_v8, %v6777_v19  ;;  %v6780_v41 = vadd.f32 %v8728_v4, %v6225_v48 }
 0x425   : > { %v6884_v0 = vmax.f32 %v6852_v55, 0.0  ;;  %v6725_v50 = vpop.f32.mrf.mxu1 }
 0x426   : > { %v6855_v39 = vadd.f32 %v12623_v34, %v6816_v17  ;;  %v6819_v38 = vmul.f32 %v12610_v8, %v6780_v41  ;;  %v6778_v9 = vadd.f32 %v6725_v50, %v6223_v33  ;;  %v6889_v5 = vmax.f32 %v6857_v1, 0.0  ;;  %v8920_v33 = vld [vmem:[%s9296_s24] sm:$0xff] }
 0x427   : > { %v6905_v57 = vpack.c.bf16 %v6884_v0, %v6883_v18  ;;  %v8731_v36 = vpop.f32.mrf.mxu1  ;;  %v8921_v18 = vld [vmem:[%s9296_s24 + $0x8] sm:$0xff] }
 0x428   : > { %v6858_v45 = vadd.f32 %v12623_v34, %v6819_v38  ;;  %v6817_v63 = vmul.f32 %v12610_v8, %v6778_v9  ;;  %v6783_v24 = vadd.f32 %v8731_v36, %v6228_v37  ;;  %8031 = vmatmul.mubr.msk.bf16.gmra.mxu0 %vm14313_vm7, %v12690_v47  ;;  %v6887_v62 = vmax.f32 %v6855_v39, 0.0  ;;  %v8922_v9 = vld [vmem:[%s9296_s24 + $0x10] sm:$0xff] }
 0x429   : > { %v6738_v7 = vpop.f32.mrf.mxu1  ;;  %7099 = vmatprep.mubr.bf16.mxu0 %v14308_v43 }
 0x42a   : > { %v6890_v60 = vmax.f32 %v6858_v45, 0.0  ;;  %v6856_v40 = vadd.f32 %v12623_v34, %v6817_v63  ;;  %v6822_v52 = vmul.f32 %v12610_v8, %v6783_v24  ;;  %v6781_v42 = vadd.f32 %v6738_v7, %v6226_v14  ;;  %v8923_v63 = vld [vmem:[%s9296_s24 + $0x18] sm:$0xff] }
 0x42b   : > { %v8732_v53 = vpop.f32.mrf.mxu1 }
 0x42c   : > { %v6908_v59 = vpack.c.bf16 %v6890_v60, %v6889_v5  ;;  %v6888_v30 = vmax.f32 %v6856_v40, 0.0  ;;  %v6861_v47 = vadd.f32 %v12623_v34, %v6822_v52  ;;  %v6820_v27 = vmul.f32 %v12610_v8, %v6781_v42  ;;  %v8924_v52 = vld [vmem:[%s9296_s24 + $0x20] sm:$0xff] }
 0x42d   : > { %v6784_v28 = vadd.f32 %v8732_v53, %v6229_v49  ;;  %v6741_v11 = vpop.f32.mrf.mxu1 }
 0x42e   : > { %v6907_v12 = vpack.c.bf16 %v6888_v30, %v6887_v62  ;;  %v6859_v3 = vadd.f32 %v12623_v34, %v6820_v27  ;;  %v6782_v15 = vadd.f32 %v6741_v11, %v6227_v29  ;;  %v6893_v20 = vmax.f32 %v6861_v47, 0.0 }
 0x42f   : > { %v6823_v61 = vmul.f32 %v12610_v8, %v6784_v28 }
 0x430   : > { %v6821_v2 = vmul.f32 %v12610_v8, %v6782_v15  ;;  %8032 = vmatmul.mubr.msk.bf16.gmra.mxu0 %vm14314_vm14, %v12720_v31  ;;  %v6891_v22 = vmax.f32 %v6859_v3, 0.0  ;;  %v14323_v8 = vld [vmem:[#allocation15_spill] sm:$0xff] }
 0x431   : > { %v6862_v16 = vadd.f32 %v12623_v34, %v6823_v61  ;;  %7109 = vmatprep.mubr.bf16.mxu0 %v14308_v43  ;;  %v7208_v31 = vsub.s32 1, %v14323_v8 }
 0x432   : > { %v6860_v46 = vadd.f32 %v12623_v34, %v6821_v2  ;;  %v7204_v34 = vsub.s32 0, %v14323_v8 }
 0x433   : > { %v6894_v21 = vmax.f32 %v6862_v16, 0.0 }
 0x434   : > { %v6892_v32 = vmax.f32 %v6860_v46, 0.0  ;;  %v8927_v46 = vld [vmem:[%s9296_s24 + $0x38] sm:$0xff] }
 0x435   : > { %v6910_v35 = vpack.c.bf16 %v6894_v21, %v6893_v20 }
 0x436   : > { %v6909_v56 = vpack.c.bf16 %v6892_v32, %v6891_v22 }
 0x438   : > { %8033 = vmatmul.mubr.msk.bf16.gmra.mxu0 %vm14315_vm12, %v12716_v25  ;;  %v7200_v25 = vld [vmem:[%s13138_s8] sm:$0x3] }
 0x439   : > { %7119 = vmatprep.mubr.bf16.mxu0 %v14308_v43 }
 0x440   : > { %8034 = vmatmul.mubr.msk.bf16.gmra.mxu0 %vm14316_vm2, %v12743_v26  ;;  %v12812_v26 = vrot.slane %v7200_v25, %v7204_v34 }
 0x441   : > { %7129 = vmatprep.mubr.bf16.mxu0 %v14308_v43 }
 0x448   : > { %8035 = vmatmul.mubr.msk.bf16.gmra.mxu0 %vm14219_vm0, %v12739_v51  ;;  %v7276_v51 = vld [vmem:[%s13139_s9] sm:$0x3] }
 0x449   : > { %7139 = vmatprep.mubr.bf16.mxu0 %v14308_v43  ;;  %v12814_v23 = vrot.slane %v7276_v51, %v7204_v34  ;;  %v12819_v54 = vrot.slane %v7276_v51, %v7208_v31 }
 0x450   : > { %8036 = vmatmul.mubr.msk.bf16.gmra.mxu0 %vm14317_vm1, %v6905_v57 }
 0x451   : > { %7149 = vmatprep.mubr.bf16.mxu0 %v14308_v43 }
 0x458   : > { %8037 = vmatmul.mubr.msk.bf16.gmra.mxu0 %vm14318_vm10, %v6906_v58 }
 0x459   : > { %7159 = vmatprep.mubr.bf16.mxu0 %v14308_v43 }
 0x460   : > { %8038 = vmatmul.mubr.msk.bf16.gmra.mxu0 %vm14319_vm15, %v6907_v12  ;;  %v8926_v12 = vld [vmem:[%s9296_s24 + $0x30] sm:$0xff] }
 0x461   : > { %7169 = vmatprep.mubr.bf16.mxu0 %v14308_v43 }
 0x468   : > { %8039 = vmatmul.mubr.msk.bf16.gmra.mxu0 %vm14320_vm13, %v6908_v59  ;;  %v8925_v59 = vld [vmem:[%s9296_s24 + $0x28] sm:$0xff] }
 0x469   : > { %7179 = vmatprep.mubr.bf16.mxu0 %v14308_v43 }
 0x470   : > { %8040 = vmatmul.mubr.msk.bf16.gmra.mxu0 %vm14321_vm8, %v6909_v56  ;;  %v8928_v56 = vld [vmem:[%s9296_s24 + $0x40] sm:$0xff] }
 0x471   : > { %7189 = vmatprep.mubr.bf16.mxu0 %v14308_v43  ;;  %v12816_v43 = vrot.slane %v7200_v25, %v7208_v31 }
 0x478   : > { %8041 = vmatmul.mubr.msk.bf16.gmra.mxu0 %vm14322_vm6, %v6910_v35 }
 0x4c0   : > { %v7041_v48 = vpop.f32.mrf.mxu0 }
 0x4c1   : > { %v7212_v6 = vmul.f32 %v12812_v26, %v7041_v48  ;;  %v8929_v48 = vld [vmem:[%s9296_s24 + $0x48] sm:$0xff] }
 0x4c2   : > { %v7043_v44 = vpop.f32.mrf.mxu0 }
 0x4c3   : > { %v7288_v19 = vadd.f32 %v12814_v23, %v7212_v6  ;;  %v7213_v55 = vmul.f32 %v12816_v43, %v7043_v44 }
 0x4c4   : > { %v7045_v4 = vpop.f32.mrf.mxu0 }
 0x4c5   : > { %v7352_v10 = vadd.f32 %v8920_v33, %v7288_v19  ;;  %v7289_v58 = vadd.f32 %v12819_v54, %v7213_v55  ;;  %v7214_v1 = vmul.f32 %v12812_v26, %v7045_v4  ;;  %v8930_v33 = vld [vmem:[%s9296_s24 + $0x50] sm:$0xff] }
 0x4c6   : > { %v7047_v17 = vpop.f32.mrf.mxu0 }
 0x4c7   : > { %v7416_v41 = vmax.f32 %v7352_v10, 0.0  ;;  %v7353_v0 = vadd.f32 %v8921_v18, %v7289_v58  ;;  %v7290_v50 = vadd.f32 %v12814_v23, %v7214_v1  ;;  %v7215_v37 = vmul.f32 %v12816_v43, %v7047_v17  ;;  %v8931_v18 = vld [vmem:[%s9296_s24 + $0x58] sm:$0xff] }
 0x4c8   : > { %v7051_v39 = vpop.f32.mrf.mxu0 }
 0x4c9   : > { %7480 = vst [vmem:[%s12831_s27] sm:$0xff] %v7416_v41  ;;  %v7417_v38 = vmax.f32 %v7353_v0, 0.0  ;;  %v7354_v57 = vadd.f32 %v8922_v9, %v7290_v50  ;;  %v7291_v36 = vadd.f32 %v12819_v54, %v7215_v37  ;;  %v7216_v14 = vmul.f32 %v12812_v26, %v7051_v39  ;;  %v8932_v9 = vld [vmem:[%s9296_s24 + $0x60] sm:$0xff] }
 0x4ca   : > { %v7053_v13 = vpop.f32.mrf.mxu0 }
 0x4cb   : > { %7481 = vst [vmem:[%s12831_s27 + $0x8] sm:$0xff] %v7417_v38  ;;  %v7418_v45 = vmax.f32 %v7354_v57, 0.0  ;;  %v7355_v24 = vadd.f32 %v8923_v63, %v7291_v36  ;;  %v7292_v5 = vadd.f32 %v12814_v23, %v7216_v14  ;;  %v7217_v7 = vmul.f32 %v12816_v43, %v7053_v13  ;;  %v8933_v63 = vld [vmem:[%s9296_s24 + $0x68] sm:$0xff] }
 0x4cc   : > { %v7055_v60 = vpop.f32.mrf.mxu0 }
 0x4cd   : > { %7482 = vst [vmem:[%s12831_s27 + $0x10] sm:$0xff] %v7418_v45  ;;  %v7419_v40 = vmax.f32 %v7355_v24, 0.0  ;;  %v7356_v42 = vadd.f32 %v8924_v52, %v7292_v5  ;;  %v7293_v49 = vadd.f32 %v12819_v54, %v7217_v7  ;;  %v7218_v29 = vmul.f32 %v12812_v26, %v7055_v60  ;;  %v8934_v52 = vld [vmem:[%s9296_s24 + $0x70] sm:$0xff] }
 0x4ce   : > { %v7057_v62 = vpop.f32.mrf.mxu0 }
 0x4cf   : > { %7483 = vst [vmem:[%s12831_s27 + $0x18] sm:$0xff] %v7419_v40  ;;  %v7420_v53 = vmax.f32 %v7356_v42, 0.0  ;;  %v7357_v30 = vadd.f32 %v8925_v59, %v7293_v49  ;;  %v7294_v47 = vadd.f32 %v12814_v23, %v7218_v29  ;;  %v7219_v27 = vmul.f32 %v12816_v43, %v7057_v62  ;;  %v8935_v59 = vld [vmem:[%s9296_s24 + $0x78] sm:$0xff] }
 0x4d0   : > { %v7061_v28 = vpop.f32.mrf.mxu0 }
 0x4d1   : > { %7484 = vst [vmem:[%s12831_s27 + $0x20] sm:$0xff] %v7420_v53  ;;  %v7421_v11 = vmax.f32 %v7357_v30, 0.0  ;;  %v7358_v3 = vadd.f32 %v8926_v12, %v7294_v47  ;;  %v7295_v15 = vadd.f32 %v12819_v54, %v7219_v27  ;;  %v7220_v61 = vmul.f32 %v12812_v26, %v7061_v28  ;;  %v8936_v12 = vld [vmem:[%s9296_s24 + $0x80] sm:$0xff] }
 0x4d2   : > { %v7063_v2 = vpop.f32.mrf.mxu0 }
 0x4d3   : > { %7485 = vst [vmem:[%s12831_s27 + $0x28] sm:$0xff] %v7421_v11  ;;  %v7422_v16 = vmax.f32 %v7358_v3, 0.0  ;;  %v7359_v20 = vadd.f32 %v8927_v46, %v7295_v15  ;;  %v7296_v21 = vadd.f32 %v12814_v23, %v7220_v61  ;;  %v7221_v22 = vmul.f32 %v12816_v43, %v7063_v2  ;;  %v8937_v46 = vld [vmem:[%s9296_s24 + $0x88] sm:$0xff] }
 0x4d4   : > { %v7065_v32 = vpop.f32.mrf.mxu0 }
 0x4d5   : > { %7486 = vst [vmem:[%s12831_s27 + $0x30] sm:$0xff] %v7422_v16  ;;  %v7423_v35 = vmax.f32 %v7359_v20, 0.0  ;;  %v7360_v8 = vadd.f32 %v8928_v56, %v7296_v21  ;;  %v7297_v34 = vadd.f32 %v12819_v54, %v7221_v22  ;;  %v7222_v25 = vmul.f32 %v12812_v26, %v7065_v32  ;;  %v8938_v56 = vld [vmem:[%s9296_s24 + $0x90] sm:$0xff] }
 0x4d6   : > { %v7067_v31 = vpop.f32.mrf.mxu0 }
 0x4d7   : > { %7487 = vst [vmem:[%s12831_s27 + $0x38] sm:$0xff] %v7423_v35  ;;  %v7424_v51 = vmax.f32 %v7360_v8, 0.0  ;;  %v7361_v6 = vadd.f32 %v8929_v48, %v7297_v34  ;;  %v7298_v44 = vadd.f32 %v12814_v23, %v7222_v25  ;;  %v7223_v19 = vmul.f32 %v12816_v43, %v7067_v31  ;;  %v8939_v48 = vld [vmem:[%s9296_s24 + $0x98] sm:$0xff] }
 0x4d8   : > { %v7071_v55 = vpop.f32.mrf.mxu0 }
 0x4d9   : > { %7488 = vst [vmem:[%s12831_s27 + $0x40] sm:$0xff] %v7424_v51  ;;  %v7425_v4 = vmax.f32 %v7361_v6, 0.0  ;;  %v7362_v10 = vadd.f32 %v8930_v33, %v7298_v44  ;;  %v7299_v58 = vadd.f32 %v12819_v54, %v7223_v19  ;;  %v7224_v1 = vmul.f32 %v12812_v26, %v7071_v55  ;;  %v8940_v33 = vld [vmem:[%s9296_s24 + $0xa0] sm:$0xff] }
 0x4da   : > { %v7073_v17 = vpop.f32.mrf.mxu0 }
 0x4db   : > { %7489 = vst [vmem:[%s12831_s27 + $0x48] sm:$0xff] %v7425_v4  ;;  %v7426_v41 = vmax.f32 %v7362_v10, 0.0  ;;  %v7363_v0 = vadd.f32 %v8931_v18, %v7299_v58  ;;  %v7300_v50 = vadd.f32 %v12814_v23, %v7224_v1  ;;  %v7225_v37 = vmul.f32 %v12816_v43, %v7073_v17  ;;  %v8941_v18 = vld [vmem:[%s9296_s24 + $0xa8] sm:$0xff] }
 0x4dc   : > { %v7075_v39 = vpop.f32.mrf.mxu0 }
 0x4dd   : > { %7490 = vst [vmem:[%s12831_s27 + $0x50] sm:$0xff] %v7426_v41  ;;  %v7427_v38 = vmax.f32 %v7363_v0, 0.0  ;;  %v7364_v57 = vadd.f32 %v8932_v9, %v7300_v50  ;;  %v7301_v36 = vadd.f32 %v12819_v54, %v7225_v37  ;;  %v7226_v14 = vmul.f32 %v12812_v26, %v7075_v39  ;;  %v8942_v9 = vld [vmem:[%s9296_s24 + $0xb0] sm:$0xff] }
 0x4de   : > { %v7077_v13 = vpop.f32.mrf.mxu0 }
 0x4df   : > { %7491 = vst [vmem:[%s12831_s27 + $0x58] sm:$0xff] %v7427_v38  ;;  %v7428_v45 = vmax.f32 %v7364_v57, 0.0  ;;  %v7365_v24 = vadd.f32 %v8933_v63, %v7301_v36  ;;  %v7302_v5 = vadd.f32 %v12814_v23, %v7226_v14  ;;  %v7227_v7 = vmul.f32 %v12816_v43, %v7077_v13  ;;  %v8943_v63 = vld [vmem:[%s9296_s24 + $0xb8] sm:$0xff] }
 0x4e0   : > { %v7081_v60 = vpop.f32.mrf.mxu0 }
 0x4e1   : > { %7492 = vst [vmem:[%s12831_s27 + $0x60] sm:$0xff] %v7428_v45  ;;  %v7429_v40 = vmax.f32 %v7365_v24, 0.0  ;;  %v7366_v42 = vadd.f32 %v8934_v52, %v7302_v5  ;;  %v7303_v49 = vadd.f32 %v12819_v54, %v7227_v7  ;;  %v7228_v29 = vmul.f32 %v12812_v26, %v7081_v60  ;;  %v8944_v52 = vld [vmem:[%s9296_s24 + $0xc0] sm:$0xff] }
 0x4e2   : > { %v7083_v62 = vpop.f32.mrf.mxu0 }
 0x4e3   : > { %7493 = vst [vmem:[%s12831_s27 + $0x68] sm:$0xff] %v7429_v40  ;;  %v7430_v53 = vmax.f32 %v7366_v42, 0.0  ;;  %v7367_v30 = vadd.f32 %v8935_v59, %v7303_v49  ;;  %v7304_v47 = vadd.f32 %v12814_v23, %v7228_v29  ;;  %v7229_v27 = vmul.f32 %v12816_v43, %v7083_v62  ;;  %v8945_v59 = vld [vmem:[%s9296_s24 + $0xc8] sm:$0xff] }
 0x4e4   : > { %v7085_v28 = vpop.f32.mrf.mxu0 }
 0x4e5   : > { %7494 = vst [vmem:[%s12831_s27 + $0x70] sm:$0xff] %v7430_v53  ;;  %v7431_v11 = vmax.f32 %v7367_v30, 0.0  ;;  %v7368_v3 = vadd.f32 %v8936_v12, %v7304_v47  ;;  %v7305_v15 = vadd.f32 %v12819_v54, %v7229_v27  ;;  %v7230_v61 = vmul.f32 %v12812_v26, %v7085_v28  ;;  %v8946_v12 = vld [vmem:[%s9296_s24 + $0xd0] sm:$0xff] }
 0x4e6   : > { %v7087_v2 = vpop.f32.mrf.mxu0 }
 0x4e7   : > { %7495 = vst [vmem:[%s12831_s27 + $0x78] sm:$0xff] %v7431_v11  ;;  %v7432_v16 = vmax.f32 %v7368_v3, 0.0  ;;  %v7369_v20 = vadd.f32 %v8937_v46, %v7305_v15  ;;  %v7306_v21 = vadd.f32 %v12814_v23, %v7230_v61  ;;  %v7231_v22 = vmul.f32 %v12816_v43, %v7087_v2  ;;  %v8947_v46 = vld [vmem:[%s9296_s24 + $0xd8] sm:$0xff] }
 0x4e8   : > { %v7091_v32 = vpop.f32.mrf.mxu0 }
 0x4e9   : > { %7496 = vst [vmem:[%s12831_s27 + $0x80] sm:$0xff] %v7432_v16  ;;  %v7433_v35 = vmax.f32 %v7369_v20, 0.0  ;;  %v7370_v8 = vadd.f32 %v8938_v56, %v7306_v21  ;;  %v7307_v34 = vadd.f32 %v12819_v54, %v7231_v22  ;;  %v7232_v25 = vmul.f32 %v12812_v26, %v7091_v32  ;;  %v8948_v56 = vld [vmem:[%s9296_s24 + $0xe0] sm:$0xff] }
 0x4ea   : > { %v7093_v31 = vpop.f32.mrf.mxu0 }
 0x4eb   : > { %7497 = vst [vmem:[%s12831_s27 + $0x88] sm:$0xff] %v7433_v35  ;;  %v7434_v51 = vmax.f32 %v7370_v8, 0.0  ;;  %v7371_v6 = vadd.f32 %v8939_v48, %v7307_v34  ;;  %v7308_v44 = vadd.f32 %v12814_v23, %v7232_v25  ;;  %v7233_v19 = vmul.f32 %v12816_v43, %v7093_v31  ;;  %v8949_v48 = vld [vmem:[%s9296_s24 + $0xe8] sm:$0xff] }
 0x4ec   : > { %v7095_v55 = vpop.f32.mrf.mxu0 }
 0x4ed   : > { %7498 = vst [vmem:[%s12831_s27 + $0x90] sm:$0xff] %v7434_v51  ;;  %v7435_v4 = vmax.f32 %v7371_v6, 0.0  ;;  %v7372_v10 = vadd.f32 %v8940_v33, %v7308_v44  ;;  %v7309_v58 = vadd.f32 %v12819_v54, %v7233_v19  ;;  %v7234_v1 = vmul.f32 %v12812_v26, %v7095_v55  ;;  %v8950_v33 = vld [vmem:[%s9296_s24 + $0xf0] sm:$0xff] }
 0x4ee   : > { %v7097_v17 = vpop.f32.mrf.mxu0 }
 0x4ef   : > { %7499 = vst [vmem:[%s12831_s27 + $0x98] sm:$0xff] %v7435_v4  ;;  %v7436_v41 = vmax.f32 %v7372_v10, 0.0  ;;  %v7373_v0 = vadd.f32 %v8941_v18, %v7309_v58  ;;  %v7310_v50 = vadd.f32 %v12814_v23, %v7234_v1  ;;  %v7235_v37 = vmul.f32 %v12816_v43, %v7097_v17  ;;  %v8951_v18 = vld [vmem:[%s9296_s24 + $0xf8] sm:$0xff] }
 0x4f0   : > { %v7101_v39 = vpop.f32.mrf.mxu0 }
 0x4f1   : > { %7500 = vst [vmem:[%s12831_s27 + $0xa0] sm:$0xff] %v7436_v41  ;;  %v7437_v38 = vmax.f32 %v7373_v0, 0.0  ;;  %v7374_v57 = vadd.f32 %v8942_v9, %v7310_v50  ;;  %v7311_v36 = vadd.f32 %v12819_v54, %v7235_v37  ;;  %v7236_v14 = vmul.f32 %v12812_v26, %v7101_v39  ;;  %v8952_v9 = vld [vmem:[%s9296_s24 + $0x100] sm:$0xff] }
 0x4f2   : > { %v7103_v13 = vpop.f32.mrf.mxu0 }
 0x4f3   : > { %7501 = vst [vmem:[%s12831_s27 + $0xa8] sm:$0xff] %v7437_v38  ;;  %v7438_v45 = vmax.f32 %v7374_v57, 0.0  ;;  %v7375_v24 = vadd.f32 %v8943_v63, %v7311_v36  ;;  %v7312_v5 = vadd.f32 %v12814_v23, %v7236_v14  ;;  %v7237_v7 = vmul.f32 %v12816_v43, %v7103_v13  ;;  %v8953_v63 = vld [vmem:[%s9296_s24 + $0x108] sm:$0xff] }
 0x4f4   : > { %v7105_v60 = vpop.f32.mrf.mxu0 }
 0x4f5   : > { %7502 = vst [vmem:[%s12831_s27 + $0xb0] sm:$0xff] %v7438_v45  ;;  %v7439_v40 = vmax.f32 %v7375_v24, 0.0  ;;  %v7376_v42 = vadd.f32 %v8944_v52, %v7312_v5  ;;  %v7313_v49 = vadd.f32 %v12819_v54, %v7237_v7  ;;  %v7238_v29 = vmul.f32 %v12812_v26, %v7105_v60  ;;  %v8954_v52 = vld [vmem:[%s9296_s24 + $0x110] sm:$0xff] }
 0x4f6   : > { %v7107_v62 = vpop.f32.mrf.mxu0 }
 0x4f7   : > { %7503 = vst [vmem:[%s12831_s27 + $0xb8] sm:$0xff] %v7439_v40  ;;  %v7440_v53 = vmax.f32 %v7376_v42, 0.0  ;;  %v7377_v30 = vadd.f32 %v8945_v59, %v7313_v49  ;;  %v7314_v47 = vadd.f32 %v12814_v23, %v7238_v29  ;;  %v7239_v27 = vmul.f32 %v12816_v43, %v7107_v62  ;;  %v8955_v59 = vld [vmem:[%s9296_s24 + $0x118] sm:$0xff] }
 0x4f8   : > { %v7111_v28 = vpop.f32.mrf.mxu0 }
 0x4f9   : > { %7504 = vst [vmem:[%s12831_s27 + $0xc0] sm:$0xff] %v7440_v53  ;;  %v7441_v11 = vmax.f32 %v7377_v30, 0.0  ;;  %v7378_v3 = vadd.f32 %v8946_v12, %v7314_v47  ;;  %v7315_v15 = vadd.f32 %v12819_v54, %v7239_v27  ;;  %v7240_v61 = vmul.f32 %v12812_v26, %v7111_v28  ;;  %v8956_v12 = vld [vmem:[%s9296_s24 + $0x120] sm:$0xff] }
 0x4fa   : > { %v7113_v2 = vpop.f32.mrf.mxu0 }
 0x4fb   : > { %7505 = vst [vmem:[%s12831_s27 + $0xc8] sm:$0xff] %v7441_v11  ;;  %v7442_v16 = vmax.f32 %v7378_v3, 0.0  ;;  %v7379_v20 = vadd.f32 %v8947_v46, %v7315_v15  ;;  %v7316_v21 = vadd.f32 %v12814_v23, %v7240_v61  ;;  %v7241_v22 = vmul.f32 %v12816_v43, %v7113_v2  ;;  %v8957_v46 = vld [vmem:[%s9296_s24 + $0x128] sm:$0xff] }
 0x4fc   : > { %v7115_v32 = vpop.f32.mrf.mxu0 }
 0x4fd   : > { %7506 = vst [vmem:[%s12831_s27 + $0xd0] sm:$0xff] %v7442_v16  ;;  %v7443_v35 = vmax.f32 %v7379_v20, 0.0  ;;  %v7380_v8 = vadd.f32 %v8948_v56, %v7316_v21  ;;  %v7317_v34 = vadd.f32 %v12819_v54, %v7241_v22  ;;  %v7242_v25 = vmul.f32 %v12812_v26, %v7115_v32  ;;  %v8958_v56 = vld [vmem:[%s9296_s24 + $0x130] sm:$0xff] }
 0x4fe   : > { %v7117_v31 = vpop.f32.mrf.mxu0 }
 0x4ff   : > { %7507 = vst [vmem:[%s12831_s27 + $0xd8] sm:$0xff] %v7443_v35  ;;  %v7444_v51 = vmax.f32 %v7380_v8, 0.0  ;;  %v7381_v6 = vadd.f32 %v8949_v48, %v7317_v34  ;;  %v7318_v44 = vadd.f32 %v12814_v23, %v7242_v25  ;;  %v7243_v19 = vmul.f32 %v12816_v43, %v7117_v31  ;;  %v8959_v48 = vld [vmem:[%s9296_s24 + $0x138] sm:$0xff] }
 0x500   : > { %v7121_v55 = vpop.f32.mrf.mxu0 }
 0x501   : > { %7508 = vst [vmem:[%s12831_s27 + $0xe0] sm:$0xff] %v7444_v51  ;;  %v7445_v4 = vmax.f32 %v7381_v6, 0.0  ;;  %v7382_v10 = vadd.f32 %v8950_v33, %v7318_v44  ;;  %v7319_v58 = vadd.f32 %v12819_v54, %v7243_v19  ;;  %v7244_v1 = vmul.f32 %v12812_v26, %v7121_v55  ;;  %v8960_v33 = vld [vmem:[%s9296_s24 + $0x140] sm:$0xff] }
 0x502   : > { %v7123_v17 = vpop.f32.mrf.mxu0 }
 0x503   : > { %7509 = vst [vmem:[%s12831_s27 + $0xe8] sm:$0xff] %v7445_v4  ;;  %v7446_v41 = vmax.f32 %v7382_v10, 0.0  ;;  %v7383_v0 = vadd.f32 %v8951_v18, %v7319_v58  ;;  %v7320_v50 = vadd.f32 %v12814_v23, %v7244_v1  ;;  %v7245_v37 = vmul.f32 %v12816_v43, %v7123_v17  ;;  %v8961_v18 = vld [vmem:[%s9296_s24 + $0x148] sm:$0xff] }
 0x504   : > { %v7125_v39 = vpop.f32.mrf.mxu0 }
 0x505   : > { %7510 = vst [vmem:[%s12831_s27 + $0xf0] sm:$0xff] %v7446_v41  ;;  %v7447_v38 = vmax.f32 %v7383_v0, 0.0  ;;  %v7384_v57 = vadd.f32 %v8952_v9, %v7320_v50  ;;  %v7321_v36 = vadd.f32 %v12819_v54, %v7245_v37  ;;  %v7246_v14 = vmul.f32 %v12812_v26, %v7125_v39  ;;  %v8962_v9 = vld [vmem:[%s9296_s24 + $0x150] sm:$0xff] }
 0x506   : > { %v7127_v13 = vpop.f32.mrf.mxu0 }
 0x507   : > { %7511 = vst [vmem:[%s12831_s27 + $0xf8] sm:$0xff] %v7447_v38  ;;  %v7448_v45 = vmax.f32 %v7384_v57, 0.0  ;;  %v7385_v24 = vadd.f32 %v8953_v63, %v7321_v36  ;;  %v7322_v5 = vadd.f32 %v12814_v23, %v7246_v14  ;;  %v7247_v7 = vmul.f32 %v12816_v43, %v7127_v13  ;;  %v8963_v63 = vld [vmem:[%s9296_s24 + $0x158] sm:$0xff] }
 0x508   : > { %v7131_v60 = vpop.f32.mrf.mxu0 }
 0x509   : > { %7512 = vst [vmem:[%s12831_s27 + $0x100] sm:$0xff] %v7448_v45  ;;  %v7449_v40 = vmax.f32 %v7385_v24, 0.0  ;;  %v7386_v42 = vadd.f32 %v8954_v52, %v7322_v5  ;;  %v7323_v49 = vadd.f32 %v12819_v54, %v7247_v7  ;;  %v7248_v29 = vmul.f32 %v12812_v26, %v7131_v60  ;;  %v8964_v52 = vld [vmem:[%s9296_s24 + $0x160] sm:$0xff] }
 0x50a   : > { %v7133_v62 = vpop.f32.mrf.mxu0 }
 0x50b   : > { %7513 = vst [vmem:[%s12831_s27 + $0x108] sm:$0xff] %v7449_v40  ;;  %v7450_v53 = vmax.f32 %v7386_v42, 0.0  ;;  %v7387_v30 = vadd.f32 %v8955_v59, %v7323_v49  ;;  %v7324_v47 = vadd.f32 %v12814_v23, %v7248_v29  ;;  %v7249_v27 = vmul.f32 %v12816_v43, %v7133_v62  ;;  %v8965_v59 = vld [vmem:[%s9296_s24 + $0x168] sm:$0xff] }
 0x50c   : > { %v7135_v28 = vpop.f32.mrf.mxu0 }
 0x50d   : > { %7514 = vst [vmem:[%s12831_s27 + $0x110] sm:$0xff] %v7450_v53  ;;  %v7451_v11 = vmax.f32 %v7387_v30, 0.0  ;;  %v7388_v3 = vadd.f32 %v8956_v12, %v7324_v47  ;;  %v7325_v15 = vadd.f32 %v12819_v54, %v7249_v27  ;;  %v7250_v61 = vmul.f32 %v12812_v26, %v7135_v28  ;;  %v8966_v12 = vld [vmem:[%s9296_s24 + $0x170] sm:$0xff] }
 0x50e   : > { %v7137_v2 = vpop.f32.mrf.mxu0 }
 0x50f   : > { %7515 = vst [vmem:[%s12831_s27 + $0x118] sm:$0xff] %v7451_v11  ;;  %v7452_v16 = vmax.f32 %v7388_v3, 0.0  ;;  %v7389_v20 = vadd.f32 %v8957_v46, %v7325_v15  ;;  %v7326_v21 = vadd.f32 %v12814_v23, %v7250_v61  ;;  %v7251_v22 = vmul.f32 %v12816_v43, %v7137_v2  ;;  %v8967_v46 = vld [vmem:[%s9296_s24 + $0x178] sm:$0xff] }
 0x510   : > { %v7141_v32 = vpop.f32.mrf.mxu0 }
 0x511   : > { %7516 = vst [vmem:[%s12831_s27 + $0x120] sm:$0xff] %v7452_v16  ;;  %v7453_v35 = vmax.f32 %v7389_v20, 0.0  ;;  %v7390_v8 = vadd.f32 %v8958_v56, %v7326_v21  ;;  %v7327_v34 = vadd.f32 %v12819_v54, %v7251_v22  ;;  %v7252_v25 = vmul.f32 %v12812_v26, %v7141_v32  ;;  %v8968_v56 = vld [vmem:[%s9296_s24 + $0x180] sm:$0xff] }
 0x512   : > { %v7143_v31 = vpop.f32.mrf.mxu0 }
 0x513   : > { %7517 = vst [vmem:[%s12831_s27 + $0x128] sm:$0xff] %v7453_v35  ;;  %v7454_v51 = vmax.f32 %v7390_v8, 0.0  ;;  %v7391_v6 = vadd.f32 %v8959_v48, %v7327_v34  ;;  %v7328_v44 = vadd.f32 %v12814_v23, %v7252_v25  ;;  %v7253_v19 = vmul.f32 %v12816_v43, %v7143_v31  ;;  %v8969_v48 = vld [vmem:[%s9296_s24 + $0x188] sm:$0xff] }
 0x514   : > { %v7145_v55 = vpop.f32.mrf.mxu0 }
 0x515   : > { %7518 = vst [vmem:[%s12831_s27 + $0x130] sm:$0xff] %v7454_v51  ;;  %v7455_v4 = vmax.f32 %v7391_v6, 0.0  ;;  %v7392_v10 = vadd.f32 %v8960_v33, %v7328_v44  ;;  %v7329_v58 = vadd.f32 %v12819_v54, %v7253_v19  ;;  %v7254_v1 = vmul.f32 %v12812_v26, %v7145_v55  ;;  %v8970_v33 = vld [vmem:[%s9296_s24 + $0x190] sm:$0xff] }
 0x516   : > { %v7147_v17 = vpop.f32.mrf.mxu0 }
 0x517   : > { %7519 = vst [vmem:[%s12831_s27 + $0x138] sm:$0xff] %v7455_v4  ;;  %v7456_v41 = vmax.f32 %v7392_v10, 0.0  ;;  %v7393_v0 = vadd.f32 %v8961_v18, %v7329_v58  ;;  %v7330_v50 = vadd.f32 %v12814_v23, %v7254_v1  ;;  %v7255_v37 = vmul.f32 %v12816_v43, %v7147_v17  ;;  %v8971_v18 = vld [vmem:[%s9296_s24 + $0x198] sm:$0xff] }
 0x518   : > { %v7151_v39 = vpop.f32.mrf.mxu0 }
 0x519   : > { %7520 = vst [vmem:[%s12831_s27 + $0x140] sm:$0xff] %v7456_v41  ;;  %v7457_v38 = vmax.f32 %v7393_v0, 0.0  ;;  %v7394_v57 = vadd.f32 %v8962_v9, %v7330_v50  ;;  %v7331_v36 = vadd.f32 %v12819_v54, %v7255_v37  ;;  %v7256_v14 = vmul.f32 %v12812_v26, %v7151_v39  ;;  %v8972_v9 = vld [vmem:[%s9296_s24 + $0x1a0] sm:$0xff] }
 0x51a   : > { %v7153_v13 = vpop.f32.mrf.mxu0 }
 0x51b   : > { %7521 = vst [vmem:[%s12831_s27 + $0x148] sm:$0xff] %v7457_v38  ;;  %v7458_v45 = vmax.f32 %v7394_v57, 0.0  ;;  %v7395_v24 = vadd.f32 %v8963_v63, %v7331_v36  ;;  %v7332_v5 = vadd.f32 %v12814_v23, %v7256_v14  ;;  %v7257_v7 = vmul.f32 %v12816_v43, %v7153_v13  ;;  %v8973_v63 = vld [vmem:[%s9296_s24 + $0x1a8] sm:$0xff] }
 0x51c   : > { %v7155_v60 = vpop.f32.mrf.mxu0 }
 0x51d   : > { %7522 = vst [vmem:[%s12831_s27 + $0x150] sm:$0xff] %v7458_v45  ;;  %v7459_v40 = vmax.f32 %v7395_v24, 0.0  ;;  %v7396_v42 = vadd.f32 %v8964_v52, %v7332_v5  ;;  %v7333_v49 = vadd.f32 %v12819_v54, %v7257_v7  ;;  %v7258_v29 = vmul.f32 %v12812_v26, %v7155_v60  ;;  %v8974_v52 = vld [vmem:[%s9296_s24 + $0x1b0] sm:$0xff] }
 0x51e   : > { %v7157_v62 = vpop.f32.mrf.mxu0 }
 0x51f   : > { %7523 = vst [vmem:[%s12831_s27 + $0x158] sm:$0xff] %v7459_v40  ;;  %v7460_v53 = vmax.f32 %v7396_v42, 0.0  ;;  %v7397_v30 = vadd.f32 %v8965_v59, %v7333_v49  ;;  %v7334_v47 = vadd.f32 %v12814_v23, %v7258_v29  ;;  %v7259_v27 = vmul.f32 %v12816_v43, %v7157_v62  ;;  %v8975_v59 = vld [vmem:[%s9296_s24 + $0x1b8] sm:$0xff] }
 0x520   : > { %v7161_v28 = vpop.f32.mrf.mxu0 }
 0x521   : > { %7524 = vst [vmem:[%s12831_s27 + $0x160] sm:$0xff] %v7460_v53  ;;  %v7461_v11 = vmax.f32 %v7397_v30, 0.0  ;;  %v7398_v3 = vadd.f32 %v8966_v12, %v7334_v47  ;;  %v7335_v15 = vadd.f32 %v12819_v54, %v7259_v27  ;;  %v7260_v61 = vmul.f32 %v12812_v26, %v7161_v28  ;;  %v8976_v12 = vld [vmem:[%s9296_s24 + $0x1c0] sm:$0xff] }
 0x522   : > { %v7163_v2 = vpop.f32.mrf.mxu0 }
 0x523   : > { %7525 = vst [vmem:[%s12831_s27 + $0x168] sm:$0xff] %v7461_v11  ;;  %v7462_v16 = vmax.f32 %v7398_v3, 0.0  ;;  %v7399_v20 = vadd.f32 %v8967_v46, %v7335_v15  ;;  %v7336_v21 = vadd.f32 %v12814_v23, %v7260_v61  ;;  %v7261_v22 = vmul.f32 %v12816_v43, %v7163_v2  ;;  %v8977_v46 = vld [vmem:[%s9296_s24 + $0x1c8] sm:$0xff] }
 0x524   : > { %v7165_v32 = vpop.f32.mrf.mxu0 }
 0x525   : > { %7526 = vst [vmem:[%s12831_s27 + $0x170] sm:$0xff] %v7462_v16  ;;  %v7463_v35 = vmax.f32 %v7399_v20, 0.0  ;;  %v7400_v8 = vadd.f32 %v8968_v56, %v7336_v21  ;;  %v7337_v34 = vadd.f32 %v12819_v54, %v7261_v22  ;;  %v7262_v25 = vmul.f32 %v12812_v26, %v7165_v32  ;;  %v8978_v56 = vld [vmem:[%s9296_s24 + $0x1d0] sm:$0xff] }
 0x526   : > { %v7167_v31 = vpop.f32.mrf.mxu0 }
 0x527   : > { %7527 = vst [vmem:[%s12831_s27 + $0x178] sm:$0xff] %v7463_v35  ;;  %v7464_v51 = vmax.f32 %v7400_v8, 0.0  ;;  %v7401_v6 = vadd.f32 %v8969_v48, %v7337_v34  ;;  %v7338_v44 = vadd.f32 %v12814_v23, %v7262_v25  ;;  %v7263_v19 = vmul.f32 %v12816_v43, %v7167_v31  ;;  %v8979_v48 = vld [vmem:[%s9296_s24 + $0x1d8] sm:$0xff] }
 0x528   : > { %v7171_v55 = vpop.f32.mrf.mxu0 }
 0x529   : > { %7528 = vst [vmem:[%s12831_s27 + $0x180] sm:$0xff] %v7464_v51  ;;  %v7465_v4 = vmax.f32 %v7401_v6, 0.0  ;;  %v7402_v10 = vadd.f32 %v8970_v33, %v7338_v44  ;;  %v7339_v58 = vadd.f32 %v12819_v54, %v7263_v19  ;;  %v7264_v1 = vmul.f32 %v12812_v26, %v7171_v55  ;;  %v8980_v33 = vld [vmem:[%s9296_s24 + $0x1e0] sm:$0xff] }
 0x52a   : > { %v7173_v17 = vpop.f32.mrf.mxu0 }
 0x52b   : > { %7529 = vst [vmem:[%s12831_s27 + $0x188] sm:$0xff] %v7465_v4  ;;  %v7466_v41 = vmax.f32 %v7402_v10, 0.0  ;;  %v7403_v0 = vadd.f32 %v8971_v18, %v7339_v58  ;;  %v7340_v50 = vadd.f32 %v12814_v23, %v7264_v1  ;;  %v7265_v37 = vmul.f32 %v12816_v43, %v7173_v17  ;;  %v8981_v18 = vld [vmem:[%s9296_s24 + $0x1e8] sm:$0xff] }
 0x52c   : > { %v7175_v39 = vpop.f32.mrf.mxu0 }
 0x52d   : > { %7530 = vst [vmem:[%s12831_s27 + $0x190] sm:$0xff] %v7466_v41  ;;  %v7467_v38 = vmax.f32 %v7403_v0, 0.0  ;;  %v7404_v57 = vadd.f32 %v8972_v9, %v7340_v50  ;;  %v7341_v36 = vadd.f32 %v12819_v54, %v7265_v37  ;;  %v7266_v14 = vmul.f32 %v12812_v26, %v7175_v39 }
 0x52e   : > { %v7177_v13 = vpop.f32.mrf.mxu0 }
 0x52f   : > { %7531 = vst [vmem:[%s12831_s27 + $0x198] sm:$0xff] %v7467_v38  ;;  %v7468_v45 = vmax.f32 %v7404_v57, 0.0  ;;  %v7405_v24 = vadd.f32 %v8973_v63, %v7341_v36  ;;  %v7342_v5 = vadd.f32 %v12814_v23, %v7266_v14  ;;  %v7267_v7 = vmul.f32 %v12816_v43, %v7177_v13  ;;  %v8982_v38 = vld [vmem:[%s9296_s24 + $0x1f0] sm:$0xff]  ;;  %v8983_v36 = vld [vmem:[%s9296_s24 + $0x1f8] sm:$0xff]  ;;  %s9116_s24 = smov [#allocation8]  }
 0x530   : > { %v7181_v60 = vpop.f32.mrf.mxu0  ;;  %s9042_s25 = sshll.u32 %s9116_s24, 4  ;;  %s9043_s25 = int_to_ptr.vmem [resolvable:$false] %s9042_s25 }
 0x531   : > { %7532 = vst [vmem:[%s12831_s27 + $0x1a0] sm:$0xff] %v7468_v45  ;;  %v7469_v40 = vmax.f32 %v7405_v24, 0.0  ;;  %v7406_v42 = vadd.f32 %v8974_v52, %v7342_v5  ;;  %v7343_v49 = vadd.f32 %v12819_v54, %v7267_v7  ;;  %v7268_v29 = vmul.f32 %v12812_v26, %v7181_v60  ;;  %s9044_s12 = scalar_lea.vmem %s9043_s25, 16384  ;;  %p9045_p10 = scmp.lt.s32.totalorder %s13085_s29, %s9043_s25 }
 0x532   : > { %v7183_v62 = vpop.f32.mrf.mxu0  ;;  %p9046_p2 = scmp.lt.s32.totalorder %s9044_s12, %s9038_s17 }
 0x533   : > { %7533 = vst [vmem:[%s12831_s27 + $0x1a8] sm:$0xff] %v7469_v40  ;;  %v7470_v53 = vmax.f32 %v7406_v42, 0.0  ;;  %v7407_v30 = vadd.f32 %v8975_v59, %v7343_v49  ;;  %v7344_v47 = vadd.f32 %v12814_v23, %v7268_v29  ;;  %v7269_v27 = vmul.f32 %v12816_v43, %v7183_v62 }
 0x534   : > { %v7185_v28 = vpop.f32.mrf.mxu0  ;;  %p9047_p13 = por %p9046_p2, %p9045_p10 }
 0x535   : > { %7534 = vst [vmem:[%s12831_s27 + $0x1b0] sm:$0xff] %v7470_v53  ;;  %v7471_v11 = vmax.f32 %v7407_v30, 0.0  ;;  %v7408_v3 = vadd.f32 %v8976_v12, %v7344_v47  ;;  %v7345_v15 = vadd.f32 %v12819_v54, %v7269_v27  ;;  %v7270_v61 = vmul.f32 %v12812_v26, %v7185_v28 }
 0x536   : > { %v7187_v2 = vpop.f32.mrf.mxu0  ;;  %p9048_p0 = pnand %p9047_p13, %p9041_p12 }
 0x537   : > { %7535 = vst [vmem:[%s12831_s27 + $0x1b8] sm:$0xff] %v7471_v11  ;;  %v7472_v16 = vmax.f32 %v7408_v3, 0.0  ;;  %v7409_v20 = vadd.f32 %v8977_v46, %v7345_v15  ;;  %v7346_v21 = vadd.f32 %v12814_v23, %v7270_v61  ;;  %v7271_v22 = vmul.f32 %v12816_v43, %v7187_v2 }
 0x538   : > { %v7191_v32 = vpop.f32.mrf.mxu0 }
 0x539   : > { %7536 = vst [vmem:[%s12831_s27 + $0x1c0] sm:$0xff] %v7472_v16  ;;  %v7473_v35 = vmax.f32 %v7409_v20, 0.0  ;;  %v7410_v8 = vadd.f32 %v8978_v56, %v7346_v21  ;;  %v7347_v34 = vadd.f32 %v12819_v54, %v7271_v22  ;;  %v7272_v25 = vmul.f32 %v12812_v26, %v7191_v32 }
 0x53a   : > { %v7193_v31 = vpop.f32.mrf.mxu0 }
 0x53b   : > { %7537 = vst [vmem:[%s12831_s27 + $0x1c8] sm:$0xff] %v7473_v35  ;;  %v7474_v51 = vmax.f32 %v7410_v8, 0.0  ;;  %v7411_v6 = vadd.f32 %v8979_v48, %v7347_v34  ;;  %v7348_v44 = vadd.f32 %v12814_v23, %v7272_v25  ;;  %v7273_v19 = vmul.f32 %v12816_v43, %v7193_v31 }
 0x53c   : > { %v7195_v55 = vpop.f32.mrf.mxu0 }
 0x53d   : > { %7538 = vst [vmem:[%s12831_s27 + $0x1d0] sm:$0xff] %v7474_v51  ;;  %v7475_v4 = vmax.f32 %v7411_v6, 0.0  ;;  %v7412_v10 = vadd.f32 %v8980_v33, %v7348_v44  ;;  %v7349_v58 = vadd.f32 %v12819_v54, %v7273_v19  ;;  %v7274_v1 = vmul.f32 %v12812_v26, %v7195_v55 }
 0x53e   : > { %v7197_v17 = vpop.f32.mrf.mxu0 }
 0x53f   : > { %7539 = vst [vmem:[%s12831_s27 + $0x1d8] sm:$0xff] %v7475_v4  ;;  %v7476_v41 = vmax.f32 %v7412_v10, 0.0  ;;  %v7413_v0 = vadd.f32 %v8981_v18, %v7349_v58  ;;  %v7350_v50 = vadd.f32 %v12814_v23, %v7274_v1  ;;  %v7275_v37 = vmul.f32 %v12816_v43, %v7197_v17 }
 0x541   : > { %7540 = vst [vmem:[%s12831_s27 + $0x1e0] sm:$0xff] %v7476_v41  ;;  %v7477_v39 = vmax.f32 %v7413_v0, 0.0  ;;  %v7414_v9 = vadd.f32 %v8982_v38, %v7350_v50  ;;  %v7351_v26 = vadd.f32 %v12819_v54, %v7275_v37 }
 0x543   : > { %7541 = vst [vmem:[%s12831_s27 + $0x1e8] sm:$0xff] %v7477_v39  ;;  %v7478_v57 = vmax.f32 %v7414_v9, 0.0  ;;  %v7415_v14 = vadd.f32 %v8983_v36, %v7351_v26 }
 0x545   : > { %7542 = vst [vmem:[%s12831_s27 + $0x1f0] sm:$0xff] %v7478_v57  ;;  %v7479_v23 = vmax.f32 %v7415_v14, 0.0 }
 0x547   : > { %7543 = vst [vmem:[%s12831_s27 + $0x1f8] sm:$0xff] %v7479_v23 }
 0x548   : > { %9051 = shalt.err (!%p9048_p0)
}
 0x549   : > { %s9052_s19 = scalar_lea.hbm %s13083_s13, 8192  ;;  %s9056_s26 = scalar_lea.hbm %s13140_s10, 16384 }
 0x54a   : > { %p9053_p5 = scmp.ne.s32.totalorder %s13083_s13, %s9052_s19  ;;  %p9057_p4 = scmp.lt.s32.totalorder %s13083_s13, %s13140_s10 }
 0x54b   : > { %p9058_p6 = scmp.lt.s32.totalorder %s9056_s26, %s9052_s19 }
 0x54c   : > { %p9054_p9 = pnand %p9053_p5, %p14324_p11 }
 0x54d   : > { %p9059_p8 = por %p9058_p6, %p9057_p4 }
 0x54e   : > { %p9055_p1 = pneg %p9054_p9 }
 0x550   : > { %p9060_p3 = pnand %p9059_p8, %p9055_p1 }
 0x552   : > { %9063 = shalt.err (!%p9060_p3)
}
 0x553   : > { %s9117_s28 = smov 256   ;;  %s9118_s23 = smov 16  }
 0x554   : > { %8747 = dma.vmem_to_hbm [thread:$0]  (%p14324_p11), %s13085_s29, 8192, %s13083_s13, %s7545_s30, %s9117_s28, %s9117_s28, %s9118_s23  }
 0x555 PF: > { %s14325_s17 = sld [smem:[#allocation12_spill]]  ;;  %p14328_p12 = scmp.ge.s32.totalorder %s9106_s16, 2 }
 0x556   : > { %s14326_s24 = sld [smem:[#allocation13_spill]] }
 0x55b   : > { %s7573_s25 = sand.u32 1, %s14325_s17  }
 0x55c   : > { %p14327_p7 = scmp.ne.s32.totalorder %s14326_s24, 0  ;;  %s7574_s12 = scalar_lea.sflag [#allocation5], %s7573_s25 }
 0x55e   : > { %p8758_p10 = pnand %p14328_p12, %p14327_p7 }
 0x560   : > { %p8759_p2 = pneg %p8758_p10 }
 0x562   : > { %9089 = dma.done.wait (%p8759_p2), %s7574_s12, 8192  }
 0x563   : > { %9091 = vsyncadd (%p8759_p2), %s7574_s12, 4294959104  ;;  %s14329_s16 = sld [smem:[#allocation14_spill]]  ;;  %s14330_s13 = smov %s9098_s14 }
 0x564   : > { %s14331_s14 = smov %s9102_s15  ;;  %s14332_s15 = smov %s9245_s18 }
 0x569   : > { %p24_p13 = scmp.ge.s32.totalorder %s14329_s16, 4  }
 0x56b   :  { %26 = sbr.rel (!%p24_p13) target bundleno = 8 (0x8), region = 117 }
 0x570   :  { %7579 = vsyncpa [#allocation4], 1 }
 0x571   :  { %7581 = vsyncpa [#allocation4 + $0x1], 1 }
 0x572   :  { %7582 = vsyncpa [#allocation7], 1 }
 0x573   :  { %7583 = vsyncpa [#allocation5], 1 }
 0x574   :  { %7585 = vsyncpa [#allocation5 + $0x1], 1 }

</bundles_post_ra>
